<compile_context>
chip_gen: v7x
topology: tpu7x:2x2x1
jax: 0.10.0
libtpu: 0.0.40
codegen_flags: <defaults>
</compile_context>

<pallas_src>
import functools

import jax
import jax.numpy as jnp
from jax.experimental import pallas as pl
from jax.experimental.pallas import tpu as pltpu

EPS = 1e-5


def _fused_kernel(x68_ref, x64_ref, w_ref, gb_ref, x58_hbm, out_ref,
                  res_buf, res_sem, *, precision):
    # x68_ref:   (1, Cin)     gate logits (lane-dense row), f32
    # x64_ref:   (Cin, HW)    main activation (f32 or bf16 straight from HBM)
    # w_ref:     (Cout, Cin)  1x1 conv weight, f32
    # gb_ref:    (2, Cout, 1) [gamma; beta]
    # x58_hbm:   (Cout, HW)   residual, left in place (ANY) -> manual DMA
    # out_ref:   (Cout, HW)   f32 output
    # res_buf:   (Cout, HW)   VMEM scratch for the residual
    # res_sem:   DMA semaphore

    # Kick off the residual fetch immediately so it overlaps matmul + stats.
    res_cp = pltpu.make_async_copy(x58_hbm, res_buf, res_sem)
    res_cp.start()

    # Fold the sigmoid gate into the weight:  W @ diag(s) @ X == (W * s) @ X.
    # (Cout*Cin elementwise work instead of Cin*HW.)
    s = jax.nn.sigmoid(x68_ref[...])                        # (1, Cin) f32
    w_scaled = w_ref[...] * s                               # (Cout, Cin) f32

    # Match the (small) weight operand to the activation dtype so no convert
    # of the big (Cin, HW) tile is ever needed in-kernel.
    x_dtype = x64_ref.dtype
    x71 = jnp.dot(w_scaled.astype(x_dtype), x64_ref[...],
                  preferred_element_type=jnp.float32,
                  precision=precision)                      # (Cout, HW) f32

    # BatchNorm2d (training mode, N=1): per-channel stats over HW.
    # Centered two-pass variance; x71 is resident so this is pure VALU work
    # hidden under the DMA.
    hw = x71.shape[1]
    inv_hw = jnp.float32(1.0 / hw)
    mean = jnp.sum(x71, axis=1, keepdims=True) * inv_hw     # (Cout, 1)
    diff = x71 - mean                                       # (Cout, HW)
    var = jnp.sum(diff * diff, axis=1, keepdims=True) * inv_hw

    gamma = gb_ref[0]                                       # (Cout, 1)
    beta = gb_ref[1]                                        # (Cout, 1)
    a = gamma * jax.lax.rsqrt(var + EPS)                    # (Cout, 1)

    # Residual only needed now; wait as late as possible.
    res_cp.wait()
    out_ref[...] = a * diff + beta + res_buf[...].astype(jnp.float32)


def fused_forward(x68, x64, x58, weight, gamma, beta, *,
                  input_dtype=jnp.bfloat16):
    """x68: (1,Cin,1,1), x64: (1,Cin,H,W), x58: (1,Cout,H,W), weight: (Cout,Cin,1,1).

    `input_dtype` controls only the HBM streaming dtype of the two large
    tensors (x64, x58); all accumulation and BN math is float32.
    """
    n, c_in, h, w = x64.shape
    assert n == 1, "BN training-mode stats are over (H,W) only; kernel assumes N==1"
    c_out = weight.shape[0]
    hw = h * w

    x68_2d = x68.reshape(1, c_in).astype(jnp.float32)        # lane-dense gate row
    x64_2d = x64.reshape(c_in, hw).astype(input_dtype)       # big stream
    x58_2d = x58.reshape(c_out, hw).astype(input_dtype)      # residual stream
    w_2d = weight.reshape(c_out, c_in).astype(jnp.float32)
    gb = jnp.stack([gamma.reshape(c_out, 1),
                    beta.reshape(c_out, 1)], axis=0)         # (2, Cout, 1)

    # f32 operands at DEFAULT precision lower to reduced-precision MXU passes;
    # HIGHEST is free here (MXU time is hidden under DMA) and keeps the 1e-4
    # parity.  Native bf16 operands need no precision bump.
    precision = (jax.lax.Precision.HIGHEST
                 if input_dtype == jnp.float32 else jax.lax.Precision.DEFAULT)
    kernel = functools.partial(_fused_kernel, precision=precision)

    # Single-block, gridless call: at Cin=240, Cout=40, HW=784 everything fits
    # in well under 1 MiB of VMEM; grid steps would only add ~0.35 us each and
    # BN needs the full-HW reduction anyway.
    out_2d = pl.pallas_call(
        kernel,
        out_shape=jax.ShapeDtypeStruct((c_out, hw), jnp.float32),
        in_specs=[
            pl.BlockSpec((1, c_in), lambda: (0, 0)),
            pl.BlockSpec((c_in, hw), lambda: (0, 0)),
            pl.BlockSpec((c_out, c_in), lambda: (0, 0)),
            pl.BlockSpec((2, c_out, 1), lambda: (0, 0, 0)),
            pl.BlockSpec(memory_space=pl.ANY),               # x58: manual DMA
        ],
        out_specs=pl.BlockSpec((c_out, hw), lambda: (0, 0)),
        scratch_shapes=[
            pltpu.VMEM((c_out, hw), x58_2d.dtype),           # residual buffer
            pltpu.SemaphoreType.DMA(()),                     # residual DMA sem
        ],
    )(x68_2d, x64_2d, w_2d, gb, x58_2d)

    return out_2d.reshape(1, c_out, h, w)


def reference_forward(x68, x64, x58, weight, gamma, beta):
    """Plain-JAX reference mirroring the PyTorch module (BN in training mode)."""
    scale = jax.nn.sigmoid(x68)                               # (1,Cin,1,1)
    x70 = x64 * scale
    c_out, c_in = weight.shape[0], weight.shape[1]
    x71 = jnp.einsum('oc,nchw->nohw', weight.reshape(c_out, c_in), x70,
                     precision=jax.lax.Precision.HIGHEST)
    mean = jnp.mean(x71, axis=(0, 2, 3), keepdims=True)
    var = jnp.mean(jnp.square(x71 - mean), axis=(0, 2, 3), keepdims=True)
    x72 = gamma.reshape(1, c_out, 1, 1) * (x71 - mean) / jnp.sqrt(var + EPS) \
        + beta.reshape(1, c_out, 1, 1)
    return x72 + x58


if __name__ == "__main__":
    key = jax.random.PRNGKey(0)
    k1, k2, k3, k4 = jax.random.split(key, 4)

    C_IN, C_OUT = 240, 40     # fixed by the module's Conv2d(240, 40, 1x1)
    H = W = 28                # matches the original module's spatial size

    x68 = jax.random.normal(k1, (1, C_IN, 1, 1), dtype=jnp.float32)
    x64 = jax.random.normal(k2, (1, C_IN, H, W), dtype=jnp.float32)
    x58 = jax.random.normal(k3, (1, C_OUT, H, W), dtype=jnp.float32)

    # Deterministic parameter init (Conv2d weight ~ small normal; BN affine defaults)
    weight = 0.05 * jax.random.normal(k4, (C_OUT, C_IN, 1, 1), dtype=jnp.float32)
    gamma = jnp.ones((C_OUT,), dtype=jnp.float32)
    beta = jnp.zeros((C_OUT,), dtype=jnp.float32)

    ref = reference_forward(x68, x64, x58, weight, gamma, beta)

    # Exact-precision path: f32 streaming, HIGHEST matmul precision -> tight check.
    out_f32 = fused_forward(x68, x64, x58, weight, gamma, beta,
                            input_dtype=jnp.float32)
    out_f32 = jax.block_until_ready(out_f32)
    assert out_f32.shape == (1, C_OUT, H, W)
    assert jnp.allclose(out_f32, ref, atol=1e-4, rtol=1e-4)

    # Performance-default path: bf16 HBM streaming of x64/x58, f32 accumulation.
    out_bf16 = fused_forward(x68, x64, x58, weight, gamma, beta,
                             input_dtype=jnp.bfloat16)
    out_bf16 = jax.block_until_ready(out_bf16)
    assert out_bf16.shape == (1, C_OUT, H, W)
    assert jnp.allclose(out_bf16, ref, atol=3e-2, rtol=3e-2)

    print("KERNEL_OK")
</pallas_src>

<mosaic_0001>
module attributes {stable_mosaic.version = 11 : i64} {
  func.func @_fused_kernel(%arg0: memref<1x240xf32, #tpu.memory_space<vmem>>, %arg1: memref<240x784xf32, #tpu.memory_space<vmem>>, %arg2: memref<40x240xf32, #tpu.memory_space<vmem>>, %arg3: memref<2x40x1xf32, #tpu.memory_space<vmem>>, %arg4: memref<40x784xf32, #tpu.memory_space<any>>, %arg5: memref<40x784xf32, #tpu.memory_space<vmem>>, %arg6: memref<40x784xf32, #tpu.memory_space<vmem>>, %arg7: memref<!tpu.dma_semaphore, #tpu.memory_space<semaphore_mem>>) attributes {dimension_semantics = [], scalar_prefetch = 0 : i64, scratch_operands = 2 : i64, tpu.core_type = #tpu.core_type<tc>} {
    tpu.enqueue_dma source(%arg4 : memref<40x784xf32, #tpu.memory_space<any>>) target(%arg6 : memref<40x784xf32, #tpu.memory_space<vmem>>) target_semaphore(%arg7 : memref<!tpu.dma_semaphore, #tpu.memory_space<semaphore_mem>>)
    %c0 = arith.constant 0 : index
    %c0_0 = arith.constant 0 : index
    %0 = vector.load %arg0[%c0, %c0_0] : memref<1x240xf32, #tpu.memory_space<vmem>>, vector<1x240xf32>
    %1 = arith.negf %0 : vector<1x240xf32>
    %2 = math.exp %1 : vector<1x240xf32>
    %cst = arith.constant 1.000000e+00 : f32
    %3 = vector.broadcast %cst : f32 to vector<1x240xf32>
    %4 = arith.addf %3, %2 : vector<1x240xf32>
    %5 = arith.divf %3, %4 : vector<1x240xf32>
    %c0_1 = arith.constant 0 : index
    %c0_2 = arith.constant 0 : index
    %6 = vector.load %arg2[%c0_1, %c0_2] : memref<40x240xf32, #tpu.memory_space<vmem>>, vector<40x240xf32>
    %7 = vector.broadcast %5 : vector<1x240xf32> to vector<40x240xf32>
    %8 = arith.mulf %6, %7 : vector<40x240xf32>
    %c0_3 = arith.constant 0 : index
    %c0_4 = arith.constant 0 : index
    %9 = vector.load %arg1[%c0_3, %c0_4] : memref<240x784xf32, #tpu.memory_space<vmem>>, vector<240x784xf32>
    %cst_5 = arith.constant dense<0.000000e+00> : vector<40x784xf32>
    %10 = tpu.matmul %8, %9, %cst_5 {dimension_numbers = #tpu.dot_dimension_numbers<[1], [0], [0], [1], [0, 0, 1, 1], [], []>, precision = #tpu.contract_precision<fp32>} : vector<40x240xf32>, vector<240x784xf32>, vector<40x784xf32> -> vector<40x784xf32>
    %cst_6 = arith.constant dense<0.000000e+00> : vector<40xf32>
    %11 = vector.multi_reduction <add>, %10, %cst_6 [1] : vector<40x784xf32> to vector<40xf32>
    %12 = vector.shape_cast %11 : vector<40xf32> to vector<40x1xf32>
    %cst_7 = arith.constant 0.00127551018 : f32
    %13 = vector.broadcast %cst_7 : f32 to vector<40x1xf32>
    %14 = arith.mulf %12, %13 : vector<40x1xf32>
    %15 = vector.broadcast %14 : vector<40x1xf32> to vector<40x784xf32>
    %16 = arith.subf %10, %15 : vector<40x784xf32>
    %17 = arith.mulf %16, %16 : vector<40x784xf32>
    %cst_8 = arith.constant dense<0.000000e+00> : vector<40xf32>
    %18 = vector.multi_reduction <add>, %17, %cst_8 [1] : vector<40x784xf32> to vector<40xf32>
    %19 = vector.shape_cast %18 : vector<40xf32> to vector<40x1xf32>
    %cst_9 = arith.constant 0.00127551018 : f32
    %20 = vector.broadcast %cst_9 : f32 to vector<40x1xf32>
    %21 = arith.mulf %19, %20 : vector<40x1xf32>
    %c0_10 = arith.constant 0 : index
    %c0_11 = arith.constant 0 : index
    %c0_12 = arith.constant 0 : index
    %22 = vector.load %arg3[%c0_10, %c0_11, %c0_12] : memref<2x40x1xf32, #tpu.memory_space<vmem>>, vector<1x40x1xf32>
    %23 = vector.shape_cast %22 : vector<1x40x1xf32> to vector<40x1xf32>
    %c1 = arith.constant 1 : index
    %c0_13 = arith.constant 0 : index
    %c0_14 = arith.constant 0 : index
    %24 = vector.load %arg3[%c1, %c0_13, %c0_14] : memref<2x40x1xf32, #tpu.memory_space<vmem>>, vector<1x40x1xf32>
    %25 = vector.shape_cast %24 : vector<1x40x1xf32> to vector<40x1xf32>
    %cst_15 = arith.constant 9.99999974E-6 : f32
    %26 = vector.broadcast %cst_15 : f32 to vector<40x1xf32>
    %27 = arith.addf %21, %26 : vector<40x1xf32>
    %28 = math.rsqrt %27 : vector<40x1xf32>
    %29 = arith.mulf %23, %28 : vector<40x1xf32>
    tpu.wait_dma2 semaphore(%arg7 : memref<!tpu.dma_semaphore, #tpu.memory_space<semaphore_mem>>) src(%arg4 : memref<40x784xf32, #tpu.memory_space<any>>) dst(%arg6 : memref<40x784xf32, #tpu.memory_space<vmem>>)
    %30 = vector.broadcast %29 : vector<40x1xf32> to vector<40x784xf32>
    %31 = arith.mulf %30, %16 : vector<40x784xf32>
    %32 = vector.broadcast %25 : vector<40x1xf32> to vector<40x784xf32>
    %33 = arith.addf %31, %32 : vector<40x784xf32>
    %c0_16 = arith.constant 0 : index
    %c0_17 = arith.constant 0 : index
    %34 = vector.load %arg6[%c0_16, %c0_17] : memref<40x784xf32, #tpu.memory_space<vmem>>, vector<40x784xf32>
    %35 = arith.addf %33, %34 : vector<40x784xf32>
    %c0_18 = arith.constant 0 : index
    %c0_19 = arith.constant 0 : index
    %36 = vector.load %arg5[%c0_18, %c0_19] : memref<40x784xf32, #tpu.memory_space<vmem>>, vector<40x784xf32>
    tpu.vector_store %arg5[%c0_18, %c0_19], %35 {strides = array<i32>} : memref<40x784xf32, #tpu.memory_space<vmem>>, vector<40x784xf32>,
    return
  }
}

</mosaic_0001>

<bundles_post_ra>
// kernel: tpu_custom_call.1
= control target key start
LH: loop header
LB: loop body
LE: loop exit
PB: predicated region body
PF: predicated region fallthrough
CT: control target
= control target key end

     0   :  { %10 = vsyncpa [#allocation5], 0  ;;  %s12474_s0 = inlined_call_operand.vmem [shape: f32[1,240], index: 0, kind: input, shape index: {}]   ;;  %s12475_s1 = inlined_call_operand.vmem [shape: f32[240,784], index: 1, kind: input, shape index: {}]   ;;  %s12476_s2 = inlined_call_operand.vmem [shape: f32[40,240], index: 2, kind: input, shape index: {}]   ;;  %s12477_s3 = inlined_call_operand.vmem [shape: f32[2,40,1], index: 3, kind: input, shape index: {}]   ;;  %s12478_s4 = inlined_call_operand.vmem [shape: f32[40,784], index: 4, kind: input, shape index: {}]   ;;  %s12479_s5 = inlined_call_operand.hbm [shape: f32[40,784], index: 5, kind: output, shape index: {}]  }
   0x1   :  { %v7991_v0 = vld [vmem:[%s12478_s4] sm:$0xff]  ;;  %v7996_v1 = vld [vmem:[%s12478_s4 + $0x8] sm:$0xff]  ;;  %v8001_v2 = vld [vmem:[%s12478_s4 + $0x10] sm:$0xff] }
   0x2   :  { %13324 = vst [vmem:[#allocation9_spill] sm:$0xff] %v7991_v0  ;;  %13325 = vst [vmem:[#allocation10_spill] sm:$0xff] %v7996_v1  ;;  %v8006_v3 = vld [vmem:[%s12478_s4 + $0x18] sm:$0xff]  ;;  %v8011_v4 = vld [vmem:[%s12478_s4 + $0x20] sm:$0xff] }
   0x3   :  { %13326 = vst [vmem:[#allocation11_spill] sm:$0xff] %v8001_v2  ;;  %13327 = vst [vmem:[#allocation12_spill] sm:$0xff] %v8006_v3  ;;  %v8016_v5 = vld [vmem:[%s12478_s4 + $0x28] sm:$0xff]  ;;  %v8021_v6 = vld [vmem:[%s12478_s4 + $0x30] sm:$0xff] }
   0x4   :  { %13328 = vst [vmem:[#allocation13_spill] sm:$0xff] %v8011_v4  ;;  %13329 = vst [vmem:[#allocation14_spill] sm:$0xff] %v8016_v5  ;;  %v8026_v7 = vld [vmem:[%s12478_s4 + $0x38] sm:$0xff]  ;;  %v8031_v8 = vld [vmem:[%s12478_s4 + $0x40] sm:$0xff] }
   0x5   :  { %13330 = vst [vmem:[#allocation15_spill] sm:$0xff] %v8021_v6  ;;  %13331 = vst [vmem:[#allocation16_spill] sm:$0xff] %v8026_v7  ;;  %v8036_v9 = vld [vmem:[%s12478_s4 + $0x48] sm:$0xff]  ;;  %v8041_v10 = vld [vmem:[%s12478_s4 + $0x50] sm:$0xff] }
   0x6   :  { %13332 = vst [vmem:[#allocation17_spill] sm:$0xff] %v8031_v8  ;;  %13333 = vst [vmem:[#allocation18_spill] sm:$0xff] %v8036_v9  ;;  %v8046_v11 = vld [vmem:[%s12478_s4 + $0x58] sm:$0xff]  ;;  %v8051_v12 = vld [vmem:[%s12478_s4 + $0x60] sm:$0xff] }
   0x7   :  { %13334 = vst [vmem:[#allocation19_spill] sm:$0xff] %v8041_v10  ;;  %13335 = vst [vmem:[#allocation20_spill] sm:$0xff] %v8046_v11  ;;  %v8056_v13 = vld [vmem:[%s12478_s4 + $0x68] sm:$0xff]  ;;  %v8061_v14 = vld [vmem:[%s12478_s4 + $0x70] sm:$0xff] }
   0x8   :  { %13336 = vst [vmem:[#allocation21_spill] sm:$0xff] %v8051_v12  ;;  %13337 = vst [vmem:[#allocation22_spill] sm:$0xff] %v8056_v13  ;;  %v8066_v15 = vld [vmem:[%s12478_s4 + $0x78] sm:$0xff]  ;;  %v8071_v16 = vld [vmem:[%s12478_s4 + $0x80] sm:$0xff] }
   0x9   :  { %13338 = vst [vmem:[#allocation23_spill] sm:$0xff] %v8061_v14  ;;  %13339 = vst [vmem:[#allocation24_spill] sm:$0xff] %v8066_v15  ;;  %v8076_v17 = vld [vmem:[%s12478_s4 + $0x88] sm:$0xff]  ;;  %v8081_v18 = vld [vmem:[%s12478_s4 + $0x90] sm:$0xff] }
   0xa   :  { %13340 = vst [vmem:[#allocation25_spill] sm:$0xff] %v8071_v16  ;;  %13341 = vst [vmem:[#allocation26_spill] sm:$0xff] %v8076_v17  ;;  %v8086_v19 = vld [vmem:[%s12478_s4 + $0x98] sm:$0xff]  ;;  %v8091_v20 = vld [vmem:[%s12478_s4 + $0xa0] sm:$0xff] }
   0xb   :  { %13342 = vst [vmem:[#allocation27_spill] sm:$0xff] %v8081_v18  ;;  %13343 = vst [vmem:[#allocation28_spill] sm:$0xff] %v8086_v19  ;;  %v8096_v21 = vld [vmem:[%s12478_s4 + $0xa8] sm:$0xff]  ;;  %v8101_v22 = vld [vmem:[%s12478_s4 + $0xb0] sm:$0xff] }
   0xc   :  { %13344 = vst [vmem:[#allocation29_spill] sm:$0xff] %v8091_v20  ;;  %13345 = vst [vmem:[#allocation30_spill] sm:$0xff] %v8096_v21  ;;  %v8106_v23 = vld [vmem:[%s12478_s4 + $0xb8] sm:$0xff]  ;;  %v8111_v24 = vld [vmem:[%s12478_s4 + $0xc0] sm:$0xff] }
   0xd   :  { %13346 = vst [vmem:[#allocation31_spill] sm:$0xff] %v8101_v22  ;;  %13347 = vst [vmem:[#allocation32_spill] sm:$0xff] %v8106_v23  ;;  %v8116_v25 = vld [vmem:[%s12478_s4 + $0xc8] sm:$0xff]  ;;  %v8121_v26 = vld [vmem:[%s12478_s4 + $0xd0] sm:$0xff] }
   0xe   :  { %13348 = vst [vmem:[#allocation33_spill] sm:$0xff] %v8111_v24  ;;  %13349 = vst [vmem:[#allocation34_spill] sm:$0xff] %v8116_v25  ;;  %v8126_v27 = vld [vmem:[%s12478_s4 + $0xd8] sm:$0xff]  ;;  %v8131_v28 = vld [vmem:[%s12478_s4 + $0xe0] sm:$0xff] }
   0xf   :  { %13350 = vst [vmem:[#allocation35_spill] sm:$0xff] %v8121_v26  ;;  %13351 = vst [vmem:[#allocation36_spill] sm:$0xff] %v8126_v27  ;;  %v8136_v29 = vld [vmem:[%s12478_s4 + $0xe8] sm:$0xff]  ;;  %v8141_v30 = vld [vmem:[%s12478_s4 + $0xf0] sm:$0xff] }
  0x10   :  { %13352 = vst [vmem:[#allocation37_spill] sm:$0xff] %v8131_v28  ;;  %13353 = vst [vmem:[#allocation38_spill] sm:$0xff] %v8136_v29  ;;  %v8146_v31 = vld [vmem:[%s12478_s4 + $0xf8] sm:$0xff]  ;;  %v8151_v32 = vld [vmem:[%s12478_s4 + $0x100] sm:$0xff] }
  0x11   :  { %13354 = vst [vmem:[#allocation39_spill] sm:$0xff] %v8141_v30  ;;  %13355 = vst [vmem:[#allocation40_spill] sm:$0xff] %v8146_v31  ;;  %v8156_v33 = vld [vmem:[%s12478_s4 + $0x108] sm:$0xff]  ;;  %v8161_v34 = vld [vmem:[%s12478_s4 + $0x110] sm:$0xff] }
  0x12   :  { %13356 = vst [vmem:[#allocation41_spill] sm:$0xff] %v8151_v32  ;;  %13357 = vst [vmem:[#allocation42_spill] sm:$0xff] %v8156_v33 }
  0x13   :  { %13358 = vst [vmem:[#allocation43_spill] sm:$0xff] %v8161_v34 }
  0x14   :  { %128 = vsyncadd [#allocation3], 4480  ;;  %v168_v35 = vld [vmem:[%s12475_s1 + $0x8] sm:$0xff]  ;;  %v175_v36 = vld [vmem:[%s12475_s1 + $0x40] sm:$0xff]  ;;  %vm377_vm0 = vcmask 916480   ;;  %vm5898_vm1 = vcmask 130048  }
  0x15   :  { %v393_v37 = vand.u32 4294901760, %v168_v35  ;;  %v397_v38 = vand.u32 4294901760, %v175_v36  ;;  %v170_v39 = vld [vmem:[%s12475_s1 + $0x18] sm:$0xff]  ;;  %v177_v40 = vld [vmem:[%s12475_s1 + $0x50] sm:$0xff]  ;;  %v167_v41 = vld [vmem:[%s12475_s1] sm:$0xff] }
  0x16   :  { %v1873_v42 = vand.u32 4294901760, %v170_v39  ;;  %v1877_v43 = vand.u32 4294901760, %v177_v40  ;;  %v174_v44 = vld [vmem:[%s12475_s1 + $0x38] sm:$0xff]  ;;  %v395_v45 = vand.u32 4294901760, %v167_v41  ;;  %v169_v46 = vld [vmem:[%s12475_s1 + $0x10] sm:$0xff]  ;;  %v176_v47 = vld [vmem:[%s12475_s1 + $0x48] sm:$0xff] }
  0x17   :  { %v8187_v49 = vpack.c.bf16 %v397_v38, %v393_v37  ;;  %v8189_v50 = vsub.f32 %v168_v35, %v393_v37  ;;  %v8191_v51 = vsub.f32 %v175_v36, %v397_v38  ;;  %v399_v52 = vand.u32 4294901760, %v174_v44  ;;  %v182_v53 = vld [vmem:[%s12475_s1 + $0x78] sm:$0xff]  ;;  %v189_v54 = vld [vmem:[%s12475_s1 + $0xb0] sm:$0xff]  ;;  %v184_v55 = vld [vmem:[%s12475_s1 + $0x88] sm:$0xff] }
  0x18   :  { %v8202_v56 = vpack.c.bf16 %v1877_v43, %v1873_v42  ;;  %v8204_v57 = vsub.f32 %v170_v39, %v1873_v42  ;;  %v8206_v58 = vsub.f32 %v177_v40, %v1877_v43  ;;  %v8208_v59 = vsub.f32 %v167_v41, %v395_v45  ;;  %v191_v60 = vld [vmem:[%s12475_s1 + $0xc0] sm:$0xff]  ;;  %v181_v61 = vld [vmem:[%s12475_s1 + $0x70] sm:$0xff]  ;;  %v188_v41 = vld [vmem:[%s12475_s1 + $0xa8] sm:$0xff] }
  0x19   :  { %13359 = vst [vmem:[#allocation44_spill] sm:$0xff] %v8187_v49  ;;  %13360 = vst [vmem:[#allocation45_spill] sm:$0xff] %v8189_v50  ;;  %6357 = vmatprep.subr.bf16.mxu0 %v8187_v49  ;;  %v8217_v62 = vpack.c.bf16 %v399_v52, %v395_v45  ;;  %v8219_v63 = vsub.f32 %v174_v44, %v399_v52  ;;  %v1875_v35 = vand.u32 4294901760, %v169_v46  ;;  %v1879_v36 = vand.u32 4294901760, %v176_v47  ;;  %v183_v42 = vld [vmem:[%s12475_s1 + $0x80] sm:$0xff]  ;;  %v190_v48 = vld [vmem:[%s12475_s1 + $0xb8] sm:$0xff] }
  0x1a   :  { %13361 = vst [vmem:[#allocation46_spill] sm:$0xff] %v8191_v51  ;;  %13362 = vst [vmem:[#allocation47_spill] sm:$0xff] %v8202_v56  ;;  %6717 = vmatprep.subr.bf16.mxu1 %v8202_v56  ;;  %v401_v37 = vand.u32 4294901760, %v182_v53  ;;  %v405_v38 = vand.u32 4294901760, %v189_v54  ;;  %v1881_v39 = vand.u32 4294901760, %v184_v55  ;;  %v1885_v40 = vand.u32 4294901760, %v191_v60 }
  0x1b   :  { %13363 = vst [vmem:[#allocation48_spill] sm:$0xff] %v8204_v57  ;;  %13364 = vst [vmem:[#allocation49_spill] sm:$0xff] %v8206_v58  ;;  %6359 = vmatpush1.bf16.msra.mxu0 %v8217_v62  ;;  %v8229_v43 = vpack.c.bf16 %v1879_v36, %v1875_v35  ;;  %v8231_v44 = vsub.f32 %v169_v46, %v1875_v35  ;;  %v8233_v45 = vsub.f32 %v176_v47, %v1879_v36  ;;  %v196_v27 = vld [vmem:[%s12475_s1 + $0xe8] sm:$0xff]  ;;  %v203_v26 = vld [vmem:[%s12475_s1 + $0x120] sm:$0xff] }
  0x1c   :  { %13365 = vst [vmem:[#allocation50_spill] sm:$0xff] %v8208_v59  ;;  %13366 = vst [vmem:[#allocation51_spill] sm:$0xff] %v8217_v62  ;;  %v403_v52 = vand.u32 4294901760, %v181_v61  ;;  %v8244_v25 = vpack.c.bf16 %v405_v38, %v401_v37  ;;  %v8246_v24 = vsub.f32 %v182_v53, %v401_v37  ;;  %v8248_v46 = vsub.f32 %v189_v54, %v405_v38  ;;  %v198_v35 = vld [vmem:[%s12475_s1 + $0xf8] sm:$0xff]  ;;  %v205_v36 = vld [vmem:[%s12475_s1 + $0x130] sm:$0xff] }
  0x1d   :  { %13367 = vst [vmem:[#allocation52_spill] sm:$0xff] %v8219_v63  ;;  %13368 = vst [vmem:[#allocation53_spill] sm:$0xff] %v8229_v43  ;;  %v8250_v47 = vpack.c.bf16 %v1885_v40, %v1881_v39  ;;  %6719 = vmatpush1.bf16.msra.mxu1 %v8229_v43  ;;  %v8259_v23 = vsub.f32 %v184_v55, %v1881_v39  ;;  %v8261_v22 = vsub.f32 %v191_v60, %v1885_v40  ;;  %v195_v33 = vld [vmem:[%s12475_s1 + $0xe0] sm:$0xff]  ;;  %v197_v40 = vld [vmem:[%s12475_s1 + $0xf0] sm:$0xff] }
  0x1e   :  { %13369 = vst [vmem:[#allocation54_spill] sm:$0xff] %v8231_v44  ;;  %13370 = vst [vmem:[#allocation55_spill] sm:$0xff] %v8233_v45  ;;  %v407_v53 = vand.u32 4294901760, %v188_v41  ;;  %v8263_v37 = vsub.f32 %v181_v61, %v403_v52  ;;  %6361 = vmatprep.subr.bf16.mxu0 %v8244_v25  ;;  %v1883_v54 = vand.u32 4294901760, %v183_v42  ;;  %v1887_v38 = vand.u32 4294901760, %v190_v48  ;;  %v202_v61 = vld [vmem:[%s12475_s1 + $0x118] sm:$0xff] }
  0x1f   :  { %13371 = vst [vmem:[#allocation56_spill] sm:$0xff] %v8244_v25  ;;  %13372 = vst [vmem:[#allocation57_spill] sm:$0xff] %v8246_v24  ;;  %6721 = vmatprep.subr.bf16.mxu1 %v8250_v47  ;;  %v409_v21 = vand.u32 4294901760, %v196_v27  ;;  %v413_v34 = vand.u32 4294901760, %v203_v26  ;;  %v1889_v60 = vand.u32 4294901760, %v198_v35  ;;  %v1893_v39 = vand.u32 4294901760, %v205_v36 }
  0x20   :  { %13373 = vst [vmem:[#allocation58_spill] sm:$0xff] %v8248_v46  ;;  %13374 = vst [vmem:[#allocation59_spill] sm:$0xff] %v8250_v47  ;;  %v8270_v32 = vpack.c.bf16 %v407_v53, %v403_v52  ;;  %v8272_v55 = vsub.f32 %v188_v41, %v407_v53  ;;  %v204_v31 = vld [vmem:[%s12475_s1 + $0x128] sm:$0xff]  ;;  %v8283_v30 = vpack.c.bf16 %v1887_v38, %v1883_v54  ;;  %v210_v29 = vld [vmem:[%s12475_s1 + $0x158] sm:$0xff]  ;;  %v411_v11 = vand.u32 4294901760, %v195_v33 }
  0x21   :  { %13375 = vst [vmem:[#allocation60_spill] sm:$0xff] %v8259_v23  ;;  %13376 = vst [vmem:[#allocation61_spill] sm:$0xff] %v8261_v22  ;;  %v8285_v52 = vsub.f32 %v183_v42, %v1883_v54  ;;  %v8287_v41 = vsub.f32 %v190_v48, %v1887_v38  ;;  %v8289_v53 = vpack.c.bf16 %v413_v34, %v409_v21  ;;  %v217_v28 = vld [vmem:[%s12475_s1 + $0x190] sm:$0xff]  ;;  %v212_v13 = vld [vmem:[%s12475_s1 + $0x168] sm:$0xff]  ;;  %v415_v10 = vand.u32 4294901760, %v202_v61 }
  0x22   :  { %13377 = vst [vmem:[#allocation62_spill] sm:$0xff] %v8263_v37  ;;  %13378 = vst [vmem:[#allocation63_spill] sm:$0xff] %v8270_v32  ;;  %6363 = vmatpush1.bf16.msra.mxu0 %v8270_v32  ;;  %v8301_v42 = vsub.f32 %v196_v27, %v409_v21  ;;  %v8303_v48 = vsub.f32 %v203_v26, %v413_v34  ;;  %v8305_v54 = vpack.c.bf16 %v1893_v39, %v1889_v60  ;;  %v219_v21 = vld [vmem:[%s12475_s1 + $0x1a0] sm:$0xff]  ;;  %v218_v18 = vld [vmem:[%s12475_s1 + $0x198] sm:$0xff] }
  0x23   :  { %13379 = vst [vmem:[#allocation64_spill] sm:$0xff] %v8272_v55  ;;  %13380 = vst [vmem:[#allocation65_spill] sm:$0xff] %v8283_v30  ;;  %v8307_v38 = vsub.f32 %v198_v35, %v1889_v60  ;;  %6723 = vmatpush1.bf16.msra.mxu1 %v8283_v30  ;;  %6365 = vmatprep.subr.bf16.mxu0 %v8289_v53  ;;  %v8311_v12 = vsub.f32 %v205_v36, %v1893_v39  ;;  %v1891_v9 = vand.u32 4294901760, %v197_v40  ;;  %v209_v60 = vld [vmem:[%s12475_s1 + $0x150] sm:$0xff]  ;;  %v216_v36 = vld [vmem:[%s12475_s1 + $0x188] sm:$0xff] }
  0x24   :  { %13381 = vst [vmem:[#allocation66_spill] sm:$0xff] %v8285_v52  ;;  %13382 = vst [vmem:[#allocation67_spill] sm:$0xff] %v8287_v41  ;;  %6725 = vmatprep.subr.bf16.mxu1 %v8305_v54  ;;  %v1895_v26 = vand.u32 4294901760, %v204_v31  ;;  %v417_v27 = vand.u32 4294901760, %v210_v29  ;;  %v421_v34 = vand.u32 4294901760, %v217_v28  ;;  %v1897_v35 = vand.u32 4294901760, %v212_v13 }
  0x25   :  { %13383 = vst [vmem:[#allocation68_spill] sm:$0xff] %v8289_v53  ;;  %13384 = vst [vmem:[#allocation69_spill] sm:$0xff] %v8301_v42  ;;  %v8323_v39 = vpack.c.bf16 %v415_v10, %v411_v11  ;;  %v8325_v8 = vsub.f32 %v195_v33, %v411_v11  ;;  %v8327_v7 = vsub.f32 %v202_v61, %v415_v10  ;;  %v211_v19 = vld [vmem:[%s12475_s1 + $0x160] sm:$0xff]  ;;  %v224_v17 = vld [vmem:[%s12475_s1 + $0x1c8] sm:$0xff]  ;;  %v1901_v15 = vand.u32 4294901760, %v219_v21 }
  0x26   :  { %13385 = vst [vmem:[#allocation70_spill] sm:$0xff] %v8303_v48  ;;  %13386 = vst [vmem:[#allocation71_spill] sm:$0xff] %v8305_v54  ;;  %v8329_v20 = vsub.f32 %v197_v40, %v1891_v9  ;;  %v8340_v16 = vpack.c.bf16 %v1895_v26, %v1891_v9  ;;  %v8342_v11 = vsub.f32 %v204_v31, %v1895_v26  ;;  %v231_v61 = vld [vmem:[%s12475_s1 + $0x200] sm:$0xff]  ;;  %v419_v6 = vand.u32 4294901760, %v209_v60  ;;  %v230_v2 = vld [vmem:[%s12475_s1 + $0x1f8] sm:$0xff] }
  0x27   :  { %13387 = vst [vmem:[#allocation72_spill] sm:$0xff] %v8307_v38  ;;  %13388 = vst [vmem:[#allocation73_spill] sm:$0xff] %v8311_v12  ;;  %v8344_v10 = vpack.c.bf16 %v421_v34, %v417_v27  ;;  %v8346_v33 = vsub.f32 %v210_v29, %v417_v27  ;;  %6367 = vmatpush1.bf16.msra.mxu0 %v8323_v39  ;;  %v8352_v40 = vsub.f32 %v217_v28, %v421_v34  ;;  %v226_v27 = vld [vmem:[%s12475_s1 + $0x1d8] sm:$0xff]  ;;  %v233_v28 = vld [vmem:[%s12475_s1 + $0x210] sm:$0xff] }
  0x28   :  { %13389 = vst [vmem:[#allocation74_spill] sm:$0xff] %v8323_v39  ;;  %13390 = vst [vmem:[#allocation75_spill] sm:$0xff] %v8325_v8  ;;  %v8354_v14 = vsub.f32 %v212_v13, %v1897_v35  ;;  %6727 = vmatpush1.bf16.msra.mxu1 %v8340_v16  ;;  %v423_v9 = vand.u32 4294901760, %v216_v36  ;;  %v1899_v31 = vand.u32 4294901760, %v211_v19  ;;  %v1903_v29 = vand.u32 4294901760, %v218_v18  ;;  %v223_v3 = vld [vmem:[%s12475_s1 + $0x1c0] sm:$0xff] }
  0x29   :  { %13391 = vst [vmem:[#allocation76_spill] sm:$0xff] %v8327_v7  ;;  %13392 = vst [vmem:[#allocation77_spill] sm:$0xff] %v8329_v20  ;;  %6369 = vmatprep.subr.bf16.mxu0 %v8344_v10  ;;  %v425_v26 = vand.u32 4294901760, %v224_v17  ;;  %v8364_v34 = vpack.c.bf16 %v1901_v15, %v1897_v35  ;;  %v8366_v13 = vsub.f32 %v219_v21, %v1901_v15  ;;  %v429_v4 = vand.u32 4294901760, %v231_v61  ;;  %v225_v1 = vld [vmem:[%s12475_s1 + $0x1d0] sm:$0xff]  ;;  %v244_v32 = vld [vmem:[%s12475_s1 + $0x268] sm:$0xff] }
  0x2a   :  { %13393 = vst [vmem:[#allocation78_spill] sm:$0xff] %v8340_v16  ;;  %13394 = vst [vmem:[#allocation79_spill] sm:$0xff] %v8342_v11  ;;  %v8368_v5 = vsub.f32 %v209_v60, %v419_v6  ;;  %v8379_v0 = vpack.c.bf16 %v423_v9, %v419_v6  ;;  %v8381_v35 = vsub.f32 %v216_v36, %v423_v9  ;;  %v232_v60 = vld [vmem:[%s12475_s1 + $0x208] sm:$0xff]  ;;  %v245_v16 = vld [vmem:[%s12475_s1 + $0x270] sm:$0xff]  ;;  %v1909_v39 = vand.u32 4294901760, %v233_v28 }
  0x2b   :  { %13395 = vst [vmem:[#allocation80_spill] sm:$0xff] %v8344_v10  ;;  %13396 = vst [vmem:[#allocation81_spill] sm:$0xff] %v8346_v33  ;;  %v8383_v15 = vpack.c.bf16 %v1903_v29, %v1899_v31  ;;  %v8385_v21 = vsub.f32 %v211_v19, %v1899_v31  ;;  %v238_v10 = vld [vmem:[%s12475_s1 + $0x238] sm:$0xff]  ;;  %6729 = vmatprep.subr.bf16.mxu1 %v8364_v34  ;;  %v8397_v6 = vsub.f32 %v218_v18, %v1903_v29  ;;  %v252_v43 = vld [vmem:[%s12475_s1 + $0x2a8] sm:$0xff] }
  0x2c   :  { %13397 = vst [vmem:[#allocation82_spill] sm:$0xff] %v8352_v40  ;;  %13398 = vst [vmem:[#allocation83_spill] sm:$0xff] %v8354_v14  ;;  %v8399_v36 = vpack.c.bf16 %v429_v4, %v425_v26  ;;  %v8401_v19 = vsub.f32 %v224_v17, %v425_v26  ;;  %v8403_v9 = vsub.f32 %v231_v61, %v429_v4  ;;  %6371 = vmatpush1.bf16.msra.mxu0 %v8379_v0  ;;  %v240_v17 = vld [vmem:[%s12475_s1 + $0x248] sm:$0xff]  ;;  %v246_v25 = vld [vmem:[%s12475_s1 + $0x278] sm:$0xff] }
  0x2d   :  { %13399 = vst [vmem:[#allocation84_spill] sm:$0xff] %v8364_v34  ;;  %13400 = vst [vmem:[#allocation85_spill] sm:$0xff] %v8366_v13  ;;  %6731 = vmatpush1.bf16.msra.mxu1 %v8383_v15  ;;  %v1905_v31 = vand.u32 4294901760, %v226_v27  ;;  %v427_v54 = vand.u32 4294901760, %v223_v3  ;;  %v431_v53 = vand.u32 4294901760, %v230_v2  ;;  %v1907_v30 = vand.u32 4294901760, %v225_v1 }
  0x2e   :  { %13401 = vst [vmem:[#allocation86_spill] sm:$0xff] %v8368_v5  ;;  %13402 = vst [vmem:[#allocation87_spill] sm:$0xff] %v8379_v0  ;;  %6373 = vmatprep.subr.bf16.mxu0 %v8399_v36  ;;  %v1911_v34 = vand.u32 4294901760, %v232_v60  ;;  %v433_v18 = vand.u32 4294901760, %v238_v10  ;;  %v437_v29 = vand.u32 4294901760, %v245_v16  ;;  %v8415_v26 = vsub.f32 %v233_v28, %v1909_v39  ;;  %v237_v0 = vld [vmem:[%s12475_s1 + $0x230] sm:$0xff] }
  0x2f   :  { %13403 = vst [vmem:[#allocation88_spill] sm:$0xff] %v8381_v35  ;;  %13404 = vst [vmem:[#allocation89_spill] sm:$0xff] %v8383_v15  ;;  %v8411_v4 = vpack.c.bf16 %v1909_v39, %v1905_v31  ;;  %v8413_v61 = vsub.f32 %v226_v27, %v1905_v31  ;;  %v8417_v15 = vpack.c.bf16 %v431_v53, %v427_v54  ;;  %v239_v31 = vld [vmem:[%s12475_s1 + $0x240] sm:$0xff]  ;;  %v435_v62 = vand.u32 4294901760, %v237_v0 }
  0x30   :  { %13405 = vst [vmem:[#allocation90_spill] sm:$0xff] %v8385_v21  ;;  %13406 = vst [vmem:[#allocation91_spill] sm:$0xff] %v8397_v6  ;;  %v8428_v47 = vsub.f32 %v223_v3, %v427_v54  ;;  %v8430_v27 = vsub.f32 %v230_v2, %v431_v53  ;;  %v8432_v39 = vpack.c.bf16 %v1911_v34, %v1907_v30  ;;  %v439_v56 = vand.u32 4294901760, %v244_v32 }
  0x31   :  { %13407 = vst [vmem:[#allocation92_spill] sm:$0xff] %v8399_v36  ;;  %13408 = vst [vmem:[#allocation93_spill] sm:$0xff] %v8401_v19  ;;  %v247_v36 = vld [vmem:[%s12475_s1 + $0x280] sm:$0xff]  ;;  %v8434_v28 = vsub.f32 %v225_v1, %v1907_v30  ;;  %6733 = vmatprep.subr.bf16.mxu1 %v8411_v4  ;;  %6375 = vmatpush1.bf16.msra.mxu0 %v8417_v15  ;;  %v8447_v2 = vsub.f32 %v232_v60, %v1911_v34  ;;  %v1913_v30 = vand.u32 4294901760, %v240_v17 }
  0x32   :  { %13409 = vst [vmem:[#allocation94_spill] sm:$0xff] %v8403_v9  ;;  %13410 = vst [vmem:[#allocation95_spill] sm:$0xff] %v8411_v4  ;;  %v8449_v1 = vpack.c.bf16 %v437_v29, %v433_v18  ;;  %v8451_v3 = vsub.f32 %v238_v10, %v433_v18  ;;  %6735 = vmatpush1.bf16.msra.mxu1 %v8432_v39  ;;  %v8454_v53 = vsub.f32 %v245_v16, %v437_v29  ;;  %v259_v4 = vld [vmem:[%s12475_s1 + $0x2e0] sm:$0xff]  ;;  %v254_v18 = vld [vmem:[%s12475_s1 + $0x2b8] sm:$0xff] }
  0x33   :  { %13411 = vst [vmem:[#allocation96_spill] sm:$0xff] %v8413_v61  ;;  %13412 = vst [vmem:[#allocation97_spill] sm:$0xff] %v8415_v26  ;;  %v1917_v54 = vand.u32 4294901760, %v247_v36  ;;  %v8460_v34 = vsub.f32 %v240_v17, %v1913_v30  ;;  %v1915_v60 = vand.u32 4294901760, %v239_v31  ;;  %v441_v10 = vand.u32 4294901760, %v252_v43  ;;  %v261_v16 = vld [vmem:[%s12475_s1 + $0x2f0] sm:$0xff] }
  0x34   :  { %13413 = vst [vmem:[#allocation98_spill] sm:$0xff] %v8417_v15  ;;  %13414 = vst [vmem:[#allocation99_spill] sm:$0xff] %v8428_v47  ;;  %6377 = vmatprep.subr.bf16.mxu0 %v8449_v1  ;;  %v1919_v15 = vand.u32 4294901760, %v246_v25  ;;  %v251_v29 = vld [vmem:[%s12475_s1 + $0x2a0] sm:$0xff]  ;;  %v8475_v17 = vpack.c.bf16 %v439_v56, %v435_v62  ;;  %v8477_v49 = vsub.f32 %v237_v0, %v435_v62  ;;  %v445_v62 = vand.u32 4294901760, %v259_v4 }
  0x35   :  { %13415 = vst [vmem:[#allocation100_spill] sm:$0xff] %v8430_v27  ;;  %13416 = vst [vmem:[#allocation101_spill] sm:$0xff] %v8432_v39  ;;  %v8471_v39 = vpack.c.bf16 %v1917_v54, %v1913_v30  ;;  %v8488_v30 = vsub.f32 %v244_v32, %v439_v56 }
  0x36   :  { %13417 = vst [vmem:[#allocation102_spill] sm:$0xff] %v8434_v28  ;;  %13418 = vst [vmem:[#allocation103_spill] sm:$0xff] %v8447_v2  ;;  %v8494_v0 = vsub.f32 %v246_v25, %v1919_v15  ;;  %6379 = vmatpush1.bf16.msra.mxu0 %v8475_v17  ;;  %v1925_v2 = vand.u32 4294901760, %v261_v16  ;;  %v443_v28 = vand.u32 4294901760, %v251_v29  ;;  %v266_v25 = vld [vmem:[%s12475_s1 + $0x318] sm:$0xff] }
  0x37   :  { %13419 = vst [vmem:[#allocation104_spill] sm:$0xff] %v8449_v1  ;;  %13420 = vst [vmem:[#allocation105_spill] sm:$0xff] %v8451_v3  ;;  %v8473_v1 = vsub.f32 %v247_v36, %v1917_v54  ;;  %v260_v3 = vld [vmem:[%s12475_s1 + $0x2e8] sm:$0xff]  ;;  %v8490_v36 = vpack.c.bf16 %v1919_v15, %v1915_v60  ;;  %v8492_v54 = vsub.f32 %v239_v31, %v1915_v60  ;;  %6737 = vmatprep.subr.bf16.mxu1 %v8471_v39  ;;  %v273_v15 = vld [vmem:[%s12475_s1 + $0x350] sm:$0xff] }
  0x38   :  { %13421 = vst [vmem:[#allocation106_spill] sm:$0xff] %v8454_v53  ;;  %13422 = vst [vmem:[#allocation107_spill] sm:$0xff] %v8460_v34  ;;  %v258_v34 = vld [vmem:[%s12475_s1 + $0x2d8] sm:$0xff]  ;;  %v253_v53 = vld [vmem:[%s12475_s1 + $0x2b0] sm:$0xff]  ;;  %v8507_v31 = vpack.c.bf16 %v445_v62, %v441_v10 }
  0x39   :  { %13423 = vst [vmem:[#allocation108_spill] sm:$0xff] %v8471_v39  ;;  %13424 = vst [vmem:[#allocation109_spill] sm:$0xff] %v8473_v1  ;;  %v1921_v1 = vand.u32 4294901760, %v254_v18  ;;  %6739 = vmatpush1.bf16.msra.mxu1 %v8490_v36  ;;  %v447_v32 = vand.u32 4294901760, %v258_v34  ;;  %v1923_v56 = vand.u32 4294901760, %v253_v53  ;;  %v275_v39 = vld [vmem:[%s12475_s1 + $0x360] sm:$0xff] }
  0x3a   :  { %13425 = vst [vmem:[#allocation110_spill] sm:$0xff] %v8475_v17  ;;  %13426 = vst [vmem:[#allocation111_spill] sm:$0xff] %v8477_v49  ;;  %v8498_v49 = vsub.f32 %v252_v43, %v441_v10  ;;  %v8509_v43 = vsub.f32 %v259_v4, %v445_v62  ;;  %v8524_v10 = vsub.f32 %v261_v16, %v1925_v2  ;;  %6381 = vmatprep.subr.bf16.mxu0 %v8507_v31 }
  0x3b   :  { %13427 = vst [vmem:[#allocation112_spill] sm:$0xff] %v8488_v30  ;;  %13428 = vst [vmem:[#allocation113_spill] sm:$0xff] %v8490_v36  ;;  %v1927_v30 = vand.u32 4294901760, %v260_v3  ;;  %v8511_v60 = vpack.c.bf16 %v1925_v2, %v1921_v1  ;;  %v8513_v17 = vsub.f32 %v254_v18, %v1921_v1  ;;  %v268_v36 = vld [vmem:[%s12475_s1 + $0x328] sm:$0xff]  ;;  %v8526_v4 = vpack.c.bf16 %v447_v32, %v443_v28 }
  0x3c   :  { %13429 = vst [vmem:[#allocation114_spill] sm:$0xff] %v8492_v54  ;;  %13430 = vst [vmem:[#allocation115_spill] sm:$0xff] %v8494_v0  ;;  %v8528_v62 = vsub.f32 %v251_v29, %v443_v28  ;;  %v8530_v1 = vsub.f32 %v258_v34, %v447_v32  ;;  %v272_v18 = vld [vmem:[%s12475_s1 + $0x348] sm:$0xff]  ;;  %v8545_v2 = vsub.f32 %v253_v53, %v1923_v56  ;;  %v449_v16 = vand.u32 4294901760, %v266_v25 }
  0x3d   :  { %13431 = vst [vmem:[#allocation116_spill] sm:$0xff] %v8498_v49  ;;  %13432 = vst [vmem:[#allocation117_spill] sm:$0xff] %v8507_v31  ;;  %v265_v49 = vld [vmem:[%s12475_s1 + $0x310] sm:$0xff]  ;;  %6741 = vmatprep.subr.bf16.mxu1 %v8511_v60  ;;  %v8543_v28 = vpack.c.bf16 %v1927_v30, %v1923_v56  ;;  %v8547_v34 = vsub.f32 %v260_v3, %v1927_v30  ;;  %6383 = vmatpush1.bf16.msra.mxu0 %v8526_v4  ;;  %v453_v29 = vand.u32 4294901760, %v273_v15  ;;  %v280_v53 = vld [vmem:[%s12475_s1 + $0x388] sm:$0xff] }
  0x3e   :  { %13433 = vst [vmem:[#allocation118_spill] sm:$0xff] %v8509_v43  ;;  %13434 = vst [vmem:[#allocation119_spill] sm:$0xff] %v8511_v60  ;;  %v274_v43 = vld [vmem:[%s12475_s1 + $0x358] sm:$0xff]  ;;  %v1929_v32 = vand.u32 4294901760, %v268_v36  ;;  %v455_v31 = vand.u32 4294901760, %v272_v18  ;;  %v287_v3 = vld [vmem:[%s12475_s1 + $0x3c0] sm:$0xff] }
  0x3f   :  { %13435 = vst [vmem:[#allocation120_spill] sm:$0xff] %v8513_v17  ;;  %13436 = vst [vmem:[#allocation121_spill] sm:$0xff] %v8524_v10  ;;  %v267_v17 = vld [vmem:[%s12475_s1 + $0x320] sm:$0xff]  ;;  %6743 = vmatpush1.bf16.msra.mxu1 %v8543_v28  ;;  %v8551_v10 = vsub.f32 %v266_v25, %v449_v16  ;;  %v1935_v60 = vand.u32 4294901760, %v274_v43  ;;  %v8559_v30 = vpack.c.bf16 %v453_v29, %v449_v16  ;;  %v282_v25 = vld [vmem:[%s12475_s1 + $0x398] sm:$0xff] }
  0x40   :  { %13437 = vst [vmem:[#allocation122_spill] sm:$0xff] %v8526_v4  ;;  %13438 = vst [vmem:[#allocation123_spill] sm:$0xff] %v8528_v62  ;;  %v451_v62 = vand.u32 4294901760, %v265_v49  ;;  %v1931_v0 = vand.u32 4294901760, %v267_v17  ;;  %v8561_v56 = vsub.f32 %v273_v15, %v453_v29 }
  0x41   :  { %13439 = vst [vmem:[#allocation124_spill] sm:$0xff] %v8530_v1  ;;  %13440 = vst [vmem:[#allocation125_spill] sm:$0xff] %v8543_v28  ;;  %v1933_v1 = vand.u32 4294901760, %v275_v39  ;;  %v8565_v28 = vsub.f32 %v268_v36, %v1929_v32  ;;  %v8582_v36 = vsub.f32 %v272_v18, %v455_v31  ;;  %6385 = vmatprep.subr.bf16.mxu0 %v8559_v30  ;;  %v1937_v18 = vand.u32 4294901760, %v282_v25 }
  0x42   :  { %13441 = vst [vmem:[#allocation126_spill] sm:$0xff] %v8545_v2  ;;  %13442 = vst [vmem:[#allocation127_spill] sm:$0xff] %v8547_v34  ;;  %v279_v34 = vld [vmem:[%s12475_s1 + $0x380] sm:$0xff]  ;;  %v8578_v15 = vpack.c.bf16 %v455_v31, %v451_v62  ;;  %v8580_v29 = vsub.f32 %v265_v49, %v451_v62  ;;  %v8595_v49 = vpack.c.bf16 %v1935_v60, %v1931_v0  ;;  %v457_v62 = vand.u32 4294901760, %v280_v53 }
  0x43   :  { %13443 = vst [vmem:[#allocation128_spill] sm:$0xff] %v8551_v10  ;;  %13444 = vst [vmem:[#allocation129_spill] sm:$0xff] %v8559_v30  ;;  %v8563_v4 = vpack.c.bf16 %v1933_v1, %v1929_v32  ;;  %v289_v10 = vld [vmem:[%s12475_s1 + $0x3d0] sm:$0xff]  ;;  %v8576_v16 = vsub.f32 %v275_v39, %v1933_v1  ;;  %v286_v32 = vld [vmem:[%s12475_s1 + $0x3b8] sm:$0xff]  ;;  %v8597_v39 = vsub.f32 %v267_v17, %v1931_v0  ;;  %v461_v1 = vand.u32 4294901760, %v287_v3 }
  0x44   :  { %13445 = vst [vmem:[#allocation130_spill] sm:$0xff] %v8561_v56  ;;  %13447 = vst [vmem:[#allocation132_spill] sm:$0xff] %v8565_v28  ;;  %v281_v28 = vld [vmem:[%s12475_s1 + $0x390] sm:$0xff]  ;;  %v288_v56 = vld [vmem:[%s12475_s1 + $0x3c8] sm:$0xff]  ;;  %v8599_v31 = vsub.f32 %v274_v43, %v1935_v60  ;;  %6387 = vmatpush1.bf16.msra.mxu0 %v8578_v15  ;;  %v463_v30 = vand.u32 4294901760, %v286_v32 }
  0x45   :  { %13446 = vst [vmem:[#allocation131_spill] sm:$0xff] %v8563_v4  ;;  %13448 = vst [vmem:[#allocation133_spill] sm:$0xff] %v8576_v16  ;;  %6745 = vmatprep.subr.bf16.mxu1 %v8563_v4  ;;  %v8603_v16 = vsub.f32 %v280_v53, %v457_v62  ;;  %v1939_v2 = vand.u32 4294901760, %v281_v28  ;;  %v1943_v4 = vand.u32 4294901760, %v288_v56  ;;  %v294_v17 = vld [vmem:[%s12475_s1 + $0x3f8] sm:$0xff]  ;;  %v301_v0 = vld [vmem:[%s12475_s1 + $0x430] sm:$0xff]  ;;  %v8611_v43 = vpack.c.bf16 %v461_v1, %v457_v62 }
  0x46   :  { %13449 = vst [vmem:[#allocation134_spill] sm:$0xff] %v8578_v15  ;;  %13450 = vst [vmem:[#allocation135_spill] sm:$0xff] %v8580_v29  ;;  %v459_v29 = vand.u32 4294901760, %v279_v34  ;;  %6747 = vmatpush1.bf16.msra.mxu1 %v8595_v49  ;;  %v8613_v60 = vsub.f32 %v287_v3, %v461_v1  ;;  %v296_v53 = vld [vmem:[%s12475_s1 + $0x408] sm:$0xff] }
  0x47   :  { %13451 = vst [vmem:[#allocation136_spill] sm:$0xff] %v8582_v36  ;;  %13452 = vst [vmem:[#allocation137_spill] sm:$0xff] %v8595_v49  ;;  %v1941_v36 = vand.u32 4294901760, %v289_v10  ;;  %v8617_v49 = vsub.f32 %v282_v25, %v1937_v18  ;;  %v8634_v25 = vsub.f32 %v286_v32, %v463_v30  ;;  %6389 = vmatprep.subr.bf16.mxu0 %v8611_v43  ;;  %v1945_v32 = vand.u32 4294901760, %v296_v53 }
  0x48   :  { %13453 = vst [vmem:[#allocation138_spill] sm:$0xff] %v8597_v39  ;;  %13454 = vst [vmem:[#allocation139_spill] sm:$0xff] %v8599_v31  ;;  %v293_v31 = vld [vmem:[%s12475_s1 + $0x3f0] sm:$0xff]  ;;  %v8630_v3 = vpack.c.bf16 %v463_v30, %v459_v29  ;;  %v8632_v1 = vsub.f32 %v279_v34, %v459_v29  ;;  %v8649_v34 = vsub.f32 %v281_v28, %v1939_v2  ;;  %v465_v29 = vand.u32 4294901760, %v294_v17  ;;  %v308_v28 = vld [vmem:[%s12475_s1 + $0x468] sm:$0xff] }
  0x49   :  { %13455 = vst [vmem:[#allocation140_spill] sm:$0xff] %v8603_v16  ;;  %13456 = vst [vmem:[#allocation141_spill] sm:$0xff] %v8611_v43  ;;  %v8615_v15 = vpack.c.bf16 %v1941_v36, %v1937_v18  ;;  %v303_v16 = vld [vmem:[%s12475_s1 + $0x440] sm:$0xff]  ;;  %v8628_v62 = vsub.f32 %v289_v10, %v1941_v36  ;;  %v300_v18 = vld [vmem:[%s12475_s1 + $0x428] sm:$0xff]  ;;  %v8647_v10 = vpack.c.bf16 %v1943_v4, %v1939_v2  ;;  %v469_v36 = vand.u32 4294901760, %v301_v0 }
  0x4a   :  { %13457 = vst [vmem:[#allocation142_spill] sm:$0xff] %v8613_v60  ;;  %13459 = vst [vmem:[#allocation144_spill] sm:$0xff] %v8617_v49  ;;  %v295_v49 = vld [vmem:[%s12475_s1 + $0x400] sm:$0xff]  ;;  %v302_v60 = vld [vmem:[%s12475_s1 + $0x438] sm:$0xff]  ;;  %v8651_v30 = vsub.f32 %v288_v56, %v1943_v4  ;;  %6391 = vmatpush1.bf16.msra.mxu0 %v8630_v3  ;;  %v471_v43 = vand.u32 4294901760, %v300_v18 }
  0x4b   :  { %13458 = vst [vmem:[#allocation143_spill] sm:$0xff] %v8615_v15  ;;  %13460 = vst [vmem:[#allocation145_spill] sm:$0xff] %v8628_v62  ;;  %6749 = vmatprep.subr.bf16.mxu1 %v8615_v15  ;;  %v8655_v62 = vsub.f32 %v294_v17, %v465_v29  ;;  %v1947_v39 = vand.u32 4294901760, %v295_v49  ;;  %v1951_v15 = vand.u32 4294901760, %v302_v60  ;;  %v315_v4 = vld [vmem:[%s12475_s1 + $0x4a0] sm:$0xff]  ;;  %v8663_v2 = vpack.c.bf16 %v469_v36, %v465_v29  ;;  %v310_v17 = vld [vmem:[%s12475_s1 + $0x478] sm:$0xff] }
  0x4c   :  { %13461 = vst [vmem:[#allocation146_spill] sm:$0xff] %v8630_v3  ;;  %13462 = vst [vmem:[#allocation147_spill] sm:$0xff] %v8632_v1  ;;  %v467_v1 = vand.u32 4294901760, %v293_v31  ;;  %6751 = vmatpush1.bf16.msra.mxu1 %v8647_v10  ;;  %v8665_v56 = vsub.f32 %v301_v0, %v469_v36 }
  0x4d   :  { %13463 = vst [vmem:[#allocation148_spill] sm:$0xff] %v8634_v25  ;;  %13464 = vst [vmem:[#allocation149_spill] sm:$0xff] %v8647_v10  ;;  %v1949_v25 = vand.u32 4294901760, %v303_v16  ;;  %v8669_v10 = vsub.f32 %v296_v53, %v1945_v32  ;;  %v8686_v53 = vsub.f32 %v300_v18, %v471_v43  ;;  %6393 = vmatprep.subr.bf16.mxu0 %v8663_v2  ;;  %v1953_v18 = vand.u32 4294901760, %v310_v17 }
  0x4e   :  { %13465 = vst [vmem:[#allocation150_spill] sm:$0xff] %v8649_v34  ;;  %13466 = vst [vmem:[#allocation151_spill] sm:$0xff] %v8651_v30  ;;  %v307_v30 = vld [vmem:[%s12475_s1 + $0x460] sm:$0xff]  ;;  %v8682_v0 = vpack.c.bf16 %v471_v43, %v467_v1  ;;  %v8684_v36 = vsub.f32 %v293_v31, %v467_v1  ;;  %v8701_v31 = vsub.f32 %v295_v49, %v1947_v39  ;;  %v473_v1 = vand.u32 4294901760, %v308_v28  ;;  %v322_v49 = vld [vmem:[%s12475_s1 + $0x4d8] sm:$0xff] }
  0x4f   :  { %13467 = vst [vmem:[#allocation152_spill] sm:$0xff] %v8655_v62  ;;  %13468 = vst [vmem:[#allocation153_spill] sm:$0xff] %v8663_v2  ;;  %v8667_v3 = vpack.c.bf16 %v1949_v25, %v1945_v32  ;;  %v317_v62 = vld [vmem:[%s12475_s1 + $0x4b0] sm:$0xff]  ;;  %v8680_v29 = vsub.f32 %v303_v16, %v1949_v25  ;;  %v314_v32 = vld [vmem:[%s12475_s1 + $0x498] sm:$0xff]  ;;  %v8699_v16 = vpack.c.bf16 %v1951_v15, %v1947_v39  ;;  %v477_v25 = vand.u32 4294901760, %v315_v4 }
  0x50   :  { %13469 = vst [vmem:[#allocation154_spill] sm:$0xff] %v8665_v56  ;;  %13471 = vst [vmem:[#allocation156_spill] sm:$0xff] %v8669_v10  ;;  %v309_v10 = vld [vmem:[%s12475_s1 + $0x470] sm:$0xff]  ;;  %v316_v56 = vld [vmem:[%s12475_s1 + $0x4a8] sm:$0xff]  ;;  %v8703_v43 = vsub.f32 %v302_v60, %v1951_v15  ;;  %6395 = vmatpush1.bf16.msra.mxu0 %v8682_v0  ;;  %v479_v2 = vand.u32 4294901760, %v314_v32 }
  0x51   :  { %13470 = vst [vmem:[#allocation155_spill] sm:$0xff] %v8667_v3  ;;  %13472 = vst [vmem:[#allocation157_spill] sm:$0xff] %v8680_v29  ;;  %6753 = vmatprep.subr.bf16.mxu1 %v8667_v3  ;;  %v8707_v29 = vsub.f32 %v308_v28, %v473_v1  ;;  %v1955_v34 = vand.u32 4294901760, %v309_v10  ;;  %v1959_v3 = vand.u32 4294901760, %v316_v56  ;;  %v329_v15 = vld [vmem:[%s12475_s1 + $0x510] sm:$0xff]  ;;  %v8715_v39 = vpack.c.bf16 %v477_v25, %v473_v1  ;;  %v324_v28 = vld [vmem:[%s12475_s1 + $0x4e8] sm:$0xff] }
  0x52   :  { %13473 = vst [vmem:[#allocation158_spill] sm:$0xff] %v8682_v0  ;;  %13474 = vst [vmem:[#allocation159_spill] sm:$0xff] %v8684_v36  ;;  %v475_v36 = vand.u32 4294901760, %v307_v30  ;;  %6755 = vmatpush1.bf16.msra.mxu1 %v8699_v16  ;;  %v8717_v60 = vsub.f32 %v315_v4, %v477_v25 }
  0x53   :  { %13475 = vst [vmem:[#allocation160_spill] sm:$0xff] %v8686_v53  ;;  %13476 = vst [vmem:[#allocation161_spill] sm:$0xff] %v8699_v16  ;;  %v1957_v53 = vand.u32 4294901760, %v317_v62  ;;  %v8721_v16 = vsub.f32 %v310_v17, %v1953_v18  ;;  %v8738_v17 = vsub.f32 %v314_v32, %v479_v2  ;;  %6397 = vmatprep.subr.bf16.mxu0 %v8715_v39  ;;  %v1961_v32 = vand.u32 4294901760, %v324_v28 }
  0x54   :  { %13477 = vst [vmem:[#allocation162_spill] sm:$0xff] %v8701_v31  ;;  %13478 = vst [vmem:[#allocation163_spill] sm:$0xff] %v8703_v43  ;;  %v321_v43 = vld [vmem:[%s12475_s1 + $0x4d0] sm:$0xff]  ;;  %v8734_v4 = vpack.c.bf16 %v479_v2, %v475_v36  ;;  %v8736_v25 = vsub.f32 %v307_v30, %v475_v36  ;;  %v8753_v30 = vsub.f32 %v309_v10, %v1955_v34  ;;  %v481_v36 = vand.u32 4294901760, %v322_v49  ;;  %v336_v10 = vld [vmem:[%s12475_s1 + $0x548] sm:$0xff] }
  0x55   :  { %13479 = vst [vmem:[#allocation164_spill] sm:$0xff] %v8707_v29  ;;  %13480 = vst [vmem:[#allocation165_spill] sm:$0xff] %v8715_v39  ;;  %v8719_v0 = vpack.c.bf16 %v1957_v53, %v1953_v18  ;;  %v331_v29 = vld [vmem:[%s12475_s1 + $0x520] sm:$0xff]  ;;  %v8732_v1 = vsub.f32 %v317_v62, %v1957_v53  ;;  %v328_v18 = vld [vmem:[%s12475_s1 + $0x508] sm:$0xff]  ;;  %v8751_v62 = vpack.c.bf16 %v1959_v3, %v1955_v34  ;;  %v485_v53 = vand.u32 4294901760, %v329_v15 }
  0x56   :  { %13481 = vst [vmem:[#allocation166_spill] sm:$0xff] %v8717_v60  ;;  %13483 = vst [vmem:[#allocation168_spill] sm:$0xff] %v8721_v16  ;;  %v323_v16 = vld [vmem:[%s12475_s1 + $0x4e0] sm:$0xff]  ;;  %v330_v60 = vld [vmem:[%s12475_s1 + $0x518] sm:$0xff]  ;;  %v8755_v2 = vsub.f32 %v316_v56, %v1959_v3  ;;  %6399 = vmatpush1.bf16.msra.mxu0 %v8734_v4  ;;  %v487_v39 = vand.u32 4294901760, %v328_v18 }
  0x57   :  { %13482 = vst [vmem:[#allocation167_spill] sm:$0xff] %v8719_v0  ;;  %13484 = vst [vmem:[#allocation169_spill] sm:$0xff] %v8732_v1  ;;  %6757 = vmatprep.subr.bf16.mxu1 %v8719_v0  ;;  %v8759_v1 = vsub.f32 %v322_v49, %v481_v36  ;;  %v1963_v31 = vand.u32 4294901760, %v323_v16  ;;  %v1967_v0 = vand.u32 4294901760, %v330_v60  ;;  %v343_v3 = vld [vmem:[%s12475_s1 + $0x580] sm:$0xff]  ;;  %v8767_v34 = vpack.c.bf16 %v485_v53, %v481_v36  ;;  %v338_v49 = vld [vmem:[%s12475_s1 + $0x558] sm:$0xff] }
  0x58   :  { %13485 = vst [vmem:[#allocation170_spill] sm:$0xff] %v8734_v4  ;;  %13486 = vst [vmem:[#allocation171_spill] sm:$0xff] %v8736_v25  ;;  %v483_v25 = vand.u32 4294901760, %v321_v43  ;;  %6759 = vmatpush1.bf16.msra.mxu1 %v8751_v62  ;;  %v8769_v56 = vsub.f32 %v329_v15, %v485_v53 }
  0x59   :  { %13487 = vst [vmem:[#allocation172_spill] sm:$0xff] %v8738_v17  ;;  %13488 = vst [vmem:[#allocation173_spill] sm:$0xff] %v8751_v62  ;;  %v1965_v17 = vand.u32 4294901760, %v331_v29  ;;  %v8773_v62 = vsub.f32 %v324_v28, %v1961_v32  ;;  %v8790_v28 = vsub.f32 %v328_v18, %v487_v39  ;;  %6401 = vmatprep.subr.bf16.mxu0 %v8767_v34  ;;  %v1969_v18 = vand.u32 4294901760, %v338_v49 }
  0x5a   :  { %13489 = vst [vmem:[#allocation174_spill] sm:$0xff] %v8753_v30  ;;  %13490 = vst [vmem:[#allocation175_spill] sm:$0xff] %v8755_v2  ;;  %v335_v2 = vld [vmem:[%s12475_s1 + $0x540] sm:$0xff]  ;;  %v8786_v15 = vpack.c.bf16 %v487_v39, %v483_v25  ;;  %v8788_v53 = vsub.f32 %v321_v43, %v483_v25  ;;  %v8805_v43 = vsub.f32 %v323_v16, %v1963_v31  ;;  %v489_v25 = vand.u32 4294901760, %v336_v10  ;;  %v350_v16 = vld [vmem:[%s12475_s1 + $0x5b8] sm:$0xff] }
  0x5b   :  { %13491 = vst [vmem:[#allocation176_spill] sm:$0xff] %v8759_v1  ;;  %13492 = vst [vmem:[#allocation177_spill] sm:$0xff] %v8767_v34  ;;  %v8771_v4 = vpack.c.bf16 %v1965_v17, %v1961_v32  ;;  %v345_v1 = vld [vmem:[%s12475_s1 + $0x590] sm:$0xff]  ;;  %v8784_v36 = vsub.f32 %v331_v29, %v1965_v17  ;;  %v342_v32 = vld [vmem:[%s12475_s1 + $0x578] sm:$0xff]  ;;  %v8803_v29 = vpack.c.bf16 %v1967_v0, %v1963_v31  ;;  %v493_v17 = vand.u32 4294901760, %v343_v3 }
  0x5c   :  { %13493 = vst [vmem:[#allocation178_spill] sm:$0xff] %v8769_v56  ;;  %13495 = vst [vmem:[#allocation180_spill] sm:$0xff] %v8773_v62  ;;  %v337_v62 = vld [vmem:[%s12475_s1 + $0x550] sm:$0xff]  ;;  %v344_v56 = vld [vmem:[%s12475_s1 + $0x588] sm:$0xff]  ;;  %v8807_v39 = vsub.f32 %v330_v60, %v1967_v0  ;;  %6403 = vmatpush1.bf16.msra.mxu0 %v8786_v15  ;;  %v495_v34 = vand.u32 4294901760, %v342_v32 }
  0x5d   :  { %13494 = vst [vmem:[#allocation179_spill] sm:$0xff] %v8771_v4  ;;  %13496 = vst [vmem:[#allocation181_spill] sm:$0xff] %v8784_v36  ;;  %6761 = vmatprep.subr.bf16.mxu1 %v8771_v4  ;;  %v8811_v36 = vsub.f32 %v336_v10, %v489_v25  ;;  %v1971_v30 = vand.u32 4294901760, %v337_v62  ;;  %v1975_v4 = vand.u32 4294901760, %v344_v56  ;;  %v357_v0 = vld [vmem:[%s12475_s1 + $0x5f0] sm:$0xff]  ;;  %v8819_v31 = vpack.c.bf16 %v493_v17, %v489_v25  ;;  %v352_v10 = vld [vmem:[%s12475_s1 + $0x5c8] sm:$0xff] }
  0x5e   :  { %13497 = vst [vmem:[#allocation182_spill] sm:$0xff] %v8786_v15  ;;  %13498 = vst [vmem:[#allocation183_spill] sm:$0xff] %v8788_v53  ;;  %v491_v53 = vand.u32 4294901760, %v335_v2  ;;  %6763 = vmatpush1.bf16.msra.mxu1 %v8803_v29  ;;  %v8821_v60 = vsub.f32 %v343_v3, %v493_v17 }
  0x5f   :  { %13499 = vst [vmem:[#allocation184_spill] sm:$0xff] %v8790_v28  ;;  %13500 = vst [vmem:[#allocation185_spill] sm:$0xff] %v8803_v29  ;;  %v1973_v28 = vand.u32 4294901760, %v345_v1  ;;  %v8825_v29 = vsub.f32 %v338_v49, %v1969_v18  ;;  %v8842_v49 = vsub.f32 %v342_v32, %v495_v34  ;;  %6405 = vmatprep.subr.bf16.mxu0 %v8819_v31  ;;  %v1977_v32 = vand.u32 4294901760, %v352_v10 }
  0x60   :  { %13501 = vst [vmem:[#allocation186_spill] sm:$0xff] %v8805_v43  ;;  %13502 = vst [vmem:[#allocation187_spill] sm:$0xff] %v8807_v39  ;;  %v349_v39 = vld [vmem:[%s12475_s1 + $0x5b0] sm:$0xff]  ;;  %v8838_v3 = vpack.c.bf16 %v495_v34, %v491_v53  ;;  %v8840_v17 = vsub.f32 %v335_v2, %v491_v53  ;;  %v8857_v2 = vsub.f32 %v337_v62, %v1971_v30  ;;  %v497_v53 = vand.u32 4294901760, %v350_v16  ;;  %v364_v62 = vld [vmem:[%s12475_s1 + $0x628] sm:$0xff] }
  0x61   :  { %13503 = vst [vmem:[#allocation188_spill] sm:$0xff] %v8811_v36  ;;  %13504 = vst [vmem:[#allocation189_spill] sm:$0xff] %v8819_v31  ;;  %v8823_v15 = vpack.c.bf16 %v1973_v28, %v1969_v18  ;;  %v359_v36 = vld [vmem:[%s12475_s1 + $0x600] sm:$0xff]  ;;  %v8836_v25 = vsub.f32 %v345_v1, %v1973_v28  ;;  %v356_v18 = vld [vmem:[%s12475_s1 + $0x5e8] sm:$0xff]  ;;  %v8855_v1 = vpack.c.bf16 %v1975_v4, %v1971_v30  ;;  %v501_v28 = vand.u32 4294901760, %v357_v0 }
  0x62   :  { %13505 = vst [vmem:[#allocation190_spill] sm:$0xff] %v8821_v60  ;;  %13507 = vst [vmem:[#allocation192_spill] sm:$0xff] %v8825_v29  ;;  %v351_v29 = vld [vmem:[%s12475_s1 + $0x5c0] sm:$0xff]  ;;  %v358_v60 = vld [vmem:[%s12475_s1 + $0x5f8] sm:$0xff]  ;;  %v8859_v34 = vsub.f32 %v344_v56, %v1975_v4  ;;  %6407 = vmatpush1.bf16.msra.mxu0 %v8838_v3  ;;  %v503_v31 = vand.u32 4294901760, %v356_v18 }
  0x63   :  { %13506 = vst [vmem:[#allocation191_spill] sm:$0xff] %v8823_v15  ;;  %13508 = vst [vmem:[#allocation193_spill] sm:$0xff] %v8836_v25  ;;  %6765 = vmatprep.subr.bf16.mxu1 %v8823_v15  ;;  %v8863_v25 = vsub.f32 %v350_v16, %v497_v53  ;;  %v1979_v43 = vand.u32 4294901760, %v351_v29  ;;  %v1983_v15 = vand.u32 4294901760, %v358_v60  ;;  %v371_v4 = vld [vmem:[%s12475_s1 + $0x660] sm:$0xff]  ;;  %v8871_v30 = vpack.c.bf16 %v501_v28, %v497_v53  ;;  %v366_v16 = vld [vmem:[%s12475_s1 + $0x638] sm:$0xff] }
  0x64   :  { %13509 = vst [vmem:[#allocation194_spill] sm:$0xff] %v8838_v3  ;;  %13510 = vst [vmem:[#allocation195_spill] sm:$0xff] %v8840_v17  ;;  %v499_v17 = vand.u32 4294901760, %v349_v39  ;;  %6767 = vmatpush1.bf16.msra.mxu1 %v8855_v1  ;;  %v8873_v56 = vsub.f32 %v357_v0, %v501_v28 }
  0x65   :  { %13511 = vst [vmem:[#allocation196_spill] sm:$0xff] %v8842_v49  ;;  %13512 = vst [vmem:[#allocation197_spill] sm:$0xff] %v8855_v1  ;;  %v1981_v49 = vand.u32 4294901760, %v359_v36  ;;  %v8877_v1 = vsub.f32 %v352_v10, %v1977_v32  ;;  %v8894_v10 = vsub.f32 %v356_v18, %v503_v31  ;;  %6409 = vmatprep.subr.bf16.mxu0 %v8871_v30  ;;  %v1985_v18 = vand.u32 4294901760, %v366_v16 }
  0x66   :  { %13513 = vst [vmem:[#allocation198_spill] sm:$0xff] %v8857_v2  ;;  %13514 = vst [vmem:[#allocation199_spill] sm:$0xff] %v8859_v34  ;;  %v363_v34 = vld [vmem:[%s12475_s1 + $0x620] sm:$0xff]  ;;  %v8890_v0 = vpack.c.bf16 %v503_v31, %v499_v17  ;;  %v8892_v28 = vsub.f32 %v349_v39, %v499_v17  ;;  %v8909_v39 = vsub.f32 %v351_v29, %v1979_v43  ;;  %v505_v17 = vand.u32 4294901760, %v364_v62 }
  0x67   :  { %13515 = vst [vmem:[#allocation200_spill] sm:$0xff] %v8863_v25  ;;  %13516 = vst [vmem:[#allocation201_spill] sm:$0xff] %v8871_v30  ;;  %v8875_v3 = vpack.c.bf16 %v1981_v49, %v1977_v32  ;;  %v373_v25 = vld [vmem:[%s12475_s1 + $0x670] sm:$0xff]  ;;  %v8888_v53 = vsub.f32 %v359_v36, %v1981_v49  ;;  %v370_v32 = vld [vmem:[%s12475_s1 + $0x658] sm:$0xff]  ;;  %v8907_v36 = vpack.c.bf16 %v1983_v15, %v1979_v43  ;;  %v509_v49 = vand.u32 4294901760, %v371_v4 }
  0x68   :  { %13517 = vst [vmem:[#allocation202_spill] sm:$0xff] %v8873_v56  ;;  %13519 = vst [vmem:[#allocation204_spill] sm:$0xff] %v8877_v1  ;;  %v365_v1 = vld [vmem:[%s12475_s1 + $0x630] sm:$0xff]  ;;  %v372_v56 = vld [vmem:[%s12475_s1 + $0x668] sm:$0xff]  ;;  %v8911_v31 = vsub.f32 %v358_v60, %v1983_v15  ;;  %6411 = vmatpush1.bf16.msra.mxu0 %v8890_v0  ;;  %v511_v30 = vand.u32 4294901760, %v370_v32 }
  0x69   :  { %13518 = vst [vmem:[#allocation203_spill] sm:$0xff] %v8875_v3  ;;  %13520 = vst [vmem:[#allocation205_spill] sm:$0xff] %v8888_v53  ;;  %6769 = vmatprep.subr.bf16.mxu1 %v8875_v3  ;;  %v8915_v53 = vsub.f32 %v364_v62, %v505_v17  ;;  %v1987_v2 = vand.u32 4294901760, %v365_v1  ;;  %v1991_v3 = vand.u32 4294901760, %v372_v56  ;;  %v129_v29 = vld [vmem:[%s12474_s0] sm:$0x3]  ;;  %v8920_v15 = vpack.c.bf16 %v509_v49, %v505_v17 }
  0x6a   :  { %13521 = vst [vmem:[#allocation206_spill] sm:$0xff] %v8890_v0  ;;  %13522 = vst [vmem:[#allocation207_spill] sm:$0xff] %v8892_v28  ;;  %v507_v28 = vand.u32 4294901760, %v363_v34  ;;  %6771 = vmatpush1.bf16.msra.mxu1 %v8907_v36  ;;  %v8922_v43 = vsub.f32 %v371_v4, %v509_v49  ;;  %v8926_v0 = vsub.f32 %v366_v16, %v1985_v18  ;;  %v6349_v16 = vmul.f32 -1.442695, %v129_v29 }
  0x6b   :  { %13523 = vst [vmem:[#allocation208_spill] sm:$0xff] %v8894_v10  ;;  %13524 = vst [vmem:[#allocation209_spill] sm:$0xff] %v8907_v36  ;;  %v1989_v10 = vand.u32 4294901760, %v373_v25  ;;  %6413 = vmatprep.subr.bf16.mxu0 %v8920_v15  ;;  %v8938_v17 = vpack.c.bf16 %v1991_v3, %v1987_v2  ;;  %v8940_v4 = vsub.f32 %v365_v1, %v1987_v2  ;;  %v12678_v1 = vand.u32 4294901760, %v8206_v58 }
  0x6c   :  { %13525 = vst [vmem:[#allocation210_spill] sm:$0xff] %v8909_v39  ;;  %13526 = vst [vmem:[#allocation211_spill] sm:$0xff] %v8911_v31  ;;  %v8930_v36 = vpack.c.bf16 %v511_v30, %v507_v28  ;;  %v8932_v62 = vsub.f32 %v363_v34, %v507_v28  ;;  %v8942_v49 = vsub.f32 %v372_v56, %v1991_v3  ;;  %v12665_v34 = vand.u32 4294901760, %v8189_v50 }
  0x6d   :  { %13527 = vst [vmem:[#allocation212_spill] sm:$0xff] %v8915_v53  ;;  %13528 = vst [vmem:[#allocation213_spill] sm:$0xff] %v8920_v15  ;;  %v8924_v60 = vpack.c.bf16 %v1989_v10, %v1985_v18  ;;  %v8928_v31 = vsub.f32 %v373_v25, %v1989_v10  ;;  %v8934_v53 = vsub.f32 %v370_v32, %v511_v30  ;;  %v13532_v25 = vlaneseq }
  0x6e   :  { %13530 = vst [vmem:[#allocation215_spill] sm:$0xff] %v8930_v36  ;;  %13531 = vst [vmem:[#allocation216_spill] sm:$0xff] %v8938_v17  ;;  %6415 = vmatpush1.bf16.msra.mxu0 %v8930_v36  ;;  %v12668_v30 = vand.u32 4294901760, %v8191_v51  ;;  %v12673_v28 = vand.u32 4294901760, %v8204_v57  ;;  %7911 = vpow2.f32 %v6349_v16  ;;  %v12681_v3 = vand.u32 4294901760, %v8208_v59 }
  0x6f   :  { %13529 = vst [vmem:[#allocation214_spill] sm:$0xff] %v8924_v60  ;;  %6773 = vmatprep.subr.bf16.mxu1 %v8924_v60  ;;  %v8946_v10 = vshrl.u32 %v13532_v25, 7  ;;  %v12684_v2 = vand.u32 4294901760, %v8219_v63  ;;  %v601_v32 = vsub.f32 %v8189_v50, %v12665_v34  ;;  %v2093_v16 = vsub.f32 %v8206_v58, %v12678_v1 }
  0x70   :  { %6775 = vmatpush1.bf16.msra.mxu1 %v8938_v17  ;;  %v613_v18 = vsub.f32 %v8191_v51, %v12668_v30  ;;  %v2081_v29 = vsub.f32 %v8204_v57, %v12673_v28  ;;  %v607_v56 = vsub.f32 %v8208_v59, %v12681_v3  ;;  %v12689_v60 = vand.u32 4294901760, %v8231_v44 }
  0x71   :  { %v619_v34 = vsub.f32 %v8219_v63, %v12684_v2  ;;  %v602_v17 = vand.u32 4294901760, %v601_v32  ;;  %v2094_v28 = vand.u32 4294901760, %v2093_v16  ;;  %v12687_v1 = vand.u32 4294901760, %v8233_v45 }
  0x72   :  { %v614_v30 = vand.u32 4294901760, %v613_v18  ;;  %v2082_v36 = vand.u32 4294901760, %v2081_v29  ;;  %v608_v15 = vand.u32 4294901760, %v607_v56  ;;  %v2087_v25 = vsub.f32 %v8231_v44, %v12689_v60 }
  0x73   :  { %v620_v57 = vand.u32 4294901760, %v619_v34  ;;  %v12686_v3 = vand.u32 4294901760, %v8246_v24  ;;  %v12685_v59 = vand.u32 4294901760, %v8248_v46  ;;  %v2099_v18 = vsub.f32 %v8233_v45, %v12687_v1 }
  0x74   :  { %v6416_v58 = vpack.c.bf16 %v614_v30, %v602_v17  ;;  %v6776_v2 = vpack.c.bf16 %v2094_v28, %v2082_v36  ;;  %v12688_v34 = vand.u32 4294901760, %v8259_v23  ;;  %v2088_v56 = vand.u32 4294901760, %v2087_v25 }
  0x75   :  { %v8982_v32 = vpack.c.bf16 %v620_v57, %v608_v15  ;;  %v625_v17 = vsub.f32 %v8246_v24, %v12686_v3  ;;  %v637_v30 = vsub.f32 %v8248_v46, %v12685_v59  ;;  %v12690_v36 = vand.u32 4294901760, %v8261_v22 }
  0x76   :  { %6417 = vmatprep.subr.bf16.mxu0 %v6416_v58  ;;  %6777 = vmatprep.subr.bf16.mxu1 %v6776_v2  ;;  %v2100_v57 = vand.u32 4294901760, %v2099_v18  ;;  %v2105_v15 = vsub.f32 %v8259_v23, %v12688_v34  ;;  %v12693_v28 = vand.u32 4294901760, %v8263_v37  ;;  %v12696_v58 = vand.u32 4294901760, %v8272_v55 }
  0x77   :  { %v626_v29 = vand.u32 4294901760, %v625_v17  ;;  %v638_v16 = vand.u32 4294901760, %v637_v30  ;;  %v2117_v25 = vsub.f32 %v8261_v22, %v12690_v36  ;;  %v12700_v59 = vand.u32 4294901760, %v8285_v52 }
  0x78   :  { %v7912_v3 = vpop.eup %7911  ;;  %v9004_v1 = vpack.c.bf16 %v2100_v57, %v2088_v56  ;;  %v2106_v2 = vand.u32 4294901760, %v2105_v15  ;;  %v631_v18 = vsub.f32 %v8263_v37, %v12693_v28  ;;  %v643_v34 = vsub.f32 %v8272_v55, %v12696_v58 }
  0x79   :  { %v133_v17 = vadd.f32 1.0, %v7912_v3  ;;  %v9012_v30 = vpack.c.bf16 %v638_v16, %v626_v29  ;;  %v2118_v60 = vand.u32 4294901760, %v2117_v25  ;;  %v2111_v36 = vsub.f32 %v8285_v52, %v12700_v59 }
  0x7a   :  { %v632_v22 = vand.u32 4294901760, %v631_v18  ;;  %v644_v56 = vand.u32 4294901760, %v643_v34  ;;  %v12699_v57 = vand.u32 4294901760, %v8287_v41  ;;  %v12697_v15 = vand.u32 4294901760, %v8301_v42 }
  0x7b   :  { %7913 = vrcp.f32 %v133_v17  ;;  %v9019_v28 = vpack.c.bf16 %v2118_v60, %v2106_v2  ;;  %v2112_v37 = vand.u32 4294901760, %v2111_v36  ;;  %v12698_v58 = vand.u32 4294901760, %v8303_v48 }
  0x7c   :  { %v9022_v3 = vpack.c.bf16 %v644_v56, %v632_v22  ;;  %v2123_v29 = vsub.f32 %v8287_v41, %v12699_v57  ;;  %v649_v34 = vsub.f32 %v8301_v42, %v12697_v15  ;;  %v12701_v16 = vand.u32 4294901760, %v8307_v38 }
  0x7d   :  { %v661_v60 = vsub.f32 %v8303_v48, %v12698_v58  ;;  %v12704_v36 = vand.u32 4294901760, %v8311_v12  ;;  %v12711_v25 = vand.u32 4294901760, %v8325_v8  ;;  %v12712_v22 = vand.u32 4294901760, %v8327_v7 }
  0x7e   :  { %v2124_v2 = vand.u32 4294901760, %v2123_v29  ;;  %v650_v18 = vand.u32 4294901760, %v649_v34  ;;  %v2129_v17 = vsub.f32 %v8307_v38, %v12701_v16  ;;  %v12713_v56 = vand.u32 4294901760, %v8329_v20 }
  0x7f   :  { %v662_v15 = vand.u32 4294901760, %v661_v60  ;;  %v2141_v58 = vsub.f32 %v8311_v12, %v12704_v36  ;;  %v655_v57 = vsub.f32 %v8325_v8, %v12711_v25  ;;  %v667_v29 = vsub.f32 %v8327_v7, %v12712_v22 }
  0x80   :  { %v9050_v34 = vpack.c.bf16 %v2124_v2, %v2112_v37  ;;  %v2130_v59 = vand.u32 4294901760, %v2129_v17  ;;  %v2135_v16 = vsub.f32 %v8329_v20, %v12713_v56  ;;  %v12716_v60 = vand.u32 4294901760, %v8342_v11 }
  0x81   :  { %v9056_v38 = vpack.c.bf16 %v662_v15, %v650_v18  ;;  %v2142_v36 = vand.u32 4294901760, %v2141_v58  ;;  %v656_v12 = vand.u32 4294901760, %v655_v57  ;;  %v668_v48 = vand.u32 4294901760, %v667_v29 }
  0x82   :  { %v2136_v42 = vand.u32 4294901760, %v2135_v16  ;;  %v2147_v25 = vsub.f32 %v8342_v11, %v12716_v60  ;;  %v12715_v37 = vand.u32 4294901760, %v8346_v33  ;;  %v12714_v2 = vand.u32 4294901760, %v8352_v40 }
  0x83   :  { %v9063_v17 = vpack.c.bf16 %v2142_v36, %v2130_v59  ;;  %v9065_v22 = vpack.c.bf16 %v668_v48, %v656_v12  ;;  %v12723_v56 = vand.u32 4294901760, %v8354_v14  ;;  %v12728_v15 = vand.u32 4294901760, %v8366_v13  ;;  %v137_v12 = vld [vmem:[%s12476_s2 + $0x8] sm:$0xff]  ;;  %v136_v59 = vld [vmem:[%s12476_s2] sm:$0xff] }
  0x84   :  { %v2148_v58 = vand.u32 4294901760, %v2147_v25  ;;  %v673_v57 = vsub.f32 %v8346_v33, %v12715_v37  ;;  %v685_v16 = vsub.f32 %v8352_v40, %v12714_v2  ;;  %v13533_v37 = vsub.s32 1, %v8946_v10 }
  0x85   :  { %v7914_v29 = vpop.eup %7913  ;;  %v2153_v48 = vsub.f32 %v8354_v14, %v12723_v56  ;;  %v2165_v36 = vsub.f32 %v8366_v13, %v12728_v15  ;;  %v13534_v18 = vsub.s32 0, %v8946_v10  ;;  %v13535_v15 = vand.u32 4294901760, %v8368_v5 }
  0x86   :  { %v9092_v60 = vrot.slane %v7914_v29, %v13533_v37  ;;  %v9098_v33 = vpack.c.bf16 %v2148_v58, %v2136_v42  ;;  %v674_v11 = vand.u32 4294901760, %v673_v57  ;;  %v686_v56 = vand.u32 4294901760, %v685_v16 }
  0x87   :  { %v9096_v40 = vrot.slane %v7914_v29, %v13534_v18  ;;  %v2154_v14 = vand.u32 4294901760, %v2153_v48  ;;  %v2166_v20 = vand.u32 4294901760, %v2165_v36  ;;  %v679_v25 = vsub.f32 %v8368_v5, %v13535_v15 }
  0x88   :  { %v158_v2 = vmul.f32 %v9092_v60, %v137_v12  ;;  %v13536_v37 = vand.u32 4294901760, %v8381_v35  ;;  %v13537_v18 = vand.u32 4294901760, %v8385_v21  ;;  %v9111_v58 = vpack.c.bf16 %v686_v56, %v674_v11 }
  0x89   :  { %v157_v13 = vmul.f32 %v9096_v40, %v136_v59  ;;  %v9113_v57 = vpack.c.bf16 %v2166_v20, %v2154_v14  ;;  %v680_v16 = vand.u32 4294901760, %v679_v25  ;;  %v12731_v29 = vand.u32 4294901760, %v8397_v6 }
  0x8a   :  { %v691_v10 = vsub.f32 %v8381_v35, %v13536_v37  ;;  %v2159_v42 = vsub.f32 %v8385_v21, %v13537_v18  ;;  %v379_v15 = vsel %vm377_vm0, %v158_v2, 0  ;;  %v12732_v11 = vand.u32 4294901760, %v8401_v19 }
  0x8b   :  { %v9117_v12 = vand.u32 4294901760, %v157_v13  ;;  %v9119_v36 = vand.u32 4294901760, %v379_v15  ;;  %v2171_v37 = vsub.f32 %v8397_v6, %v12731_v29  ;;  %v12735_v14 = vand.u32 4294901760, %v8403_v9 }
  0x8c   :  { %v692_v59 = vand.u32 4294901760, %v691_v10  ;;  %v2160_v48 = vand.u32 4294901760, %v2159_v42  ;;  %v12742_v2 = vand.u32 4294901760, %v8413_v61  ;;  %v12743_v25 = vand.u32 4294901760, %v8415_v26 }
  0x8d   :  { %13538 = vst [vmem:[#allocation217_spill] sm:$0xff] %v9117_v12  ;;  %13539 = vst [vmem:[#allocation218_spill] sm:$0xff] %v9119_v36  ;;  %v9127_v20 = vsub.f32 %v157_v13, %v9117_v12  ;;  %v9134_v10 = vsub.f32 %v379_v15, %v9119_v36  ;;  %v2172_v18 = vand.u32 4294901760, %v2171_v37  ;;  %v697_v42 = vsub.f32 %v8401_v19, %v12732_v11 }
  0x8e   :  { %v9129_v56 = vpack.c.bf16 %v692_v59, %v680_v16  ;;  %v709_v29 = vsub.f32 %v8403_v9, %v12735_v14  ;;  %v2177_v16 = vsub.f32 %v8413_v61, %v12742_v2  ;;  %v2189_v15 = vsub.f32 %v8415_v26, %v12743_v25 }
  0x8f   :  { %13540 = vst [vmem:[#allocation219_spill] sm:$0xff] %v9127_v20  ;;  %13541 = vst [vmem:[#allocation220_spill] sm:$0xff] %v9134_v10  ;;  %v9143_v13 = vand.u32 4294901760, %v9127_v20  ;;  %v12752_v59 = vand.u32 4294901760, %v8428_v47  ;;  %v9153_v37 = vand.u32 4294901760, %v9134_v10  ;;  %v9155_v11 = vpack.c.bf16 %v2172_v18, %v2160_v48  ;;  %v13544_v48 = vld [vmem:[#allocation102_spill] sm:$0xff] }
  0x90   :  { %v698_v19 = vand.u32 4294901760, %v697_v42  ;;  %v710_v14 = vand.u32 4294901760, %v709_v29  ;;  %v2178_v6 = vand.u32 4294901760, %v2177_v16  ;;  %v2190_v21 = vand.u32 4294901760, %v2189_v15  ;;  %v13546_v16 = vld [vmem:[#allocation103_spill] sm:$0xff] }
  0x91   :  { %13542 = vst [vmem:[#allocation221_spill] sm:$0xff] %v9143_v13  ;;  %13543 = vst [vmem:[#allocation222_spill] sm:$0xff] %v9153_v37  ;;  %v526_v9 = vsub.f32 %v9127_v20, %v9143_v13  ;;  %v703_v2 = vsub.f32 %v8428_v47, %v12752_v59  ;;  %v520_v25 = vsub.f32 %v9134_v10, %v9153_v37  ;;  %v12759_v61 = vand.u32 4294901760, %v8430_v27 }
  0x92   :  { %v9164_v26 = vpack.c.bf16 %v710_v14, %v698_v19  ;;  %v12762_v18 = vand.u32 4294901760, %v13544_v48  ;;  %v9170_v29 = vpack.c.bf16 %v2190_v21, %v2178_v6  ;;  %v12766_v15 = vand.u32 4294901760, %v13546_v16  ;;  %v13548_v14 = vld [vmem:[#allocation105_spill] sm:$0xff]  ;;  %v13549_v6 = vld [vmem:[#allocation106_spill] sm:$0xff] }
  0x93   :  { %v9168_v42 = vand.u32 4294901760, %v526_v9  ;;  %v704_v13 = vand.u32 4294901760, %v703_v2  ;;  %v9173_v20 = vand.u32 4294901760, %v520_v25  ;;  %v715_v59 = vsub.f32 %v8430_v27, %v12759_v61  ;;  %v13550_v2 = vld [vmem:[#allocation107_spill] sm:$0xff]  ;;  %v13551_v25 = vld [vmem:[#allocation109_spill] sm:$0xff] }
  0x94   :  { %v2183_v19 = vsub.f32 %v13544_v48, %v12762_v18  ;;  %v12769_v37 = vand.u32 4294901760, %v13548_v14  ;;  %v2195_v21 = vsub.f32 %v13546_v16, %v12766_v15  ;;  %v12772_v9 = vand.u32 4294901760, %v13549_v6  ;;  %v13552_v48 = vld [vmem:[#allocation111_spill] sm:$0xff] }
  0x95   :  { %13545 = vst [vmem:[#allocation223_spill] sm:$0xff] %v9168_v42  ;;  %13547 = vst [vmem:[#allocation224_spill] sm:$0xff] %v9173_v20  ;;  %v12774_v10 = vand.u32 4294901760, %v13550_v2  ;;  %522 = vmatprep.mubr.f32.mxu0 %v9173_v20  ;;  %2002 = vmatprep.mubr.f32.mxu1 %v9173_v20  ;;  %v716_v61 = vand.u32 4294901760, %v715_v59 }
  0x96   :  { %v2184_v27 = vand.u32 4294901760, %v2183_v19  ;;  %v721_v18 = vsub.f32 %v13548_v14, %v12769_v37  ;;  %528 = vmatmul.mubr.f32.vlgmr.msra.gmra.mrb[0].mxu0 %v9168_v42  ;;  %2008 = vmatmul.mubr.f32.vlgmr.msra.gmra.mrb[0].mxu1 %v9168_v42  ;;  %v2196_v15 = vand.u32 4294901760, %v2195_v21  ;;  %v733_v47 = vsub.f32 %v13549_v6, %v12772_v9  ;;  %v13555_v9 = vld [vmem:[#allocation112_spill] sm:$0xff] }
  0x97   :  { %v2201_v59 = vsub.f32 %v13550_v2, %v12774_v10  ;;  %v13553_v19 = vand.u32 4294901760, %v13551_v25  ;;  %6419 = vmatpush1.bf16.msra.mxu0 %v8982_v32  ;;  %6779 = vmatpush1.bf16.msra.mxu1 %v9004_v1  ;;  %v9207_v37 = vpack.c.bf16 %v716_v61, %v704_v13  ;;  %v13554_v21 = vand.u32 4294901760, %v13552_v48  ;;  %v13556_v13 = vld [vmem:[#allocation115_spill] sm:$0xff] }
  0x98   :  { %v722_v35 = vand.u32 4294901760, %v721_v18  ;;  %v12780_v6 = vand.u32 4294901760, %v13555_v9  ;;  %6421 = vmatprep.subr.bf16.mxu0 %v9012_v30  ;;  %6781 = vmatprep.subr.bf16.mxu1 %v9019_v28  ;;  %v9215_v10 = vpack.c.bf16 %v2196_v15, %v2184_v27  ;;  %v12778_v1 = vand.u32 4294901760, %v8492_v54  ;;  %v13557_v30 = vld [vmem:[#allocation116_spill] sm:$0xff]  ;;  %v13558_v27 = vld [vmem:[#allocation118_spill] sm:$0xff] }
  0x99   :  { %v2213_v20 = vsub.f32 %v13551_v25, %v13553_v19  ;;  %v727_v42 = vsub.f32 %v13552_v48, %v13554_v21  ;;  %v734_v19 = vand.u32 4294901760, %v733_v47  ;;  %v2202_v25 = vand.u32 4294901760, %v2201_v59  ;;  %v13560_v59 = vld [vmem:[#allocation121_spill] sm:$0xff] }
  0x9a   :  { %v739_v61 = vsub.f32 %v13555_v9, %v12780_v6  ;;  %v12779_v18 = vand.u32 4294901760, %v13556_v13  ;;  %v12782_v28 = vand.u32 4294901760, %v13557_v30  ;;  %v12783_v15 = vand.u32 4294901760, %v13558_v27 }
  0x9b   :  { %v2214_v32 = vand.u32 4294901760, %v2213_v20  ;;  %v728_v2 = vand.u32 4294901760, %v727_v42  ;;  %v9222_v21 = vpack.c.bf16 %v734_v19, %v722_v35  ;;  %6423 = vmatpush1.bf16.msra.mxu0 %v9022_v3  ;;  %6783 = vmatpush1.bf16.msra.mxu1 %v9050_v34  ;;  %v2207_v20 = vsub.f32 %v8492_v54, %v12778_v1  ;;  %v13559_v42 = vld [vmem:[#allocation120_spill] sm:$0xff] }
  0x9c   :  { %v740_v47 = vand.u32 4294901760, %v739_v61  ;;  %v2219_v35 = vsub.f32 %v13556_v13, %v12779_v18  ;;  %6425 = vmatprep.subr.bf16.mxu0 %v9056_v38  ;;  %6785 = vmatprep.subr.bf16.mxu1 %v9063_v17  ;;  %v745_v3 = vsub.f32 %v13557_v30, %v12782_v28  ;;  %v757_v34 = vsub.f32 %v13558_v27, %v12783_v15  ;;  %v13563_v27 = vld [vmem:[#allocation126_spill] sm:$0xff] }
  0x9d   :  { %v9224_v48 = vpack.c.bf16 %v2214_v32, %v2202_v25  ;;  %v12785_v25 = vand.u32 4294901760, %v13559_v42  ;;  %v12786_v19 = vand.u32 4294901760, %v13560_v59  ;;  %v13561_v32 = vld [vmem:[#allocation123_spill] sm:$0xff]  ;;  %v2208_v18 = vand.u32 4294901760, %v2207_v20  ;;  %v13562_v20 = vld [vmem:[#allocation124_spill] sm:$0xff] }
  0x9e   :  { %v12789_v61 = vand.u32 4294901760, %v13561_v32  ;;  %v9247_v1 = vpack.c.bf16 %v740_v47, %v728_v2  ;;  %v2220_v6 = vand.u32 4294901760, %v2219_v35  ;;  %v746_v17 = vand.u32 4294901760, %v745_v3 }
  0x9f   :  { %v2225_v38 = vsub.f32 %v13559_v42, %v12785_v25  ;;  %v758_v13 = vand.u32 4294901760, %v757_v34  ;;  %v2237_v28 = vsub.f32 %v13560_v59, %v12786_v19  ;;  %6427 = vmatpush1.bf16.msra.mxu0 %v9065_v22  ;;  %6787 = vmatpush1.bf16.msra.mxu1 %v9098_v33  ;;  %v12790_v35 = vand.u32 4294901760, %v13562_v20  ;;  %v13564_v59 = vld [vmem:[#allocation127_spill] sm:$0xff] }
  0xa0   :  { %v751_v15 = vsub.f32 %v13561_v32, %v12789_v61  ;;  %v6798_v2 = vpack.c.bf16 %v2220_v6, %v2208_v18  ;;  %v12792_v25 = vand.u32 4294901760, %v13563_v27  ;;  %6429 = vmatprep.subr.bf16.mxu0 %v9111_v58  ;;  %6789 = vmatprep.subr.bf16.mxu1 %v9113_v57  ;;  %v12794_v42 = vand.u32 4294901760, %v13564_v59  ;;  %v13565_v6 = vld [vmem:[#allocation128_spill] sm:$0xff] }
  0xa1   :  { %v2226_v47 = vand.u32 4294901760, %v2225_v38  ;;  %v6440_v3 = vpack.c.bf16 %v758_v13, %v746_v17  ;;  %v2238_v34 = vand.u32 4294901760, %v2237_v28  ;;  %v763_v22 = vsub.f32 %v13562_v20, %v12790_v35  ;;  %v13566_v38 = vld [vmem:[#allocation130_spill] sm:$0xff]  ;;  %v13567_v13 = vld [vmem:[#allocation132_spill] sm:$0xff] }
  0xa2   :  { %v752_v19 = vand.u32 4294901760, %v751_v15  ;;  %v2231_v33 = vsub.f32 %v13563_v27, %v12792_v25  ;;  %v12793_v18 = vand.u32 4294901760, %v13565_v6  ;;  %v12797_v61 = vand.u32 4294901760, %v13566_v38  ;;  %v13568_v15 = vld [vmem:[#allocation133_spill] sm:$0xff] }
  0xa3   :  { %v6800_v58 = vpack.c.bf16 %v2238_v34, %v2226_v47  ;;  %v2243_v57 = vsub.f32 %v13564_v59, %v12794_v42  ;;  %v12803_v28 = vand.u32 4294901760, %v13567_v13  ;;  %v12800_v17 = vand.u32 4294901760, %v13568_v15  ;;  %6431 = vmatpush1.bf16.msra.mxu0 %v9129_v56  ;;  %6791 = vmatpush1.bf16.msra.mxu1 %v9155_v11  ;;  %v13570_v59 = vld [vmem:[#allocation136_spill] sm:$0xff] }
  0xa4   :  { %v764_v35 = vand.u32 4294901760, %v763_v22  ;;  %v2232_v20 = vand.u32 4294901760, %v2231_v33  ;;  %v769_v25 = vsub.f32 %v13565_v6, %v12793_v18  ;;  %v781_v47 = vsub.f32 %v13566_v38, %v12797_v61  ;;  %6433 = vmatprep.subr.bf16.mxu0 %v9164_v26  ;;  %6793 = vmatprep.subr.bf16.mxu1 %v9170_v29  ;;  %v13569_v22 = vld [vmem:[#allocation135_spill] sm:$0xff] }
  0xa5   :  { %v2244_v34 = vand.u32 4294901760, %v2243_v57  ;;  %v2249_v56 = vsub.f32 %v13567_v13, %v12803_v28  ;;  %v2261_v11 = vsub.f32 %v13568_v15, %v12800_v17  ;;  %v12801_v33 = vand.u32 4294901760, %v13569_v22  ;;  %v13601_v13 = vld [vmem:[#allocation181_spill] sm:$0xff] }
  0xa6   :  { %v6442_v18 = vpack.c.bf16 %v764_v35, %v752_v19  ;;  %v770_v42 = vand.u32 4294901760, %v769_v25  ;;  %v782_v6 = vand.u32 4294901760, %v781_v47  ;;  %v12802_v61 = vand.u32 4294901760, %v13570_v59  ;;  %v13571_v25 = vld [vmem:[#allocation138_spill] sm:$0xff]  ;;  %v13572_v47 = vld [vmem:[#allocation139_spill] sm:$0xff] }
  0xa7   :  { %v6802_v38 = vpack.c.bf16 %v2244_v34, %v2232_v20  ;;  %v2250_v26 = vand.u32 4294901760, %v2249_v56  ;;  %v2262_v27 = vand.u32 4294901760, %v2261_v11  ;;  %v775_v29 = vsub.f32 %v13569_v22, %v12801_v33  ;;  %6435 = vmatpush1.bf16.msra.mxu0 %v9207_v37  ;;  %6795 = vmatpush1.bf16.msra.mxu1 %v9215_v10  ;;  %v13573_v56 = vld [vmem:[#allocation140_spill] sm:$0xff]  ;;  %v13574_v37 = vld [vmem:[#allocation142_spill] sm:$0xff] }
  0xa8   :  { %v6444_v57 = vpack.c.bf16 %v782_v6, %v770_v42  ;;  %v787_v19 = vsub.f32 %v13570_v59, %v12802_v61  ;;  %v12804_v35 = vand.u32 4294901760, %v13571_v25  ;;  %v12806_v17 = vand.u32 4294901760, %v13572_v47  ;;  %6437 = vmatprep.subr.bf16.mxu0 %v9222_v21  ;;  %6797 = vmatprep.subr.bf16.mxu1 %v9224_v48  ;;  %v13575_v61 = vld [vmem:[#allocation144_spill] sm:$0xff] }
  0xa9   :  { %v6804_v20 = vpack.c.bf16 %v2262_v27, %v2250_v26  ;;  %v776_v34 = vand.u32 4294901760, %v775_v29  ;;  %v12808_v11 = vand.u32 4294901760, %v13573_v56  ;;  %v12810_v33 = vand.u32 4294901760, %v13574_v37  ;;  %v13576_v27 = vld [vmem:[#allocation145_spill] sm:$0xff]  ;;  %v13577_v29 = vld [vmem:[#allocation147_spill] sm:$0xff] }
  0xaa   :  { %v788_v10 = vand.u32 4294901760, %v787_v19  ;;  %v2255_v42 = vsub.f32 %v13571_v25, %v12804_v35  ;;  %v2267_v6 = vsub.f32 %v13572_v47, %v12806_v17  ;;  %v12813_v28 = vand.u32 4294901760, %v13575_v61 }
  0xab   :  { %v793_v48 = vsub.f32 %v13573_v56, %v12808_v11  ;;  %v805_v21 = vsub.f32 %v13574_v37, %v12810_v33  ;;  %v12815_v26 = vand.u32 4294901760, %v13576_v27  ;;  %v12814_v19 = vand.u32 4294901760, %v13577_v29  ;;  %6439 = vmatpush1.bf16.msra.mxu0 %v9247_v1  ;;  %6799 = vmatpush1.bf16.msra.mxu1 %v6798_v2 }
  0xac   :  { %v6446_v35 = vpack.c.bf16 %v788_v10, %v776_v34  ;;  %v2256_v25 = vand.u32 4294901760, %v2255_v42  ;;  %v2268_v17 = vand.u32 4294901760, %v2267_v6  ;;  %v2273_v47 = vsub.f32 %v13575_v61, %v12813_v28  ;;  %6441 = vmatprep.subr.bf16.mxu0 %v6440_v3  ;;  %6801 = vmatprep.subr.bf16.mxu1 %v6800_v58  ;;  %v13578_v10 = vld [vmem:[#allocation148_spill] sm:$0xff]  ;;  %v13579_v6 = vld [vmem:[#allocation150_spill] sm:$0xff]  ;;  %v13580_v58 = vld [vmem:[#allocation151_spill] sm:$0xff] }
  0xad   :  { %v794_v11 = vand.u32 4294901760, %v793_v48  ;;  %v806_v56 = vand.u32 4294901760, %v805_v21  ;;  %v2285_v33 = vsub.f32 %v13576_v27, %v12815_v26  ;;  %v799_v1 = vsub.f32 %v13577_v29, %v12814_v19  ;;  %v13582_v19 = vld [vmem:[#allocation154_spill] sm:$0xff]  ;;  %v13596_v27 = vld [vmem:[#allocation175_spill] sm:$0xff] }
  0xae   :  { %v6806_v2 = vpack.c.bf16 %v2268_v17, %v2256_v25  ;;  %v2274_v34 = vand.u32 4294901760, %v2273_v47  ;;  %v12816_v42 = vand.u32 4294901760, %v13578_v10  ;;  %v12818_v37 = vand.u32 4294901760, %v13579_v6  ;;  %v13581_v25 = vld [vmem:[#allocation152_spill] sm:$0xff] }
  0xaf   :  { %v6448_v59 = vpack.c.bf16 %v806_v56, %v794_v11  ;;  %v2286_v28 = vand.u32 4294901760, %v2285_v33  ;;  %v800_v3 = vand.u32 4294901760, %v799_v1  ;;  %v12819_v48 = vand.u32 4294901760, %v13580_v58  ;;  %6443 = vmatpush1.bf16.msra.mxu0 %v6442_v18  ;;  %6803 = vmatpush1.bf16.msra.mxu1 %v6802_v38  ;;  %v13583_v38 = vld [vmem:[#allocation156_spill] sm:$0xff]  ;;  %v13584_v11 = vld [vmem:[#allocation157_spill] sm:$0xff] }
  0xb0   :  { %v811_v21 = vsub.f32 %v13578_v10, %v12816_v42  ;;  %v2279_v17 = vsub.f32 %v13579_v6, %v12818_v37  ;;  %v12821_v47 = vand.u32 4294901760, %v13581_v25  ;;  %v12824_v26 = vand.u32 4294901760, %v13582_v19  ;;  %6445 = vmatprep.subr.bf16.mxu0 %v6444_v57  ;;  %6805 = vmatprep.subr.bf16.mxu1 %v6804_v20 }
  0xb1   :  { %v6808_v33 = vpack.c.bf16 %v2286_v28, %v2274_v34  ;;  %v2291_v18 = vsub.f32 %v13580_v58, %v12819_v48  ;;  %v12826_v56 = vand.u32 4294901760, %v13583_v38  ;;  %v12828_v1 = vand.u32 4294901760, %v13584_v11  ;;  %v13585_v48 = vld [vmem:[#allocation159_spill] sm:$0xff] }
  0xb2   :  { %v812_v42 = vand.u32 4294901760, %v811_v21  ;;  %v2280_v10 = vand.u32 4294901760, %v2279_v17  ;;  %v817_v37 = vsub.f32 %v13581_v25, %v12821_v47  ;;  %v829_v57 = vsub.f32 %v13582_v19, %v12824_v26  ;;  %v13586_v25 = vld [vmem:[#allocation160_spill] sm:$0xff] }
  0xb3   :  { %v2292_v20 = vand.u32 4294901760, %v2291_v18  ;;  %v2297_v28 = vsub.f32 %v13583_v38, %v12826_v56  ;;  %v2309_v34 = vsub.f32 %v13584_v11, %v12828_v1  ;;  %v12831_v21 = vand.u32 4294901760, %v13585_v48  ;;  %6447 = vmatpush1.bf16.msra.mxu0 %v6446_v35  ;;  %6807 = vmatpush1.bf16.msra.mxu1 %v6806_v2  ;;  %v13587_v2 = vld [vmem:[#allocation162_spill] sm:$0xff] }
  0xb4   :  { %v6450_v17 = vpack.c.bf16 %v812_v42, %v800_v3  ;;  %v818_v58 = vand.u32 4294901760, %v817_v37  ;;  %v830_v47 = vand.u32 4294901760, %v829_v57  ;;  %v12829_v6 = vand.u32 4294901760, %v13586_v25  ;;  %6449 = vmatprep.subr.bf16.mxu0 %v6448_v59  ;;  %6809 = vmatprep.subr.bf16.mxu1 %v6808_v33  ;;  %v13588_v37 = vld [vmem:[#allocation163_spill] sm:$0xff]  ;;  %v13589_v59 = vld [vmem:[#allocation164_spill] sm:$0xff] }
  0xb5   :  { %v6810_v18 = vpack.c.bf16 %v2292_v20, %v2280_v10  ;;  %v2298_v26 = vand.u32 4294901760, %v2297_v28  ;;  %v2310_v19 = vand.u32 4294901760, %v2309_v34  ;;  %v823_v56 = vsub.f32 %v13585_v48, %v12831_v21  ;;  %v13590_v10 = vld [vmem:[#allocation166_spill] sm:$0xff]  ;;  %v13591_v34 = vld [vmem:[#allocation168_spill] sm:$0xff] }
  0xb6   :  { %v6452_v38 = vpack.c.bf16 %v830_v47, %v818_v58  ;;  %v835_v35 = vsub.f32 %v13586_v25, %v12829_v6  ;;  %v12830_v42 = vand.u32 4294901760, %v13587_v2  ;;  %v12833_v3 = vand.u32 4294901760, %v13588_v37 }
  0xb7   :  { %v6812_v57 = vpack.c.bf16 %v2310_v19, %v2298_v26  ;;  %v824_v1 = vand.u32 4294901760, %v823_v56  ;;  %v12834_v33 = vand.u32 4294901760, %v13589_v59  ;;  %v12835_v20 = vand.u32 4294901760, %v13590_v10  ;;  %6451 = vmatpush1.bf16.msra.mxu0 %v6450_v17  ;;  %6811 = vmatpush1.bf16.msra.mxu1 %v6810_v18  ;;  %v13592_v56 = vld [vmem:[#allocation169_spill] sm:$0xff]  ;;  %v13593_v18 = vld [vmem:[#allocation171_spill] sm:$0xff] }
  0xb8   :  { %v836_v28 = vand.u32 4294901760, %v835_v35  ;;  %v2303_v58 = vsub.f32 %v13587_v2, %v12830_v42  ;;  %v2315_v47 = vsub.f32 %v13588_v37, %v12833_v3  ;;  %v12837_v6 = vand.u32 4294901760, %v13591_v34  ;;  %6453 = vmatprep.subr.bf16.mxu0 %v6452_v38 }
  0xb9   :  { %6813 = vmatprep.subr.bf16.mxu1 %v6812_v57  ;;  %v841_v26 = vsub.f32 %v13589_v59, %v12834_v33  ;;  %v853_v19 = vsub.f32 %v13590_v10, %v12835_v20  ;;  %v12841_v17 = vand.u32 4294901760, %v13592_v56  ;;  %v12842_v35 = vand.u32 4294901760, %v13593_v18 }
  0xba   :  { %v6454_v42 = vpack.c.bf16 %v836_v28, %v824_v1  ;;  %v2304_v21 = vand.u32 4294901760, %v2303_v58  ;;  %v2316_v25 = vand.u32 4294901760, %v2315_v47  ;;  %v2321_v38 = vsub.f32 %v13591_v34, %v12837_v6  ;;  %v139_v1 = vld [vmem:[%s12476_s2 + $0x18] sm:$0xff]  ;;  %v13594_v47 = vld [vmem:[#allocation172_spill] sm:$0xff]  ;;  %v13595_v6 = vld [vmem:[#allocation174_spill] sm:$0xff] }
  0xbb   :  { %v842_v57 = vand.u32 4294901760, %v841_v26  ;;  %v854_v3 = vand.u32 4294901760, %v853_v19  ;;  %v2333_v33 = vsub.f32 %v13592_v56, %v12841_v17  ;;  %v847_v20 = vsub.f32 %v13593_v18, %v12842_v35 }
  0xbc   :  { %6455 = vmatpush1.bf16.msra.mxu0 %v6454_v42  ;;  %v6814_v28 = vpack.c.bf16 %v2316_v25, %v2304_v21  ;;  %v2322_v58 = vand.u32 4294901760, %v2321_v38  ;;  %v12844_v48 = vand.u32 4294901760, %v13594_v47  ;;  %v12846_v26 = vand.u32 4294901760, %v13595_v6  ;;  %v13597_v21 = vld [vmem:[#allocation176_spill] sm:$0xff] }
  0xbd   :  { %v6456_v19 = vpack.c.bf16 %v854_v3, %v842_v57  ;;  %v2334_v11 = vand.u32 4294901760, %v2333_v33  ;;  %v848_v29 = vand.u32 4294901760, %v847_v20  ;;  %v12847_v17 = vand.u32 4294901760, %v13596_v27  ;;  %v13598_v33 = vld [vmem:[#allocation178_spill] sm:$0xff]  ;;  %v13599_v57 = vld [vmem:[#allocation180_spill] sm:$0xff] }
  0xbe   :  { %6815 = vmatpush1.bf16.msra.mxu1 %v6814_v28  ;;  %v859_v35 = vsub.f32 %v13594_v47, %v12844_v48  ;;  %v2327_v42 = vsub.f32 %v13595_v6, %v12846_v26  ;;  %v160_v25 = vmul.f32 %v9092_v60, %v139_v1  ;;  %v12852_v38 = vand.u32 4294901760, %v13597_v21  ;;  %v138_v48 = vld [vmem:[%s12476_s2 + $0x10] sm:$0xff] }
  0xbf   :  { %6457 = vmatprep.subr.bf16.mxu0 %v6456_v19  ;;  %v6816_v61 = vpack.c.bf16 %v2334_v11, %v2322_v58  ;;  %v2339_v3 = vsub.f32 %v13596_v27, %v12847_v17  ;;  %v12853_v20 = vand.u32 4294901760, %v13598_v33  ;;  %v12856_v28 = vand.u32 4294901760, %v13599_v57 }
  0xc0   :  { %v860_v22 = vand.u32 4294901760, %v859_v35  ;;  %v2328_v26 = vand.u32 4294901760, %v2327_v42  ;;  %v382_v1 = vsel %vm377_vm0, %v160_v25, 0  ;;  %v865_v11 = vsub.f32 %v13597_v21, %v12852_v38 }
  0xc1   :  { %6817 = vmatprep.subr.bf16.mxu1 %v6816_v61  ;;  %v2340_v58 = vand.u32 4294901760, %v2339_v3  ;;  %v9425_v19 = vand.u32 4294901760, %v382_v1  ;;  %v877_v17 = vsub.f32 %v13598_v33, %v12853_v20  ;;  %v2345_v15 = vsub.f32 %v13599_v57, %v12856_v28  ;;  %v13604_v28 = vld [vmem:[#allocation183_spill] sm:$0xff] }
  0xc2   :  { %v6458_v35 = vpack.c.bf16 %v860_v22, %v848_v29  ;;  %v866_v42 = vand.u32 4294901760, %v865_v11  ;;  %v12857_v25 = vand.u32 4294901760, %v13601_v13  ;;  %v159_v32 = vmul.f32 %v9096_v40, %v138_v48  ;;  %v13605_v29 = vld [vmem:[#allocation184_spill] sm:$0xff]  ;;  %v141_v48 = vld [vmem:[%s12476_s2 + $0x28] sm:$0xff] }
  0xc3   :  { %13600 = vst [vmem:[#allocation162_spill] sm:$0xff] %v9425_v19  ;;  %v6818_v30 = vpack.c.bf16 %v2340_v58, %v2328_v26  ;;  %v9436_v61 = vsub.f32 %v382_v1, %v9425_v19  ;;  %v878_v3 = vand.u32 4294901760, %v877_v17  ;;  %v2346_v38 = vand.u32 4294901760, %v2345_v15  ;;  %v13607_v17 = vld [vmem:[#allocation186_spill] sm:$0xff]  ;;  %v13608_v58 = vld [vmem:[#allocation187_spill] sm:$0xff] }
  0xc4   :  { %6459 = vmatpush1.bf16.msra.mxu0 %v6458_v35  ;;  %v2357_v20 = vsub.f32 %v13601_v13, %v12857_v25  ;;  %v9441_v54 = vand.u32 4294901760, %v159_v32  ;;  %v12861_v22 = vand.u32 4294901760, %v13604_v28  ;;  %v12869_v1 = vand.u32 4294901760, %v13607_v17 }
  0xc5   :  { %13602 = vst [vmem:[#allocation163_spill] sm:$0xff] %v9436_v61  ;;  %6819 = vmatpush1.bf16.msra.mxu1 %v6818_v30  ;;  %v9449_v26 = vand.u32 4294901760, %v9436_v61  ;;  %v6460_v15 = vpack.c.bf16 %v878_v3, %v866_v42  ;;  %v12870_v35 = vand.u32 4294901760, %v13608_v58  ;;  %v13610_v14 = vand.u32 4294901760, %v13605_v29 }
  0xc6   :  { %13603 = vst [vmem:[#allocation164_spill] sm:$0xff] %v9441_v54  ;;  %v2358_v25 = vand.u32 4294901760, %v2357_v20  ;;  %v9454_v9 = vsub.f32 %v159_v32, %v9441_v54  ;;  %v871_v11 = vsub.f32 %v13604_v28, %v12861_v22  ;;  %v2351_v42 = vsub.f32 %v13607_v17, %v12869_v1  ;;  %v140_v1 = vld [vmem:[%s12476_s2 + $0x20] sm:$0xff] }
  0xc7   :  { %13606 = vst [vmem:[#allocation166_spill] sm:$0xff] %v9449_v26  ;;  %v883_v30 = vsub.f32 %v13605_v29, %v13610_v14  ;;  %v536_v16 = vsub.f32 %v9436_v61, %v9449_v26  ;;  %6461 = vmatprep.subr.bf16.mxu0 %v6460_v15  ;;  %v2363_v32 = vsub.f32 %v13608_v58, %v12870_v35  ;;  %v13614_v35 = vld [vmem:[#allocation188_spill] sm:$0xff]  ;;  %v13617_v58 = vld [vmem:[#allocation193_spill] sm:$0xff] }
  0xc8   :  { %13609 = vst [vmem:[#allocation168_spill] sm:$0xff] %v9454_v9  ;;  %v162_v20 = vmul.f32 %v9092_v60, %v141_v48  ;;  %v6820_v3 = vpack.c.bf16 %v2358_v25, %v2346_v38  ;;  %v9472_v22 = vand.u32 4294901760, %v9454_v9  ;;  %v872_v54 = vand.u32 4294901760, %v871_v11 }
  0xc9   :  { %v884_v14 = vand.u32 4294901760, %v883_v30  ;;  %v9474_v29 = vand.u32 4294901760, %v536_v16  ;;  %v2352_v26 = vand.u32 4294901760, %v2351_v42  ;;  %v2364_v15 = vand.u32 4294901760, %v2363_v32  ;;  %v13615_v30 = vld [vmem:[#allocation190_spill] sm:$0xff]  ;;  %v13616_v32 = vld [vmem:[#allocation192_spill] sm:$0xff] }
  0xca   :  { %13611 = vst [vmem:[#allocation169_spill] sm:$0xff] %v9472_v22  ;;  %v385_v61 = vsel %vm377_vm0, %v162_v20, 0  ;;  %6821 = vmatprep.subr.bf16.mxu1 %v6820_v3  ;;  %v542_v48 = vsub.f32 %v9454_v9, %v9472_v22  ;;  %v12875_v11 = vand.u32 4294901760, %v13614_v35  ;;  %v12876_v42 = vand.u32 4294901760, %v13615_v30 }
  0xcb   :  { %13612 = vst [vmem:[#allocation171_spill] sm:$0xff] %v9474_v29  ;;  %v6462_v38 = vpack.c.bf16 %v884_v14, %v872_v54  ;;  %v9482_v25 = vand.u32 4294901760, %v385_v61  ;;  %538 = vmatprep.mubr.f32.mxu0 %v9474_v29  ;;  %2018 = vmatprep.mubr.f32.mxu1 %v9474_v29  ;;  %v6822_v16 = vpack.c.bf16 %v2364_v15, %v2352_v26  ;;  %v12881_v20 = vand.u32 4294901760, %v13616_v32 }
  0xcc   :  { %v12884_v17 = vand.u32 4294901760, %v13617_v58  ;;  %v9490_v3 = vand.u32 4294901760, %v542_v48  ;;  %v889_v14 = vsub.f32 %v13614_v35, %v12875_v11  ;;  %v161_v22 = vmul.f32 %v9096_v40, %v140_v1  ;;  %v13620_v48 = vld [vmem:[#allocation195_spill] sm:$0xff] }
  0xcd   :  { %13613 = vst [vmem:[#allocation172_spill] sm:$0xff] %v9482_v25  ;;  %6463 = vmatpush1.bf16.msra.mxu0 %v6462_v38  ;;  %v9493_v54 = vsub.f32 %v385_v61, %v9482_v25  ;;  %6823 = vmatpush1.bf16.msra.mxu1 %v6822_v16  ;;  %v901_v26 = vsub.f32 %v13615_v30, %v12876_v42  ;;  %v12891_v38 = vand.u32 4294901760, %v13620_v48  ;;  %v13623_v42 = vld [vmem:[#allocation196_spill] sm:$0xff] }
  0xce   :  { %13618 = vst [vmem:[#allocation174_spill] sm:$0xff] %v9490_v3  ;;  %v2369_v15 = vsub.f32 %v13616_v32, %v12881_v20  ;;  %v2381_v61 = vsub.f32 %v13617_v58, %v12884_v17  ;;  %544 = vmatmul.mubr.f32.gmra.mrb[2].mxu0 %v9490_v3  ;;  %2024 = vmatmul.mubr.f32.gmra.mrb[2].mxu1 %v9490_v3  ;;  %v890_v16 = vand.u32 4294901760, %v889_v14  ;;  %v9514_v11 = vand.u32 4294901760, %v161_v22  ;;  %v13625_v32 = vld [vmem:[#allocation198_spill] sm:$0xff] }
  0xcf   :  { %13619 = vst [vmem:[#allocation175_spill] sm:$0xff] %v9493_v54  ;;  %v9512_v1 = vand.u32 4294901760, %v9493_v54  ;;  %v12896_v29 = vand.u32 4294901760, %v13623_v42  ;;  %v902_v9 = vand.u32 4294901760, %v901_v26  ;;  %v895_v17 = vsub.f32 %v13620_v48, %v12891_v38  ;;  %v143_v26 = vld [vmem:[%s12476_s2 + $0x38] sm:$0xff]  ;;  %v13626_v38 = vld [vmem:[#allocation199_spill] sm:$0xff] }
  0xd0   :  { %13622 = vst [vmem:[#allocation178_spill] sm:$0xff] %v9514_v11  ;;  %v2370_v20 = vand.u32 4294901760, %v2369_v15  ;;  %v2382_v25 = vand.u32 4294901760, %v2381_v61  ;;  %v9523_v3 = vsub.f32 %v161_v22, %v9514_v11  ;;  %v12897_v30 = vand.u32 4294901760, %v13625_v32 }
  0xd1   :  { %13621 = vst [vmem:[#allocation176_spill] sm:$0xff] %v9512_v1  ;;  %v552_v58 = vsub.f32 %v9493_v54, %v9512_v1  ;;  %v907_v14 = vsub.f32 %v13623_v42, %v12896_v29  ;;  %v6464_v15 = vpack.c.bf16 %v902_v9, %v890_v16  ;;  %v896_v35 = vand.u32 4294901760, %v895_v17 }
  0xd2   :  { %13624 = vst [vmem:[#allocation180_spill] sm:$0xff] %v9523_v3  ;;  %v6824_v61 = vpack.c.bf16 %v2382_v25, %v2370_v20  ;;  %v12900_v48 = vand.u32 4294901760, %v13626_v38  ;;  %v9536_v22 = vand.u32 4294901760, %v9523_v3  ;;  %v2375_v29 = vsub.f32 %v13625_v32, %v12897_v30  ;;  %v13629_v25 = vld [vmem:[#allocation200_spill] sm:$0xff] }
  0xd3   :  { %v9533_v28 = vand.u32 4294901760, %v552_v58  ;;  %v908_v1 = vand.u32 4294901760, %v907_v14  ;;  %6465 = vmatprep.subr.bf16.mxu0 %v6464_v15  ;;  %v164_v17 = vmul.f32 %v9092_v60, %v143_v26  ;;  %v13630_v58 = vld [vmem:[#allocation202_spill] sm:$0xff]  ;;  %v13632_v16 = vand.u32 4294901760, %v13629_v25 }
  0xd4   :  { %13628 = vst [vmem:[#allocation196_spill] sm:$0xff] %v9536_v22  ;;  %6825 = vmatprep.subr.bf16.mxu1 %v6824_v61  ;;  %v2387_v9 = vsub.f32 %v13626_v38, %v12900_v48  ;;  %v558_v14 = vsub.f32 %v9523_v3, %v9536_v22  ;;  %v2376_v15 = vand.u32 4294901760, %v2375_v29  ;;  %v13631_v61 = vld [vmem:[#allocation204_spill] sm:$0xff] }
  0xd5   :  { %13627 = vst [vmem:[#allocation181_spill] sm:$0xff] %v9533_v28  ;;  %554 = vmatprep.mubr.f32.mxu0 %v9533_v28  ;;  %2034 = vmatprep.mubr.f32.mxu1 %v9533_v28  ;;  %v6466_v30 = vpack.c.bf16 %v908_v1, %v896_v35  ;;  %v12911_v54 = vand.u32 4294901760, %v13631_v61  ;;  %v142_v48 = vld [vmem:[%s12476_s2 + $0x30] sm:$0xff]  ;;  %v388_v20 = vsel %vm377_vm0, %v164_v17, 0  ;;  %v913_v11 = vsub.f32 %v13629_v25, %v13632_v16  ;;  %v13636_v1 = vld [vmem:[#allocation205_spill] sm:$0xff] }
  0xd6   :  { %v2388_v26 = vand.u32 4294901760, %v2387_v9  ;;  %v13633_v28 = vand.u32 4294901760, %v13630_v58  ;;  %v9562_v22 = vand.u32 4294901760, %v558_v14  ;;  %v9564_v29 = vand.u32 4294901760, %v388_v20 }
  0xd7   :  { %6467 = vmatpush1.bf16.msra.mxu0 %v6466_v30  ;;  %v2393_v35 = vsub.f32 %v13631_v61, %v12911_v54  ;;  %v12915_v9 = vand.u32 4294901760, %v13636_v1  ;;  %v914_v3 = vand.u32 4294901760, %v913_v11  ;;  %v163_v16 = vmul.f32 %v9096_v40, %v142_v48  ;;  %v13638_v54 = vld [vmem:[#allocation207_spill] sm:$0xff] }
  0xd8   :  { %v925_v38 = vsub.f32 %v13630_v58, %v13633_v28  ;;  %13634 = vst [vmem:[#allocation225_spill] sm:$0xff] %v9562_v22  ;;  %13635 = vst [vmem:[#allocation226_spill] sm:$0xff] %v9564_v29  ;;  %v6826_v17 = vpack.c.bf16 %v2388_v26, %v2376_v15  ;;  %560 = vmatmul.mubr.f32.gmra.mrb[4].mxu0 %v9562_v22  ;;  %2040 = vmatmul.mubr.f32.gmra.mrb[4].mxu1 %v9562_v22  ;;  %v12920_v61 = vand.u32 4294901760, %v13638_v54  ;;  %v145_v11 = vld [vmem:[%s12476_s2 + $0x48] sm:$0xff]  ;;  %v13640_v15 = vld [vmem:[#allocation208_spill] sm:$0xff] }
  0xd9   :  { %v9574_v28 = vsub.f32 %v388_v20, %v9564_v29  ;;  %v2394_v30 = vand.u32 4294901760, %v2393_v35  ;;  %v2405_v14 = vsub.f32 %v13636_v1, %v12915_v9  ;;  %v12924_v26 = vand.u32 4294901760, %v13640_v15  ;;  %v13642_v29 = vld [vmem:[#allocation211_spill] sm:$0xff] }
  0xda   :  { %v926_v32 = vand.u32 4294901760, %v925_v38  ;;  %6827 = vmatpush1.bf16.msra.mxu1 %v6826_v17  ;;  %v9583_v38 = vand.u32 4294901760, %v163_v16  ;;  %v12927_v20 = vand.u32 4294901760, %v8909_v39  ;;  %v919_v9 = vsub.f32 %v13638_v54, %v12920_v61 }
  0xdb   :  { %13637 = vst [vmem:[#allocation227_spill] sm:$0xff] %v9574_v28  ;;  %v9588_v35 = vand.u32 4294901760, %v9574_v28  ;;  %v2406_v22 = vand.u32 4294901760, %v2405_v14  ;;  %v12928_v1 = vand.u32 4294901760, %v13642_v29  ;;  %v166_v14 = vmul.f32 %v9092_v60, %v145_v11 }
  0xdc   :  { %v6468_v48 = vpack.c.bf16 %v926_v32, %v914_v3  ;;  %13639 = vst [vmem:[#allocation228_spill] sm:$0xff] %v9583_v38  ;;  %v9595_v17 = vsub.f32 %v163_v16, %v9583_v38  ;;  %v931_v32 = vsub.f32 %v13640_v15, %v12924_v26  ;;  %v2399_v3 = vsub.f32 %v8909_v39, %v12927_v20  ;;  %v13647_v20 = vld [vmem:[#allocation212_spill] sm:$0xff] }
  0xdd   :  { %13641 = vst [vmem:[#allocation229_spill] sm:$0xff] %v9588_v35  ;;  %v568_v58 = vsub.f32 %v9574_v28, %v9588_v35  ;;  %v6828_v61 = vpack.c.bf16 %v2406_v22, %v2394_v30  ;;  %v920_v54 = vand.u32 4294901760, %v919_v9  ;;  %v2411_v16 = vsub.f32 %v13642_v29, %v12928_v1  ;;  %v144_v9 = vld [vmem:[%s12476_s2 + $0x40] sm:$0xff] }
  0xde   :  { %6469 = vmatprep.subr.bf16.mxu0 %v6468_v48  ;;  %13643 = vst [vmem:[#allocation230_spill] sm:$0xff] %v9595_v17  ;;  %v9610_v48 = vand.u32 4294901760, %v9595_v17  ;;  %v932_v38 = vand.u32 4294901760, %v931_v32  ;;  %v2400_v26 = vand.u32 4294901760, %v2399_v3  ;;  %v391_v15 = vsel %vm377_vm0, %v166_v14, 0 }
  0xdf   :  { %v9613_v25 = vand.u32 4294901760, %v568_v58  ;;  %6829 = vmatprep.subr.bf16.mxu1 %v6828_v61  ;;  %v2412_v60 = vand.u32 4294901760, %v2411_v16  ;;  %v9615_v11 = vand.u32 4294901760, %v391_v15  ;;  %v12932_v22 = vand.u32 4294901760, %v13647_v20 }
  0xe0   :  { %13644 = vst [vmem:[#allocation231_spill] sm:$0xff] %v9610_v48  ;;  %v574_v30 = vsub.f32 %v9595_v17, %v9610_v48  ;;  %v6470_v1 = vpack.c.bf16 %v932_v38, %v920_v54  ;;  %v12931_v32 = vand.u32 4294901760, %v8922_v43  ;;  %v12933_v3 = vand.u32 4294901760, %v8926_v0 }
  0xe1   :  { %13645 = vst [vmem:[#allocation232_spill] sm:$0xff] %v9613_v25  ;;  %13646 = vst [vmem:[#allocation233_spill] sm:$0xff] %v9615_v11  ;;  %570 = vmatprep.mubr.f32.mxu0 %v9613_v25  ;;  %2050 = vmatprep.mubr.f32.mxu1 %v9613_v25  ;;  %v6830_v58 = vpack.c.bf16 %v2412_v60, %v2400_v26  ;;  %v9628_v61 = vsub.f32 %v391_v15, %v9615_v11  ;;  %v12934_v16 = vand.u32 4294901760, %v8928_v31 }
  0xe2   :  { %v937_v14 = vsub.f32 %v13647_v20, %v12932_v22  ;;  %v9634_v48 = vand.u32 4294901760, %v574_v30  ;;  %6471 = vmatpush1.bf16.msra.mxu0 %v6470_v1  ;;  %v949_v54 = vsub.f32 %v8922_v43, %v12931_v32  ;;  %v2417_v38 = vsub.f32 %v8926_v0, %v12933_v3 }
  0xe3   :  { %13648 = vst [vmem:[#allocation212_spill] sm:$0xff] %v9628_v61  ;;  %v165_v15 = vmul.f32 %v9096_v40, %v144_v9  ;;  %6831 = vmatpush1.bf16.msra.mxu1 %v6830_v58  ;;  %v9644_v26 = vand.u32 4294901760, %v9628_v61  ;;  %v2429_v30 = vsub.f32 %v8928_v31, %v12934_v16  ;;  %v12943_v1 = vand.u32 4294901760, %v8932_v62 }
  0xe4   :  { %13649 = vst [vmem:[#allocation234_spill] sm:$0xff] %v9634_v48  ;;  %v938_v60 = vand.u32 4294901760, %v937_v14  ;;  %576 = vmatmul.mubr.f32.gmra.mrb[6].mxu0 %v9634_v48  ;;  %2056 = vmatmul.mubr.f32.gmra.mrb[6].mxu1 %v9634_v48  ;;  %v950_v32 = vand.u32 4294901760, %v949_v54  ;;  %v2418_v22 = vand.u32 4294901760, %v2417_v38  ;;  %v12945_v40 = vand.u32 4294901760, %v8934_v53 }
  0xe5   :  { %13650 = vst [vmem:[#allocation235_spill] sm:$0xff] %v9644_v26  ;;  %v9652_v3 = vand.u32 4294901760, %v165_v15  ;;  %v584_v9 = vsub.f32 %v9628_v61, %v9644_v26  ;;  %v2430_v58 = vand.u32 4294901760, %v2429_v30  ;;  %v943_v14 = vsub.f32 %v8932_v62, %v12943_v1 }
  0xe6   :  { %v12944_v16 = vand.u32 4294901760, %v8940_v4  ;;  %v6472_v25 = vpack.c.bf16 %v950_v32, %v938_v60  ;;  %v955_v54 = vsub.f32 %v8934_v53, %v12945_v40  ;;  %v12946_v38 = vand.u32 4294901760, %v8942_v49  ;;  %v13656_v40 = vld [vmem:[#allocation48_spill] sm:$0xff] }
  0xe7   :  { %13651 = vst [vmem:[#allocation236_spill] sm:$0xff] %v9652_v3  ;;  %v9662_v35 = vsub.f32 %v165_v15, %v9652_v3  ;;  %v9668_v48 = vand.u32 4294901760, %v584_v9  ;;  %v6832_v26 = vpack.c.bf16 %v2430_v58, %v2418_v22  ;;  %v944_v30 = vand.u32 4294901760, %v943_v14 }
  0xe8   :  { %v2423_v1 = vsub.f32 %v8940_v4, %v12944_v16  ;;  %6473 = vmatprep.subr.bf16.mxu0 %v6472_v25  ;;  %v956_v15 = vand.u32 4294901760, %v955_v54  ;;  %v2435_v60 = vsub.f32 %v8942_v49, %v12946_v38  ;;  %v6476_v22 = vpack.c.bf16 %v8191_v51, %v8189_v50  ;;  %v13657_v38 = vld [vmem:[#allocation49_spill] sm:$0xff] }
  0xe9   :  { %13652 = vst [vmem:[#allocation237_spill] sm:$0xff] %v9662_v35  ;;  %13653 = vst [vmem:[#allocation238_spill] sm:$0xff] %v9668_v48  ;;  %v9674_v32 = vand.u32 4294901760, %v9662_v35  ;;  %586 = vmatprep.mubr.f32.mxu0 %v9668_v48  ;;  %2066 = vmatprep.mubr.f32.mxu1 %v9668_v48  ;;  %v6836_v61 = vpack.c.bf16 %v13657_v38, %v13656_v40  ;;  %v13664_v48 = vld [vmem:[#allocation73_spill] sm:$0xff] }
  0xea   :  { %v2424_v9 = vand.u32 4294901760, %v2423_v1  ;;  %6833 = vmatprep.subr.bf16.mxu1 %v6832_v26  ;;  %v6474_v58 = vpack.c.bf16 %v956_v15, %v944_v30  ;;  %v2436_v14 = vand.u32 4294901760, %v2435_v60  ;;  %v13658_v26 = vld [vmem:[#allocation50_spill] sm:$0xff]  ;;  %v6838_v30 = vpack.c.bf16 %v8233_v45, %v8231_v44  ;;  %v13659_v60 = vld [vmem:[#allocation61_spill] sm:$0xff]  ;;  %v13702_v44 = vld [vmem:[#allocation103_spill] sm:$0xff] }
  0xeb   :  { %13654 = vst [vmem:[#allocation239_spill] sm:$0xff] %v9674_v32  ;;  %v590_v25 = vsub.f32 %v9662_v35, %v9674_v32  ;;  %v6478_v1 = vpack.c.bf16 %v8219_v63, %v13658_v26  ;;  %v6480_v15 = vpack.c.bf16 %v8248_v46, %v8246_v24  ;;  %v6486_v32 = vpack.c.bf16 %v8327_v7, %v8325_v8  ;;  %v13673_v24 = vld [vmem:[#allocation91_spill] sm:$0xff]  ;;  %v13689_v45 = vld [vmem:[#allocation205_spill] sm:$0xff]  ;;  %v13692_v63 = vld [vmem:[#allocation208_spill] sm:$0xff] }
  0xec   :  { %6475 = vmatpush1.bf16.msra.mxu0 %v6474_v58  ;;  %v6834_v54 = vpack.c.bf16 %v2436_v14, %v2424_v9  ;;  %v6840_v9 = vpack.c.bf16 %v13659_v60, %v8259_v23  ;;  %v6842_v58 = vpack.c.bf16 %v8287_v41, %v8285_v52  ;;  %v13661_v14 = vld [vmem:[#allocation69_spill] sm:$0xff]  ;;  %v13666_v60 = vld [vmem:[#allocation79_spill] sm:$0xff]  ;;  %v13671_v52 = vld [vmem:[#allocation88_spill] sm:$0xff] }
  0xed   :  { %v9685_v16 = vand.u32 4294901760, %v590_v25  ;;  %6477 = vmatprep.subr.bf16.mxu0 %v6476_v22  ;;  %v13660_v22 = vld [vmem:[#allocation62_spill] sm:$0xff]  ;;  %v13669_v41 = vld [vmem:[#allocation83_spill] sm:$0xff]  ;;  %v13695_v26 = vld [vmem:[#allocation96_spill] sm:$0xff] }
  0xee   :  { %6835 = vmatpush1.bf16.msra.mxu1 %v6834_v54  ;;  %v6482_v25 = vpack.c.bf16 %v8272_v55, %v13660_v22  ;;  %v13667_v55 = vld [vmem:[#allocation81_spill] sm:$0xff]  ;;  %v13668_v22 = vld [vmem:[#allocation82_spill] sm:$0xff]  ;;  %v13674_v7 = vld [vmem:[#allocation183_spill] sm:$0xff] }
  0xef   :  { %13655 = vst [vmem:[#allocation240_spill] sm:$0xff] %v9685_v16  ;;  %592 = vmatmul.mubr.f32.gmra.mrb[8].mxu0 %v9685_v16  ;;  %2072 = vmatmul.mubr.f32.gmra.mrb[8].mxu1 %v9685_v16  ;;  %v13663_v16 = vld [vmem:[#allocation72_spill] sm:$0xff]  ;;  %v6488_v46 = vpack.c.bf16 %v13668_v22, %v13667_v55  ;;  %v13687_v22 = vld [vmem:[#allocation202_spill] sm:$0xff]  ;;  %v13696_v40 = vld [vmem:[#allocation97_spill] sm:$0xff] }
  0xf0   :  { %963 = vmatprep.mubr.f32.mxu0 %v9119_v36  ;;  %2443 = vmatprep.mubr.f32.mxu1 %v9119_v36  ;;  %v6844_v36 = vpack.c.bf16 %v13664_v48, %v13663_v16  ;;  %v13686_v16 = vld [vmem:[#allocation200_spill] sm:$0xff]  ;;  %v6852_v51 = vpack.c.bf16 %v13696_v40, %v13695_v26  ;;  %v13704_v40 = vld [vmem:[#allocation106_spill] sm:$0xff]  ;;  %v13706_v50 = vld [vmem:[#allocation109_spill] sm:$0xff] }
  0xf1   :  { %6837 = vmatprep.subr.bf16.mxu1 %v6836_v61  ;;  %v13662_v61 = vld [vmem:[#allocation70_spill] sm:$0xff]  ;;  %v13690_v55 = vld [vmem:[#allocation172_spill] sm:$0xff] }
  0xf2   :  { %v6484_v54 = vpack.c.bf16 %v13662_v61, %v13661_v14  ;;  %v6490_v61 = vpack.c.bf16 %v13671_v52, %v8368_v5  ;;  %v13672_v14 = vld [vmem:[#allocation90_spill] sm:$0xff]  ;;  %v13685_v5 = vld [vmem:[#allocation199_spill] sm:$0xff]  ;;  %v13700_v8 = vld [vmem:[#allocation100_spill] sm:$0xff] }
  0xf3   :  { %965 = vmatmul.mubr.f32.vlgmr.msra.gmra.mrb[0].mxu0 %v9117_v12  ;;  %2445 = vmatmul.mubr.f32.vlgmr.msra.gmra.mrb[0].mxu1 %v9117_v12  ;;  %v13665_v12 = vld [vmem:[#allocation77_spill] sm:$0xff]  ;;  %v6850_v48 = vpack.c.bf16 %v13673_v24, %v13672_v14  ;;  %v13675_v14 = vld [vmem:[#allocation184_spill] sm:$0xff]  ;;  %v13679_v52 = vld [vmem:[#allocation190_spill] sm:$0xff] }
  0xf4   :  { %6479 = vmatpush1.bf16.msra.mxu0 %v6478_v1  ;;  %6839 = vmatpush1.bf16.msra.mxu1 %v6838_v30  ;;  %v6846_v23 = vpack.c.bf16 %v13666_v60, %v13665_v12  ;;  %v13670_v1 = vld [vmem:[#allocation85_spill] sm:$0xff]  ;;  %v13680_v60 = vld [vmem:[#allocation192_spill] sm:$0xff]  ;;  %v13691_v12 = vld [vmem:[#allocation207_spill] sm:$0xff] }
  0xf5   :  { %6481 = vmatprep.subr.bf16.mxu0 %v6480_v15  ;;  %6841 = vmatprep.subr.bf16.mxu1 %v6840_v9  ;;  %v6848_v30 = vpack.c.bf16 %v13670_v1, %v13669_v41  ;;  %v13676_v9 = vld [vmem:[#allocation186_spill] sm:$0xff]  ;;  %v13677_v41 = vld [vmem:[#allocation187_spill] sm:$0xff]  ;;  %v13678_v1 = vld [vmem:[#allocation188_spill] sm:$0xff] }
  0xf6   :  { %971 = vmatprep.mubr.f32.mxu0 %v9425_v19  ;;  %2451 = vmatprep.mubr.f32.mxu1 %v9425_v19  ;;  %v13681_v24 = vld [vmem:[#allocation193_spill] sm:$0xff]  ;;  %v13682_v19 = vld [vmem:[#allocation195_spill] sm:$0xff]  ;;  %v13684_v15 = vld [vmem:[#allocation198_spill] sm:$0xff] }
  0xf7   :  { %v13707_v35 = vld [vmem:[#allocation228_spill] sm:$0xff] }
  0xf8   :  { %6483 = vmatpush1.bf16.msra.mxu0 %v6482_v25  ;;  %6843 = vmatpush1.bf16.msra.mxu1 %v6842_v58  ;;  %v13683_v58 = vld [vmem:[#allocation164_spill] sm:$0xff]  ;;  %v13693_v25 = vld [vmem:[#allocation93_spill] sm:$0xff] }
  0xf9   :  { %6485 = vmatprep.subr.bf16.mxu0 %v6484_v54  ;;  %6845 = vmatprep.subr.bf16.mxu1 %v6844_v36  ;;  %v13688_v36 = vld [vmem:[#allocation204_spill] sm:$0xff] }
  0xfa   :  { %973 = vmatmul.mubr.f32.gmra.mrb[2].mxu0 %v13683_v58  ;;  %2453 = vmatmul.mubr.f32.gmra.mrb[2].mxu1 %v13683_v58  ;;  %v13697_v58 = vld [vmem:[#allocation178_spill] sm:$0xff] }
  0xfb   :  { %979 = vmatprep.mubr.f32.mxu0 %v13690_v55  ;;  %2459 = vmatprep.mubr.f32.mxu1 %v13690_v55  ;;  %v13694_v55 = vld [vmem:[#allocation94_spill] sm:$0xff] }
  0xfc   :  { %6487 = vmatpush1.bf16.msra.mxu0 %v6486_v32  ;;  %6847 = vmatpush1.bf16.msra.mxu1 %v6846_v23  ;;  %v6492_v38 = vpack.c.bf16 %v13694_v55, %v13693_v25  ;;  %v13698_v23 = vld [vmem:[#allocation226_spill] sm:$0xff]  ;;  %v13699_v32 = vld [vmem:[#allocation99_spill] sm:$0xff]  ;;  %v13703_v55 = vld [vmem:[#allocation105_spill] sm:$0xff] }
  0xfd   :  { %6489 = vmatprep.subr.bf16.mxu0 %v6488_v46  ;;  %6849 = vmatprep.subr.bf16.mxu1 %v6848_v30  ;;  %v6494_v46 = vpack.c.bf16 %v13700_v8, %v13699_v32  ;;  %v13701_v30 = vld [vmem:[#allocation102_spill] sm:$0xff]  ;;  %v6496_v26 = vpack.c.bf16 %v13704_v40, %v13703_v55  ;;  %v13705_v25 = vld [vmem:[#allocation107_spill] sm:$0xff]  ;;  %v13712_v40 = vld [vmem:[#allocation116_spill] sm:$0xff] }
  0xfe   :  { %981 = vmatmul.mubr.f32.gmra.mrb[4].mxu0 %v13697_v58  ;;  %2461 = vmatmul.mubr.f32.gmra.mrb[4].mxu1 %v13697_v58  ;;  %v6854_v54 = vpack.c.bf16 %v13702_v44, %v13701_v30  ;;  %v6856_v58 = vpack.c.bf16 %v13706_v50, %v13705_v25  ;;  %v13713_v50 = vld [vmem:[#allocation118_spill] sm:$0xff]  ;;  %v13714_v55 = vld [vmem:[#allocation120_spill] sm:$0xff]  ;;  %v13715_v30 = vld [vmem:[#allocation121_spill] sm:$0xff] }
  0xff   :  { %987 = vmatprep.mubr.f32.mxu0 %v13698_v23  ;;  %2467 = vmatprep.mubr.f32.mxu1 %v13698_v23  ;;  %v13711_v23 = vld [vmem:[#allocation115_spill] sm:$0xff]  ;;  %v6500_v25 = vpack.c.bf16 %v13713_v50, %v13712_v40  ;;  %v13721_v50 = vld [vmem:[#allocation128_spill] sm:$0xff] }
 0x100   :  { %6491 = vmatpush1.bf16.msra.mxu0 %v6490_v61  ;;  %6851 = vmatpush1.bf16.msra.mxu1 %v6850_v48  ;;  %v13708_v48 = vld [vmem:[#allocation111_spill] sm:$0xff]  ;;  %v13709_v61 = vld [vmem:[#allocation112_spill] sm:$0xff] }
 0x101   :  { %6493 = vmatprep.subr.bf16.mxu0 %v6492_v38  ;;  %6853 = vmatprep.subr.bf16.mxu1 %v6852_v51  ;;  %v6498_v38 = vpack.c.bf16 %v13709_v61, %v13708_v48  ;;  %v13710_v51 = vld [vmem:[#allocation114_spill] sm:$0xff]  ;;  %v13723_v40 = vld [vmem:[#allocation132_spill] sm:$0xff]  ;;  %v13724_v61 = vld [vmem:[#allocation133_spill] sm:$0xff] }
 0x102   :  { %989 = vmatmul.mubr.f32.gmra.mrb[6].mxu0 %v13707_v35  ;;  %2469 = vmatmul.mubr.f32.gmra.mrb[6].mxu1 %v13707_v35  ;;  %v6858_v44 = vpack.c.bf16 %v13711_v23, %v13710_v51  ;;  %v6860_v35 = vpack.c.bf16 %v13715_v30, %v13714_v55  ;;  %v13720_v23 = vld [vmem:[#allocation127_spill] sm:$0xff]  ;;  %v13722_v30 = vld [vmem:[#allocation130_spill] sm:$0xff] }
 0x103   :  { %995 = vmatprep.mubr.f32.mxu0 %v9615_v11  ;;  %2475 = vmatprep.mubr.f32.mxu1 %v9615_v11  ;;  %v13718_v11 = vld [vmem:[#allocation124_spill] sm:$0xff]  ;;  %v6504_v55 = vpack.c.bf16 %v13722_v30, %v13721_v50  ;;  %v13725_v48 = vld [vmem:[#allocation135_spill] sm:$0xff] }
 0x104   :  { %6495 = vmatpush1.bf16.msra.mxu0 %v6494_v46  ;;  %6855 = vmatpush1.bf16.msra.mxu1 %v6854_v54  ;;  %v13716_v46 = vld [vmem:[#allocation220_spill] sm:$0xff]  ;;  %v13717_v54 = vld [vmem:[#allocation123_spill] sm:$0xff] }
 0x105   :  { %6497 = vmatprep.subr.bf16.mxu0 %v6496_v26  ;;  %6857 = vmatprep.subr.bf16.mxu1 %v6856_v58  ;;  %v6502_v26 = vpack.c.bf16 %v13718_v11, %v13717_v54  ;;  %v13719_v58 = vld [vmem:[#allocation126_spill] sm:$0xff]  ;;  %v13728_v8 = vld [vmem:[#allocation139_spill] sm:$0xff]  ;;  %v13729_v11 = vld [vmem:[#allocation140_spill] sm:$0xff] }
 0x106   :  { %997 = vmatmul.mubr.f32.gmra.mrb[8].mxu0 %v9652_v3  ;;  %2477 = vmatmul.mubr.f32.gmra.mrb[8].mxu1 %v9652_v3  ;;  %v6862_v51 = vpack.c.bf16 %v13720_v23, %v13719_v58  ;;  %v6864_v3 = vpack.c.bf16 %v13724_v61, %v13723_v40  ;;  %v13730_v23 = vld [vmem:[#allocation142_spill] sm:$0xff]  ;;  %v13732_v58 = vld [vmem:[#allocation145_spill] sm:$0xff]  ;;  %v13733_v30 = vld [vmem:[#allocation147_spill] sm:$0xff] }
 0x107   :  { %1189 = vmatprep.mubr.f32.mxu0 %v13716_v46  ;;  %2669 = vmatprep.mubr.f32.mxu1 %v13716_v46  ;;  %v13726_v46 = vld [vmem:[#allocation136_spill] sm:$0xff]  ;;  %v13736_v40 = vld [vmem:[#allocation151_spill] sm:$0xff] }
 0x108   :  { %6499 = vmatpush1.bf16.msra.mxu0 %v6498_v38  ;;  %6859 = vmatpush1.bf16.msra.mxu1 %v6858_v44  ;;  %v6506_v38 = vpack.c.bf16 %v13726_v46, %v13725_v48  ;;  %v13727_v44 = vld [vmem:[#allocation138_spill] sm:$0xff]  ;;  %v13734_v61 = vld [vmem:[#allocation148_spill] sm:$0xff] }
 0x109   :  { %6501 = vmatprep.subr.bf16.mxu0 %v6500_v25  ;;  %6861 = vmatprep.subr.bf16.mxu1 %v6860_v35  ;;  %v6866_v32 = vpack.c.bf16 %v13728_v8, %v13727_v44  ;;  %v6508_v25 = vpack.c.bf16 %v13730_v23, %v13729_v11  ;;  %v13731_v35 = vld [vmem:[#allocation144_spill] sm:$0xff]  ;;  %v13738_v8 = vld [vmem:[#allocation154_spill] sm:$0xff]  ;;  %v13740_v44 = vld [vmem:[#allocation157_spill] sm:$0xff] }
 0x10a   :  { %v6868_v54 = vpack.c.bf16 %v13732_v58, %v13731_v35  ;;  %v13737_v46 = vld [vmem:[#allocation152_spill] sm:$0xff]  ;;  %v13741_v23 = vld [vmem:[#allocation159_spill] sm:$0xff] }
 0x10b   :  { %v13742_v58 = vld [vmem:[#allocation160_spill] sm:$0xff] }
 0x10c   :  { %6503 = vmatpush1.bf16.msra.mxu0 %v6502_v26  ;;  %6863 = vmatpush1.bf16.msra.mxu1 %v6862_v51  ;;  %v6510_v26 = vpack.c.bf16 %v13734_v61, %v13733_v30  ;;  %v13735_v51 = vld [vmem:[#allocation150_spill] sm:$0xff] }
 0x10d   :  { %6505 = vmatprep.subr.bf16.mxu0 %v6504_v55  ;;  %6865 = vmatprep.subr.bf16.mxu1 %v6864_v3  ;;  %v6870_v50 = vpack.c.bf16 %v13736_v40, %v13735_v51  ;;  %v6512_v55 = vpack.c.bf16 %v13738_v8, %v13737_v46  ;;  %v13739_v3 = vld [vmem:[#allocation156_spill] sm:$0xff] }
 0x10e   :  { %v6872_v48 = vpack.c.bf16 %v13740_v44, %v13739_v3 }
 0x110   :  { %6507 = vmatpush1.bf16.msra.mxu0 %v6506_v38  ;;  %6867 = vmatpush1.bf16.msra.mxu1 %v6866_v32  ;;  %v6514_v38 = vpack.c.bf16 %v13742_v58, %v13741_v23  ;;  %v13743_v32 = vpack.c.bf16 %v13588_v37, %v13587_v2 }
 0x111   :  { %6509 = vmatprep.subr.bf16.mxu0 %v6508_v25  ;;  %6869 = vmatprep.subr.bf16.mxu1 %v6868_v54  ;;  %v13744_v54 = vpack.c.bf16 %v13590_v10, %v13589_v59  ;;  %v13745_v25 = vpack.c.bf16 %v13592_v56, %v13591_v34 }
 0x114   :  { %6511 = vmatpush1.bf16.msra.mxu0 %v6510_v26  ;;  %6871 = vmatpush1.bf16.msra.mxu1 %v6870_v50  ;;  %v13746_v50 = vpack.c.bf16 %v13594_v47, %v13593_v18  ;;  %v13748_v26 = vpack.c.bf16 %v13598_v33, %v13597_v21 }
 0x115   :  { %6513 = vmatprep.subr.bf16.mxu0 %v6512_v55  ;;  %6873 = vmatprep.subr.bf16.mxu1 %v6872_v48  ;;  %v13747_v48 = vpack.c.bf16 %v13596_v27, %v13595_v6  ;;  %v13749_v55 = vpack.c.bf16 %v13601_v13, %v13599_v57 }
 0x118   :  { %6515 = vmatpush1.bf16.msra.mxu0 %v6514_v38  ;;  %6875 = vmatpush1.bf16.msra.mxu1 %v13743_v32  ;;  %v13750_v38 = vpack.c.bf16 %v13675_v14, %v13674_v7  ;;  %v13751_v32 = vpack.c.bf16 %v13677_v41, %v13676_v9  ;;  %v13761_v9 = vand.u32 4294901760, %v8934_v53 }
 0x119   :  { %6517 = vmatprep.subr.bf16.mxu0 %v13744_v54  ;;  %6877 = vmatprep.subr.bf16.mxu1 %v13745_v25  ;;  %v13752_v54 = vand.u32 4294901760, %v13647_v20  ;;  %v13753_v25 = vand.u32 4294901760, %v8922_v43 }
 0x11c   :  { %6519 = vmatpush1.bf16.msra.mxu0 %v13746_v50  ;;  %6879 = vmatpush1.bf16.msra.mxu1 %v13747_v48  ;;  %v9860_v50 = vpack.c.bf16 %v13753_v25, %v13752_v54  ;;  %v13755_v48 = vpack.c.bf16 %v13679_v52, %v13678_v1  ;;  %v13763_v25 = vand.u32 4294901760, %v8940_v4 }
 0x11d   :  { %6521 = vmatprep.subr.bf16.mxu0 %v13748_v26  ;;  %6881 = vmatprep.subr.bf16.mxu1 %v13749_v55  ;;  %v13756_v26 = vpack.c.bf16 %v13681_v24, %v13680_v60  ;;  %v13757_v55 = vand.u32 4294901760, %v8926_v0 }
 0x11e   :  { %13754 = vst [vmem:[#allocation183_spill] sm:$0xff] %v9860_v50 }
 0x120   :  { %6523 = vmatpush1.bf16.msra.mxu0 %v13750_v38  ;;  %6883 = vmatpush1.bf16.msra.mxu1 %v13751_v32  ;;  %v13758_v38 = vand.u32 4294901760, %v8928_v31  ;;  %v13760_v32 = vand.u32 4294901760, %v8932_v62 }
 0x121   :  { %6525 = vmatprep.subr.bf16.mxu0 %v13755_v48  ;;  %6885 = vmatprep.subr.bf16.mxu1 %v13756_v26  ;;  %v13764_v48 = vand.u32 4294901760, %v8942_v49  ;;  %v13766_v26 = vpack.c.bf16 %v13623_v42, %v13682_v19 }
 0x122   :  { %v9872_v41 = vpack.c.bf16 %v13758_v38, %v13757_v55  ;;  %v9878_v54 = vpack.c.bf16 %v13761_v9, %v13760_v32  ;;  %v13767_v55 = vpack.c.bf16 %v13685_v5, %v13684_v15  ;;  %v13768_v38 = vpack.c.bf16 %v13687_v22, %v13686_v16 }
 0x123   :  { %v9884_v50 = vpack.c.bf16 %v13764_v48, %v13763_v25  ;;  %v13769_v9 = vpack.c.bf16 %v13689_v45, %v13688_v36  ;;  %v13770_v32 = vpack.c.bf16 %v13692_v63, %v13691_v12  ;;  %v13771_v25 = vpack.c.bf16 %v13642_v29, %v8909_v39  ;;  %v13868_v39 = vld [vmem:[#allocation221_spill] sm:$0xff] }
 0x124   :  { %13759 = vst [vmem:[#allocation184_spill] sm:$0xff] %v9872_v41  ;;  %13762 = vst [vmem:[#allocation188_spill] sm:$0xff] %v9878_v54  ;;  %6527 = vmatpush1.bf16.msra.mxu0 %v13766_v26  ;;  %6887 = vmatpush1.bf16.msra.mxu1 %v13767_v55  ;;  %v13772_v48 = vpack.c.bf16 %v8922_v43, %v13647_v20  ;;  %v13773_v26 = vpack.c.bf16 %v8928_v31, %v8926_v0  ;;  %v13779_v43 = vld [vmem:[#allocation51_spill] sm:$0xff]  ;;  %v13780_v0 = vld [vmem:[#allocation53_spill] sm:$0xff] }
 0x125   :  { %13765 = vst [vmem:[#allocation190_spill] sm:$0xff] %v9884_v50  ;;  %6529 = vmatprep.subr.bf16.mxu0 %v13768_v38  ;;  %6889 = vmatprep.subr.bf16.mxu1 %v13769_v9  ;;  %v13774_v55 = vpack.c.bf16 %v8934_v53, %v8932_v62  ;;  %v13775_v38 = vpack.c.bf16 %v8942_v49, %v8940_v4  ;;  %v13776_v9 = vld [vmem:[#allocation44_spill] sm:$0xff]  ;;  %v13782_v53 = vld [vmem:[#allocation59_spill] sm:$0xff]  ;;  %v13786_v20 = vld [vmem:[#allocation65_spill] sm:$0xff] }
 0x126   :  { %v13781_v31 = vld [vmem:[#allocation56_spill] sm:$0xff]  ;;  %v13783_v62 = vld [vmem:[#allocation163_spill] sm:$0xff] }
 0x127   :  { %v13784_v4 = vld [vmem:[#allocation168_spill] sm:$0xff]  ;;  %v13785_v49 = vld [vmem:[#allocation63_spill] sm:$0xff] }
 0x128   :  { %6531 = vmatpush1.bf16.msra.mxu0 %v13770_v32  ;;  %6891 = vmatpush1.bf16.msra.mxu1 %v13771_v25  ;;  %v13777_v32 = vld [vmem:[#allocation47_spill] sm:$0xff] }
 0x129   :  { %6533 = vmatprep.subr.bf16.mxu0 %v13772_v48  ;;  %6893 = vmatprep.subr.bf16.mxu1 %v13773_v26  ;;  %v13778_v25 = vld [vmem:[#allocation219_spill] sm:$0xff]  ;;  %v13787_v48 = vld [vmem:[#allocation68_spill] sm:$0xff] }
 0x12a   :  { %v13788_v26 = vld [vmem:[#allocation71_spill] sm:$0xff] }
 0x12c   :  { %6535 = vmatpush1.bf16.msra.mxu0 %v13774_v55  ;;  %6895 = vmatpush1.bf16.msra.mxu1 %v13775_v38  ;;  %v13789_v55 = vld [vmem:[#allocation175_spill] sm:$0xff]  ;;  %v13790_v38 = vld [vmem:[#allocation180_spill] sm:$0xff] }
 0x12d   :  { %6537 = vmatprep.subr.bf16.mxu0 %v13776_v9  ;;  %6897 = vmatprep.subr.bf16.mxu1 %v13777_v32  ;;  %v13850_v32 = vld [vmem:[#allocation215_spill] sm:$0xff]  ;;  %v13854_v9 = vld [vmem:[#allocation52_spill] sm:$0xff] }
 0x12f   :  { %1192 = vmatmul.mubr.f32.vlgmr.msra.gmra.mrb[0].mxu0 %v13778_v25  ;;  %2672 = vmatmul.mubr.f32.vlgmr.msra.gmra.mrb[0].mxu1 %v13778_v25  ;;  %v13792_v25 = vld [vmem:[#allocation78_spill] sm:$0xff] }
 0x130   :  { %6539 = vmatpush1.bf16.msra.mxu0 %v13779_v43  ;;  %6899 = vmatpush1.bf16.msra.mxu1 %v13780_v0 }
 0x131   :  { %6541 = vmatprep.subr.bf16.mxu0 %v13781_v31  ;;  %6901 = vmatprep.subr.bf16.mxu1 %v13782_v53  ;;  %v13844_v53 = vld [vmem:[#allocation46_spill] sm:$0xff] }
 0x132   :  { %1199 = vmatprep.mubr.f32.mxu0 %v13783_v62  ;;  %2679 = vmatprep.mubr.f32.mxu1 %v13783_v62  ;;  %v13791_v62 = vld [vmem:[#allocation74_spill] sm:$0xff] }
 0x133   :  { %1202 = vmatmul.mubr.f32.gmra.mrb[2].mxu0 %v13784_v4  ;;  %2682 = vmatmul.mubr.f32.gmra.mrb[2].mxu1 %v13784_v4  ;;  %v13793_v4 = vld [vmem:[#allocation80_spill] sm:$0xff] }
 0x134   :  { %6543 = vmatpush1.bf16.msra.mxu0 %v13785_v49  ;;  %6903 = vmatpush1.bf16.msra.mxu1 %v13786_v20  ;;  %v13794_v49 = vld [vmem:[#allocation84_spill] sm:$0xff]  ;;  %v13815_v20 = vld [vmem:[#allocation137_spill] sm:$0xff] }
 0x135   :  { %6545 = vmatprep.subr.bf16.mxu0 %v13787_v48  ;;  %6905 = vmatprep.subr.bf16.mxu1 %v13788_v26  ;;  %v13796_v26 = vld [vmem:[#allocation89_spill] sm:$0xff]  ;;  %v13809_v48 = vld [vmem:[#allocation119_spill] sm:$0xff] }
 0x136   :  { %1209 = vmatprep.mubr.f32.mxu0 %v13789_v55  ;;  %2689 = vmatprep.mubr.f32.mxu1 %v13789_v55  ;;  %v13795_v55 = vld [vmem:[#allocation87_spill] sm:$0xff] }
 0x137   :  { %1212 = vmatmul.mubr.f32.gmra.mrb[4].mxu0 %v13790_v38  ;;  %2692 = vmatmul.mubr.f32.gmra.mrb[4].mxu1 %v13790_v38  ;;  %v13797_v38 = vld [vmem:[#allocation92_spill] sm:$0xff] }
 0x138   :  { %6547 = vmatpush1.bf16.msra.mxu0 %v13791_v62  ;;  %6907 = vmatpush1.bf16.msra.mxu1 %v13792_v25  ;;  %v13798_v62 = vld [vmem:[#allocation95_spill] sm:$0xff]  ;;  %v13799_v25 = vld [vmem:[#allocation212_spill] sm:$0xff] }
 0x139   :  { %6549 = vmatprep.subr.bf16.mxu0 %v13793_v4  ;;  %6909 = vmatprep.subr.bf16.mxu1 %v13794_v49  ;;  %v13800_v49 = vld [vmem:[#allocation237_spill] sm:$0xff] }
 0x13a   :  { %1219 = vmatprep.mubr.f32.mxu0 %v9574_v28  ;;  %2699 = vmatprep.mubr.f32.mxu1 %v9574_v28  ;;  %v13801_v28 = vld [vmem:[#allocation98_spill] sm:$0xff]  ;;  %v13802_v4 = vld [vmem:[#allocation101_spill] sm:$0xff] }
 0x13b   :  { %1222 = vmatmul.mubr.f32.gmra.mrb[6].mxu0 %v9595_v17  ;;  %2702 = vmatmul.mubr.f32.gmra.mrb[6].mxu1 %v9595_v17  ;;  %v13803_v17 = vld [vmem:[#allocation104_spill] sm:$0xff] }
 0x13c   :  { %6551 = vmatpush1.bf16.msra.mxu0 %v13795_v55  ;;  %6911 = vmatpush1.bf16.msra.mxu1 %v13796_v26  ;;  %v13804_v55 = vld [vmem:[#allocation108_spill] sm:$0xff]  ;;  %v13805_v26 = vld [vmem:[#allocation222_spill] sm:$0xff] }
 0x13d   :  { %6553 = vmatprep.subr.bf16.mxu0 %v13797_v38  ;;  %6913 = vmatprep.subr.bf16.mxu1 %v13798_v62  ;;  %v13806_v62 = vld [vmem:[#allocation110_spill] sm:$0xff]  ;;  %v13807_v38 = vld [vmem:[#allocation113_spill] sm:$0xff] }
 0x13e   :  { %1229 = vmatprep.mubr.f32.mxu0 %v13799_v25  ;;  %2709 = vmatprep.mubr.f32.mxu1 %v13799_v25  ;;  %v13808_v25 = vld [vmem:[#allocation117_spill] sm:$0xff] }
 0x13f   :  { %1232 = vmatmul.mubr.f32.gmra.mrb[8].mxu0 %v13800_v49  ;;  %2712 = vmatmul.mubr.f32.gmra.mrb[8].mxu1 %v13800_v49  ;;  %v13810_v49 = vld [vmem:[#allocation122_spill] sm:$0xff] }
 0x140   :  { %6555 = vmatpush1.bf16.msra.mxu0 %v13801_v28  ;;  %6915 = vmatpush1.bf16.msra.mxu1 %v13802_v4  ;;  %v13811_v28 = vld [vmem:[#allocation125_spill] sm:$0xff] }
 0x141   :  { %6557 = vmatprep.subr.bf16.mxu0 %v13803_v17  ;;  %6917 = vmatprep.subr.bf16.mxu1 %v13804_v55  ;;  %v13812_v4 = vld [vmem:[#allocation129_spill] sm:$0xff]  ;;  %v13813_v17 = vld [vmem:[#allocation131_spill] sm:$0xff]  ;;  %v13814_v55 = vld [vmem:[#allocation134_spill] sm:$0xff] }
 0x142   :  { %1365 = vmatprep.mubr.f32.mxu0 %v13805_v26  ;;  %2845 = vmatprep.mubr.f32.mxu1 %v13805_v26  ;;  %v13816_v26 = vld [vmem:[#allocation141_spill] sm:$0xff] }
 0x144   :  { %6559 = vmatpush1.bf16.msra.mxu0 %v13806_v62  ;;  %6919 = vmatpush1.bf16.msra.mxu1 %v13807_v38  ;;  %v13817_v62 = vld [vmem:[#allocation143_spill] sm:$0xff]  ;;  %v13818_v38 = vld [vmem:[#allocation146_spill] sm:$0xff] }
 0x145   :  { %6561 = vmatprep.subr.bf16.mxu0 %v13808_v25  ;;  %6921 = vmatprep.subr.bf16.mxu1 %v13809_v48  ;;  %v13819_v25 = vld [vmem:[#allocation149_spill] sm:$0xff] }
 0x146   :  { %v13820_v48 = vld [vmem:[#allocation153_spill] sm:$0xff] }
 0x148   :  { %6563 = vmatpush1.bf16.msra.mxu0 %v13810_v49  ;;  %6923 = vmatpush1.bf16.msra.mxu1 %v13811_v28  ;;  %v13821_v49 = vld [vmem:[#allocation155_spill] sm:$0xff]  ;;  %v13822_v28 = vld [vmem:[#allocation158_spill] sm:$0xff] }
 0x149   :  { %6565 = vmatprep.subr.bf16.mxu0 %v13812_v4  ;;  %6925 = vmatprep.subr.bf16.mxu1 %v13813_v17  ;;  %v13823_v4 = vld [vmem:[#allocation161_spill] sm:$0xff] }
 0x14a   :  { %v13824_v17 = vld [vmem:[#allocation165_spill] sm:$0xff] }
 0x14c   :  { %6567 = vmatpush1.bf16.msra.mxu0 %v13814_v55  ;;  %6927 = vmatpush1.bf16.msra.mxu1 %v13815_v20  ;;  %v13825_v55 = vld [vmem:[#allocation167_spill] sm:$0xff]  ;;  %v13826_v20 = vld [vmem:[#allocation170_spill] sm:$0xff] }
 0x14d   :  { %6569 = vmatprep.subr.bf16.mxu0 %v13816_v26  ;;  %6929 = vmatprep.subr.bf16.mxu1 %v13817_v62  ;;  %v13827_v26 = vld [vmem:[#allocation173_spill] sm:$0xff] }
 0x14e   :  { %v13828_v62 = vld [vmem:[#allocation177_spill] sm:$0xff] }
 0x150   :  { %6571 = vmatpush1.bf16.msra.mxu0 %v13818_v38  ;;  %6931 = vmatpush1.bf16.msra.mxu1 %v13819_v25  ;;  %v13829_v38 = vld [vmem:[#allocation179_spill] sm:$0xff]  ;;  %v13830_v25 = vld [vmem:[#allocation182_spill] sm:$0xff] }
 0x151   :  { %6573 = vmatprep.subr.bf16.mxu0 %v13820_v48  ;;  %6933 = vmatprep.subr.bf16.mxu1 %v13821_v49  ;;  %v13831_v48 = vld [vmem:[#allocation185_spill] sm:$0xff] }
 0x152   :  { %v13832_v49 = vld [vmem:[#allocation189_spill] sm:$0xff] }
 0x154   :  { %6575 = vmatpush1.bf16.msra.mxu0 %v13822_v28  ;;  %6935 = vmatpush1.bf16.msra.mxu1 %v13823_v4  ;;  %v13833_v28 = vld [vmem:[#allocation191_spill] sm:$0xff]  ;;  %v13834_v4 = vld [vmem:[#allocation194_spill] sm:$0xff] }
 0x155   :  { %6577 = vmatprep.subr.bf16.mxu0 %v13824_v17  ;;  %6937 = vmatprep.subr.bf16.mxu1 %v13825_v55  ;;  %v13835_v17 = vld [vmem:[#allocation197_spill] sm:$0xff] }
 0x156   :  { %v13836_v55 = vld [vmem:[#allocation201_spill] sm:$0xff] }
 0x158   :  { %6579 = vmatpush1.bf16.msra.mxu0 %v13826_v20  ;;  %6939 = vmatpush1.bf16.msra.mxu1 %v13827_v26  ;;  %v13837_v20 = vld [vmem:[#allocation203_spill] sm:$0xff]  ;;  %v13838_v26 = vld [vmem:[#allocation206_spill] sm:$0xff] }
 0x159   :  { %6581 = vmatprep.subr.bf16.mxu0 %v13828_v62  ;;  %6941 = vmatprep.subr.bf16.mxu1 %v13829_v38  ;;  %v13839_v62 = vld [vmem:[#allocation209_spill] sm:$0xff] }
 0x15a   :  { %v13840_v38 = vld [vmem:[#allocation213_spill] sm:$0xff] }
 0x15c   :  { %6583 = vmatpush1.bf16.msra.mxu0 %v13830_v25  ;;  %6943 = vmatpush1.bf16.msra.mxu1 %v13831_v48  ;;  %v13841_v25 = vld [vmem:[#allocation214_spill] sm:$0xff]  ;;  %v13842_v48 = vld [vmem:[#allocation45_spill] sm:$0xff] }
 0x15d   :  { %6585 = vmatprep.subr.bf16.mxu0 %v13832_v49  ;;  %6945 = vmatprep.subr.bf16.mxu1 %v13833_v28  ;;  %v13843_v49 = vand.u32 4294901760, %v13842_v48  ;;  %v13845_v28 = vand.u32 4294901760, %v13844_v53  ;;  %v13858_v48 = vld [vmem:[#allocation55_spill] sm:$0xff] }
 0x15e   :  { %v13859_v41 = vand.u32 4294901760, %v13858_v48 }
 0x15f   :  { %v6596_v31 = vpack.c.bf16 %v13845_v28, %v13843_v49  ;;  %v13860_v28 = vld [vmem:[#allocation57_spill] sm:$0xff]  ;;  %v13864_v49 = vld [vmem:[#allocation60_spill] sm:$0xff] }
 0x160   :  { %6587 = vmatpush1.bf16.msra.mxu0 %v13834_v4  ;;  %6947 = vmatpush1.bf16.msra.mxu1 %v13835_v17  ;;  %v13846_v4 = vld [vmem:[#allocation48_spill] sm:$0xff]  ;;  %v13848_v17 = vld [vmem:[#allocation49_spill] sm:$0xff] }
 0x161   :  { %6589 = vmatprep.subr.bf16.mxu0 %v13836_v55  ;;  %6949 = vmatprep.subr.bf16.mxu1 %v13837_v20  ;;  %v13847_v0 = vand.u32 4294901760, %v13846_v4  ;;  %v13849_v43 = vand.u32 4294901760, %v13848_v17  ;;  %v13851_v20 = vld [vmem:[#allocation216_spill] sm:$0xff]  ;;  %v13861_v4 = vand.u32 4294901760, %v13860_v28  ;;  %v13862_v17 = vld [vmem:[#allocation58_spill] sm:$0xff] }
 0x163   :  { %v6956_v55 = vpack.c.bf16 %v13849_v43, %v13847_v0  ;;  %v13863_v43 = vand.u32 4294901760, %v13862_v17 }
 0x164   :  { %6591 = vmatpush1.bf16.msra.mxu0 %v13838_v26  ;;  %6951 = vmatpush1.bf16.msra.mxu1 %v13839_v62  ;;  %v13852_v26 = vld [vmem:[#allocation50_spill] sm:$0xff] }
 0x165   :  { %6593 = vmatprep.subr.bf16.mxu0 %v13840_v38  ;;  %6953 = vmatprep.subr.bf16.mxu1 %v13841_v25  ;;  %v13853_v62 = vand.u32 4294901760, %v13852_v26  ;;  %v13855_v38 = vand.u32 4294901760, %v13854_v9  ;;  %v13856_v25 = vld [vmem:[#allocation54_spill] sm:$0xff]  ;;  %v6600_v0 = vpack.c.bf16 %v13863_v43, %v13861_v4  ;;  %v13881_v43 = vld [vmem:[#allocation72_spill] sm:$0xff] }
 0x166   :  { %v13857_v54 = vand.u32 4294901760, %v13856_v25  ;;  %v13869_v9 = vld [vmem:[#allocation62_spill] sm:$0xff] }
 0x167   :  { %v6598_v50 = vpack.c.bf16 %v13855_v38, %v13853_v62  ;;  %v13873_v62 = vld [vmem:[#allocation66_spill] sm:$0xff]  ;;  %v13875_v38 = vld [vmem:[#allocation67_spill] sm:$0xff] }
 0x168   :  { %6595 = vmatpush1.bf16.msra.mxu0 %v13850_v32  ;;  %6955 = vmatpush1.bf16.msra.mxu1 %v13851_v20  ;;  %v6958_v53 = vpack.c.bf16 %v13859_v41, %v13857_v54  ;;  %v13865_v32 = vand.u32 4294901760, %v13864_v49  ;;  %v13866_v20 = vld [vmem:[#allocation61_spill] sm:$0xff]  ;;  %v13870_v41 = vand.u32 4294901760, %v13869_v9  ;;  %v13871_v54 = vld [vmem:[#allocation64_spill] sm:$0xff]  ;;  %v13876_v48 = vand.u32 4294901760, %v13875_v38 }
 0x169   :  { %6597 = vmatprep.subr.bf16.mxu0 %v6596_v31  ;;  %6957 = vmatprep.subr.bf16.mxu1 %v6956_v55  ;;  %v13867_v29 = vand.u32 4294901760, %v13866_v20  ;;  %v13872_v25 = vand.u32 4294901760, %v13871_v54  ;;  %v13874_v55 = vand.u32 4294901760, %v13873_v62  ;;  %v13877_v20 = vld [vmem:[#allocation69_spill] sm:$0xff]  ;;  %v13889_v54 = vld [vmem:[#allocation76_spill] sm:$0xff] }
 0x16b   :  { %v6960_v26 = vpack.c.bf16 %v13867_v29, %v13865_v32  ;;  %1369 = vmatmul.mubr.f32.vlgmr.msra.gmra.mrb[0].mxu0 %v13868_v39  ;;  %2849 = vmatmul.mubr.f32.vlgmr.msra.gmra.mrb[0].mxu1 %v13868_v39  ;;  %v6602_v31 = vpack.c.bf16 %v13872_v25, %v13870_v41  ;;  %v6962_v28 = vpack.c.bf16 %v13876_v48, %v13874_v55  ;;  %v13878_v29 = vand.u32 4294901760, %v13877_v20  ;;  %v13879_v32 = vld [vmem:[#allocation70_spill] sm:$0xff]  ;;  %v13886_v41 = vld [vmem:[#allocation169_spill] sm:$0xff]  ;;  %v13893_v48 = vld [vmem:[#allocation79_spill] sm:$0xff] }
 0x16c   :  { %6599 = vmatpush1.bf16.msra.mxu0 %v6598_v50  ;;  %6959 = vmatpush1.bf16.msra.mxu1 %v6958_v53  ;;  %v13880_v4 = vand.u32 4294901760, %v13879_v32  ;;  %v13882_v50 = vand.u32 4294901760, %v13881_v43  ;;  %v13883_v53 = vld [vmem:[#allocation73_spill] sm:$0xff]  ;;  %v13885_v39 = vld [vmem:[#allocation166_spill] sm:$0xff]  ;;  %v13890_v25 = vand.u32 4294901760, %v13889_v54  ;;  %v13894_v20 = vand.u32 4294901760, %v13893_v48 }
 0x16d   :  { %6601 = vmatprep.subr.bf16.mxu0 %v6600_v0  ;;  %6961 = vmatprep.subr.bf16.mxu1 %v6960_v26  ;;  %v13884_v49 = vand.u32 4294901760, %v13883_v53  ;;  %v13887_v0 = vld [vmem:[#allocation75_spill] sm:$0xff]  ;;  %v13891_v55 = vld [vmem:[#allocation77_spill] sm:$0xff]  ;;  %v13897_v43 = vld [vmem:[#allocation82_spill] sm:$0xff] }
 0x16e   :  { %v6604_v17 = vpack.c.bf16 %v13880_v4, %v13878_v29  ;;  %1377 = vmatprep.mubr.f32.mxu0 %v13885_v39  ;;  %2857 = vmatprep.mubr.f32.mxu1 %v13885_v39  ;;  %v13888_v26 = vand.u32 4294901760, %v13887_v0  ;;  %v13892_v38 = vand.u32 4294901760, %v13891_v55  ;;  %v13895_v32 = vld [vmem:[#allocation81_spill] sm:$0xff]  ;;  %v13903_v39 = vld [vmem:[#allocation176_spill] sm:$0xff] }
 0x16f   :  { %v6964_v9 = vpack.c.bf16 %v13884_v49, %v13882_v50  ;;  %1381 = vmatmul.mubr.f32.gmra.mrb[2].mxu0 %v13886_v41  ;;  %2861 = vmatmul.mubr.f32.gmra.mrb[2].mxu1 %v13886_v41  ;;  %v13896_v4 = vand.u32 4294901760, %v13895_v32  ;;  %v13898_v50 = vand.u32 4294901760, %v13897_v43  ;;  %v13899_v49 = vld [vmem:[#allocation83_spill] sm:$0xff]  ;;  %v13907_v54 = vld [vmem:[#allocation88_spill] sm:$0xff] }
 0x170   :  { %6603 = vmatpush1.bf16.msra.mxu0 %v6602_v31  ;;  %6963 = vmatpush1.bf16.msra.mxu1 %v6962_v28  ;;  %v6606_v62 = vpack.c.bf16 %v13890_v25, %v13888_v26  ;;  %v6966_v29 = vpack.c.bf16 %v13894_v20, %v13892_v38  ;;  %v13900_v31 = vand.u32 4294901760, %v13899_v49  ;;  %v13901_v28 = vld [vmem:[#allocation85_spill] sm:$0xff]  ;;  %v13904_v26 = vld [vmem:[#allocation196_spill] sm:$0xff]  ;;  %v13908_v25 = vand.u32 4294901760, %v13907_v54  ;;  %v13909_v38 = vld [vmem:[#allocation90_spill] sm:$0xff] }
 0x171   :  { %6605 = vmatprep.subr.bf16.mxu0 %v6604_v17  ;;  %6965 = vmatprep.subr.bf16.mxu1 %v6964_v9  ;;  %v6608_v53 = vpack.c.bf16 %v13898_v50, %v13896_v4  ;;  %v13902_v41 = vand.u32 4294901760, %v13901_v28  ;;  %v13905_v17 = vld [vmem:[#allocation86_spill] sm:$0xff]  ;;  %v13910_v48 = vand.u32 4294901760, %v13909_v38  ;;  %v13911_v20 = vld [vmem:[#allocation91_spill] sm:$0xff]  ;;  %v13913_v4 = vld [vmem:[#allocation93_spill] sm:$0xff] }
 0x172   :  { %1389 = vmatprep.mubr.f32.mxu0 %v13903_v39  ;;  %2869 = vmatprep.mubr.f32.mxu1 %v13903_v39  ;;  %v13906_v9 = vand.u32 4294901760, %v13905_v17  ;;  %v13912_v32 = vand.u32 4294901760, %v13911_v20  ;;  %v13914_v43 = vand.u32 4294901760, %v13913_v4  ;;  %v13915_v50 = vld [vmem:[#allocation94_spill] sm:$0xff]  ;;  %v13917_v28 = vld [vmem:[#allocation96_spill] sm:$0xff]  ;;  %v13921_v39 = vld [vmem:[#allocation229_spill] sm:$0xff] }
 0x173   :  { %v6968_v0 = vpack.c.bf16 %v13902_v41, %v13900_v31  ;;  %1393 = vmatmul.mubr.f32.gmra.mrb[4].mxu0 %v13904_v26  ;;  %2873 = vmatmul.mubr.f32.gmra.mrb[4].mxu1 %v13904_v26  ;;  %v13916_v49 = vand.u32 4294901760, %v13915_v50  ;;  %v13925_v54 = vld [vmem:[#allocation100_spill] sm:$0xff] }
 0x174   :  { %6607 = vmatpush1.bf16.msra.mxu0 %v6606_v62  ;;  %6967 = vmatpush1.bf16.msra.mxu1 %v6966_v29  ;;  %v6610_v55 = vpack.c.bf16 %v13908_v25, %v13906_v9  ;;  %v6970_v41 = vpack.c.bf16 %v13912_v32, %v13910_v48  ;;  %v13918_v62 = vand.u32 4294901760, %v13917_v28  ;;  %v13919_v29 = vld [vmem:[#allocation97_spill] sm:$0xff]  ;;  %v13922_v9 = vld [vmem:[#allocation231_spill] sm:$0xff]  ;;  %v13926_v25 = vand.u32 4294901760, %v13925_v54  ;;  %v13927_v48 = vld [vmem:[#allocation102_spill] sm:$0xff] }
 0x175   :  { %6609 = vmatprep.subr.bf16.mxu0 %v6608_v53  ;;  %6969 = vmatprep.subr.bf16.mxu1 %v6968_v0  ;;  %v6612_v31 = vpack.c.bf16 %v13916_v49, %v13914_v43  ;;  %v13920_v26 = vand.u32 4294901760, %v13919_v29  ;;  %v13923_v53 = vld [vmem:[#allocation99_spill] sm:$0xff]  ;;  %v13928_v20 = vand.u32 4294901760, %v13927_v48  ;;  %v13931_v43 = vld [vmem:[#allocation105_spill] sm:$0xff]  ;;  %v13933_v49 = vld [vmem:[#allocation106_spill] sm:$0xff] }
 0x176   :  { %1401 = vmatprep.mubr.f32.mxu0 %v13921_v39  ;;  %2881 = vmatprep.mubr.f32.mxu1 %v13921_v39  ;;  %v13924_v0 = vand.u32 4294901760, %v13923_v53  ;;  %v13929_v32 = vld [vmem:[#allocation103_spill] sm:$0xff]  ;;  %v13932_v50 = vand.u32 4294901760, %v13931_v43  ;;  %v13934_v28 = vand.u32 4294901760, %v13933_v49  ;;  %v13943_v54 = vld [vmem:[#allocation112_spill] sm:$0xff] }
 0x177   :  { %v6972_v17 = vpack.c.bf16 %v13920_v26, %v13918_v62  ;;  %1405 = vmatmul.mubr.f32.gmra.mrb[6].mxu0 %v13922_v9  ;;  %2885 = vmatmul.mubr.f32.gmra.mrb[6].mxu1 %v13922_v9  ;;  %v13930_v4 = vand.u32 4294901760, %v13929_v32  ;;  %v13935_v29 = vld [vmem:[#allocation107_spill] sm:$0xff] }
 0x178   :  { %6611 = vmatpush1.bf16.msra.mxu0 %v6610_v55  ;;  %6971 = vmatpush1.bf16.msra.mxu1 %v6970_v41  ;;  %v6614_v38 = vpack.c.bf16 %v13926_v25, %v13924_v0  ;;  %v6616_v62 = vpack.c.bf16 %v13934_v28, %v13932_v50  ;;  %v13936_v55 = vand.u32 4294901760, %v13935_v29  ;;  %v13937_v41 = vld [vmem:[#allocation109_spill] sm:$0xff]  ;;  %v13939_v39 = vld [vmem:[#allocation235_spill] sm:$0xff]  ;;  %v13944_v25 = vand.u32 4294901760, %v13943_v54  ;;  %v13949_v50 = vld [vmem:[#allocation116_spill] sm:$0xff] }
 0x179   :  { %v6974_v26 = vpack.c.bf16 %v13930_v4, %v13928_v20  ;;  %6613 = vmatprep.subr.bf16.mxu0 %v6612_v31  ;;  %6973 = vmatprep.subr.bf16.mxu1 %v6972_v17  ;;  %v13938_v9 = vand.u32 4294901760, %v13937_v41  ;;  %v13940_v0 = vld [vmem:[#allocation239_spill] sm:$0xff]  ;;  %v13945_v20 = vld [vmem:[#allocation114_spill] sm:$0xff]  ;;  %v13950_v49 = vand.u32 4294901760, %v13949_v50  ;;  %v13953_v41 = vld [vmem:[#allocation120_spill] sm:$0xff] }
 0x17a   :  { %1413 = vmatprep.mubr.f32.mxu0 %v13939_v39  ;;  %2893 = vmatprep.mubr.f32.mxu1 %v13939_v39  ;;  %v13941_v31 = vld [vmem:[#allocation111_spill] sm:$0xff]  ;;  %v13946_v32 = vand.u32 4294901760, %v13945_v20  ;;  %v13951_v28 = vld [vmem:[#allocation118_spill] sm:$0xff] }
 0x17b   :  { %v6976_v53 = vpack.c.bf16 %v13938_v9, %v13936_v55  ;;  %1417 = vmatmul.mubr.f32.gmra.mrb[8].mxu0 %v13940_v0  ;;  %2897 = vmatmul.mubr.f32.gmra.mrb[8].mxu1 %v13940_v0  ;;  %v13942_v17 = vand.u32 4294901760, %v13941_v31  ;;  %v13947_v4 = vld [vmem:[#allocation115_spill] sm:$0xff]  ;;  %v13952_v29 = vand.u32 4294901760, %v13951_v28  ;;  %v13957_v39 = vld [vmem:[#allocation218_spill] sm:$0xff] }
 0x17c   :  { %6615 = vmatpush1.bf16.msra.mxu0 %v6614_v38  ;;  %6975 = vmatpush1.bf16.msra.mxu1 %v6974_v26  ;;  %v13948_v43 = vand.u32 4294901760, %v13947_v4  ;;  %v13954_v38 = vand.u32 4294901760, %v13953_v41  ;;  %v13955_v26 = vld [vmem:[#allocation121_spill] sm:$0xff]  ;;  %v13962_v20 = vld [vmem:[#allocation126_spill] sm:$0xff]  ;;  %v13964_v4 = vld [vmem:[#allocation127_spill] sm:$0xff] }
 0x17d   :  { %v6618_v48 = vpack.c.bf16 %v13944_v25, %v13942_v17  ;;  %6617 = vmatprep.subr.bf16.mxu0 %v6616_v62  ;;  %6977 = vmatprep.subr.bf16.mxu1 %v6976_v53  ;;  %v6620_v55 = vpack.c.bf16 %v13952_v29, %v13950_v49  ;;  %v13956_v0 = vand.u32 4294901760, %v13955_v26  ;;  %v13958_v17 = vld [vmem:[#allocation123_spill] sm:$0xff]  ;;  %v13960_v62 = vld [vmem:[#allocation124_spill] sm:$0xff]  ;;  %v13968_v28 = vld [vmem:[#allocation130_spill] sm:$0xff] }
 0x17e   :  { %v6978_v9 = vpack.c.bf16 %v13948_v43, %v13946_v32  ;;  %1668 = vmatprep.mubr.f32.mxu0 %v13957_v39  ;;  %3148 = vmatprep.mubr.f32.mxu1 %v13957_v39  ;;  %v13959_v54 = vand.u32 4294901760, %v13958_v17  ;;  %v13961_v53 = vand.u32 4294901760, %v13960_v62  ;;  %v13963_v32 = vand.u32 4294901760, %v13962_v20  ;;  %v13966_v49 = vld [vmem:[#allocation128_spill] sm:$0xff] }
 0x17f   :  { %v6980_v31 = vpack.c.bf16 %v13956_v0, %v13954_v38  ;;  %v13965_v43 = vand.u32 4294901760, %v13964_v4  ;;  %v13967_v0 = vand.u32 4294901760, %v13966_v49  ;;  %v13969_v29 = vand.u32 4294901760, %v13968_v28  ;;  %v13970_v38 = vld [vmem:[#allocation132_spill] sm:$0xff]  ;;  %v13983_v28 = vld [vmem:[#allocation142_spill] sm:$0xff] }
 0x180   :  { %6619 = vmatpush1.bf16.msra.mxu0 %v6618_v48  ;;  %6979 = vmatpush1.bf16.msra.mxu1 %v6978_v9  ;;  %v6622_v25 = vpack.c.bf16 %v13961_v53, %v13959_v54  ;;  %v13971_v48 = vand.u32 4294901760, %v13970_v38  ;;  %v13972_v9 = vld [vmem:[#allocation133_spill] sm:$0xff]  ;;  %v13974_v54 = vld [vmem:[#allocation135_spill] sm:$0xff]  ;;  %v13976_v53 = vld [vmem:[#allocation136_spill] sm:$0xff] }
 0x181   :  { %v6982_v50 = vpack.c.bf16 %v13965_v43, %v13963_v32  ;;  %6621 = vmatprep.subr.bf16.mxu0 %v6620_v55  ;;  %6981 = vmatprep.subr.bf16.mxu1 %v6980_v31  ;;  %v6624_v41 = vpack.c.bf16 %v13969_v29, %v13967_v0  ;;  %v13973_v26 = vand.u32 4294901760, %v13972_v9  ;;  %v13975_v62 = vand.u32 4294901760, %v13974_v54  ;;  %v13978_v32 = vld [vmem:[#allocation138_spill] sm:$0xff]  ;;  %v13980_v31 = vld [vmem:[#allocation139_spill] sm:$0xff] }
 0x182   :  { %v13977_v20 = vand.u32 4294901760, %v13976_v53  ;;  %v13979_v55 = vand.u32 4294901760, %v13978_v32  ;;  %v13981_v43 = vand.u32 4294901760, %v13980_v31  ;;  %v13982_v0 = vand.u32 4294901760, %v13729_v11 }
 0x183   :  { %v6984_v17 = vpack.c.bf16 %v13973_v26, %v13971_v48  ;;  %v13984_v29 = vand.u32 4294901760, %v13983_v28  ;;  %v13988_v26 = vand.u32 4294901760, %v13733_v30  ;;  %v13989_v54 = vand.u32 4294901760, %v13734_v61 }
 0x184   :  { %6623 = vmatpush1.bf16.msra.mxu0 %v6622_v25  ;;  %6983 = vmatpush1.bf16.msra.mxu1 %v6982_v50  ;;  %v6626_v4 = vpack.c.bf16 %v13977_v20, %v13975_v62  ;;  %v6986_v49 = vpack.c.bf16 %v13981_v43, %v13979_v55  ;;  %v13985_v25 = vand.u32 4294901760, %v13731_v35  ;;  %v13986_v50 = vld [vmem:[#allocation145_spill] sm:$0xff]  ;;  %v13992_v53 = vand.u32 4294901760, %v13737_v46 }
 0x185   :  { %6625 = vmatprep.subr.bf16.mxu0 %v6624_v41  ;;  %6985 = vmatprep.subr.bf16.mxu1 %v6984_v17  ;;  %v6628_v38 = vpack.c.bf16 %v13984_v29, %v13982_v0  ;;  %v13987_v48 = vand.u32 4294901760, %v13986_v50  ;;  %v6630_v62 = vpack.c.bf16 %v13989_v54, %v13988_v26  ;;  %v13990_v41 = vand.u32 4294901760, %v13735_v51 }
 0x186   :  { %v13991_v17 = vand.u32 4294901760, %v13736_v40  ;;  %v13993_v35 = vand.u32 4294901760, %v13738_v8  ;;  %v13995_v32 = vand.u32 4294901760, %v13740_v44  ;;  %v13996_v61 = vand.u32 4294901760, %v13741_v23 }
 0x187   :  { %v6988_v9 = vpack.c.bf16 %v13987_v48, %v13985_v25  ;;  %v13997_v51 = vand.u32 4294901760, %v13742_v58  ;;  %v13998_v55 = vand.u32 4294901760, %v13587_v2  ;;  %v13999_v31 = vand.u32 4294901760, %v13588_v37  ;;  %v14014_v25 = vld [vmem:[#allocation186_spill] sm:$0xff]  ;;  %v14016_v48 = vld [vmem:[#allocation187_spill] sm:$0xff] }
 0x188   :  { %6627 = vmatpush1.bf16.msra.mxu0 %v6626_v4  ;;  %6987 = vmatpush1.bf16.msra.mxu1 %v6986_v49  ;;  %v6990_v11 = vpack.c.bf16 %v13991_v17, %v13990_v41  ;;  %v6632_v20 = vpack.c.bf16 %v13993_v35, %v13992_v53  ;;  %v13994_v4 = vand.u32 4294901760, %v13739_v3  ;;  %v14000_v8 = vand.u32 4294901760, %v13589_v59 }
 0x189   :  { %6629 = vmatprep.subr.bf16.mxu0 %v6628_v38  ;;  %6989 = vmatprep.subr.bf16.mxu1 %v6988_v9  ;;  %v6634_v40 = vpack.c.bf16 %v13997_v51, %v13996_v61  ;;  %v6994_v46 = vpack.c.bf16 %v13999_v31, %v13998_v55  ;;  %v14001_v3 = vand.u32 4294901760, %v13590_v10  ;;  %v14002_v43 = vand.u32 4294901760, %v13591_v34  ;;  %v14039_v61 = vld [vmem:[#allocation190_spill] sm:$0xff]  ;;  %v14042_v51 = vld [vmem:[#allocation217_spill] sm:$0xff]  ;;  %v14045_v31 = vld [vmem:[#allocation56_spill] sm:$0xff] }
 0x18a   :  { %v6992_v30 = vpack.c.bf16 %v13995_v32, %v13994_v4  ;;  %v14003_v49 = vand.u32 4294901760, %v13592_v56  ;;  %v14004_v58 = vand.u32 4294901760, %v13593_v18  ;;  %v14005_v2 = vand.u32 4294901760, %v13594_v47  ;;  %v14034_v32 = vld [vmem:[#allocation211_spill] sm:$0xff]  ;;  %v14044_v55 = vld [vmem:[#allocation53_spill] sm:$0xff] }
 0x18b   :  { %v6636_v44 = vpack.c.bf16 %v14001_v3, %v14000_v8  ;;  %v14006_v0 = vand.u32 4294901760, %v13595_v6  ;;  %v14007_v28 = vand.u32 4294901760, %v13596_v27  ;;  %v14008_v10 = vand.u32 4294901760, %v13597_v21  ;;  %v14047_v8 = vld [vmem:[#allocation162_spill] sm:$0xff]  ;;  %v14048_v3 = vld [vmem:[#allocation164_spill] sm:$0xff] }
 0x18c   :  { %6631 = vmatpush1.bf16.msra.mxu0 %v6630_v62  ;;  %6991 = vmatpush1.bf16.msra.mxu1 %v6990_v11  ;;  %v6996_v23 = vpack.c.bf16 %v14003_v49, %v14002_v43  ;;  %v6638_v37 = vpack.c.bf16 %v14005_v2, %v14004_v58  ;;  %v14009_v34 = vand.u32 4294901760, %v13598_v33  ;;  %v14010_v29 = vand.u32 4294901760, %v13599_v57  ;;  %v14050_v43 = vld [vmem:[#allocation65_spill] sm:$0xff]  ;;  %v14051_v49 = vld [vmem:[#allocation68_spill] sm:$0xff]  ;;  %v14054_v2 = vld [vmem:[#allocation178_spill] sm:$0xff] }
 0x18d   :  { %6633 = vmatprep.subr.bf16.mxu0 %v6632_v20  ;;  %6993 = vmatprep.subr.bf16.mxu1 %v6992_v30  ;;  %v6998_v59 = vpack.c.bf16 %v14007_v28, %v14006_v0  ;;  %v14011_v38 = vand.u32 4294901760, %v13601_v13  ;;  %v14012_v47 = vand.u32 4294901760, %v13674_v7  ;;  %v14013_v6 = vand.u32 4294901760, %v13675_v14  ;;  %v14032_v20 = vld [vmem:[#allocation210_spill] sm:$0xff]  ;;  %v14053_v58 = vld [vmem:[#allocation172_spill] sm:$0xff] }
 0x18e   :  { %v6640_v56 = vpack.c.bf16 %v14009_v34, %v14008_v10  ;;  %v14015_v50 = vand.u32 4294901760, %v14014_v25  ;;  %v14017_v9 = vand.u32 4294901760, %v14016_v48  ;;  %v14018_v33 = vand.u32 4294901760, %v13678_v1  ;;  %v14056_v0 = vld [vmem:[#allocation78_spill] sm:$0xff]  ;;  %v14057_v28 = vld [vmem:[#allocation80_spill] sm:$0xff]  ;;  %v178_v48 = vld [vmem:[%s12475_s1 + $0x58] sm:$0xff] }
 0x18f   :  { %v7000_v18 = vpack.c.bf16 %v14011_v38, %v14010_v29  ;;  %v6642_v27 = vpack.c.bf16 %v14013_v6, %v14012_v47  ;;  %v14019_v57 = vand.u32 4294901760, %v13679_v52  ;;  %v14020_v26 = vand.u32 4294901760, %v13680_v60  ;;  %v14059_v10 = vld [vmem:[#allocation226_spill] sm:$0xff]  ;;  %v14060_v34 = vld [vmem:[#allocation228_spill] sm:$0xff]  ;;  %v14062_v29 = vld [vmem:[#allocation89_spill] sm:$0xff] }
 0x190   :  { %6635 = vmatpush1.bf16.msra.mxu0 %v6634_v40  ;;  %6995 = vmatpush1.bf16.msra.mxu1 %v6994_v46  ;;  %v7002_v21 = vpack.c.bf16 %v14017_v9, %v14015_v50  ;;  %v14021_v54 = vand.u32 4294901760, %v13681_v24  ;;  %v14022_v14 = vand.u32 4294901760, %v13682_v19  ;;  %v14023_v62 = vand.u32 4294901760, %v13623_v42  ;;  %v14043_v40 = vld [vmem:[#allocation51_spill] sm:$0xff]  ;;  %v14063_v38 = vld [vmem:[#allocation92_spill] sm:$0xff]  ;;  %v14065_v47 = vld [vmem:[#allocation233_spill] sm:$0xff] }
 0x191   :  { %6637 = vmatprep.subr.bf16.mxu0 %v6636_v44  ;;  %6997 = vmatprep.subr.bf16.mxu1 %v6996_v23  ;;  %v6644_v13 = vpack.c.bf16 %v14019_v57, %v14018_v33  ;;  %v14024_v17 = vand.u32 4294901760, %v13684_v15  ;;  %v14025_v11 = vand.u32 4294901760, %v13685_v5  ;;  %v14026_v52 = vand.u32 4294901760, %v13686_v16  ;;  %v14046_v46 = vld [vmem:[#allocation59_spill] sm:$0xff]  ;;  %v179_v25 = vld [vmem:[%s12475_s1 + $0x60] sm:$0xff]  ;;  %v14069_v33 = vld [vmem:[#allocation104_spill] sm:$0xff] }
 0x192   :  { %v7004_v7 = vpack.c.bf16 %v14021_v54, %v14020_v26  ;;  %v6646_v41 = vpack.c.bf16 %v14023_v62, %v14022_v14  ;;  %v14027_v60 = vand.u32 4294901760, %v13687_v22  ;;  %v14028_v53 = vand.u32 4294901760, %v13688_v36  ;;  %v14036_v22 = vld [vmem:[#allocation183_spill] sm:$0xff]  ;;  %v14038_v36 = vld [vmem:[#allocation188_spill] sm:$0xff]  ;;  %v171_v50 = vld [vmem:[%s12475_s1 + $0x20] sm:$0xff] }
 0x193   :  { %v7006_v1 = vpack.c.bf16 %v14025_v11, %v14024_v17  ;;  %v14029_v35 = vand.u32 4294901760, %v13689_v45  ;;  %v14030_v42 = vand.u32 4294901760, %v13691_v12  ;;  %v14031_v15 = vand.u32 4294901760, %v13692_v63  ;;  %v14037_v45 = vld [vmem:[#allocation184_spill] sm:$0xff]  ;;  %v14041_v63 = vld [vmem:[#allocation47_spill] sm:$0xff]  ;;  %v14067_v9 = vld [vmem:[#allocation98_spill] sm:$0xff] }
 0x194   :  { %6639 = vmatpush1.bf16.msra.mxu0 %v6638_v37  ;;  %6999 = vmatpush1.bf16.msra.mxu1 %v6998_v59  ;;  %v6648_v24 = vpack.c.bf16 %v14027_v60, %v14026_v52  ;;  %v14033_v4 = vand.u32 4294901760, %v14032_v20  ;;  %v14035_v30 = vand.u32 4294901760, %v14034_v32  ;;  %v14040_v12 = vld [vmem:[#allocation44_spill] sm:$0xff]  ;;  %v14049_v44 = vld [vmem:[#allocation63_spill] sm:$0xff]  ;;  %v14055_v37 = vld [vmem:[#allocation74_spill] sm:$0xff]  ;;  %v3355_v14 = vand.u32 4294901760, %v171_v50 }
 0x195   :  { %6641 = vmatprep.subr.bf16.mxu0 %v6640_v56  ;;  %7001 = vmatprep.subr.bf16.mxu1 %v7000_v18  ;;  %v7008_v19 = vpack.c.bf16 %v14029_v35, %v14028_v53  ;;  %v6650_v5 = vpack.c.bf16 %v14031_v15, %v14030_v42  ;;  %v14052_v23 = vld [vmem:[#allocation71_spill] sm:$0xff]  ;;  %v14058_v59 = vld [vmem:[#allocation84_spill] sm:$0xff]  ;;  %v3359_v62 = vand.u32 4294901760, %v178_v48  ;;  %v14071_v11 = vld [vmem:[#allocation110_spill] sm:$0xff] }
 0x196   :  { %v7010_v16 = vpack.c.bf16 %v14035_v30, %v14033_v4  ;;  %v14061_v56 = vld [vmem:[#allocation87_spill] sm:$0xff]  ;;  %v14070_v57 = vld [vmem:[#allocation108_spill] sm:$0xff]  ;;  %v14073_v35 = vld [vmem:[#allocation117_spill] sm:$0xff] }
 0x197   :  { %v14064_v18 = vld [vmem:[#allocation95_spill] sm:$0xff]  ;;  %v193_v17 = vld [vmem:[%s12475_s1 + $0xd0] sm:$0xff]  ;;  %v187_v42 = vld [vmem:[%s12475_s1 + $0xa0] sm:$0xff]  ;;  %v10328_v20 = vpack.c.bf16 %v3359_v62, %v3355_v14 }
 0x198   :  { %6643 = vmatpush1.bf16.msra.mxu0 %v6642_v27  ;;  %7003 = vmatpush1.bf16.msra.mxu1 %v7002_v21  ;;  %v172_v6 = vld [vmem:[%s12475_s1 + $0x28] sm:$0xff]  ;;  %v14066_v27 = vld [vmem:[#allocation236_spill] sm:$0xff]  ;;  %v14068_v21 = vld [vmem:[#allocation101_spill] sm:$0xff]  ;;  %v3365_v32 = vand.u32 4294901760, %v193_v17 }
 0x199   :  { %6645 = vmatprep.subr.bf16.mxu0 %v6644_v13  ;;  %7005 = vmatprep.subr.bf16.mxu1 %v7004_v7  ;;  %v173_v13 = vld [vmem:[%s12475_s1 + $0x30] sm:$0xff]  ;;  %v180_v26 = vld [vmem:[%s12475_s1 + $0x68] sm:$0xff]  ;;  %v3353_v54 = vand.u32 4294901760, %v172_v6  ;;  %v3357_v7 = vand.u32 4294901760, %v179_v25  ;;  %v194_v15 = vld [vmem:[%s12475_s1 + $0xd8] sm:$0xff]  ;;  %14076 = vst [vmem:[#allocation193_spill] sm:$0xff] %v10328_v20 }
 0x19a   :  { %v4834_v52 = vand.u32 4294901760, %v173_v13  ;;  %v4837_v60 = vand.u32 4294901760, %v180_v26  ;;  %v192_v53 = vld [vmem:[%s12475_s1 + $0xc8] sm:$0xff] }
 0x19b   :  { %v10330_v30 = vsub.f32 %v172_v6, %v3353_v54  ;;  %v208_v6 = vld [vmem:[%s12475_s1 + $0x148] sm:$0xff] }
 0x19c   :  { %6647 = vmatpush1.bf16.msra.mxu0 %v6646_v41  ;;  %7007 = vmatpush1.bf16.msra.mxu1 %v7006_v1  ;;  %v186_v41 = vld [vmem:[%s12475_s1 + $0x98] sm:$0xff] }
 0x19d   :  { %6649 = vmatprep.subr.bf16.mxu0 %v6648_v24  ;;  %7009 = vmatprep.subr.bf16.mxu1 %v7008_v19  ;;  %v14072_v1 = vld [vmem:[#allocation113_spill] sm:$0xff]  ;;  %v185_v24 = vld [vmem:[%s12475_s1 + $0x90] sm:$0xff]  ;;  %v14074_v19 = vld [vmem:[#allocation119_spill] sm:$0xff]  ;;  %v3361_v4 = vand.u32 4294901760, %v186_v41  ;;  %14077 = vst [vmem:[#allocation195_spill] sm:$0xff] %v10330_v30 }
 0x1a0   :  { %6651 = vmatpush1.bf16.msra.mxu0 %v6650_v5  ;;  %7011 = vmatpush1.bf16.msra.mxu1 %v7010_v16  ;;  %v10326_v5 = vpack.c.bf16 %v3357_v7, %v3353_v54  ;;  %v10332_v16 = vsub.f32 %v179_v25, %v3357_v7  ;;  %v10370_v25 = vsub.f32 %v193_v17, %v3365_v32  ;;  %v14098_v17 = vld [vmem:[#allocation143_spill] sm:$0xff] }
 0x1a1   :  { %6653 = vmatprep.subr.bf16.mxu0 %v14036_v22  ;;  %7013 = vmatprep.subr.bf16.mxu1 %v14037_v45  ;;  %v3363_v22 = vand.u32 4294901760, %v185_v24  ;;  %v3367_v45 = vand.u32 4294901760, %v192_v53 }
 0x1a2   :  { %14075 = vst [vmem:[#allocation192_spill] sm:$0xff] %v10326_v5  ;;  %14078 = vst [vmem:[#allocation198_spill] sm:$0xff] %v10332_v16 }
 0x1a3   :  { %14090 = vst [vmem:[#allocation140_spill] sm:$0xff] %v10370_v25  ;;  %v10384_v54 = vsub.f32 %v192_v53, %v3367_v45  ;;  %v222_v53 = vld [vmem:[%s12475_s1 + $0x1b8] sm:$0xff] }
 0x1a4   :  { %6655 = vmatpush1.bf16.msra.mxu0 %v14038_v36  ;;  %7015 = vmatpush1.bf16.msra.mxu1 %v14039_v61  ;;  %v200_v36 = vld [vmem:[%s12475_s1 + $0x108] sm:$0xff]  ;;  %v207_v61 = vld [vmem:[%s12475_s1 + $0x140] sm:$0xff] }
 0x1a5   :  { %6657 = vmatprep.subr.bf16.mxu0 %v14040_v12  ;;  %7017 = vmatprep.subr.bf16.mxu1 %v14041_v63  ;;  %v14079_v12 = vld [vmem:[#allocation122_spill] sm:$0xff]  ;;  %v14080_v63 = vld [vmem:[#allocation125_spill] sm:$0xff]  ;;  %14095 = vst [vmem:[#allocation148_spill] sm:$0xff] %v10384_v54 }
 0x1a7   :  { %1670 = vmatmul.mubr.f32.vlgmr.msra.gmra.mrb[0].mxu0 %v14042_v51  ;;  %3150 = vmatmul.mubr.f32.vlgmr.msra.gmra.mrb[0].mxu1 %v14042_v51 }
 0x1a8   :  { %6659 = vmatpush1.bf16.msra.mxu0 %v14043_v40  ;;  %7019 = vmatpush1.bf16.msra.mxu1 %v14044_v55  ;;  %v10342_v40 = vsub.f32 %v171_v50, %v3355_v14  ;;  %v10344_v55 = vpack.c.bf16 %v4837_v60, %v4834_v52  ;;  %v10372_v50 = vpack.c.bf16 %v3367_v45, %v3363_v22  ;;  %v213_v14 = vld [vmem:[%s12475_s1 + $0x170] sm:$0xff] }
 0x1a9   :  { %6661 = vmatprep.subr.bf16.mxu0 %v14045_v31  ;;  %7021 = vmatprep.subr.bf16.mxu1 %v14046_v46  ;;  %v4840_v31 = vand.u32 4294901760, %v187_v42  ;;  %v4843_v46 = vand.u32 4294901760, %v194_v15 }
 0x1aa   :  { %1676 = vmatprep.mubr.f32.mxu0 %v14047_v8  ;;  %3156 = vmatprep.mubr.f32.mxu1 %v14047_v8  ;;  %14081 = vst [vmem:[#allocation199_spill] sm:$0xff] %v10342_v40  ;;  %14082 = vst [vmem:[#allocation200_spill] sm:$0xff] %v10344_v55 }
 0x1ab   :  { %1678 = vmatmul.mubr.f32.gmra.mrb[2].mxu0 %v14048_v3  ;;  %3158 = vmatmul.mubr.f32.gmra.mrb[2].mxu1 %v14048_v3  ;;  %14091 = vst [vmem:[#allocation144_spill] sm:$0xff] %v10372_v50  ;;  %v10386_v7 = vpack.c.bf16 %v4843_v46, %v4840_v31 }
 0x1ac   :  { %6663 = vmatpush1.bf16.msra.mxu0 %v14049_v44  ;;  %7023 = vmatpush1.bf16.msra.mxu1 %v14050_v43  ;;  %v199_v44 = vld [vmem:[%s12475_s1 + $0x100] sm:$0xff]  ;;  %v206_v43 = vld [vmem:[%s12475_s1 + $0x138] sm:$0xff] }
 0x1ad   :  { %6665 = vmatprep.subr.bf16.mxu0 %v14051_v49  ;;  %7025 = vmatprep.subr.bf16.mxu1 %v14052_v23  ;;  %v14083_v49 = vld [vmem:[#allocation129_spill] sm:$0xff]  ;;  %v14084_v23 = vld [vmem:[#allocation131_spill] sm:$0xff]  ;;  %14096 = vst [vmem:[#allocation150_spill] sm:$0xff] %v10386_v7 }
 0x1ae   :  { %1684 = vmatprep.mubr.f32.mxu0 %v14053_v58  ;;  %3164 = vmatprep.mubr.f32.mxu1 %v14053_v58 }
 0x1af   :  { %1686 = vmatmul.mubr.f32.gmra.mrb[4].mxu0 %v14054_v2  ;;  %3166 = vmatmul.mubr.f32.gmra.mrb[4].mxu1 %v14054_v2 }
 0x1b0   :  { %6667 = vmatpush1.bf16.msra.mxu0 %v14055_v37  ;;  %7027 = vmatpush1.bf16.msra.mxu1 %v14056_v0  ;;  %v10354_v37 = vsub.f32 %v178_v48, %v3359_v62  ;;  %v10356_v0 = vsub.f32 %v173_v13, %v4834_v52  ;;  %v3371_v48 = vand.u32 4294901760, %v199_v44  ;;  %v14093_v13 = vld [vmem:[#allocation137_spill] sm:$0xff]  ;;  %v220_v62 = vld [vmem:[%s12475_s1 + $0x1a8] sm:$0xff] }
 0x1b1   :  { %6669 = vmatprep.subr.bf16.mxu0 %v14057_v28  ;;  %7029 = vmatprep.subr.bf16.mxu1 %v14058_v59  ;;  %v10358_v28 = vsub.f32 %v180_v26, %v4837_v60  ;;  %v10360_v59 = vpack.c.bf16 %v3365_v32, %v3361_v4  ;;  %v10382_v26 = vsub.f32 %v185_v24, %v3363_v22  ;;  %v4849_v60 = vand.u32 4294901760, %v208_v6  ;;  %v215_v24 = vld [vmem:[%s12475_s1 + $0x180] sm:$0xff] }
 0x1b2   :  { %1692 = vmatprep.mubr.f32.mxu0 %v14059_v10  ;;  %3172 = vmatprep.mubr.f32.mxu1 %v14059_v10  ;;  %14085 = vst [vmem:[#allocation202_spill] sm:$0xff] %v10354_v37  ;;  %14086 = vst [vmem:[#allocation204_spill] sm:$0xff] %v10356_v0  ;;  %v14147_v37 = vld [vmem:[#allocation185_spill] sm:$0xff] }
 0x1b3   :  { %1694 = vmatmul.mubr.f32.gmra.mrb[6].mxu0 %v14060_v34  ;;  %3174 = vmatmul.mubr.f32.gmra.mrb[6].mxu1 %v14060_v34  ;;  %14087 = vst [vmem:[#allocation205_spill] sm:$0xff] %v10358_v28  ;;  %14088 = vst [vmem:[#allocation207_spill] sm:$0xff] %v10360_v59 }
 0x1b4   :  { %6671 = vmatpush1.bf16.msra.mxu0 %v14061_v56  ;;  %7031 = vmatpush1.bf16.msra.mxu1 %v14062_v29  ;;  %v10362_v56 = vsub.f32 %v186_v41, %v3361_v4  ;;  %v3369_v29 = vand.u32 4294901760, %v200_v36  ;;  %14094 = vst [vmem:[#allocation147_spill] sm:$0xff] %v10382_v26  ;;  %v14097_v41 = vld [vmem:[#allocation141_spill] sm:$0xff] }
 0x1b5   :  { %6673 = vmatprep.subr.bf16.mxu0 %v14063_v38  ;;  %7033 = vmatprep.subr.bf16.mxu1 %v14064_v18  ;;  %v3373_v38 = vand.u32 4294901760, %v207_v61  ;;  %v201_v18 = vld [vmem:[%s12475_s1 + $0x110] sm:$0xff] }
 0x1b6   :  { %1700 = vmatprep.mubr.f32.mxu0 %v14065_v47  ;;  %3180 = vmatprep.mubr.f32.mxu1 %v14065_v47  ;;  %14089 = vst [vmem:[#allocation208_spill] sm:$0xff] %v10362_v56  ;;  %v4846_v52 = vand.u32 4294901760, %v201_v18 }
 0x1b7   :  { %1702 = vmatmul.mubr.f32.gmra.mrb[8].mxu0 %v14066_v27  ;;  %3182 = vmatmul.mubr.f32.gmra.mrb[8].mxu1 %v14066_v27  ;;  %v10416_v22 = vsub.f32 %v207_v61, %v3373_v38  ;;  %v234_v61 = vld [vmem:[%s12475_s1 + $0x218] sm:$0xff] }
 0x1b8   :  { %6675 = vmatpush1.bf16.msra.mxu0 %v14067_v9  ;;  %7035 = vmatpush1.bf16.msra.mxu1 %v14068_v21  ;;  %v3375_v9 = vand.u32 4294901760, %v206_v43  ;;  %v214_v21 = vld [vmem:[%s12475_s1 + $0x178] sm:$0xff] }
 0x1b9   :  { %6677 = vmatprep.subr.bf16.mxu0 %v14069_v33  ;;  %7037 = vmatprep.subr.bf16.mxu1 %v14070_v57  ;;  %v221_v33 = vld [vmem:[%s12475_s1 + $0x1b0] sm:$0xff]  ;;  %v14092_v57 = vld [vmem:[#allocation134_spill] sm:$0xff]  ;;  %v3377_v4 = vand.u32 4294901760, %v214_v21  ;;  %14103 = vst [vmem:[#allocation157_spill] sm:$0xff] %v10416_v22  ;;  %v14163_v27 = vld [vmem:[#allocation201_spill] sm:$0xff] }
 0x1ba   :  { %1833 = vmatprep.mubr.f32.mxu0 %v13957_v39  ;;  %3313 = vmatprep.mubr.f32.mxu1 %v13957_v39  ;;  %v3381_v32 = vand.u32 4294901760, %v221_v33  ;;  %v10418_v45 = vpack.c.bf16 %v3375_v9, %v3371_v48 }
 0x1bc   :  { %6679 = vmatpush1.bf16.msra.mxu0 %v14071_v11  ;;  %7039 = vmatpush1.bf16.msra.mxu1 %v14072_v1  ;;  %v10396_v11 = vsub.f32 %v187_v42, %v4840_v31  ;;  %v10398_v1 = vsub.f32 %v194_v15, %v4843_v46  ;;  %v228_v42 = vld [vmem:[%s12475_s1 + $0x1e8] sm:$0xff]  ;;  %v235_v15 = vld [vmem:[%s12475_s1 + $0x220] sm:$0xff]  ;;  %14104 = vst [vmem:[#allocation159_spill] sm:$0xff] %v10418_v45 }
 0x1bd   :  { %6681 = vmatprep.subr.bf16.mxu0 %v14073_v35  ;;  %7041 = vmatprep.subr.bf16.mxu1 %v14074_v19  ;;  %v10406_v35 = vpack.c.bf16 %v3373_v38, %v3369_v29  ;;  %v10408_v19 = vsub.f32 %v200_v36, %v3369_v29  ;;  %v14105_v31 = vld [vmem:[#allocation146_spill] sm:$0xff]  ;;  %v14106_v36 = vld [vmem:[#allocation149_spill] sm:$0xff]  ;;  %v10422_v46 = vsub.f32 %v199_v44, %v3371_v48  ;;  %v4855_v29 = vand.u32 4294901760, %v222_v53 }
 0x1be   :  { %14099 = vst [vmem:[#allocation151_spill] sm:$0xff] %v10396_v11  ;;  %14100 = vst [vmem:[#allocation152_spill] sm:$0xff] %v10398_v1  ;;  %v14109_v38 = vld [vmem:[#allocation153_spill] sm:$0xff]  ;;  %v10436_v44 = vsub.f32 %v201_v18, %v4846_v52  ;;  %v3389_v48 = vand.u32 4294901760, %v235_v15  ;;  %v14137_v11 = vld [vmem:[#allocation179_spill] sm:$0xff] }
 0x1bf   :  { %14101 = vst [vmem:[#allocation154_spill] sm:$0xff] %v10406_v35  ;;  %14102 = vst [vmem:[#allocation156_spill] sm:$0xff] %v10408_v19  ;;  %v14136_v1 = vld [vmem:[#allocation177_spill] sm:$0xff] }
 0x1c0   :  { %6683 = vmatpush1.bf16.msra.mxu0 %v14079_v12  ;;  %7043 = vmatpush1.bf16.msra.mxu1 %v14080_v63  ;;  %v3379_v12 = vand.u32 4294901760, %v213_v14  ;;  %v3383_v63 = vand.u32 4294901760, %v220_v62  ;;  %14107 = vst [vmem:[#allocation160_spill] sm:$0xff] %v10422_v46  ;;  %14112 = vst [vmem:[#allocation48_spill] sm:$0xff] %v10436_v44  ;;  %v3391_v44 = vand.u32 4294901760, %v234_v61  ;;  %v10490_v46 = vsub.f32 %v235_v15, %v3389_v48  ;;  %v262_v15 = vld [vmem:[%s12475_s1 + $0x2f8] sm:$0xff] }
 0x1c1   :  { %6685 = vmatprep.subr.bf16.mxu0 %v14083_v49  ;;  %7045 = vmatprep.subr.bf16.mxu1 %v14084_v23  ;;  %v10424_v49 = vsub.f32 %v206_v43, %v3375_v9  ;;  %v4852_v23 = vand.u32 4294901760, %v215_v24  ;;  %v3385_v43 = vand.u32 4294901760, %v228_v42  ;;  %v229_v9 = vld [vmem:[%s12475_s1 + $0x1f0] sm:$0xff] }
 0x1c2   :  { %v10452_v18 = vpack.c.bf16 %v3383_v63, %v3379_v12  ;;  %14129 = vst [vmem:[#allocation67_spill] sm:$0xff] %v10490_v46  ;;  %v10510_v22 = vsub.f32 %v234_v61, %v3391_v44  ;;  %v264_v61 = vld [vmem:[%s12475_s1 + $0x308] sm:$0xff] }
 0x1c3   :  { %14108 = vst [vmem:[#allocation45_spill] sm:$0xff] %v10424_v49  ;;  %v242_v49 = vld [vmem:[%s12475_s1 + $0x258] sm:$0xff] }
 0x1c4   :  { %6687 = vmatpush1.bf16.msra.mxu0 %v14092_v57  ;;  %7047 = vmatpush1.bf16.msra.mxu1 %v14093_v13  ;;  %v227_v57 = vld [vmem:[%s12475_s1 + $0x1e0] sm:$0xff]  ;;  %v14110_v13 = vld [vmem:[#allocation155_spill] sm:$0xff]  ;;  %14117 = vst [vmem:[#allocation55_spill] sm:$0xff] %v10452_v18  ;;  %14134 = vst [vmem:[#allocation72_spill] sm:$0xff] %v10510_v22 }
 0x1c5   :  { %6689 = vmatprep.subr.bf16.mxu0 %v14097_v41  ;;  %7049 = vmatprep.subr.bf16.mxu1 %v14098_v17  ;;  %v10434_v41 = vpack.c.bf16 %v4849_v60, %v4846_v52  ;;  %v236_v17 = vld [vmem:[%s12475_s1 + $0x228] sm:$0xff]  ;;  %v10454_v52 = vsub.f32 %v213_v14, %v3379_v12  ;;  %v3387_v39 = vand.u32 4294901760, %v227_v57  ;;  %v4858_v14 = vand.u32 4294901760, %v229_v9  ;;  %v241_v12 = vld [vmem:[%s12475_s1 + $0x250] sm:$0xff] }
 0x1c7   :  { %14111 = vst [vmem:[#allocation46_spill] sm:$0xff] %v10434_v41  ;;  %14118 = vst [vmem:[#allocation57_spill] sm:$0xff] %v10454_v52  ;;  %v248_v52 = vld [vmem:[%s12475_s1 + $0x288] sm:$0xff]  ;;  %v10516_v54 = vsub.f32 %v229_v9, %v4858_v14  ;;  %v270_v9 = vld [vmem:[%s12475_s1 + $0x338] sm:$0xff] }
 0x1c8   :  { %6691 = vmatpush1.bf16.msra.mxu0 %v14105_v31  ;;  %7051 = vmatpush1.bf16.msra.mxu1 %v14106_v36  ;;  %v10444_v31 = vsub.f32 %v208_v6, %v4849_v60  ;;  %v10446_v36 = vpack.c.bf16 %v3381_v32, %v3377_v4  ;;  %v249_v6 = vld [vmem:[%s12475_s1 + $0x290] sm:$0xff]  ;;  %v14119_v60 = vld [vmem:[#allocation158_spill] sm:$0xff] }
 0x1c9   :  { %6693 = vmatprep.subr.bf16.mxu0 %v14109_v38  ;;  %7053 = vmatprep.subr.bf16.mxu1 %v14110_v13  ;;  %v10448_v38 = vsub.f32 %v214_v21, %v3377_v4  ;;  %v10450_v13 = vsub.f32 %v221_v33, %v3381_v32  ;;  %v14120_v21 = vld [vmem:[#allocation161_spill] sm:$0xff]  ;;  %v10464_v33 = vsub.f32 %v220_v62, %v3383_v63  ;;  %v4861_v32 = vand.u32 4294901760, %v236_v17 }
 0x1ca   :  { %14113 = vst [vmem:[#allocation49_spill] sm:$0xff] %v10444_v31  ;;  %14114 = vst [vmem:[#allocation50_spill] sm:$0xff] %v10446_v36  ;;  %v10466_v4 = vpack.c.bf16 %v4855_v29, %v4852_v23  ;;  %v10478_v62 = vsub.f32 %v222_v53, %v4855_v29  ;;  %v10480_v63 = vpack.c.bf16 %v3389_v48, %v3385_v43  ;;  %v263_v53 = vld [vmem:[%s12475_s1 + $0x300] sm:$0xff]  ;;  %v14133_v48 = vld [vmem:[#allocation173_spill] sm:$0xff] }
 0x1cb   :  { %14115 = vst [vmem:[#allocation52_spill] sm:$0xff] %v10448_v38  ;;  %14116 = vst [vmem:[#allocation54_spill] sm:$0xff] %v10450_v13  ;;  %v14123_v13 = vld [vmem:[#allocation165_spill] sm:$0xff]  ;;  %v14124_v38 = vld [vmem:[#allocation167_spill] sm:$0xff]  ;;  %v10488_v31 = vsub.f32 %v228_v42, %v3385_v43  ;;  %v10500_v29 = vsub.f32 %v227_v57, %v3387_v39  ;;  %v10512_v19 = vpack.c.bf16 %v4861_v32, %v4858_v14  ;;  %v3405_v56 = vand.u32 4294901760, %v263_v53 }
 0x1cc   :  { %6695 = vmatpush1.bf16.msra.mxu0 %v14119_v60  ;;  %7055 = vmatpush1.bf16.msra.mxu1 %v14120_v21  ;;  %14121 = vst [vmem:[#allocation58_spill] sm:$0xff] %v10464_v33  ;;  %14122 = vst [vmem:[#allocation60_spill] sm:$0xff] %v10466_v4  ;;  %v10476_v60 = vsub.f32 %v215_v24, %v4852_v23  ;;  %v243_v21 = vld [vmem:[%s12475_s1 + $0x260] sm:$0xff]  ;;  %v250_v33 = vld [vmem:[%s12475_s1 + $0x298] sm:$0xff]  ;;  %v10498_v23 = vpack.c.bf16 %v3391_v44, %v3387_v39 }
 0x1cd   :  { %6697 = vmatprep.subr.bf16.mxu0 %v14123_v13  ;;  %7057 = vmatprep.subr.bf16.mxu1 %v14124_v38  ;;  %14126 = vst [vmem:[#allocation62_spill] sm:$0xff] %v10478_v62  ;;  %14127 = vst [vmem:[#allocation64_spill] sm:$0xff] %v10480_v63  ;;  %v3393_v13 = vand.u32 4294901760, %v242_v49  ;;  %v3397_v38 = vand.u32 4294901760, %v249_v6  ;;  %v256_v24 = vld [vmem:[%s12475_s1 + $0x2c8] sm:$0xff]  ;;  %v3395_v62 = vand.u32 4294901760, %v241_v12  ;;  %v10518_v26 = vsub.f32 %v236_v17, %v4861_v32 }
 0x1ce   :  { %14125 = vst [vmem:[#allocation61_spill] sm:$0xff] %v10476_v60  ;;  %14128 = vst [vmem:[#allocation66_spill] sm:$0xff] %v10488_v31  ;;  %v3399_v60 = vand.u32 4294901760, %v248_v52  ;;  %v255_v42 = vld [vmem:[%s12475_s1 + $0x2c0] sm:$0xff]  ;;  %v4864_v39 = vand.u32 4294901760, %v243_v21  ;;  %v4867_v57 = vand.u32 4294901760, %v250_v33  ;;  %v10570_v30 = vsub.f32 %v263_v53, %v3405_v56 }
 0x1cf   :  { %14130 = vst [vmem:[#allocation69_spill] sm:$0xff] %v10498_v23  ;;  %14131 = vst [vmem:[#allocation70_spill] sm:$0xff] %v10500_v29  ;;  %v14132_v43 = vld [vmem:[#allocation170_spill] sm:$0xff]  ;;  %v3401_v25 = vand.u32 4294901760, %v256_v24  ;;  %v10526_v44 = vpack.c.bf16 %v3397_v38, %v3393_v13  ;;  %v277_v17 = vld [vmem:[%s12475_s1 + $0x370] sm:$0xff]  ;;  %v10536_v14 = vsub.f32 %v249_v6, %v3397_v38  ;;  %v10540_v28 = vsub.f32 %v241_v12, %v3395_v62 }
 0x1d0   :  { %6699 = vmatpush1.bf16.msra.mxu0 %v14132_v43  ;;  %7059 = vmatpush1.bf16.msra.mxu1 %v14133_v48  ;;  %14135 = vst [vmem:[#allocation73_spill] sm:$0xff] %v10512_v19  ;;  %14138 = vst [vmem:[#allocation75_spill] sm:$0xff] %v10516_v54  ;;  %v257_v43 = vld [vmem:[%s12475_s1 + $0x2d0] sm:$0xff]  ;;  %v10528_v48 = vsub.f32 %v242_v49, %v3393_v13  ;;  %v10538_v32 = vpack.c.bf16 %v3399_v60, %v3395_v62  ;;  %v14146_v13 = vld [vmem:[#allocation182_spill] sm:$0xff]  ;;  %v4873_v38 = vand.u32 4294901760, %v264_v61 }
 0x1d1   :  { %6701 = vmatprep.subr.bf16.mxu0 %v14136_v1  ;;  %7061 = vmatprep.subr.bf16.mxu1 %v14137_v11  ;;  %14139 = vst [vmem:[#allocation76_spill] sm:$0xff] %v10518_v26  ;;  %14140 = vst [vmem:[#allocation77_spill] sm:$0xff] %v10526_v44  ;;  %v3403_v1 = vand.u32 4294901760, %v255_v42  ;;  %v3407_v11 = vand.u32 4294901760, %v262_v15  ;;  %v10542_v0 = vsub.f32 %v248_v52, %v3399_v60  ;;  %v269_v49 = vld [vmem:[%s12475_s1 + $0x330] sm:$0xff]  ;;  %v4870_v6 = vand.u32 4294901760, %v257_v43 }
 0x1d2   :  { %14141 = vst [vmem:[#allocation79_spill] sm:$0xff] %v10528_v48  ;;  %14142 = vst [vmem:[#allocation81_spill] sm:$0xff] %v10536_v14  ;;  %v10549_v40 = vpack.c.bf16 %v4867_v57, %v4864_v39  ;;  %v10551_v16 = vsub.f32 %v243_v21, %v4864_v39  ;;  %v276_v12 = vld [vmem:[%s12475_s1 + $0x368] sm:$0xff]  ;;  %v271_v52 = vld [vmem:[%s12475_s1 + $0x340] sm:$0xff]  ;;  %v10564_v21 = vsub.f32 %v250_v33, %v4867_v57  ;;  %v3411_v57 = vand.u32 4294901760, %v269_v49 }
 0x1d3   :  { %14143 = vst [vmem:[#allocation82_spill] sm:$0xff] %v10538_v32  ;;  %14144 = vst [vmem:[#allocation83_spill] sm:$0xff] %v10540_v28  ;;  %v278_v60 = vld [vmem:[%s12475_s1 + $0x378] sm:$0xff]  ;;  %v10566_v39 = vpack.c.bf16 %v3405_v56, %v3401_v25  ;;  %v10568_v32 = vsub.f32 %v256_v24, %v3401_v25  ;;  %v10572_v44 = vpack.c.bf16 %v3407_v11, %v3403_v1  ;;  %v291_v33 = vld [vmem:[%s12475_s1 + $0x3e0] sm:$0xff] }
 0x1d4   :  { %14145 = vst [vmem:[#allocation85_spill] sm:$0xff] %v10542_v0  ;;  %6703 = vmatpush1.bf16.msra.mxu0 %v14146_v13  ;;  %7063 = vmatpush1.bf16.msra.mxu1 %v14147_v37  ;;  %14148 = vst [vmem:[#allocation86_spill] sm:$0xff] %v10549_v40  ;;  %v14150_v62 = vld [vmem:[#allocation189_spill] sm:$0xff]  ;;  %v14151_v37 = vld [vmem:[#allocation191_spill] sm:$0xff]  ;;  %v3409_v13 = vand.u32 4294901760, %v270_v9  ;;  %v3413_v40 = vand.u32 4294901760, %v277_v17  ;;  %v10574_v19 = vsub.f32 %v255_v42, %v3403_v1 }
 0x1d5   :  { %14149 = vst [vmem:[#allocation88_spill] sm:$0xff] %v10551_v16  ;;  %6705 = vmatprep.subr.bf16.mxu0 %v14150_v62  ;;  %7065 = vmatprep.subr.bf16.mxu1 %v14151_v37  ;;  %14152 = vst [vmem:[#allocation90_spill] sm:$0xff] %v10564_v21  ;;  %v284_v62 = vld [vmem:[%s12475_s1 + $0x3a8] sm:$0xff]  ;;  %v3415_v37 = vand.u32 4294901760, %v276_v12  ;;  %v4879_v23 = vand.u32 4294901760, %v278_v60  ;;  %v283_v56 = vld [vmem:[%s12475_s1 + $0x3a0] sm:$0xff]  ;;  %v10590_v42 = vsub.f32 %v262_v15, %v3407_v11 }
 0x1d6   :  { %14153 = vst [vmem:[#allocation91_spill] sm:$0xff] %v10566_v39  ;;  %14154 = vst [vmem:[#allocation93_spill] sm:$0xff] %v10568_v32  ;;  %v4876_v39 = vand.u32 4294901760, %v271_v52  ;;  %v290_v25 = vld [vmem:[%s12475_s1 + $0x3d8] sm:$0xff]  ;;  %v14158_v24 = vld [vmem:[#allocation194_spill] sm:$0xff]  ;;  %v10592_v1 = vpack.c.bf16 %v4873_v38, %v4870_v6  ;;  %v10600_v47 = vpack.c.bf16 %v3413_v40, %v3409_v13  ;;  %v3421_v32 = vand.u32 4294901760, %v291_v33 }
 0x1d7   :  { %14155 = vst [vmem:[#allocation94_spill] sm:$0xff] %v10570_v30  ;;  %14156 = vst [vmem:[#allocation96_spill] sm:$0xff] %v10572_v44  ;;  %v14159_v53 = vld [vmem:[#allocation197_spill] sm:$0xff]  ;;  %v10594_v44 = vsub.f32 %v257_v43, %v4870_v6  ;;  %v14164_v63 = vld [vmem:[#allocation203_spill] sm:$0xff]  ;;  %v3417_v30 = vand.u32 4294901760, %v284_v62  ;;  %v10608_v43 = vsub.f32 %v270_v9, %v3409_v13  ;;  %v10610_v11 = vsub.f32 %v277_v17, %v3413_v40 }
 0x1d8   :  { %14157 = vst [vmem:[#allocation97_spill] sm:$0xff] %v10574_v19  ;;  %6707 = vmatpush1.bf16.msra.mxu0 %v14158_v24  ;;  %7067 = vmatpush1.bf16.msra.mxu1 %v14159_v53  ;;  %14160 = vst [vmem:[#allocation99_spill] sm:$0xff] %v10590_v42  ;;  %v10598_v19 = vsub.f32 %v264_v61, %v4873_v38  ;;  %v285_v24 = vld [vmem:[%s12475_s1 + $0x3b0] sm:$0xff]  ;;  %v292_v15 = vld [vmem:[%s12475_s1 + $0x3e8] sm:$0xff]  ;;  %v10618_v38 = vpack.c.bf16 %v3415_v37, %v3411_v57 }
 0x1d9   :  { %14161 = vst [vmem:[#allocation100_spill] sm:$0xff] %v10592_v1  ;;  %14162 = vst [vmem:[#allocation102_spill] sm:$0xff] %v10594_v44  ;;  %6709 = vmatprep.subr.bf16.mxu0 %v14163_v27  ;;  %7069 = vmatprep.subr.bf16.mxu1 %v14164_v63  ;;  %v3419_v27 = vand.u32 4294901760, %v283_v56  ;;  %v3423_v63 = vand.u32 4294901760, %v290_v25  ;;  %v298_v61 = vld [vmem:[%s12475_s1 + $0x418] sm:$0xff]  ;;  %v305_v6 = vld [vmem:[%s12475_s1 + $0x450] sm:$0xff]  ;;  %v10620_v53 = vsub.f32 %v269_v49, %v3411_v57 }
 0x1da   :  { %14165 = vst [vmem:[#allocation103_spill] sm:$0xff] %v10598_v19  ;;  %14166 = vst [vmem:[#allocation105_spill] sm:$0xff] %v10600_v47  ;;  %v10622_v47 = vsub.f32 %v276_v12, %v3415_v37  ;;  %v10624_v9 = vpack.c.bf16 %v4879_v23, %v4876_v39  ;;  %v297_v40 = vld [vmem:[%s12475_s1 + $0x410] sm:$0xff]  ;;  %v304_v17 = vld [vmem:[%s12475_s1 + $0x448] sm:$0xff]  ;;  %v10636_v49 = vsub.f32 %v278_v60, %v4879_v23  ;;  %v4882_v12 = vand.u32 4294901760, %v285_v24 }
 0x1db   :  { %14167 = vst [vmem:[#allocation106_spill] sm:$0xff] %v10608_v43  ;;  %14168 = vst [vmem:[#allocation107_spill] sm:$0xff] %v10610_v11  ;;  %v14173_v13 = vld [vmem:[#allocation206_spill] sm:$0xff]  ;;  %v14174_v1 = vld [vmem:[#allocation209_spill] sm:$0xff]  ;;  %v10634_v11 = vsub.f32 %v271_v52, %v4876_v39  ;;  %v4885_v57 = vand.u32 4294901760, %v292_v15  ;;  %v10648_v52 = vsub.f32 %v284_v62, %v3417_v30  ;;  %v3425_v23 = vand.u32 4294901760, %v298_v61 }
 0x1dc   :  { %14169 = vst [vmem:[#allocation109_spill] sm:$0xff] %v10618_v38  ;;  %14170 = vst [vmem:[#allocation111_spill] sm:$0xff] %v10620_v53  ;;  %6711 = vmatpush1.bf16.msra.mxu0 %v14173_v13  ;;  %7071 = vmatpush1.bf16.msra.mxu1 %v14174_v1  ;;  %v299_v37 = vld [vmem:[%s12475_s1 + $0x420] sm:$0xff]  ;;  %v14177_v38 = vld [vmem:[#allocation213_spill] sm:$0xff]  ;;  %v10646_v13 = vpack.c.bf16 %v3421_v32, %v3417_v30  ;;  %v3429_v60 = vand.u32 4294901760, %v305_v6  ;;  %v10650_v39 = vsub.f32 %v291_v33, %v3421_v32 }
 0x1dd   :  { %14171 = vst [vmem:[#allocation112_spill] sm:$0xff] %v10622_v47  ;;  %14172 = vst [vmem:[#allocation114_spill] sm:$0xff] %v10624_v9  ;;  %v306_v9 = vld [vmem:[%s12475_s1 + $0x458] sm:$0xff]  ;;  %6713 = vmatprep.subr.bf16.mxu0 %v14177_v38  ;;  %v14178_v47 = vld [vmem:[#allocation214_spill] sm:$0xff]  ;;  %v10652_v1 = vpack.c.bf16 %v3423_v63, %v3419_v27  ;;  %v10660_v38 = vsub.f32 %v283_v56, %v3419_v27  ;;  %v10662_v30 = vsub.f32 %v290_v25, %v3423_v63  ;;  %v13066_v27 = vmov 0.0|0.0  }
 0x1de   :  { %14175 = vst [vmem:[#allocation115_spill] sm:$0xff] %v10634_v11  ;;  %14176 = vst [vmem:[#allocation116_spill] sm:$0xff] %v10636_v49  ;;  %7073 = vmatprep.subr.bf16.mxu1 %v14178_v47  ;;  %v3427_v49 = vand.u32 4294901760, %v297_v40  ;;  %v3431_v11 = vand.u32 4294901760, %v304_v17  ;;  %v312_v53 = vld [vmem:[%s12475_s1 + $0x488] sm:$0xff]  ;;  %v319_v47 = vld [vmem:[%s12475_s1 + $0x4c0] sm:$0xff]  ;;  %v10674_v56 = vsub.f32 %v285_v24, %v4882_v12  ;;  %v10676_v25 = vsub.f32 %v292_v15, %v4885_v57 }
 0x1df   :  { %14179 = vst [vmem:[#allocation118_spill] sm:$0xff] %v10646_v13  ;;  %14180 = vst [vmem:[#allocation120_spill] sm:$0xff] %v10648_v52  ;;  %v4888_v62 = vand.u32 4294901760, %v299_v37  ;;  %v4891_v13 = vand.u32 4294901760, %v306_v9  ;;  %v311_v32 = vld [vmem:[%s12475_s1 + $0x480] sm:$0xff]  ;;  %v318_v33 = vld [vmem:[%s12475_s1 + $0x4b8] sm:$0xff]  ;;  %v10672_v52 = vpack.c.bf16 %v4885_v57, %v4882_v12  ;;  %v10680_v63 = vpack.c.bf16 %v3429_v60, %v3425_v23 }
 0x1e0   :  { %14181 = vst [vmem:[#allocation121_spill] sm:$0xff] %v10650_v39  ;;  %14182 = vst [vmem:[#allocation123_spill] sm:$0xff] %v10652_v1  ;;  %v14185_v1 = vld [vmem:[#allocation215_spill] sm:$0xff]  ;;  %v14186_v39 = vld [vmem:[#allocation216_spill] sm:$0xff]  ;;  %v3437_v43 = vand.u32 4294901760, %v319_v47  ;;  %v10690_v15 = vsub.f32 %v305_v6, %v3429_v60  ;;  %v10692_v12 = vpack.c.bf16 %v3431_v11, %v3427_v49  ;;  %v3435_v57 = vand.u32 4294901760, %v311_v32 }
 0x1e1   :  { %14183 = vst [vmem:[#allocation124_spill] sm:$0xff] %v10660_v38  ;;  %14184 = vst [vmem:[#allocation126_spill] sm:$0xff] %v10662_v30  ;;  %6715 = vmatpush1.bf16.msra.mxu0 %v14185_v1  ;;  %7075 = vmatpush1.bf16.msra.mxu1 %v14186_v39  ;;  %v10682_v30 = vsub.f32 %v298_v61, %v3425_v23  ;;  %v3433_v38 = vand.u32 4294901760, %v312_v53  ;;  %v313_v39 = vld [vmem:[%s12475_s1 + $0x490] sm:$0xff]  ;;  %v320_v24 = vld [vmem:[%s12475_s1 + $0x4c8] sm:$0xff]  ;;  %v3439_v1 = vand.u32 4294901760, %v318_v33 }
 0x1e2   :  { %14187 = vst [vmem:[#allocation127_spill] sm:$0xff] %v10672_v52  ;;  %14188 = vst [vmem:[#allocation128_spill] sm:$0xff] %v10674_v56  ;;  %7077 = vmatprep.subr.bf16.mxu0 %v10326_v5  ;;  %7436 = vmatprep.subr.bf16.mxu1 %v13066_v27  ;;  %v326_v61 = vld [vmem:[%s12475_s1 + $0x4f8] sm:$0xff]  ;;  %v333_v23 = vld [vmem:[%s12475_s1 + $0x530] sm:$0xff]  ;;  %v10702_v27 = vsub.f32 %v297_v40, %v3427_v49  ;;  %v10704_v6 = vsub.f32 %v304_v17, %v3431_v11  ;;  %v4894_v11 = vand.u32 4294901760, %v313_v39 }
 0x1e3   :  { %14189 = vst [vmem:[#allocation130_spill] sm:$0xff] %v10676_v25  ;;  %14190 = vst [vmem:[#allocation132_spill] sm:$0xff] %v10680_v63  ;;  %v10706_v60 = vpack.c.bf16 %v4891_v13, %v4888_v62  ;;  %v325_v5 = vld [vmem:[%s12475_s1 + $0x4f0] sm:$0xff]  ;;  %v10716_v63 = vsub.f32 %v299_v37, %v4888_v62  ;;  %v10718_v40 = vsub.f32 %v306_v9, %v4891_v13  ;;  %v4897_v17 = vand.u32 4294901760, %v320_v24  ;;  %v327_v49 = vld [vmem:[%s12475_s1 + $0x500] sm:$0xff] }
 0x1e4   :  { %14191 = vst [vmem:[#allocation133_spill] sm:$0xff] %v10682_v30  ;;  %14192 = vst [vmem:[#allocation135_spill] sm:$0xff] %v10690_v15  ;;  %1835 = vmatmul.mubr.f32.vlgmr.msra.gmra.mrb[0].mxu0 %v14042_v51  ;;  %3315 = vmatmul.mubr.f32.vlgmr.msra.gmra.mrb[0].mxu1 %v14042_v51  ;;  %v334_v51 = vld [vmem:[%s12475_s1 + $0x538] sm:$0xff]  ;;  %v10730_v37 = vsub.f32 %v312_v53, %v3433_v38  ;;  %v3441_v9 = vand.u32 4294901760, %v326_v61  ;;  %v3445_v13 = vand.u32 4294901760, %v333_v23  ;;  %v340_v62 = vld [vmem:[%s12475_s1 + $0x568] sm:$0xff] }
 0x1e5   :  { %14193 = vst [vmem:[#allocation136_spill] sm:$0xff] %v10692_v12  ;;  %14194 = vst [vmem:[#allocation138_spill] sm:$0xff] %v10704_v6  ;;  %v332_v12 = vld [vmem:[%s12475_s1 + $0x528] sm:$0xff]  ;;  %7079 = vmatpush1.bf16.msra.mxu0 %v10328_v20  ;;  %7438 = vmatpush1.bf16.msra.mxu1 %v10344_v55  ;;  %v10728_v20 = vpack.c.bf16 %v3437_v43, %v3433_v38  ;;  %v347_v55 = vld [vmem:[%s12475_s1 + $0x5a0] sm:$0xff]  ;;  %v10740_v52 = vsub.f32 %v319_v47, %v3437_v43  ;;  %v3443_v53 = vand.u32 4294901760, %v325_v5 }
 0x1e6   :  { %14195 = vst [vmem:[#allocation139_spill] sm:$0xff] %v10706_v60  ;;  %14196 = vst [vmem:[#allocation142_spill] sm:$0xff] %v10716_v63  ;;  %1841 = vmatprep.mubr.f32.mxu0 %v14047_v8  ;;  %3321 = vmatprep.mubr.f32.mxu1 %v14047_v8  ;;  %v14200_v60 = vmov 0.0|0.0   ;;  %v10742_v8 = vpack.c.bf16 %v3439_v1, %v3435_v57  ;;  %v3447_v38 = vand.u32 4294901760, %v332_v12  ;;  %v4903_v63 = vand.u32 4294901760, %v334_v51  ;;  %v346_v43 = vld [vmem:[%s12475_s1 + $0x598] sm:$0xff] }
 0x1e7   :  { %14197 = vst [vmem:[#allocation145_spill] sm:$0xff] %v10718_v40  ;;  %14198 = vst [vmem:[#allocation186_spill] sm:$0xff] %v10728_v20  ;;  %7081 = vmatprep.subr.bf16.mxu0 %v10360_v59  ;;  %7439 = vmatprep.subr.bf16.mxu1 %v14200_v60  ;;  %v10746_v20 = vsub.f32 %v311_v32, %v3435_v57  ;;  %v4900_v40 = vand.u32 4294901760, %v327_v49  ;;  %v339_v59 = vld [vmem:[%s12475_s1 + $0x560] sm:$0xff]  ;;  %v10758_v47 = vpack.c.bf16 %v4897_v17, %v4894_v11  ;;  %v14223_v26 = vld [vmem:[#allocation64_spill] sm:$0xff] }
 0x1e8   :  { %14199 = vst [vmem:[#allocation187_spill] sm:$0xff] %v10730_v37  ;;  %14201 = vst [vmem:[#allocation210_spill] sm:$0xff] %v10740_v52  ;;  %1843 = vmatmul.mubr.f32.gmra.mrb[2].mxu0 %v14048_v3  ;;  %3323 = vmatmul.mubr.f32.gmra.mrb[2].mxu1 %v14048_v3  ;;  %v10748_v37 = vsub.f32 %v318_v33, %v3439_v1  ;;  %v10760_v32 = vsub.f32 %v313_v39, %v4894_v11  ;;  %v3449_v33 = vand.u32 4294901760, %v340_v62  ;;  %v14225_v48 = vld [vmem:[#allocation236_spill] sm:$0xff]  ;;  %v14227_v42 = vld [vmem:[#allocation69_spill] sm:$0xff] }
 0x1e9   :  { %14202 = vst [vmem:[#allocation211_spill] sm:$0xff] %v10742_v8  ;;  %7083 = vmatpush1.bf16.msra.mxu0 %v10372_v50  ;;  %7441 = vmatpush1.bf16.msra.mxu1 %v10386_v7  ;;  %14204 = vst [vmem:[#allocation184_spill] sm:$0xff] %v10758_v47  ;;  %v3453_v57 = vand.u32 4294901760, %v347_v55  ;;  %v10764_v1 = vsub.f32 %v320_v24, %v4897_v17  ;;  %v10766_v3 = vpack.c.bf16 %v3445_v13, %v3441_v9  ;;  %v348_v24 = vld [vmem:[%s12475_s1 + $0x5a8] sm:$0xff]  ;;  %v14228_v14 = vld [vmem:[#allocation73_spill] sm:$0xff] }
 0x1ea   :  { %14203 = vst [vmem:[#allocation183_spill] sm:$0xff] %v10748_v37  ;;  %14205 = vst [vmem:[#allocation188_spill] sm:$0xff] %v10760_v32  ;;  %1849 = vmatprep.mubr.f32.mxu0 %v14053_v58  ;;  %3329 = vmatprep.mubr.f32.mxu1 %v14053_v58  ;;  %v10768_v8 = vsub.f32 %v326_v61, %v3441_v9  ;;  %v10772_v7 = vsub.f32 %v333_v23, %v3445_v13  ;;  %v3451_v11 = vand.u32 4294901760, %v339_v59  ;;  %v341_v58 = vld [vmem:[%s12475_s1 + $0x570] sm:$0xff]  ;;  %v354_v9 = vld [vmem:[%s12475_s1 + $0x5d8] sm:$0xff] }
 0x1eb   :  { %14206 = vst [vmem:[#allocation190_spill] sm:$0xff] %v10764_v1  ;;  %14207 = vst [vmem:[#allocation44_spill] sm:$0xff] %v10766_v3  ;;  %7085 = vmatprep.subr.bf16.mxu0 %v10406_v35  ;;  %7442 = vmatprep.subr.bf16.mxu1 %v14200_v60  ;;  %v10774_v39 = vpack.c.bf16 %v3447_v38, %v3443_v53  ;;  %v3455_v50 = vand.u32 4294901760, %v346_v43  ;;  %v10784_v61 = vsub.f32 %v325_v5, %v3443_v53  ;;  %v361_v5 = vld [vmem:[%s12475_s1 + $0x610] sm:$0xff]  ;;  %v374_v16 = vld [vmem:[%s12475_s1 + $0x678] sm:$0xff] }
 0x1ec   :  { %1851 = vmatmul.mubr.f32.gmra.mrb[4].mxu0 %v14054_v2  ;;  %3331 = vmatmul.mubr.f32.gmra.mrb[4].mxu1 %v14054_v2  ;;  %v10786_v23 = vsub.f32 %v332_v12, %v3447_v38  ;;  %v10788_v17 = vpack.c.bf16 %v4903_v63, %v4900_v40  ;;  %v10795_v13 = vsub.f32 %v327_v49, %v4900_v40  ;;  %v4906_v38 = vand.u32 4294901760, %v341_v58  ;;  %v353_v49 = vld [vmem:[%s12475_s1 + $0x5d0] sm:$0xff]  ;;  %v376_v0 = vld [vmem:[%s12475_s1 + $0x688] sm:$0xff]  ;;  %v14291_v37 = vld [vmem:[#allocation157_spill] sm:$0xff] }
 0x1ed   :  { %14208 = vst [vmem:[#allocation47_spill] sm:$0xff] %v10774_v39  ;;  %14209 = vst [vmem:[#allocation51_spill] sm:$0xff] %v10784_v61  ;;  %7087 = vmatpush1.bf16.msra.mxu0 %v10418_v45  ;;  %7444 = vmatpush1.bf16.msra.mxu1 %v10434_v41  ;;  %v10797_v35 = vsub.f32 %v334_v51, %v4903_v63  ;;  %v10799_v39 = vpack.c.bf16 %v3453_v57, %v3449_v33  ;;  %v4909_v41 = vand.u32 4294901760, %v348_v24  ;;  %v14261_v22 = vld [vmem:[#allocation96_spill] sm:$0xff]  ;;  %v14283_v54 = vld [vmem:[#allocation147_spill] sm:$0xff] }
 0x1ee   :  { %14210 = vst [vmem:[#allocation53_spill] sm:$0xff] %v10786_v23  ;;  %14211 = vst [vmem:[#allocation56_spill] sm:$0xff] %v10788_v17  ;;  %1857 = vmatprep.mubr.f32.mxu0 %v14059_v10  ;;  %3337 = vmatprep.mubr.f32.mxu1 %v14059_v10  ;;  %v10806_v12 = vsub.f32 %v340_v62, %v3449_v33  ;;  %v10808_v53 = vsub.f32 %v347_v55, %v3453_v57  ;;  %v3457_v40 = vand.u32 4294901760, %v354_v9  ;;  %v360_v55 = vld [vmem:[%s12475_s1 + $0x608] sm:$0xff]  ;;  %v355_v62 = vld [vmem:[%s12475_s1 + $0x5e0] sm:$0xff] }
 0x1ef   :  { %14212 = vst [vmem:[#allocation59_spill] sm:$0xff] %v10795_v13  ;;  %14213 = vst [vmem:[#allocation63_spill] sm:$0xff] %v10797_v35  ;;  %7089 = vmatprep.subr.bf16.mxu0 %v10446_v36  ;;  %7445 = vmatprep.subr.bf16.mxu1 %v14200_v60  ;;  %v10812_v51 = vpack.c.bf16 %v3455_v50, %v3451_v11  ;;  %v10814_v63 = vsub.f32 %v339_v59, %v3451_v11  ;;  %v3461_v33 = vand.u32 4294901760, %v361_v5  ;;  %v362_v36 = vld [vmem:[%s12475_s1 + $0x618] sm:$0xff]  ;;  %v14275_v56 = vld [vmem:[#allocation140_spill] sm:$0xff] }
 0x1f0   :  { %14214 = vst [vmem:[#allocation65_spill] sm:$0xff] %v10799_v39  ;;  %14215 = vst [vmem:[#allocation68_spill] sm:$0xff] %v10806_v12  ;;  %1859 = vmatmul.mubr.f32.gmra.mrb[6].mxu0 %v14060_v34  ;;  %3339 = vmatmul.mubr.f32.gmra.mrb[6].mxu1 %v14060_v34  ;;  %v3459_v10 = vand.u32 4294901760, %v353_v49  ;;  %v3463_v2 = vand.u32 4294901760, %v360_v55  ;;  %v10854_v59 = vpack.c.bf16 %v4909_v41, %v4906_v38  ;;  %v368_v34 = vld [vmem:[%s12475_s1 + $0x648] sm:$0xff]  ;;  %v14273_v15 = vld [vmem:[#allocation145_spill] sm:$0xff] }
 0x1f1   :  { %14216 = vst [vmem:[#allocation71_spill] sm:$0xff] %v10808_v53  ;;  %14217 = vst [vmem:[#allocation74_spill] sm:$0xff] %v10812_v51  ;;  %7091 = vmatpush1.bf16.msra.mxu0 %v10452_v18  ;;  %7447 = vmatpush1.bf16.msra.mxu1 %v10466_v4  ;;  %v14220_v18 = vld [vmem:[#allocation233_spill] sm:$0xff]  ;;  %v10848_v4 = vsub.f32 %v346_v43, %v3455_v50  ;;  %v10856_v57 = vsub.f32 %v341_v58, %v4906_v38  ;;  %v375_v50 = vld [vmem:[%s12475_s1 + $0x680] sm:$0xff]  ;;  %v4912_v58 = vand.u32 4294901760, %v355_v62 }
 0x1f2   :  { %1865 = vmatprep.mubr.f32.mxu0 %v14220_v18  ;;  %3345 = vmatprep.mubr.f32.mxu1 %v14220_v18  ;;  %14224 = vst [vmem:[#allocation80_spill] sm:$0xff] %v10854_v59  ;;  %v10870_v18 = vpack.c.bf16 %v3461_v33, %v3457_v40  ;;  %v4915_v38 = vand.u32 4294901760, %v362_v36  ;;  %v10874_v11 = vsub.f32 %v354_v9, %v3457_v40  ;;  %v367_v43 = vld [vmem:[%s12475_s1 + $0x640] sm:$0xff]  ;;  %v3469_v21 = vand.u32 4294901760, %v375_v50  ;;  %v14287_v52 = vld [vmem:[#allocation152_spill] sm:$0xff]  ;;  %v14288_v6 = vld [vmem:[#allocation123_spill] sm:$0xff] }
 0x1f3   :  { %14221 = vst [vmem:[#allocation78_spill] sm:$0xff] %v10848_v4  ;;  %7093 = vmatprep.subr.bf16.mxu0 %v14223_v26  ;;  %7448 = vmatprep.subr.bf16.mxu1 %v14200_v60  ;;  %v10868_v26 = vsub.f32 %v348_v24, %v4909_v41  ;;  %v10876_v45 = vsub.f32 %v361_v5, %v3461_v33  ;;  %v14231_v24 = vld [vmem:[#allocation77_spill] sm:$0xff]  ;;  %v14237_v41 = vld [vmem:[#allocation224_spill] sm:$0xff]  ;;  %v14245_v9 = vld [vmem:[#allocation86_spill] sm:$0xff]  ;;  %v14304_v35 = vand.u32 4294901760, %v14291_v37 }
 0x1f4   :  { %1867 = vmatmul.mubr.f32.gmra.mrb[8].mxu0 %v14225_v48  ;;  %3347 = vmatmul.mubr.f32.gmra.mrb[8].mxu1 %v14225_v48  ;;  %14226 = vst [vmem:[#allocation84_spill] sm:$0xff] %v10870_v18  ;;  %v10885_v44 = vpack.c.bf16 %v3463_v2, %v3459_v10  ;;  %v10889_v5 = vsub.f32 %v353_v49, %v3459_v10  ;;  %v3467_v10 = vand.u32 4294901760, %v367_v43  ;;  %v14247_v48 = vld [vmem:[#allocation199_spill] sm:$0xff]  ;;  %v14254_v18 = vld [vmem:[#allocation124_spill] sm:$0xff]  ;;  %v4921_v49 = vand.u32 4294901760, %v376_v0  ;;  %v14313_v12 = vld [vmem:[#allocation58_spill] sm:$0xff] }
 0x1f5   :  { %7095 = vmatpush1.bf16.msra.mxu0 %v14227_v42  ;;  %7450 = vmatpush1.bf16.msra.mxu1 %v14228_v14  ;;  %v3465_v42 = vand.u32 4294901760, %v368_v34  ;;  %v10891_v33 = vsub.f32 %v360_v55, %v3463_v2  ;;  %v10901_v28 = vpack.c.bf16 %v4915_v38, %v4912_v58  ;;  %v10903_v40 = vsub.f32 %v355_v62, %v4912_v58  ;;  %v14243_v2 = vld [vmem:[#allocation198_spill] sm:$0xff]  ;;  %v14257_v62 = vld [vmem:[#allocation204_spill] sm:$0xff]  ;;  %v14302_v61 = vld [vmem:[#allocation139_spill] sm:$0xff] }
 0x1f6   :  { %7097 = vmatprep.subr.bf16.mxu0 %v14231_v24  ;;  %7451 = vmatprep.subr.bf16.mxu1 %v14200_v60  ;;  %14232 = vst [vmem:[#allocation87_spill] sm:$0xff] %v10885_v44  ;;  %14235 = vst [vmem:[#allocation89_spill] sm:$0xff] %v10889_v5  ;;  %v14238_v24 = vld [vmem:[#allocation195_spill] sm:$0xff]  ;;  %v14244_v55 = vld [vmem:[#allocation82_spill] sm:$0xff]  ;;  %v10908_v14 = vsub.f32 %v362_v36, %v4915_v38  ;;  %v10928_v29 = vsub.f32 %v375_v50, %v3469_v21  ;;  %v14263_v50 = vand.u32 4294901760, %v14247_v48 }
 0x1f7   :  { %14236 = vst [vmem:[#allocation92_spill] sm:$0xff] %v10891_v33  ;;  %3482 = vmatprep.mubr.f32.mxu0 %v14237_v41  ;;  %4932 = vmatprep.mubr.f32.mxu1 %v14237_v41  ;;  %14241 = vst [vmem:[#allocation95_spill] sm:$0xff] %v10901_v28  ;;  %v369_v41 = vld [vmem:[%s12475_s1 + $0x650] sm:$0xff]  ;;  %v14248_v58 = vld [vmem:[#allocation202_spill] sm:$0xff]  ;;  %v10922_v36 = vpack.c.bf16 %v3469_v21, %v3465_v42  ;;  %v10924_v38 = vsub.f32 %v368_v34, %v3465_v42  ;;  %v14259_v19 = vand.u32 4294901760, %v14238_v24 }
 0x1f8   :  { %14242 = vst [vmem:[#allocation98_spill] sm:$0xff] %v10903_v40  ;;  %14246 = vst [vmem:[#allocation101_spill] sm:$0xff] %v10908_v14  ;;  %v14258_v44 = vld [vmem:[#allocation205_spill] sm:$0xff]  ;;  %v14260_v42 = vand.u32 4294901760, %v14243_v2  ;;  %v14262_v21 = vld [vmem:[#allocation100_spill] sm:$0xff]  ;;  %v3567_v51 = vsub.f32 %v14247_v48, %v14263_v50  ;;  %v14264_v28 = vand.u32 4294901760, %v14248_v58  ;;  %v10980_v30 = vsub.f32 %v376_v0, %v4921_v49 }
 0x1f9   :  { %7099 = vmatpush1.bf16.msra.mxu0 %v14244_v55  ;;  %7453 = vmatpush1.bf16.msra.mxu1 %v14245_v9  ;;  %v14251_v55 = vld [vmem:[#allocation91_spill] sm:$0xff]  ;;  %14252 = vst [vmem:[#allocation104_spill] sm:$0xff] %v10922_v36  ;;  %14253 = vst [vmem:[#allocation108_spill] sm:$0xff] %v10924_v38  ;;  %v3471_v9 = vand.u32 4294901760, %v374_v16  ;;  %v3561_v34 = vsub.f32 %v14238_v24, %v14259_v19  ;;  %v14265_v19 = vld [vmem:[#allocation105_spill] sm:$0xff]  ;;  %v14271_v25 = vand.u32 4294901760, %v14258_v44 }
 0x1fa   :  { %7101 = vmatprep.subr.bf16.mxu0 %v14251_v55  ;;  %7454 = vmatprep.subr.bf16.mxu1 %v14200_v60  ;;  %14256 = vst [vmem:[#allocation110_spill] sm:$0xff] %v10928_v29  ;;  %v4918_v55 = vand.u32 4294901760, %v369_v41  ;;  %v3573_v36 = vsub.f32 %v14243_v2, %v14260_v42  ;;  %v3579_v59 = vsub.f32 %v14248_v58, %v14264_v28  ;;  %v14270_v28 = vand.u32 4294901760, %v14257_v62  ;;  %v14272_v24 = vld [vmem:[#allocation142_spill] sm:$0xff]  ;;  %v14276_v50 = vld [vmem:[#allocation109_spill] sm:$0xff] }
 0x1fb   :  { %v10952_v42 = vpack.c.bf16 %v3471_v9, %v3467_v10  ;;  %v10959_v48 = vsub.f32 %v374_v16, %v3471_v9  ;;  %v14277_v16 = vld [vmem:[#allocation114_spill] sm:$0xff]  ;;  %14281 = vst [vmem:[#allocation129_spill] sm:$0xff] %v10980_v30  ;;  %v14285_v0 = vand.u32 4294901760, %v14275_v56 }
 0x1fc   :  { %v5007_v58 = vsub.f32 %v14257_v62, %v14270_v28  ;;  %v3574_v2 = vand.u32 4294901760, %v3573_v36  ;;  %v10974_v9 = vsub.f32 %v369_v41, %v4918_v55  ;;  %v3568_v28 = vand.u32 4294901760, %v3567_v51  ;;  %v14284_v41 = vld [vmem:[#allocation148_spill] sm:$0xff]  ;;  %v14289_v51 = vld [vmem:[#allocation127_spill] sm:$0xff] }
 0x1fd   :  { %7103 = vmatpush1.bf16.msra.mxu0 %v14261_v22  ;;  %7456 = vmatpush1.bf16.msra.mxu1 %v14262_v21  ;;  %14266 = vst [vmem:[#allocation113_spill] sm:$0xff] %v10952_v42  ;;  %v10954_v22 = vsub.f32 %v367_v43, %v3467_v10  ;;  %v14268_v21 = vld [vmem:[#allocation208_spill] sm:$0xff]  ;;  %14269 = vst [vmem:[#allocation119_spill] sm:$0xff] %v10959_v48  ;;  %v10969_v43 = vpack.c.bf16 %v4921_v49, %v4918_v55  ;;  %v3562_v10 = vand.u32 4294901760, %v3561_v34 }
 0x1fe   :  { %7105 = vmatprep.subr.bf16.mxu0 %v14265_v19  ;;  %7457 = vmatprep.subr.bf16.mxu1 %v14200_v60  ;;  %v5014_v19 = vsub.f32 %v14258_v44, %v14271_v25  ;;  %14278 = vst [vmem:[#allocation125_spill] sm:$0xff] %v10974_v9  ;;  %v3580_v62 = vand.u32 4294901760, %v3579_v59  ;;  %v14280_v44 = vld [vmem:[#allocation118_spill] sm:$0xff]  ;;  %v14282_v36 = vand.u32 4294901760, %v14268_v21  ;;  %v5008_v59 = vand.u32 4294901760, %v5007_v58  ;;  %v14340_v48 = vld [vmem:[#allocation95_spill] sm:$0xff] }
 0x1ff   :  { %14267 = vst [vmem:[#allocation117_spill] sm:$0xff] %v10954_v22  ;;  %14274 = vst [vmem:[#allocation122_spill] sm:$0xff] %v10969_v43  ;;  %v3597_v49 = vsub.f32 %v14275_v56, %v14285_v0  ;;  %v14293_v0 = vand.u32 4294901760, %v14283_v54 }
 0x200   :  { %v10985_v34 = vsub.f32 %v14268_v21, %v14282_v36  ;;  %v5015_v55 = vand.u32 4294901760, %v5014_v19  ;;  %v14286_v36 = vld [vmem:[#allocation151_spill] sm:$0xff]  ;;  %v11002_v58 = vpack.c.bf16 %v3580_v62, %v3568_v28  ;;  %v14290_v19 = vld [vmem:[#allocation156_spill] sm:$0xff]  ;;  %v14298_v62 = vand.u32 4294901760, %v14287_v52 }
 0x201   :  { %7107 = vmatpush1.bf16.msra.mxu0 %v14276_v50  ;;  %7459 = vmatpush1.bf16.msra.mxu1 %v14277_v16  ;;  %v10993_v50 = vpack.c.bf16 %v3574_v2, %v3562_v10  ;;  %v14292_v10 = vld [vmem:[#allocation132_spill] sm:$0xff]  ;;  %v3591_v16 = vsub.f32 %v14283_v54, %v14293_v0  ;;  %v14296_v2 = vand.u32 4294901760, %v14284_v41  ;;  %v14297_v0 = vand.u32 4294901760, %v14286_v36 }
 0x202   :  { %7109 = vmatprep.subr.bf16.mxu0 %v14280_v44  ;;  %7460 = vmatprep.subr.bf16.mxu1 %v14200_v60  ;;  %v14294_v21 = vld [vmem:[#allocation160_spill] sm:$0xff]  ;;  %v11017_v25 = vpack.c.bf16 %v5015_v55, %v5008_v59  ;;  %v3586_v44 = vand.u32 4294901760, %v10985_v34  ;;  %v5028_v54 = vsub.f32 %v14287_v52, %v14298_v62  ;;  %v14300_v55 = vld [vmem:[#allocation49_spill] sm:$0xff]  ;;  %v14305_v52 = vld [vmem:[#allocation186_spill] sm:$0xff] }
 0x203   :  { %v14299_v28 = vld [vmem:[#allocation48_spill] sm:$0xff]  ;;  %v3592_v23 = vand.u32 4294901760, %v3591_v16  ;;  %v14306_v59 = vand.u32 4294901760, %v14294_v21  ;;  %v14309_v62 = vld [vmem:[#allocation54_spill] sm:$0xff] }
 0x204   :  { %v14301_v34 = vld [vmem:[#allocation136_spill] sm:$0xff]  ;;  %v14310_v16 = vand.u32 4294901760, %v14299_v28 }
 0x205   :  { %7111 = vmatpush1.bf16.msra.mxu0 %v14288_v6  ;;  %7462 = vmatpush1.bf16.msra.mxu1 %v14289_v51  ;;  %v14295_v51 = vld [vmem:[#allocation45_spill] sm:$0xff]  ;;  %v5021_v6 = vsub.f32 %v14286_v36, %v14297_v0  ;;  %v3621_v0 = vsub.f32 %v14291_v37, %v14304_v35  ;;  %v14308_v37 = vld [vmem:[#allocation52_spill] sm:$0xff] }
 0x206   :  { %7113 = vmatprep.subr.bf16.mxu0 %v14292_v10  ;;  %7463 = vmatprep.subr.bf16.mxu1 %v14200_v60  ;;  %v3603_v10 = vsub.f32 %v14284_v41, %v14296_v2  ;;  %v3598_v2 = vand.u32 4294901760, %v3597_v49  ;;  %v14303_v41 = vand.u32 4294901760, %v14290_v19  ;;  %v3615_v49 = vsub.f32 %v14294_v21, %v14306_v59 }
 0x207   :  { %v5035_v53 = vsub.f32 %v14299_v28, %v14310_v16  ;;  %v14311_v59 = vand.u32 4294901760, %v14300_v55  ;;  %v5022_v36 = vand.u32 4294901760, %v5021_v6  ;;  %v3622_v16 = vand.u32 4294901760, %v3621_v0 }
 0x208   :  { %v3609_v56 = vsub.f32 %v14290_v19, %v14303_v41  ;;  %v3604_v35 = vand.u32 4294901760, %v3603_v10  ;;  %v14314_v10 = vld [vmem:[#allocation211_spill] sm:$0xff]  ;;  %v5029_v19 = vand.u32 4294901760, %v5028_v54 }
 0x209   :  { %7115 = vmatpush1.bf16.msra.mxu0 %v14301_v34  ;;  %7465 = vmatpush1.bf16.msra.mxu1 %v14302_v61  ;;  %v14307_v61 = vand.u32 4294901760, %v14295_v51  ;;  %v5042_v21 = vsub.f32 %v14300_v55, %v14311_v59  ;;  %v3616_v59 = vand.u32 4294901760, %v3615_v49  ;;  %v14319_v34 = vld [vmem:[#allocation47_spill] sm:$0xff] }
 0x20a   :  { %7117 = vmatprep.subr.bf16.mxu0 %v14305_v52  ;;  %7466 = vmatprep.subr.bf16.mxu1 %v14200_v60  ;;  %v3610_v4 = vand.u32 4294901760, %v3609_v56  ;;  %v14316_v56 = vand.u32 4294901760, %v14309_v62 }
 0x20b   :  { %v3627_v41 = vsub.f32 %v14295_v51, %v14307_v61  ;;  %v14312_v61 = vld [vmem:[#allocation57_spill] sm:$0xff]  ;;  %v11073_v51 = vpack.c.bf16 %v3598_v2, %v3586_v44  ;;  %v5043_v0 = vand.u32 4294901760, %v5042_v21  ;;  %v14318_v44 = vand.u32 4294901760, %v14313_v12 }
 0x20c   :  { %v3645_v6 = vsub.f32 %v14309_v62, %v14316_v56  ;;  %v14317_v49 = vand.u32 4294901760, %v14312_v61  ;;  %v11093_v56 = vpack.c.bf16 %v5029_v19, %v5022_v36  ;;  %v11100_v21 = vpack.c.bf16 %v3622_v16, %v3610_v4  ;;  %v14323_v16 = vld [vmem:[#allocation80_spill] sm:$0xff]  ;;  %v14335_v62 = vld [vmem:[#allocation85_spill] sm:$0xff]  ;;  %v14338_v4 = vld [vmem:[#allocation90_spill] sm:$0xff] }
 0x20d   :  { %7119 = vmatpush1.bf16.msra.mxu0 %v14314_v10  ;;  %7468 = vmatpush1.bf16.msra.mxu1 %v10758_v47  ;;  %v3628_v55 = vand.u32 4294901760, %v3627_v41  ;;  %v14315_v47 = vand.u32 4294901760, %v14308_v37  ;;  %v3651_v2 = vsub.f32 %v14313_v12, %v14318_v44  ;;  %v14320_v10 = vld [vmem:[#allocation61_spill] sm:$0xff]  ;;  %v14321_v44 = vld [vmem:[#allocation62_spill] sm:$0xff]  ;;  %v14327_v12 = vld [vmem:[#allocation75_spill] sm:$0xff] }
 0x20e   :  { %7121 = vmatprep.subr.bf16.mxu0 %v10766_v3  ;;  %7469 = vmatprep.subr.bf16.mxu1 %v14200_v60  ;;  %v5036_v3 = vand.u32 4294901760, %v5035_v53  ;;  %v3639_v41 = vsub.f32 %v14312_v61, %v14317_v49  ;;  %v3646_v19 = vand.u32 4294901760, %v3645_v6  ;;  %v14325_v6 = vld [vmem:[#allocation70_spill] sm:$0xff]  ;;  %v14332_v61 = vld [vmem:[#allocation81_spill] sm:$0xff] }
 0x20f   :  { %v3633_v54 = vsub.f32 %v14308_v37, %v14315_v47  ;;  %v11091_v47 = vpack.c.bf16 %v3604_v35, %v3592_v23  ;;  %v11102_v49 = vpack.c.bf16 %v3628_v55, %v3616_v59  ;;  %v14322_v55 = vld [vmem:[#allocation74_spill] sm:$0xff]  ;;  %v14324_v59 = vand.u32 4294901760, %v14320_v10  ;;  %v14326_v35 = vld [vmem:[#allocation72_spill] sm:$0xff] }
 0x210   :  { %v11110_v52 = vpack.c.bf16 %v5043_v0, %v5036_v3  ;;  %v14328_v3 = vld [vmem:[#allocation84_spill] sm:$0xff]  ;;  %v14329_v0 = vand.u32 4294901760, %v14321_v44  ;;  %v14333_v23 = vand.u32 4294901760, %v10488_v31  ;;  %v14341_v53 = vand.u32 4294901760, %v14325_v6 }
 0x211   :  { %7123 = vmatpush1.bf16.msra.mxu0 %v14319_v34  ;;  %7471 = vmatpush1.bf16.msra.mxu1 %v10788_v17  ;;  %v3634_v36 = vand.u32 4294901760, %v3633_v54  ;;  %v3652_v17 = vand.u32 4294901760, %v3651_v2  ;;  %v5049_v54 = vsub.f32 %v14320_v10, %v14324_v59  ;;  %v14330_v2 = vld [vmem:[#allocation76_spill] sm:$0xff]  ;;  %v14334_v10 = vld [vmem:[#allocation83_spill] sm:$0xff] }
 0x212   :  { %7125 = vmatprep.subr.bf16.mxu0 %v10799_v39  ;;  %7472 = vmatprep.subr.bf16.mxu1 %v14200_v60  ;;  %v3640_v39 = vand.u32 4294901760, %v3639_v41  ;;  %v5056_v41 = vsub.f32 %v14321_v44, %v14329_v0  ;;  %v3657_v34 = vsub.f32 %v10488_v31, %v14333_v23  ;;  %v14336_v37 = vld [vmem:[#allocation88_spill] sm:$0xff]  ;;  %v14337_v0 = vand.u32 4294901760, %v10490_v46  ;;  %v14339_v44 = vld [vmem:[#allocation87_spill] sm:$0xff]  ;;  %v14352_v31 = vld [vmem:[#allocation93_spill] sm:$0xff] }
 0x213   :  { %v11135_v30 = vpack.c.bf16 %v3646_v19, %v3634_v36  ;;  %v5050_v23 = vand.u32 4294901760, %v5049_v54  ;;  %v14342_v36 = vand.u32 4294901760, %v14326_v35  ;;  %v14345_v28 = vand.u32 4294901760, %v14330_v2 }
 0x214   :  { %v11137_v9 = vpack.c.bf16 %v3652_v17, %v3640_v39  ;;  %v14343_v17 = vand.u32 4294901760, %v14327_v12  ;;  %v5057_v59 = vand.u32 4294901760, %v5056_v41 }
 0x215   :  { %7127 = vmatpush1.bf16.msra.mxu0 %v14322_v55  ;;  %7474 = vmatpush1.bf16.msra.mxu1 %v14323_v16  ;;  %v14331_v16 = vld [vmem:[#allocation79_spill] sm:$0xff]  ;;  %v3669_v55 = vsub.f32 %v10490_v46, %v14337_v0  ;;  %v3675_v39 = vsub.f32 %v14326_v35, %v14342_v36  ;;  %v14344_v0 = vld [vmem:[#allocation104_spill] sm:$0xff]  ;;  %v5070_v54 = vsub.f32 %v14330_v2, %v14345_v28  ;;  %v14350_v35 = vand.u32 4294901760, %v14336_v37 }
 0x216   :  { %7129 = vmatprep.subr.bf16.mxu0 %v14328_v3  ;;  %7475 = vmatprep.subr.bf16.mxu1 %v14200_v60  ;;  %v3663_v3 = vsub.f32 %v14325_v6, %v14341_v53  ;;  %v5063_v19 = vsub.f32 %v14327_v12, %v14343_v17  ;;  %v3658_v6 = vand.u32 4294901760, %v3657_v34  ;;  %v14348_v17 = vand.u32 4294901760, %v14334_v10  ;;  %v14353_v34 = vld [vmem:[#allocation94_spill] sm:$0xff]  ;;  %v14355_v46 = vld [vmem:[#allocation99_spill] sm:$0xff] }
 0x217   :  { %v14349_v12 = vand.u32 4294901760, %v14335_v62  ;;  %v5077_v28 = vsub.f32 %v14336_v37, %v14350_v35  ;;  %v3670_v2 = vand.u32 4294901760, %v3669_v55  ;;  %v5071_v55 = vand.u32 4294901760, %v5070_v54  ;;  %v14359_v54 = vld [vmem:[#allocation102_spill] sm:$0xff] }
 0x218   :  { %v5064_v35 = vand.u32 4294901760, %v5063_v19  ;;  %v11185_v37 = vpack.c.bf16 %v5057_v59, %v5050_v23  ;;  %v14358_v22 = vand.u32 4294901760, %v14353_v34 }
 0x219   :  { %7131 = vmatpush1.bf16.msra.mxu0 %v14339_v44  ;;  %7477 = vmatpush1.bf16.msra.mxu1 %v14340_v48  ;;  %v14346_v48 = vand.u32 4294901760, %v14331_v16  ;;  %v14347_v44 = vand.u32 4294901760, %v14332_v61  ;;  %v3699_v41 = vsub.f32 %v14335_v62, %v14349_v12  ;;  %v14354_v12 = vld [vmem:[#allocation97_spill] sm:$0xff]  ;;  %v11198_v59 = vpack.c.bf16 %v3670_v2, %v3658_v6  ;;  %v14362_v6 = vld [vmem:[#allocation106_spill] sm:$0xff] }
 0x21a   :  { %7133 = vmatprep.subr.bf16.mxu0 %v14344_v0  ;;  %7478 = vmatprep.subr.bf16.mxu1 %v14200_v60  ;;  %v3687_v0 = vsub.f32 %v14334_v10, %v14348_v17  ;;  %v3664_v17 = vand.u32 4294901760, %v3663_v3  ;;  %v3676_v10 = vand.u32 4294901760, %v3675_v39  ;;  %v13227_v62 = vand.u32 4294901760, %v14354_v12 }
 0x21b   :  { %v3681_v53 = vsub.f32 %v14331_v16, %v14346_v48  ;;  %v3693_v36 = vsub.f32 %v14332_v61, %v14347_v44  ;;  %v14351_v48 = vand.u32 4294901760, %v14338_v4  ;;  %v14357_v39 = vand.u32 4294901760, %v14352_v31 }
 0x21c   :  { %v3688_v61 = vand.u32 4294901760, %v3687_v0  ;;  %v3717_v19 = vsub.f32 %v14353_v34, %v14358_v22  ;;  %v14361_v0 = vld [vmem:[#allocation103_spill] sm:$0xff]  ;;  %v11209_v22 = vpack.c.bf16 %v3676_v10, %v3664_v17  ;;  %v13229_v2 = vand.u32 4294901760, %v14362_v6 }
 0x21d   :  { %v5084_v16 = vsub.f32 %v14338_v4, %v14351_v48  ;;  %7135 = vmatpush1.bf16.msra.mxu0 %v10952_v42  ;;  %7480 = vmatpush1.bf16.msra.mxu1 %v10969_v43  ;;  %v3682_v48 = vand.u32 4294901760, %v3681_v53  ;;  %v3694_v44 = vand.u32 4294901760, %v3693_v36  ;;  %v3700_v42 = vand.u32 4294901760, %v3699_v41  ;;  %v14356_v43 = vld [vmem:[#allocation223_spill] sm:$0xff]  ;;  %v14365_v53 = vld [vmem:[#allocation112_spill] sm:$0xff] }
 0x21e   :  { %7137 = vmatprep.subr.bf16.mxu0 %v10993_v50  ;;  %7481 = vmatprep.subr.bf16.mxu1 %v14200_v60  ;;  %v5078_v4 = vand.u32 4294901760, %v5077_v28  ;;  %v3705_v50 = vsub.f32 %v14352_v31, %v14357_v39  ;;  %v14363_v28 = vld [vmem:[#allocation107_spill] sm:$0xff]  ;;  %v13232_v36 = vand.u32 4294901760, %v14365_v53  ;;  %v3718_v17 = vand.u32 4294901760, %v3717_v19  ;;  %v14371_v19 = vld [vmem:[#allocation116_spill] sm:$0xff] }
 0x21f   :  { %v5085_v3 = vand.u32 4294901760, %v5084_v16  ;;  %v14360_v16 = vand.u32 4294901760, %v14355_v46  ;;  %v11216_v41 = vpack.c.bf16 %v3700_v42, %v3688_v61  ;;  %v13230_v39 = vand.u32 4294901760, %v14363_v28  ;;  %v14368_v42 = vld [vmem:[#allocation174_spill] sm:$0xff] }
 0x220   :  { %3488 = vmatmul.mubr.f32.vlgmr.msra.gmra.mrb[10].mxu0 %v14356_v43  ;;  %4938 = vmatmul.mubr.f32.vlgmr.msra.gmra.mrb[10].mxu1 %v14356_v43  ;;  %v3711_v43 = vsub.f32 %v14354_v12, %v13227_v62  ;;  %v14364_v62 = vld [vmem:[#allocation111_spill] sm:$0xff]  ;;  %v3706_v10 = vand.u32 4294901760, %v3705_v50  ;;  %v3729_v50 = vsub.f32 %v14362_v6, %v13229_v2  ;;  %v14374_v2 = vld [vmem:[#allocation181_spill] sm:$0xff] }
 0x221   :  { %7139 = vmatpush1.bf16.msra.mxu0 %v11002_v58  ;;  %7483 = vmatpush1.bf16.msra.mxu1 %v11017_v25  ;;  %v3723_v23 = vsub.f32 %v14355_v46, %v14360_v16  ;;  %v11211_v58 = vpack.c.bf16 %v5071_v55, %v5064_v35  ;;  %v11213_v25 = vpack.c.bf16 %v3694_v44, %v3682_v48  ;;  %v13233_v16 = vand.u32 4294901760, %v14364_v62  ;;  %v14366_v12 = vld [vmem:[#allocation171_spill] sm:$0xff]  ;;  %v14376_v6 = vld [vmem:[#allocation225_spill] sm:$0xff] }
 0x222   :  { %7141 = vmatprep.subr.bf16.mxu0 %v11073_v51  ;;  %7484 = vmatprep.subr.bf16.mxu1 %v14200_v60  ;;  %v11223_v51 = vpack.c.bf16 %v5085_v3, %v5078_v4  ;;  %v14367_v44 = vand.u32 4294901760, %v14359_v54  ;;  %v3712_v61 = vand.u32 4294901760, %v3711_v43  ;;  %v14369_v4 = vand.u32 4294901760, %v14361_v0  ;;  %v14370_v48 = vld [vmem:[#allocation115_spill] sm:$0xff]  ;;  %v14373_v43 = vld [vmem:[#allocation121_spill] sm:$0xff] }
 0x223   :  { %3498 = vmatprep.mubr.f32.mxu0 %v14366_v12  ;;  %4947 = vmatprep.mubr.f32.mxu1 %v14366_v12  ;;  %v3724_v55 = vand.u32 4294901760, %v3723_v23 }
 0x224   :  { %v11228_v35 = vsub.f32 %v14359_v54, %v14367_v44  ;;  %3504 = vmatmul.mubr.f32.gmra.mrb[12].mxu0 %v14368_v42  ;;  %4953 = vmatmul.mubr.f32.gmra.mrb[12].mxu1 %v14368_v42  ;;  %v5098_v12 = vsub.f32 %v14361_v0, %v14369_v4  ;;  %v14372_v44 = vld [vmem:[#allocation120_spill] sm:$0xff]  ;;  %v3741_v42 = vsub.f32 %v14363_v28, %v13230_v39  ;;  %v14392_v28 = vld [vmem:[#allocation238_spill] sm:$0xff] }
 0x225   :  { %7143 = vmatpush1.bf16.msra.mxu0 %v11091_v47  ;;  %7486 = vmatpush1.bf16.msra.mxu1 %v11093_v56  ;;  %v11257_v4 = vsub.f32 %v14365_v53, %v13232_v36  ;;  %v11261_v56 = vpack.c.bf16 %v3718_v17, %v3706_v10  ;;  %v14375_v47 = vld [vmem:[#allocation126_spill] sm:$0xff]  ;;  %v11270_v36 = vpack.c.bf16 %v3724_v55, %v3712_v61  ;;  %v14378_v17 = vld [vmem:[#allocation128_spill] sm:$0xff]  ;;  %v14382_v55 = vand.u32 4294901760, %v14373_v43 }
 0x226   :  { %7145 = vmatprep.subr.bf16.mxu0 %v11100_v21  ;;  %7487 = vmatprep.subr.bf16.mxu1 %v14200_v60  ;;  %v11252_v21 = vsub.f32 %v14364_v62, %v13233_v16  ;;  %v5092_v23 = vand.u32 4294901760, %v11228_v35  ;;  %v14379_v16 = vld [vmem:[#allocation130_spill] sm:$0xff]  ;;  %v5099_v3 = vand.u32 4294901760, %v5098_v12  ;;  %v3730_v35 = vand.u32 4294901760, %v3729_v50  ;;  %v14383_v62 = vld [vmem:[#allocation232_spill] sm:$0xff]  ;;  %v14387_v50 = vld [vmem:[#allocation135_spill] sm:$0xff] }
 0x227   :  { %3514 = vmatprep.mubr.f32.mxu0 %v14374_v2  ;;  %4962 = vmatprep.mubr.f32.mxu1 %v14374_v2  ;;  %v14377_v2 = vand.u32 4294901760, %v14370_v48  ;;  %v14384_v12 = vand.u32 4294901760, %v14254_v18 }
 0x228   :  { %3520 = vmatmul.mubr.f32.gmra.mrb[14].mxu0 %v14376_v6  ;;  %4968 = vmatmul.mubr.f32.gmra.mrb[14].mxu1 %v14376_v6  ;;  %v14380_v6 = vand.u32 4294901760, %v14371_v19  ;;  %v3736_v39 = vand.u32 4294901760, %v11252_v21 }
 0x229   :  { %7147 = vmatpush1.bf16.msra.mxu0 %v11102_v49  ;;  %7489 = vmatpush1.bf16.msra.mxu1 %v11110_v52  ;;  %v5105_v10 = vsub.f32 %v14370_v48, %v14377_v2  ;;  %v14381_v52 = vand.u32 4294901760, %v14372_v44  ;;  %v3765_v2 = vsub.f32 %v14373_v43, %v14382_v55  ;;  %v3742_v48 = vand.u32 4294901760, %v3741_v42  ;;  %v14388_v43 = vld [vmem:[#allocation234_spill] sm:$0xff] }
 0x22a   :  { %7149 = vmatprep.subr.bf16.mxu0 %v11135_v30  ;;  %7490 = vmatprep.subr.bf16.mxu1 %v14200_v60  ;;  %v5112_v49 = vsub.f32 %v14371_v19, %v14380_v6  ;;  %v3748_v30 = vand.u32 4294901760, %v11257_v4  ;;  %v3759_v6 = vsub.f32 %v14254_v18, %v14384_v12  ;;  %v14386_v19 = vld [vmem:[#allocation133_spill] sm:$0xff]  ;;  %v14390_v4 = vand.u32 4294901760, %v14379_v16  ;;  %v14391_v55 = vld [vmem:[#allocation138_spill] sm:$0xff] }
 0x22b   :  { %v3753_v61 = vsub.f32 %v14372_v44, %v14381_v52  ;;  %3530 = vmatprep.mubr.f32.mxu0 %v14383_v62  ;;  %4977 = vmatprep.mubr.f32.mxu1 %v14383_v62  ;;  %v14385_v52 = vand.u32 4294901760, %v14375_v47  ;;  %v14389_v62 = vand.u32 4294901760, %v14378_v17  ;;  %v7164_v53 = vpack.c.bf16 %v3742_v48, %v3730_v35 }
 0x22c   :  { %3536 = vmatmul.mubr.f32.gmra.mrb[16].mxu0 %v14388_v43  ;;  %4983 = vmatmul.mubr.f32.gmra.mrb[16].mxu1 %v14388_v43  ;;  %v5126_v12 = vsub.f32 %v14379_v16, %v14390_v4  ;;  %v5106_v43 = vand.u32 4294901760, %v5105_v10  ;;  %v3760_v4 = vand.u32 4294901760, %v3759_v6  ;;  %v14394_v10 = vand.u32 4294901760, %v14387_v50 }
 0x22d   :  { %v3771_v44 = vsub.f32 %v14375_v47, %v14385_v52  ;;  %7151 = vmatpush1.bf16.msra.mxu0 %v11137_v9  ;;  %7492 = vmatpush1.bf16.msra.mxu1 %v11185_v37  ;;  %v5119_v21 = vsub.f32 %v14378_v17, %v14389_v62  ;;  %v5113_v9 = vand.u32 4294901760, %v5112_v49  ;;  %v3754_v18 = vand.u32 4294901760, %v3753_v61 }
 0x22e   :  { %7153 = vmatprep.subr.bf16.mxu0 %v11198_v59  ;;  %7493 = vmatprep.subr.bf16.mxu1 %v14200_v60  ;;  %v3766_v37 = vand.u32 4294901760, %v3765_v2  ;;  %v7500_v47 = vpack.c.bf16 %v5099_v3, %v5092_v23  ;;  %v13245_v62 = vand.u32 4294901760, %v14272_v24  ;;  %v13244_v17 = vand.u32 4294901760, %v14273_v15  ;;  %v14395_v3 = vld [vmem:[#allocation240_spill] sm:$0xff] }
 0x22f   :  { %3546 = vmatprep.mubr.f32.mxu0 %v14392_v28  ;;  %4992 = vmatprep.mubr.f32.mxu1 %v14392_v28  ;;  %v3772_v42 = vand.u32 4294901760, %v3771_v44  ;;  %v14393_v59 = vand.u32 4294901760, %v14386_v19  ;;  %v3789_v49 = vsub.f32 %v14387_v50, %v14394_v10  ;;  %v5120_v48 = vand.u32 4294901760, %v5119_v21 }
 0x230   :  { %3552 = vmatmul.mubr.f32.gmra.mrb[18].mxu0 %v14395_v3  ;;  %4998 = vmatmul.mubr.f32.gmra.mrb[18].mxu1 %v14395_v3  ;;  %v5127_v28 = vand.u32 4294901760, %v5126_v12  ;;  %v14396_v44 = vand.u32 4294901760, %v10702_v27  ;;  %v14397_v35 = vand.u32 4294901760, %v14391_v55  ;;  %v7166_v2 = vpack.c.bf16 %v3748_v30, %v3736_v39  ;;  %v14399_v12 = vld [vmem:[#allocation210_spill] sm:$0xff] }
 0x231   :  { %v3777_v52 = vsub.f32 %v14386_v19, %v14393_v59  ;;  %7155 = vmatpush1.bf16.msra.mxu0 %v11209_v22  ;;  %7495 = vmatpush1.bf16.msra.mxu1 %v11211_v58  ;;  %v7503_v6 = vpack.c.bf16 %v5113_v9, %v5106_v43  ;;  %v7168_v59 = vpack.c.bf16 %v3766_v37, %v3754_v18  ;;  %v14398_v22 = vld [vmem:[#allocation187_spill] sm:$0xff]  ;;  %v13247_v3 = vand.u32 4294901760, %v14399_v12 }
 0x232   :  { %v3783_v23 = vsub.f32 %v10702_v27, %v14396_v44  ;;  %v3795_v61 = vsub.f32 %v14391_v55, %v14397_v35  ;;  %7157 = vmatprep.subr.bf16.mxu0 %v11213_v25  ;;  %7496 = vmatprep.subr.bf16.mxu1 %v14200_v60  ;;  %v13246_v10 = vand.u32 4294901760, %v14398_v22  ;;  %v5133_v58 = vsub.f32 %v14272_v24, %v13245_v62  ;;  %v14400_v25 = vld [vmem:[#allocation218_spill] sm:$0xff]  ;;  %v14401_v43 = vld [vmem:[#allocation183_spill] sm:$0xff] }
 0x233   :  { %v5140_v21 = vsub.f32 %v14273_v15, %v13244_v17  ;;  %v13248_v44 = vand.u32 4294901760, %v10746_v20  ;;  %3923 = vmatprep.mubr.f32.mxu0 %v14400_v25  ;;  %5218 = vmatprep.mubr.f32.mxu1 %v14400_v25  ;;  %v11347_v39 = vpack.c.bf16 %v3772_v42, %v3760_v4  ;;  %v3778_v18 = vand.u32 4294901760, %v3777_v52  ;;  %v14403_v4 = vld [vmem:[#allocation53_spill] sm:$0xff] }
 0x234   :  { %v3790_v30 = vand.u32 4294901760, %v3789_v49  ;;  %v13249_v9 = vand.u32 4294901760, %v14401_v43  ;;  %v7506_v37 = vpack.c.bf16 %v5127_v28, %v5120_v48  ;;  %v3784_v35 = vand.u32 4294901760, %v3783_v23 }
 0x235   :  { %7159 = vmatpush1.bf16.msra.mxu0 %v11216_v41  ;;  %7498 = vmatpush1.bf16.msra.mxu1 %v11223_v51  ;;  %v3796_v17 = vand.u32 4294901760, %v3795_v61  ;;  %v13250_v62 = vand.u32 4294901760, %v10760_v32  ;;  %v3801_v42 = vsub.f32 %v14398_v22, %v13246_v10  ;;  %v13257_v41 = vand.u32 4294901760, %v10772_v7  ;;  %v14402_v61 = vld [vmem:[#allocation51_spill] sm:$0xff] }
 0x236   :  { %7161 = vmatprep.subr.bf16.mxu0 %v11261_v56  ;;  %7499 = vmatprep.subr.bf16.mxu1 %v14200_v60  ;;  %v5134_v51 = vand.u32 4294901760, %v5133_v58  ;;  %v5141_v49 = vand.u32 4294901760, %v5140_v21  ;;  %v3813_v48 = vsub.f32 %v14399_v12, %v13247_v3  ;;  %v3807_v56 = vsub.f32 %v10746_v20, %v13248_v44  ;;  %v14404_v44 = vld [vmem:[#allocation63_spill] sm:$0xff] }
 0x237   :  { %v7172_v28 = vpack.c.bf16 %v3790_v30, %v3778_v18  ;;  %v3819_v23 = vsub.f32 %v14401_v43, %v13249_v9  ;;  %v13256_v10 = vand.u32 4294901760, %v14402_v61  ;;  %v7174_v58 = vpack.c.bf16 %v3796_v17, %v3784_v35 }
 0x238   :  { %v5147_v21 = vsub.f32 %v10760_v32, %v13250_v62  ;;  %v14405_v30 = vand.u32 4294901760, %v10764_v1  ;;  %v14406_v52 = vand.u32 4294901760, %v10768_v8  ;;  %v7509_v17 = vpack.c.bf16 %v5141_v49, %v5134_v51  ;;  %v14408_v32 = vld [vmem:[#allocation68_spill] sm:$0xff] }
 0x239   :  { %7163 = vmatpush1.bf16.msra.mxu0 %v11270_v36  ;;  %7501 = vmatpush1.bf16.msra.mxu1 %v7500_v47  ;;  %v3837_v47 = vsub.f32 %v10772_v7, %v13257_v41  ;;  %v3802_v35 = vand.u32 4294901760, %v3801_v42  ;;  %v3814_v62 = vand.u32 4294901760, %v3813_v48  ;;  %v3808_v3 = vand.u32 4294901760, %v3807_v56  ;;  %v14411_v48 = vld [vmem:[#allocation71_spill] sm:$0xff] }
 0x23a   :  { %7165 = vmatprep.subr.bf16.mxu0 %v7164_v53  ;;  %7502 = vmatprep.subr.bf16.mxu1 %v14200_v60  ;;  %v5154_v9 = vsub.f32 %v10764_v1, %v14405_v30  ;;  %v3825_v36 = vsub.f32 %v10768_v8, %v14406_v52  ;;  %v3820_v18 = vand.u32 4294901760, %v3819_v23  ;;  %v3831_v53 = vsub.f32 %v14402_v61, %v13256_v10  ;;  %v14412_v1 = vld [vmem:[#allocation78_spill] sm:$0xff] }
 0x23b   :  { %v14407_v25 = vand.u32 4294901760, %v14403_v4  ;;  %v14409_v52 = vand.u32 4294901760, %v10795_v13  ;;  %v14410_v42 = vand.u32 4294901760, %v14404_v44  ;;  %v13269_v23 = vand.u32 4294901760, %v10814_v63 }
 0x23c   :  { %v5155_v10 = vand.u32 4294901760, %v5154_v9  ;;  %v3826_v41 = vand.u32 4294901760, %v3825_v36  ;;  %v13268_v61 = vand.u32 4294901760, %v14412_v1  ;;  %v14413_v56 = vand.u32 4294901760, %v14408_v32 }
 0x23d   :  { %v3843_v30 = vsub.f32 %v14403_v4, %v14407_v25  ;;  %7167 = vmatpush1.bf16.msra.mxu0 %v7166_v2  ;;  %7504 = vmatpush1.bf16.msra.mxu1 %v7503_v6  ;;  %v5161_v51 = vsub.f32 %v10795_v13, %v14409_v52  ;;  %v5168_v49 = vsub.f32 %v14404_v44, %v14410_v42  ;;  %v5148_v25 = vand.u32 4294901760, %v5147_v21 }
 0x23e   :  { %7169 = vmatprep.subr.bf16.mxu0 %v7168_v59  ;;  %7505 = vmatprep.subr.bf16.mxu1 %v14200_v60  ;;  %v3838_v2 = vand.u32 4294901760, %v3837_v47  ;;  %v7176_v6 = vpack.c.bf16 %v3814_v62, %v3802_v35  ;;  %v13267_v52 = vand.u32 4294901760, %v10856_v57  ;;  %v13263_v13 = vand.u32 4294901760, %v10868_v26 }
 0x23f   :  { %v7178_v4 = vpack.c.bf16 %v3820_v18, %v3808_v3  ;;  %v3832_v42 = vand.u32 4294901760, %v3831_v53  ;;  %v3844_v44 = vand.u32 4294901760, %v3843_v30  ;;  %v3849_v59 = vsub.f32 %v14408_v32, %v14413_v56 }
 0x240   :  { %v5162_v9 = vand.u32 4294901760, %v5161_v51  ;;  %v5169_v21 = vand.u32 4294901760, %v5168_v49  ;;  %v14414_v62 = vand.u32 4294901760, %v14411_v48  ;;  %v3855_v47 = vsub.f32 %v10814_v63, %v13269_v23 }
 0x241   :  { %7171 = vmatpush1.bf16.msra.mxu0 %v11347_v39  ;;  %7507 = vmatpush1.bf16.msra.mxu1 %v7506_v37  ;;  %v7512_v3 = vpack.c.bf16 %v5155_v10, %v5148_v25  ;;  %v7180_v18 = vpack.c.bf16 %v3838_v2, %v3826_v41  ;;  %v13265_v35 = vand.u32 4294901760, %v10874_v11  ;;  %v13264_v39 = vand.u32 4294901760, %v10876_v45 }
 0x242   :  { %v3861_v36 = vsub.f32 %v14411_v48, %v14414_v62  ;;  %7173 = vmatprep.subr.bf16.mxu0 %v7172_v28  ;;  %7508 = vmatprep.subr.bf16.mxu1 %v14200_v60  ;;  %v3867_v37 = vsub.f32 %v14412_v1, %v13268_v61  ;;  %v5175_v53 = vsub.f32 %v10856_v57, %v13267_v52  ;;  %v13266_v30 = vand.u32 4294901760, %v10889_v5  ;;  %v14418_v61 = vld [vmem:[#allocation129_spill] sm:$0xff] }
 0x243   :  { %v5182_v28 = vsub.f32 %v10868_v26, %v13263_v13  ;;  %v7182_v10 = vpack.c.bf16 %v3844_v44, %v3832_v42  ;;  %v13270_v41 = vand.u32 4294901760, %v10891_v33  ;;  %v13271_v51 = vand.u32 4294901760, %v10903_v40 }
 0x244   :  { %v13272_v49 = vand.u32 4294901760, %v10908_v14  ;;  %v7515_v56 = vpack.c.bf16 %v5169_v21, %v5162_v9  ;;  %v3850_v25 = vand.u32 4294901760, %v3849_v59  ;;  %v3862_v2 = vand.u32 4294901760, %v3861_v36 }
 0x245   :  { %7175 = vmatpush1.bf16.msra.mxu0 %v7174_v58  ;;  %7510 = vmatpush1.bf16.msra.mxu1 %v7509_v17  ;;  %v3856_v62 = vand.u32 4294901760, %v3855_v47  ;;  %v3873_v13 = vsub.f32 %v10874_v11, %v13265_v35  ;;  %v3885_v44 = vsub.f32 %v10876_v45, %v13264_v39  ;;  %v13273_v42 = vand.u32 4294901760, %v10924_v38  ;;  %v14415_v39 = vld [vmem:[#allocation117_spill] sm:$0xff] }
 0x246   :  { %7177 = vmatprep.subr.bf16.mxu0 %v7176_v6  ;;  %7511 = vmatprep.subr.bf16.mxu1 %v14200_v60  ;;  %v13274_v58 = vand.u32 4294901760, %v10928_v29  ;;  %v3868_v17 = vand.u32 4294901760, %v3867_v37  ;;  %v5176_v9 = vand.u32 4294901760, %v5175_v53  ;;  %v5183_v59 = vand.u32 4294901760, %v5182_v28  ;;  %v14416_v28 = vld [vmem:[#allocation119_spill] sm:$0xff] }
 0x247   :  { %v3879_v6 = vsub.f32 %v10889_v5, %v13266_v30  ;;  %v3891_v21 = vsub.f32 %v10891_v33, %v13270_v41  ;;  %v5189_v36 = vsub.f32 %v10903_v40, %v13271_v51  ;;  %v5196_v47 = vsub.f32 %v10908_v14, %v13272_v49  ;;  %v14417_v30 = vld [vmem:[#allocation125_spill] sm:$0xff] }
 0x248   :  { %v7184_v53 = vpack.c.bf16 %v3862_v2, %v3850_v25  ;;  %v3874_v41 = vand.u32 4294901760, %v3873_v13  ;;  %v3886_v51 = vand.u32 4294901760, %v3885_v44  ;;  %v3897_v49 = vsub.f32 %v10924_v38, %v13273_v42 }
 0x249   :  { %7179 = vmatpush1.bf16.msra.mxu0 %v7178_v4  ;;  %7513 = vmatpush1.bf16.msra.mxu1 %v7512_v3  ;;  %v3909_v4 = vsub.f32 %v10928_v29, %v13274_v58  ;;  %v7186_v3 = vpack.c.bf16 %v3868_v17, %v3856_v62  ;;  %v7518_v25 = vpack.c.bf16 %v5183_v59, %v5176_v9  ;;  %v3880_v2 = vand.u32 4294901760, %v3879_v6 }
 0x24a   :  { %7181 = vmatprep.subr.bf16.mxu0 %v7180_v18  ;;  %7514 = vmatprep.subr.bf16.mxu1 %v14200_v60  ;;  %v3892_v35 = vand.u32 4294901760, %v3891_v21  ;;  %v5190_v52 = vand.u32 4294901760, %v5189_v36  ;;  %v5197_v37 = vand.u32 4294901760, %v5196_v47  ;;  %v14419_v18 = vand.u32 4294901760, %v14415_v39 }
 0x24b   :  { %v14420_v13 = vand.u32 4294901760, %v14416_v28  ;;  %v14421_v42 = vand.u32 4294901760, %v14417_v30  ;;  %v14422_v62 = vand.u32 4294901760, %v14418_v61  ;;  %v7188_v9 = vpack.c.bf16 %v3886_v51, %v3874_v41  ;;  %v14423_v41 = vld [vmem:[#allocation195_spill] sm:$0xff]  ;;  %v14426_v51 = vld [vmem:[#allocation202_spill] sm:$0xff] }
 0x24c   :  { %v3903_v23 = vsub.f32 %v14415_v39, %v14419_v18  ;;  %v3898_v59 = vand.u32 4294901760, %v3897_v49  ;;  %v3910_v6 = vand.u32 4294901760, %v3909_v4 }
 0x24d   :  { %7183 = vmatpush1.bf16.msra.mxu0 %v7182_v10  ;;  %7516 = vmatpush1.bf16.msra.mxu1 %v7515_v56  ;;  %v3915_v44 = vsub.f32 %v14416_v28, %v14420_v13  ;;  %v5203_v58 = vsub.f32 %v14417_v30, %v14421_v42  ;;  %v5210_v17 = vsub.f32 %v14418_v61, %v14422_v62  ;;  %v14432_v62 = vld [vmem:[#allocation147_spill] sm:$0xff] }
 0x24e   :  { %7185 = vmatprep.subr.bf16.mxu0 %v7184_v53  ;;  %7517 = vmatprep.subr.bf16.mxu1 %v14200_v60  ;;  %v7190_v10 = vpack.c.bf16 %v3892_v35, %v3880_v2  ;;  %v7521_v56 = vpack.c.bf16 %v5197_v37, %v5190_v52  ;;  %v3904_v21 = vand.u32 4294901760, %v3903_v23  ;;  %v7192_v42 = vpack.c.bf16 %v3910_v6, %v3898_v59  ;;  %v14424_v35 = vld [vmem:[#allocation198_spill] sm:$0xff]  ;;  %v14425_v23 = vld [vmem:[#allocation199_spill] sm:$0xff]  ;;  %v14428_v37 = vld [vmem:[#allocation205_spill] sm:$0xff] }
 0x24f   :  { %v3916_v36 = vand.u32 4294901760, %v3915_v44  ;;  %v5204_v47 = vand.u32 4294901760, %v5203_v58  ;;  %v5211_v18 = vand.u32 4294901760, %v5210_v17  ;;  %v7196_v52 = vpack.c.bf16 %v14424_v35, %v14423_v41  ;;  %v14427_v58 = vld [vmem:[#allocation204_spill] sm:$0xff]  ;;  %v14431_v44 = vld [vmem:[#allocation217_spill] sm:$0xff]  ;;  %v14434_v59 = vld [vmem:[#allocation151_spill] sm:$0xff] }
 0x250   :  { %v7198_v49 = vpack.c.bf16 %v14426_v51, %v14425_v23  ;;  %v7527_v4 = vpack.c.bf16 %v14428_v37, %v14427_v58  ;;  %v14433_v17 = vld [vmem:[#allocation148_spill] sm:$0xff] }
 0x251   :  { %7187 = vmatpush1.bf16.msra.mxu0 %v7186_v3  ;;  %7519 = vmatpush1.bf16.msra.mxu1 %v7518_v25  ;;  %v7194_v53 = vpack.c.bf16 %v3916_v36, %v3904_v21  ;;  %v7524_v13 = vpack.c.bf16 %v5211_v18, %v5204_v47  ;;  %v14429_v3 = vld [vmem:[#allocation208_spill] sm:$0xff]  ;;  %v14437_v21 = vld [vmem:[#allocation157_spill] sm:$0xff]  ;;  %v14438_v47 = vld [vmem:[#allocation162_spill] sm:$0xff] }
 0x252   :  { %7189 = vmatprep.subr.bf16.mxu0 %v7188_v9  ;;  %7520 = vmatprep.subr.bf16.mxu1 %v14200_v60  ;;  %v14430_v25 = vld [vmem:[#allocation140_spill] sm:$0xff]  ;;  %v7202_v9 = vpack.c.bf16 %v14433_v17, %v14432_v62 }
 0x253   :  { %v7200_v2 = vpack.c.bf16 %v14430_v25, %v14429_v3  ;;  %v14435_v6 = vld [vmem:[#allocation152_spill] sm:$0xff] }
 0x254   :  { %v14439_v18 = vld [vmem:[#allocation164_spill] sm:$0xff] }
 0x255   :  { %7191 = vmatpush1.bf16.msra.mxu0 %v7190_v10  ;;  %7522 = vmatpush1.bf16.msra.mxu1 %v7521_v56  ;;  %v7530_v10 = vpack.c.bf16 %v14435_v6, %v14434_v59  ;;  %v14436_v56 = vld [vmem:[#allocation156_spill] sm:$0xff] }
 0x256   :  { %7193 = vmatprep.subr.bf16.mxu0 %v7192_v42  ;;  %7523 = vmatprep.subr.bf16.mxu1 %v14200_v60  ;;  %v7204_v36 = vpack.c.bf16 %v14437_v21, %v14436_v56  ;;  %v14440_v42 = vld [vmem:[#allocation160_spill] sm:$0xff] }
 0x257   :  { %v14446_v56 = vld [vmem:[#allocation172_spill] sm:$0xff] }
 0x259   :  { %7195 = vmatpush1.bf16.msra.mxu0 %v7194_v53  ;;  %7525 = vmatpush1.bf16.msra.mxu1 %v7524_v13  ;;  %v14441_v53 = vld [vmem:[#allocation45_spill] sm:$0xff] }
 0x25a   :  { %7197 = vmatprep.subr.bf16.mxu0 %v7196_v52  ;;  %7526 = vmatprep.subr.bf16.mxu1 %v14200_v60  ;;  %v7206_v13 = vpack.c.bf16 %v14441_v53, %v14440_v42  ;;  %v14442_v52 = vld [vmem:[#allocation48_spill] sm:$0xff] }
 0x25c   :  { %3925 = vmatmul.mubr.f32.vlgmr.msra.gmra.mrb[10].mxu0 %v14431_v44  ;;  %5220 = vmatmul.mubr.f32.vlgmr.msra.gmra.mrb[10].mxu1 %v14431_v44  ;;  %v14445_v44 = vld [vmem:[#allocation54_spill] sm:$0xff] }
 0x25d   :  { %7199 = vmatpush1.bf16.msra.mxu0 %v7198_v49  ;;  %7528 = vmatpush1.bf16.msra.mxu1 %v7527_v4  ;;  %v14443_v49 = vld [vmem:[#allocation49_spill] sm:$0xff] }
 0x25e   :  { %7201 = vmatprep.subr.bf16.mxu0 %v7200_v2  ;;  %7529 = vmatprep.subr.bf16.mxu1 %v14200_v60  ;;  %v7533_v4 = vpack.c.bf16 %v14443_v49, %v14442_v52  ;;  %v14444_v2 = vld [vmem:[#allocation52_spill] sm:$0xff]  ;;  %v14450_v49 = vld [vmem:[#allocation61_spill] sm:$0xff] }
 0x25f   :  { %3931 = vmatprep.mubr.f32.mxu0 %v14438_v47  ;;  %5225 = vmatprep.mubr.f32.mxu1 %v14438_v47  ;;  %v7208_v21 = vpack.c.bf16 %v14445_v44, %v14444_v2  ;;  %v14447_v47 = vld [vmem:[#allocation178_spill] sm:$0xff] }
 0x260   :  { %3933 = vmatmul.mubr.f32.gmra.mrb[12].mxu0 %v14439_v18  ;;  %5227 = vmatmul.mubr.f32.gmra.mrb[12].mxu1 %v14439_v18  ;;  %v14452_v44 = vld [vmem:[#allocation226_spill] sm:$0xff] }
 0x261   :  { %7203 = vmatpush1.bf16.msra.mxu0 %v7202_v9  ;;  %7531 = vmatpush1.bf16.msra.mxu1 %v7530_v10  ;;  %v14448_v9 = vld [vmem:[#allocation57_spill] sm:$0xff]  ;;  %v14449_v10 = vld [vmem:[#allocation58_spill] sm:$0xff] }
 0x262   :  { %7205 = vmatprep.subr.bf16.mxu0 %v7204_v36  ;;  %7532 = vmatprep.subr.bf16.mxu1 %v14200_v60  ;;  %v7210_v18 = vpack.c.bf16 %v14449_v10, %v14448_v9  ;;  %v14451_v36 = vld [vmem:[#allocation62_spill] sm:$0xff]  ;;  %v14468_v9 = vld [vmem:[#allocation220_spill] sm:$0xff] }
 0x263   :  { %3939 = vmatprep.mubr.f32.mxu0 %v14446_v56  ;;  %5232 = vmatprep.mubr.f32.mxu1 %v14446_v56  ;;  %v7536_v52 = vpack.c.bf16 %v14451_v36, %v14450_v49  ;;  %v14453_v56 = vld [vmem:[#allocation228_spill] sm:$0xff]  ;;  %v14457_v36 = vld [vmem:[#allocation233_spill] sm:$0xff]  ;;  %v14460_v49 = vld [vmem:[#allocation70_spill] sm:$0xff] }
 0x264   :  { %3941 = vmatmul.mubr.f32.gmra.mrb[14].mxu0 %v14447_v47  ;;  %5234 = vmatmul.mubr.f32.gmra.mrb[14].mxu1 %v14447_v47 }
 0x265   :  { %7207 = vmatpush1.bf16.msra.mxu0 %v7206_v13  ;;  %7534 = vmatpush1.bf16.msra.mxu1 %v7533_v4  ;;  %v14454_v13 = vld [vmem:[#allocation67_spill] sm:$0xff]  ;;  %v14455_v4 = vld [vmem:[#allocation66_spill] sm:$0xff] }
 0x266   :  { %7209 = vmatprep.subr.bf16.mxu0 %v7208_v21  ;;  %7535 = vmatprep.subr.bf16.mxu1 %v14200_v60  ;;  %v14456_v47 = vpack.c.bf16 %v14454_v13, %v14455_v4  ;;  %v14458_v21 = vld [vmem:[#allocation236_spill] sm:$0xff]  ;;  %v14465_v13 = vld [vmem:[#allocation81_spill] sm:$0xff] }
 0x267   :  { %3947 = vmatprep.mubr.f32.mxu0 %v14452_v44  ;;  %5239 = vmatprep.mubr.f32.mxu1 %v14452_v44  ;;  %v14459_v44 = vld [vmem:[#allocation72_spill] sm:$0xff] }
 0x268   :  { %3949 = vmatmul.mubr.f32.gmra.mrb[16].mxu0 %v14453_v56  ;;  %5241 = vmatmul.mubr.f32.gmra.mrb[16].mxu1 %v14453_v56  ;;  %v14461_v10 = vpack.c.bf16 %v14459_v44, %v14460_v49  ;;  %v14472_v44 = vld [vmem:[#allocation90_spill] sm:$0xff] }
 0x269   :  { %7211 = vmatpush1.bf16.msra.mxu0 %v7210_v18  ;;  %7537 = vmatpush1.bf16.msra.mxu1 %v7536_v52  ;;  %v14462_v18 = vld [vmem:[#allocation76_spill] sm:$0xff]  ;;  %v14463_v52 = vld [vmem:[#allocation75_spill] sm:$0xff] }
 0x26a   :  { %7213 = vmatprep.subr.bf16.mxu0 %v14456_v47  ;;  %7538 = vmatprep.subr.bf16.mxu1 %v14200_v60  ;;  %v14464_v56 = vpack.c.bf16 %v14462_v18, %v14463_v52  ;;  %v14466_v47 = vld [vmem:[#allocation79_spill] sm:$0xff] }
 0x26b   :  { %3955 = vmatprep.mubr.f32.mxu0 %v14457_v36  ;;  %5246 = vmatprep.mubr.f32.mxu1 %v14457_v36  ;;  %v14467_v4 = vpack.c.bf16 %v14465_v13, %v14466_v47  ;;  %v14469_v36 = vld [vmem:[#allocation85_spill] sm:$0xff] }
 0x26c   :  { %3957 = vmatmul.mubr.f32.gmra.mrb[18].mxu0 %v14458_v21  ;;  %5248 = vmatmul.mubr.f32.gmra.mrb[18].mxu1 %v14458_v21  ;;  %v14470_v21 = vld [vmem:[#allocation83_spill] sm:$0xff] }
 0x26d   :  { %7215 = vmatpush1.bf16.msra.mxu0 %v14461_v10  ;;  %7540 = vmatpush1.bf16.msra.mxu1 %v14464_v56  ;;  %v14471_v2 = vpack.c.bf16 %v14469_v36, %v14470_v21  ;;  %v14473_v10 = vld [vmem:[#allocation88_spill] sm:$0xff]  ;;  %v14475_v56 = vpack.c.bf16 %v14353_v34, %v14352_v31  ;;  %v14479_v36 = vld [vmem:[#allocation107_spill] sm:$0xff] }
 0x26e   :  { %7217 = vmatprep.subr.bf16.mxu0 %v14467_v4  ;;  %7541 = vmatprep.subr.bf16.mxu1 %v14200_v60  ;;  %v14474_v49 = vpack.c.bf16 %v14472_v44, %v14473_v10  ;;  %v14476_v4 = vld [vmem:[#allocation97_spill] sm:$0xff]  ;;  %v14483_v44 = vld [vmem:[#allocation111_spill] sm:$0xff] }
 0x26f   :  { %4149 = vmatprep.mubr.f32.mxu0 %v14468_v9  ;;  %5379 = vmatprep.mubr.f32.mxu1 %v14468_v9  ;;  %v14477_v13 = vpack.c.bf16 %v14355_v46, %v14476_v4  ;;  %v14478_v9 = vpack.c.bf16 %v14361_v0, %v14359_v54  ;;  %v14486_v31 = vld [vmem:[#allocation115_spill] sm:$0xff]  ;;  %v14488_v46 = vld [vmem:[#allocation121_spill] sm:$0xff]  ;;  %v14492_v0 = vld [vmem:[#allocation124_spill] sm:$0xff] }
 0x271   :  { %7219 = vmatpush1.bf16.msra.mxu0 %v14471_v2  ;;  %7543 = vmatpush1.bf16.msra.mxu1 %v14474_v49  ;;  %v14480_v2 = vld [vmem:[#allocation106_spill] sm:$0xff]  ;;  %v14482_v49 = vld [vmem:[#allocation112_spill] sm:$0xff] }
 0x272   :  { %7221 = vmatprep.subr.bf16.mxu0 %v14475_v56  ;;  %7544 = vmatprep.subr.bf16.mxu1 %v14200_v60  ;;  %v14481_v21 = vpack.c.bf16 %v14479_v36, %v14480_v2  ;;  %v14484_v34 = vpack.c.bf16 %v14482_v49, %v14483_v44  ;;  %v14485_v56 = vld [vmem:[#allocation116_spill] sm:$0xff] }
 0x273   :  { %v14487_v10 = vpack.c.bf16 %v14485_v56, %v14486_v31 }
 0x275   :  { %7223 = vmatpush1.bf16.msra.mxu0 %v14477_v13  ;;  %7546 = vmatpush1.bf16.msra.mxu1 %v14478_v9  ;;  %v14489_v13 = vld [vmem:[#allocation120_spill] sm:$0xff]  ;;  %v14491_v9 = vld [vmem:[#allocation126_spill] sm:$0xff] }
 0x276   :  { %7225 = vmatprep.subr.bf16.mxu0 %v14481_v21  ;;  %7547 = vmatprep.subr.bf16.mxu1 %v14200_v60  ;;  %v14490_v4 = vpack.c.bf16 %v14488_v46, %v14489_v13  ;;  %v14493_v36 = vpack.c.bf16 %v14491_v9, %v14492_v0  ;;  %v14494_v21 = vld [vmem:[#allocation128_spill] sm:$0xff] }
 0x277   :  { %v14495_v2 = vpack.c.bf16 %v14379_v16, %v14494_v21 }
 0x279   :  { %7227 = vmatpush1.bf16.msra.mxu0 %v14484_v34  ;;  %7549 = vmatpush1.bf16.msra.mxu1 %v14487_v10  ;;  %v14496_v34 = vpack.c.bf16 %v14387_v50, %v14386_v19  ;;  %v14497_v10 = vpack.c.bf16 %v14391_v55, %v10702_v27  ;;  %v14502_v50 = vld [vmem:[#allocation188_spill] sm:$0xff] }
 0x27a   :  { %7229 = vmatprep.subr.bf16.mxu0 %v14490_v4  ;;  %7550 = vmatprep.subr.bf16.mxu1 %v14200_v60  ;;  %v14498_v4 = vpack.c.bf16 %v14273_v15, %v14272_v24  ;;  %v14506_v15 = vld [vmem:[#allocation51_spill] sm:$0xff] }
 0x27d   :  { %7231 = vmatpush1.bf16.msra.mxu0 %v14493_v36  ;;  %7552 = vmatpush1.bf16.msra.mxu1 %v14495_v2  ;;  %v14499_v36 = vpack.c.bf16 %v14399_v12, %v14398_v22  ;;  %v14500_v2 = vpack.c.bf16 %v14401_v43, %v10746_v20  ;;  %v14509_v22 = vld [vmem:[#allocation59_spill] sm:$0xff] }
 0x27e   :  { %7233 = vmatprep.subr.bf16.mxu0 %v14496_v34  ;;  %7553 = vmatprep.subr.bf16.mxu1 %v14200_v60  ;;  %v14501_v34 = vld [vmem:[#allocation190_spill] sm:$0xff] }
 0x27f   :  { %v14503_v19 = vpack.c.bf16 %v14501_v34, %v14502_v50 }
 0x281   :  { %7235 = vmatpush1.bf16.msra.mxu0 %v14497_v10  ;;  %7555 = vmatpush1.bf16.msra.mxu1 %v14498_v4  ;;  %v14504_v10 = vpack.c.bf16 %v10772_v7, %v10768_v8  ;;  %v14505_v4 = vld [vmem:[#allocation53_spill] sm:$0xff] }
 0x282   :  { %7237 = vmatprep.subr.bf16.mxu0 %v14499_v36  ;;  %7556 = vmatprep.subr.bf16.mxu1 %v14200_v60  ;;  %v14507_v12 = vpack.c.bf16 %v14505_v4, %v14506_v15  ;;  %v14508_v36 = vld [vmem:[#allocation63_spill] sm:$0xff] }
 0x283   :  { %v14510_v24 = vpack.c.bf16 %v14508_v36, %v14509_v22 }
 0x285   :  { %7239 = vmatpush1.bf16.msra.mxu0 %v14500_v2  ;;  %7558 = vmatpush1.bf16.msra.mxu1 %v14503_v19  ;;  %v14511_v2 = vpack.c.bf16 %v14411_v48, %v14408_v32  ;;  %v14512_v19 = vpack.c.bf16 %v14412_v1, %v10814_v63 }
 0x286   :  { %7241 = vmatprep.subr.bf16.mxu0 %v14504_v10  ;;  %7559 = vmatprep.subr.bf16.mxu1 %v14200_v60  ;;  %v14513_v10 = vpack.c.bf16 %v10868_v26, %v10856_v57 }
 0x289   :  { %7243 = vmatpush1.bf16.msra.mxu0 %v14507_v12  ;;  %7561 = vmatpush1.bf16.msra.mxu1 %v14510_v24  ;;  %v14514_v12 = vpack.c.bf16 %v10876_v45, %v10874_v11  ;;  %v14515_v24 = vpack.c.bf16 %v10891_v33, %v10889_v5  ;;  %v14520_v33 = vld [vmem:[#allocation192_spill] sm:$0xff] }
 0x28a   :  { %7245 = vmatprep.subr.bf16.mxu0 %v14511_v2  ;;  %7562 = vmatprep.subr.bf16.mxu1 %v14200_v60  ;;  %v14516_v2 = vpack.c.bf16 %v10908_v14, %v10903_v40 }
 0x28d   :  { %7247 = vmatpush1.bf16.msra.mxu0 %v14512_v19  ;;  %7564 = vmatpush1.bf16.msra.mxu1 %v14513_v10  ;;  %v14517_v19 = vpack.c.bf16 %v10928_v29, %v10924_v38  ;;  %v14518_v10 = vpack.c.bf16 %v14416_v28, %v14415_v39  ;;  %v14524_v29 = vld [vmem:[#allocation207_spill] sm:$0xff] }
 0x28e   :  { %7249 = vmatprep.subr.bf16.mxu0 %v14514_v12  ;;  %7565 = vmatprep.subr.bf16.mxu1 %v14200_v60  ;;  %v14519_v12 = vpack.c.bf16 %v14418_v61, %v14417_v30  ;;  %v14528_v61 = vld [vmem:[#allocation150_spill] sm:$0xff] }
 0x28f   :  { %v14553_v30 = vld [vmem:[#allocation114_spill] sm:$0xff] }
 0x291   :  { %7251 = vmatpush1.bf16.msra.mxu0 %v14515_v24  ;;  %7567 = vmatpush1.bf16.msra.mxu1 %v14516_v2  ;;  %v14521_v24 = vld [vmem:[#allocation219_spill] sm:$0xff]  ;;  %v14522_v2 = vld [vmem:[#allocation193_spill] sm:$0xff] }
 0x292   :  { %7253 = vmatprep.subr.bf16.mxu0 %v14517_v19  ;;  %7568 = vmatprep.subr.bf16.mxu1 %v14200_v60  ;;  %v14523_v19 = vld [vmem:[#allocation200_spill] sm:$0xff] }
 0x295   :  { %7255 = vmatpush1.bf16.msra.mxu0 %v14518_v10  ;;  %7570 = vmatpush1.bf16.msra.mxu1 %v14519_v12  ;;  %v14525_v10 = vld [vmem:[#allocation163_spill] sm:$0xff]  ;;  %v14526_v12 = vld [vmem:[#allocation168_spill] sm:$0xff] }
 0x296   :  { %7257 = vmatprep.subr.bf16.mxu0 %v14520_v33  ;;  %7571 = vmatprep.subr.bf16.mxu1 %v14200_v60  ;;  %v14527_v33 = vld [vmem:[#allocation144_spill] sm:$0xff] }
 0x298   :  { %4152 = vmatmul.mubr.f32.vlgmr.msra.gmra.mrb[10].mxu0 %v14521_v24  ;;  %5382 = vmatmul.mubr.f32.vlgmr.msra.gmra.mrb[10].mxu1 %v14521_v24  ;;  %v14529_v24 = vld [vmem:[#allocation154_spill] sm:$0xff] }
 0x299   :  { %7259 = vmatpush1.bf16.msra.mxu0 %v14522_v2  ;;  %7573 = vmatpush1.bf16.msra.mxu1 %v14523_v19  ;;  %v14530_v19 = vld [vmem:[#allocation175_spill] sm:$0xff]  ;;  %v14533_v2 = vld [vmem:[#allocation46_spill] sm:$0xff] }
 0x29a   :  { %7261 = vmatprep.subr.bf16.mxu0 %v14524_v29  ;;  %7574 = vmatprep.subr.bf16.mxu1 %v14200_v60  ;;  %v14531_v29 = vld [vmem:[#allocation180_spill] sm:$0xff] }
 0x29b   :  { %4159 = vmatprep.mubr.f32.mxu0 %v14525_v10  ;;  %5388 = vmatprep.mubr.f32.mxu1 %v14525_v10  ;;  %v14532_v10 = vld [vmem:[#allocation159_spill] sm:$0xff] }
 0x29c   :  { %4162 = vmatmul.mubr.f32.gmra.mrb[12].mxu0 %v14526_v12  ;;  %5391 = vmatmul.mubr.f32.gmra.mrb[12].mxu1 %v14526_v12  ;;  %v14534_v12 = vld [vmem:[#allocation50_spill] sm:$0xff] }
 0x29d   :  { %7263 = vmatpush1.bf16.msra.mxu0 %v14527_v33  ;;  %7576 = vmatpush1.bf16.msra.mxu1 %v14528_v61  ;;  %v14535_v61 = vld [vmem:[#allocation227_spill] sm:$0xff]  ;;  %v14538_v33 = vld [vmem:[#allocation60_spill] sm:$0xff] }
 0x29e   :  { %7265 = vmatprep.subr.bf16.mxu0 %v14529_v24  ;;  %7577 = vmatprep.subr.bf16.mxu1 %v14200_v60  ;;  %v14536_v24 = vld [vmem:[#allocation230_spill] sm:$0xff] }
 0x29f   :  { %4169 = vmatprep.mubr.f32.mxu0 %v14530_v19  ;;  %5397 = vmatprep.mubr.f32.mxu1 %v14530_v19  ;;  %v14537_v19 = vld [vmem:[#allocation55_spill] sm:$0xff] }
 0x2a0   :  { %4172 = vmatmul.mubr.f32.gmra.mrb[14].mxu0 %v14531_v29  ;;  %5400 = vmatmul.mubr.f32.gmra.mrb[14].mxu1 %v14531_v29  ;;  %v14539_v29 = vld [vmem:[#allocation64_spill] sm:$0xff] }
 0x2a1   :  { %7267 = vmatpush1.bf16.msra.mxu0 %v14532_v10  ;;  %7579 = vmatpush1.bf16.msra.mxu1 %v14533_v2  ;;  %v14540_v2 = vld [vmem:[#allocation212_spill] sm:$0xff]  ;;  %v14543_v10 = vld [vmem:[#allocation73_spill] sm:$0xff] }
 0x2a2   :  { %7269 = vmatprep.subr.bf16.mxu0 %v14534_v12  ;;  %7580 = vmatprep.subr.bf16.mxu1 %v14200_v60  ;;  %v14541_v12 = vld [vmem:[#allocation237_spill] sm:$0xff] }
 0x2a3   :  { %4179 = vmatprep.mubr.f32.mxu0 %v14535_v61  ;;  %5406 = vmatprep.mubr.f32.mxu1 %v14535_v61  ;;  %v14542_v61 = vld [vmem:[#allocation69_spill] sm:$0xff] }
 0x2a4   :  { %4182 = vmatmul.mubr.f32.gmra.mrb[16].mxu0 %v14536_v24  ;;  %5409 = vmatmul.mubr.f32.gmra.mrb[16].mxu1 %v14536_v24  ;;  %v14544_v24 = vld [vmem:[#allocation77_spill] sm:$0xff] }
 0x2a5   :  { %7271 = vmatpush1.bf16.msra.mxu0 %v14537_v19  ;;  %7582 = vmatpush1.bf16.msra.mxu1 %v14538_v33  ;;  %v14545_v33 = vld [vmem:[#allocation222_spill] sm:$0xff] }
 0x2a6   :  { %7273 = vmatprep.subr.bf16.mxu0 %v14539_v29  ;;  %7583 = vmatprep.subr.bf16.mxu1 %v14200_v60  ;;  %v14546_v29 = vld [vmem:[#allocation82_spill] sm:$0xff] }
 0x2a7   :  { %4189 = vmatprep.mubr.f32.mxu0 %v14540_v2  ;;  %5415 = vmatprep.mubr.f32.mxu1 %v14540_v2  ;;  %v14547_v19 = vld [vmem:[#allocation86_spill] sm:$0xff]  ;;  %v14548_v2 = vld [vmem:[#allocation91_spill] sm:$0xff] }
 0x2a8   :  { %4192 = vmatmul.mubr.f32.gmra.mrb[18].mxu0 %v14541_v12  ;;  %5418 = vmatmul.mubr.f32.gmra.mrb[18].mxu1 %v14541_v12  ;;  %v14549_v12 = vld [vmem:[#allocation96_spill] sm:$0xff] }
 0x2a9   :  { %7275 = vmatpush1.bf16.msra.mxu0 %v14542_v61  ;;  %7585 = vmatpush1.bf16.msra.mxu1 %v14543_v10  ;;  %v14550_v61 = vld [vmem:[#allocation100_spill] sm:$0xff]  ;;  %v14551_v10 = vld [vmem:[#allocation105_spill] sm:$0xff] }
 0x2aa   :  { %7277 = vmatprep.subr.bf16.mxu0 %v14544_v24  ;;  %7586 = vmatprep.subr.bf16.mxu1 %v14200_v60  ;;  %v14552_v24 = vld [vmem:[#allocation109_spill] sm:$0xff] }
 0x2ab   :  { %4325 = vmatprep.mubr.f32.mxu0 %v14545_v33  ;;  %5520 = vmatprep.mubr.f32.mxu1 %v14545_v33  ;;  %v14554_v33 = vld [vmem:[#allocation118_spill] sm:$0xff] }
 0x2ad   :  { %7279 = vmatpush1.bf16.msra.mxu0 %v14546_v29  ;;  %7588 = vmatpush1.bf16.msra.mxu1 %v14547_v19 }
 0x2ae   :  { %7281 = vmatprep.subr.bf16.mxu0 %v14548_v2  ;;  %7589 = vmatprep.subr.bf16.mxu1 %v14200_v60 }
 0x2b1   :  { %7283 = vmatpush1.bf16.msra.mxu0 %v14549_v12  ;;  %7591 = vmatpush1.bf16.msra.mxu1 %v14550_v61  ;;  %v14559_v61 = vld [vmem:[#allocation123_spill] sm:$0xff] }
 0x2b2   :  { %7285 = vmatprep.subr.bf16.mxu0 %v14551_v10  ;;  %7592 = vmatprep.subr.bf16.mxu1 %v14200_v60 }
 0x2b5   :  { %7287 = vmatpush1.bf16.msra.mxu0 %v14552_v24  ;;  %7594 = vmatpush1.bf16.msra.mxu1 %v14553_v30  ;;  %v14560_v24 = vld [vmem:[#allocation127_spill] sm:$0xff]  ;;  %v14561_v30 = vld [vmem:[#allocation132_spill] sm:$0xff] }
 0x2b6   :  { %7289 = vmatprep.subr.bf16.mxu0 %v14554_v33  ;;  %7595 = vmatprep.subr.bf16.mxu1 %v14200_v60 }
 0x2b7   :  { %v11692_v19 = vpop.f32.mrb[0].mxu0  ;;  %v11694_v2 = vpop.f32.mrb[0].mxu1 }
 0x2b8   :  { %14555 = vst [vmem:[#allocation131_spill] sm:$0xff] %v11692_v19  ;;  %14556 = vst [vmem:[#allocation134_spill] sm:$0xff] %v11694_v2  ;;  %v11696_v29 = vpop.f32.mrb[1].mxu0  ;;  %v11698_v12 = vpop.f32.mrb[1].mxu1 }
 0x2b9   :  { %14557 = vst [vmem:[#allocation137_spill] sm:$0xff] %v11696_v29  ;;  %14558 = vst [vmem:[#allocation141_spill] sm:$0xff] %v11698_v12  ;;  %v5893_v10 = vadd.f32 %v11696_v29, %v11692_v19  ;;  %7291 = vmatpush1.bf16.msra.mxu0 %v14559_v61  ;;  %7597 = vmatpush1.bf16.msra.mxu1 %v14560_v24  ;;  %v14567_v24 = vld [vmem:[#allocation136_spill] sm:$0xff]  ;;  %v14569_v61 = vld [vmem:[#allocation186_spill] sm:$0xff] }
 0x2ba   :  { %7293 = vmatprep.subr.bf16.mxu0 %v14561_v30  ;;  %7598 = vmatprep.subr.bf16.mxu1 %v14200_v60  ;;  %v14568_v30 = vld [vmem:[#allocation139_spill] sm:$0xff] }
 0x2bb   :  { %v5894_v33 = vadd.f32 %v5893_v10, %v11694_v2  ;;  %v11707_v28 = vpop.f32.mrb[2].mxu0  ;;  %v11709_v39 = vpop.f32.mrb[2].mxu1 }
 0x2bc   :  { %14562 = vst [vmem:[#allocation143_spill] sm:$0xff] %v11707_v28  ;;  %14563 = vst [vmem:[#allocation146_spill] sm:$0xff] %v11709_v39  ;;  %v11711_v38 = vpop.f32.mrb[3].mxu0  ;;  %v11713_v14 = vpop.f32.mrb[3].mxu1 }
 0x2bd   :  { %14564 = vst [vmem:[#allocation149_spill] sm:$0xff] %v11711_v38  ;;  %14565 = vst [vmem:[#allocation153_spill] sm:$0xff] %v11713_v14  ;;  %v11716_v29 = vadd.f32 %v5894_v33, %v11698_v12  ;;  %v5903_v19 = vadd.f32 %v11711_v38, %v11707_v28  ;;  %7295 = vmatpush1.bf16.msra.mxu0 %v14567_v24  ;;  %7600 = vmatpush1.bf16.msra.mxu1 %v14568_v30  ;;  %v14575_v12 = vld [vmem:[#allocation211_spill] sm:$0xff] }
 0x2be   :  { %7297 = vmatprep.subr.bf16.mxu0 %v14569_v61  ;;  %7601 = vmatprep.subr.bf16.mxu1 %v14200_v60  ;;  %v14577_v61 = vld [vmem:[#allocation44_spill] sm:$0xff] }
 0x2bf   :  { %14566 = vst [vmem:[#allocation155_spill] sm:$0xff] %v11716_v29  ;;  %v5904_v10 = vadd.f32 %v5903_v19, %v11709_v39  ;;  %v11725_v2 = vpop.f32.mrb[4].mxu0  ;;  %v11727_v40 = vpop.f32.mrb[4].mxu1  ;;  %v14576_v29 = vld [vmem:[#allocation184_spill] sm:$0xff] }
 0x2c0   :  { %14570 = vst [vmem:[#allocation158_spill] sm:$0xff] %v11725_v2  ;;  %14571 = vst [vmem:[#allocation161_spill] sm:$0xff] %v11727_v40  ;;  %v11729_v5 = vpop.f32.mrb[5].mxu0  ;;  %v11731_v33 = vpop.f32.mrb[5].mxu1 }
 0x2c1   :  { %14572 = vst [vmem:[#allocation165_spill] sm:$0xff] %v11729_v5  ;;  %14573 = vst [vmem:[#allocation167_spill] sm:$0xff] %v11731_v33  ;;  %v11734_v38 = vadd.f32 %v5904_v10, %v11713_v14  ;;  %v5912_v28 = vadd.f32 %v11729_v5, %v11725_v2  ;;  %7299 = vmatpush1.bf16.msra.mxu0 %v14575_v12  ;;  %7603 = vmatpush1.bf16.msra.mxu1 %v14576_v29  ;;  %v14583_v14 = vld [vmem:[#allocation47_spill] sm:$0xff] }
 0x2c2   :  { %7301 = vmatprep.subr.bf16.mxu0 %v14577_v61  ;;  %7604 = vmatprep.subr.bf16.mxu1 %v14200_v60  ;;  %v14585_v61 = vld [vmem:[#allocation65_spill] sm:$0xff] }
 0x2c3   :  { %14574 = vst [vmem:[#allocation170_spill] sm:$0xff] %v11734_v38  ;;  %v5913_v19 = vadd.f32 %v5912_v28, %v11727_v40  ;;  %v11743_v39 = vpop.f32.mrb[6].mxu0  ;;  %v11745_v30 = vpop.f32.mrb[6].mxu1  ;;  %v14584_v38 = vld [vmem:[#allocation56_spill] sm:$0xff] }
 0x2c4   :  { %14578 = vst [vmem:[#allocation173_spill] sm:$0xff] %v11743_v39  ;;  %14579 = vst [vmem:[#allocation177_spill] sm:$0xff] %v11745_v30  ;;  %v11747_v24 = vpop.f32.mrb[7].mxu0  ;;  %v11749_v10 = vpop.f32.mrb[7].mxu1 }
 0x2c5   :  { %14580 = vst [vmem:[#allocation179_spill] sm:$0xff] %v11747_v24  ;;  %14581 = vst [vmem:[#allocation182_spill] sm:$0xff] %v11749_v10  ;;  %v11752_v5 = vadd.f32 %v5913_v19, %v11731_v33  ;;  %v5921_v2 = vadd.f32 %v11747_v24, %v11743_v39  ;;  %7303 = vmatpush1.bf16.msra.mxu0 %v14583_v14  ;;  %7606 = vmatpush1.bf16.msra.mxu1 %v14584_v38  ;;  %v14591_v33 = vld [vmem:[#allocation74_spill] sm:$0xff]  ;;  %v14595_v38 = vld [vmem:[#allocation87_spill] sm:$0xff] }
 0x2c6   :  { %7305 = vmatprep.subr.bf16.mxu0 %v14585_v61  ;;  %7607 = vmatprep.subr.bf16.mxu1 %v14200_v60  ;;  %v14593_v61 = vld [vmem:[#allocation84_spill] sm:$0xff] }
 0x2c7   :  { %14582 = vst [vmem:[#allocation185_spill] sm:$0xff] %v11752_v5  ;;  %v5922_v28 = vadd.f32 %v5921_v2, %v11745_v30  ;;  %v11761_v40 = vpop.f32.mrb[8].mxu0  ;;  %v11763_v29 = vpop.f32.mrb[8].mxu1  ;;  %v14592_v5 = vld [vmem:[#allocation80_spill] sm:$0xff] }
 0x2c8   :  { %14586 = vst [vmem:[#allocation189_spill] sm:$0xff] %v11761_v40  ;;  %14587 = vst [vmem:[#allocation191_spill] sm:$0xff] %v11763_v29  ;;  %v11765_v12 = vpop.f32.mrb[9].mxu0  ;;  %v11767_v19 = vpop.f32.mrb[9].mxu1 }
 0x2c9   :  { %14588 = vst [vmem:[#allocation194_spill] sm:$0xff] %v11765_v12  ;;  %14589 = vst [vmem:[#allocation197_spill] sm:$0xff] %v11767_v19  ;;  %v11770_v24 = vadd.f32 %v5922_v28, %v11749_v10  ;;  %v5930_v39 = vadd.f32 %v11765_v12, %v11761_v40  ;;  %7307 = vmatpush1.bf16.msra.mxu0 %v14591_v33  ;;  %7609 = vmatpush1.bf16.msra.mxu1 %v14592_v5  ;;  %v14596_v28 = vld [vmem:[#allocation95_spill] sm:$0xff]  ;;  %v14597_v10 = vld [vmem:[#allocation104_spill] sm:$0xff]  ;;  %v14598_v12 = vand.u32 4294901760, %v14423_v41 }
 0x2ca   :  { %7309 = vmatprep.subr.bf16.mxu0 %v14593_v61  ;;  %7610 = vmatprep.subr.bf16.mxu1 %v14200_v60  ;;  %v14599_v40 = vand.u32 4294901760, %v14424_v35  ;;  %v14600_v61 = vld [vmem:[#allocation113_spill] sm:$0xff]  ;;  %v14601_v5 = vld [vmem:[#allocation122_spill] sm:$0xff]  ;;  %v14606_v41 = vand.u32 4294901760, %v14429_v3  ;;  %v14613_v3 = vld [vmem:[#allocation156_spill] sm:$0xff] }
 0x2cb   :  { %14590 = vst [vmem:[#allocation201_spill] sm:$0xff] %v11770_v24  ;;  %v5931_v2 = vadd.f32 %v5930_v39, %v11763_v29  ;;  %v14602_v39 = vand.u32 4294901760, %v14425_v23  ;;  %v14604_v29 = vand.u32 4294901760, %v14427_v58  ;;  %v14609_v23 = vand.u32 4294901760, %v14432_v62  ;;  %v14618_v62 = vld [vmem:[#allocation169_spill] sm:$0xff] }
 0x2cc   :  { %v7316_v24 = vpack.c.bf16 %v14599_v40, %v14598_v12  ;;  %v14607_v40 = vand.u32 4294901760, %v14430_v25  ;;  %v14608_v12 = vld [vmem:[#allocation221_spill] sm:$0xff]  ;;  %v14614_v25 = vand.u32 4294901760, %v14613_v3 }
 0x2cd   :  { %v11780_v30 = vadd.f32 %v5931_v2, %v11767_v19  ;;  %7311 = vmatpush1.bf16.msra.mxu0 %v14595_v38  ;;  %7612 = vmatpush1.bf16.msra.mxu1 %v14596_v28  ;;  %v14603_v2 = vand.u32 4294901760, %v14426_v51  ;;  %v14610_v51 = vand.u32 4294901760, %v14433_v17  ;;  %v14619_v17 = vand.u32 4294901760, %v14440_v42  ;;  %v14630_v42 = vld [vmem:[#allocation196_spill] sm:$0xff] }
 0x2ce   :  { %7313 = vmatprep.subr.bf16.mxu0 %v14597_v10  ;;  %7613 = vmatprep.subr.bf16.mxu1 %v14200_v60  ;;  %v7320_v35 = vpack.c.bf16 %v14607_v40, %v14606_v41  ;;  %v14623_v40 = vld [vmem:[#allocation49_spill] sm:$0xff] }
 0x2cf   :  { %14594 = vst [vmem:[#allocation203_spill] sm:$0xff] %v11780_v30  ;;  %v7318_v19 = vpack.c.bf16 %v14603_v2, %v14602_v39  ;;  %v14605_v30 = vand.u32 4294901760, %v14428_v37  ;;  %v7322_v58 = vpack.c.bf16 %v14610_v51, %v14609_v23  ;;  %v14612_v37 = vand.u32 4294901760, %v14435_v6  ;;  %v14625_v23 = vld [vmem:[#allocation52_spill] sm:$0xff] }
 0x2d0   :  { %v14626_v51 = vand.u32 4294901760, %v14625_v23 }
 0x2d1   :  { %7315 = vmatpush1.bf16.msra.mxu0 %v14600_v61  ;;  %7615 = vmatpush1.bf16.msra.mxu1 %v14601_v5  ;;  %v7617_v10 = vpack.c.bf16 %v14605_v30, %v14604_v29  ;;  %v14611_v30 = vand.u32 4294901760, %v14434_v59  ;;  %v14620_v59 = vand.u32 4294901760, %v14441_v53  ;;  %v14631_v53 = vld [vmem:[#allocation57_spill] sm:$0xff] }
 0x2d2   :  { %7317 = vmatprep.subr.bf16.mxu0 %v7316_v24  ;;  %7616 = vmatprep.subr.bf16.mxu1 %v14200_v60  ;;  %v14615_v24 = vld [vmem:[#allocation157_spill] sm:$0xff] }
 0x2d3   :  { %v7620_v29 = vpack.c.bf16 %v14612_v37, %v14611_v30  ;;  %v14616_v39 = vand.u32 4294901760, %v14615_v24  ;;  %v7326_v6 = vpack.c.bf16 %v14620_v59, %v14619_v17  ;;  %v14627_v30 = vld [vmem:[#allocation54_spill] sm:$0xff] }
 0x2d4   :  { %4329 = vmatmul.mubr.f32.vlgmr.msra.gmra.mrb[10].mxu0 %v14608_v12  ;;  %5524 = vmatmul.mubr.f32.vlgmr.msra.gmra.mrb[10].mxu1 %v14608_v12  ;;  %v14628_v37 = vand.u32 4294901760, %v14627_v30 }
 0x2d5   :  { %7319 = vmatpush1.bf16.msra.mxu0 %v7318_v19  ;;  %7618 = vmatpush1.bf16.msra.mxu1 %v7617_v10  ;;  %v7324_v2 = vpack.c.bf16 %v14616_v39, %v14614_v25  ;;  %v14617_v19 = vld [vmem:[#allocation166_spill] sm:$0xff]  ;;  %v14621_v10 = vld [vmem:[#allocation48_spill] sm:$0xff] }
 0x2d6   :  { %7321 = vmatprep.subr.bf16.mxu0 %v7320_v35  ;;  %7619 = vmatprep.subr.bf16.mxu1 %v14200_v60  ;;  %v14622_v41 = vand.u32 4294901760, %v14621_v10  ;;  %v14624_v35 = vand.u32 4294901760, %v14623_v40  ;;  %v7328_v3 = vpack.c.bf16 %v14628_v37, %v14626_v51  ;;  %v14633_v25 = vld [vmem:[#allocation58_spill] sm:$0xff]  ;;  %v14641_v40 = vld [vmem:[#allocation67_spill] sm:$0xff]  ;;  %v14647_v37 = vld [vmem:[#allocation72_spill] sm:$0xff] }
 0x2d7   :  { %4337 = vmatprep.mubr.f32.mxu0 %v14617_v19  ;;  %5531 = vmatprep.mubr.f32.mxu1 %v14617_v19  ;;  %v14634_v24 = vand.u32 4294901760, %v14633_v25  ;;  %v14639_v10 = vld [vmem:[#allocation66_spill] sm:$0xff]  ;;  %v14651_v25 = vand.u32 4294901760, %v14466_v47 }
 0x2d8   :  { %4341 = vmatmul.mubr.f32.gmra.mrb[12].mxu0 %v14618_v62  ;;  %5535 = vmatmul.mubr.f32.gmra.mrb[12].mxu1 %v14618_v62  ;;  %v7623_v12 = vpack.c.bf16 %v14624_v35, %v14622_v41  ;;  %v14637_v62 = vld [vmem:[#allocation62_spill] sm:$0xff]  ;;  %v14640_v41 = vand.u32 4294901760, %v14639_v10  ;;  %v14642_v35 = vand.u32 4294901760, %v14641_v40 }
 0x2d9   :  { %7323 = vmatpush1.bf16.msra.mxu0 %v7322_v58  ;;  %7621 = vmatpush1.bf16.msra.mxu1 %v7620_v29  ;;  %v14629_v58 = vld [vmem:[#allocation176_spill] sm:$0xff]  ;;  %v14632_v29 = vand.u32 4294901760, %v14631_v53  ;;  %v14638_v17 = vand.u32 4294901760, %v14637_v62  ;;  %v14645_v51 = vld [vmem:[#allocation70_spill] sm:$0xff]  ;;  %v14650_v53 = vand.u32 4294901760, %v14462_v18  ;;  %v14655_v62 = vld [vmem:[#allocation239_spill] sm:$0xff] }
 0x2da   :  { %7325 = vmatprep.subr.bf16.mxu0 %v7324_v2  ;;  %7622 = vmatprep.subr.bf16.mxu1 %v14200_v60  ;;  %v14635_v2 = vld [vmem:[#allocation61_spill] sm:$0xff]  ;;  %v7332_v23 = vpack.c.bf16 %v14642_v35, %v14640_v41  ;;  %v14646_v30 = vand.u32 4294901760, %v14645_v51  ;;  %v14656_v18 = vld [vmem:[#allocation83_spill] sm:$0xff]  ;;  %v14660_v41 = vld [vmem:[#allocation88_spill] sm:$0xff] }
 0x2db   :  { %4349 = vmatprep.mubr.f32.mxu0 %v14629_v58  ;;  %5542 = vmatprep.mubr.f32.mxu1 %v14629_v58  ;;  %v7330_v39 = vpack.c.bf16 %v14634_v24, %v14632_v29  ;;  %v14636_v19 = vand.u32 4294901760, %v14635_v2  ;;  %v14652_v24 = vld [vmem:[#allocation81_spill] sm:$0xff]  ;;  %v14661_v47 = vand.u32 4294901760, %v14660_v41  ;;  %v14662_v40 = vld [vmem:[#allocation90_spill] sm:$0xff]  ;;  %v14681_v41 = vand.u32 4294901760, %v14482_v49 }
 0x2dc   :  { %4353 = vmatmul.mubr.f32.gmra.mrb[14].mxu0 %v14630_v42  ;;  %5546 = vmatmul.mubr.f32.gmra.mrb[14].mxu1 %v14630_v42  ;;  %v14649_v42 = vand.u32 4294901760, %v14463_v52  ;;  %v14653_v2 = vand.u32 4294901760, %v14652_v24  ;;  %v14657_v52 = vand.u32 4294901760, %v14656_v18  ;;  %v14663_v35 = vand.u32 4294901760, %v14662_v40  ;;  %v14666_v51 = vld [vmem:[#allocation94_spill] sm:$0xff] }
 0x2dd   :  { %7327 = vmatpush1.bf16.msra.mxu0 %v7326_v6  ;;  %7624 = vmatpush1.bf16.msra.mxu1 %v7623_v12  ;;  %v7626_v59 = vpack.c.bf16 %v14638_v17, %v14636_v19  ;;  %v14643_v6 = vld [vmem:[#allocation229_spill] sm:$0xff]  ;;  %v14644_v12 = vld [vmem:[#allocation231_spill] sm:$0xff]  ;;  %v14673_v24 = vand.u32 4294901760, %v14359_v54  ;;  %v14682_v54 = vand.u32 4294901760, %v14486_v31  ;;  %v14683_v40 = vand.u32 4294901760, %v14485_v56 }
 0x2de   :  { %7329 = vmatprep.subr.bf16.mxu0 %v7328_v3  ;;  %7625 = vmatprep.subr.bf16.mxu1 %v14200_v60  ;;  %v14648_v3 = vand.u32 4294901760, %v14647_v37  ;;  %v7629_v29 = vpack.c.bf16 %v14650_v53, %v14649_v42  ;;  %v7336_v19 = vpack.c.bf16 %v14653_v2, %v14651_v25  ;;  %v14658_v17 = vld [vmem:[#allocation85_spill] sm:$0xff]  ;;  %v14671_v53 = vld [vmem:[#allocation99_spill] sm:$0xff]  ;;  %v14687_v49 = vand.u32 4294901760, %v14491_v9 }
 0x2df   :  { %4361 = vmatprep.mubr.f32.mxu0 %v14643_v6  ;;  %5553 = vmatprep.mubr.f32.mxu1 %v14643_v6  ;;  %v14664_v6 = vld [vmem:[#allocation93_spill] sm:$0xff]  ;;  %v14674_v2 = vld [vmem:[#allocation103_spill] sm:$0xff]  ;;  %v14688_v31 = vand.u32 4294901760, %v14494_v21  ;;  %v14689_v56 = vand.u32 4294901760, %v14379_v16  ;;  %v14695_v9 = vand.u32 4294901760, %v14391_v55  ;;  %v14705_v55 = vand.u32 4294901760, %v14401_v43 }
 0x2e0   :  { %4365 = vmatmul.mubr.f32.gmra.mrb[16].mxu0 %v14644_v12  ;;  %5557 = vmatmul.mubr.f32.gmra.mrb[16].mxu1 %v14644_v12  ;;  %v7334_v58 = vpack.c.bf16 %v14648_v3, %v14646_v30  ;;  %v14665_v12 = vand.u32 4294901760, %v14664_v6  ;;  %v14667_v30 = vand.u32 4294901760, %v14666_v51  ;;  %v14668_v3 = vld [vmem:[#allocation218_spill] sm:$0xff]  ;;  %v14685_v6 = vand.u32 4294901760, %v14488_v46 }
 0x2e1   :  { %7331 = vmatpush1.bf16.msra.mxu0 %v7330_v39  ;;  %7627 = vmatpush1.bf16.msra.mxu1 %v7626_v59  ;;  %v14654_v39 = vld [vmem:[#allocation235_spill] sm:$0xff]  ;;  %v14659_v59 = vand.u32 4294901760, %v14658_v17  ;;  %v14711_v43 = vand.u32 4294901760, %v14505_v4  ;;  %v14717_v4 = vand.u32 4294901760, %v14412_v1 }
 0x2e2   :  { %7333 = vmatprep.subr.bf16.mxu0 %v7332_v23  ;;  %7628 = vmatprep.subr.bf16.mxu1 %v14200_v60  ;;  %v7632_v23 = vpack.c.bf16 %v14663_v35, %v14661_v47  ;;  %v7340_v37 = vpack.c.bf16 %v14667_v30, %v14665_v12  ;;  %v7638_v35 = vpack.c.bf16 %v14683_v40, %v14682_v54 }
 0x2e3   :  { %4373 = vmatprep.mubr.f32.mxu0 %v14654_v39  ;;  %5564 = vmatprep.mubr.f32.mxu1 %v14654_v39  ;;  %v7338_v10 = vpack.c.bf16 %v14659_v59, %v14657_v52  ;;  %v14678_v52 = vld [vmem:[#allocation107_spill] sm:$0xff]  ;;  %v7641_v30 = vpack.c.bf16 %v14689_v56, %v14688_v31  ;;  %v14726_v56 = vld [vmem:[#allocation98_spill] sm:$0xff] }
 0x2e4   :  { %4377 = vmatmul.mubr.f32.gmra.mrb[18].mxu0 %v14655_v62  ;;  %5568 = vmatmul.mubr.f32.gmra.mrb[18].mxu1 %v14655_v62  ;;  %v14676_v62 = vld [vmem:[#allocation106_spill] sm:$0xff]  ;;  %v14679_v17 = vand.u32 4294901760, %v14678_v52 }
 0x2e5   :  { %7335 = vmatpush1.bf16.msra.mxu0 %v7334_v58  ;;  %7630 = vmatpush1.bf16.msra.mxu1 %v7629_v29  ;;  %v14669_v58 = vld [vmem:[#allocation97_spill] sm:$0xff]  ;;  %v14672_v29 = vand.u32 4294901760, %v14671_v53  ;;  %v14677_v18 = vand.u32 4294901760, %v14676_v62 }
 0x2e6   :  { %7337 = vmatprep.subr.bf16.mxu0 %v7336_v19  ;;  %7631 = vmatprep.subr.bf16.mxu1 %v14200_v60  ;;  %v14670_v42 = vand.u32 4294901760, %v14669_v58  ;;  %v14675_v19 = vand.u32 4294901760, %v14674_v2  ;;  %v14692_v58 = vld [vmem:[#allocation135_spill] sm:$0xff] }
 0x2e7   :  { %4628 = vmatprep.mubr.f32.mxu0 %v14668_v3  ;;  %5728 = vmatprep.mubr.f32.mxu1 %v14668_v3  ;;  %v7344_v59 = vpack.c.bf16 %v14679_v17, %v14677_v18  ;;  %v14693_v46 = vand.u32 4294901760, %v14692_v58  ;;  %v14700_v2 = vld [vmem:[#allocation187_spill] sm:$0xff]  ;;  %v14706_v17 = vand.u32 4294901760, %v14502_v50  ;;  %v14712_v50 = vand.u32 4294901760, %v14509_v22  ;;  %v14732_v58 = vld [vmem:[#allocation110_spill] sm:$0xff] }
 0x2e8   :  { %v7342_v25 = vpack.c.bf16 %v14672_v29, %v14670_v42  ;;  %v7635_v39 = vpack.c.bf16 %v14675_v19, %v14673_v24  ;;  %v14696_v29 = vld [vmem:[#allocation142_spill] sm:$0xff]  ;;  %v14701_v19 = vand.u32 4294901760, %v14700_v2  ;;  %v14718_v22 = vand.u32 4294901760, %v10856_v57 }
 0x2e9   :  { %7339 = vmatpush1.bf16.msra.mxu0 %v7338_v10  ;;  %7633 = vmatpush1.bf16.msra.mxu1 %v7632_v23  ;;  %v14680_v10 = vand.u32 4294901760, %v14483_v44  ;;  %v14684_v23 = vand.u32 4294901760, %v14489_v13  ;;  %v14686_v44 = vand.u32 4294901760, %v14492_v0  ;;  %v14694_v0 = vand.u32 4294901760, %v10702_v27 }
 0x2ea   :  { %7341 = vmatprep.subr.bf16.mxu0 %v7340_v37  ;;  %7634 = vmatprep.subr.bf16.mxu1 %v14200_v60  ;;  %v14690_v37 = vld [vmem:[#allocation133_spill] sm:$0xff]  ;;  %v14697_v21 = vand.u32 4294901760, %v14696_v29  ;;  %v14704_v27 = vand.u32 4294901760, %v10746_v20  ;;  %v14710_v20 = vand.u32 4294901760, %v14506_v15  ;;  %v14716_v15 = vand.u32 4294901760, %v10814_v63 }
 0x2eb   :  { %v7346_v47 = vpack.c.bf16 %v14681_v41, %v14680_v10  ;;  %v7348_v12 = vpack.c.bf16 %v14685_v6, %v14684_v23  ;;  %v7350_v51 = vpack.c.bf16 %v14687_v49, %v14686_v44  ;;  %v14691_v13 = vand.u32 4294901760, %v14690_v37  ;;  %v14722_v49 = vld [vmem:[#allocation89_spill] sm:$0xff] }
 0x2ec   :  { %v7354_v53 = vpack.c.bf16 %v14695_v9, %v14694_v0  ;;  %v7358_v52 = vpack.c.bf16 %v14705_v55, %v14704_v27  ;;  %v14708_v41 = vand.u32 4294901760, %v10768_v8  ;;  %v7362_v40 = vpack.c.bf16 %v14711_v43, %v14710_v20  ;;  %v14736_v9 = vld [vmem:[#allocation119_spill] sm:$0xff]  ;;  %v14747_v55 = vld [vmem:[#allocation162_spill] sm:$0xff] }
 0x2ed   :  { %7343 = vmatpush1.bf16.msra.mxu0 %v7342_v25  ;;  %7636 = vmatpush1.bf16.msra.mxu1 %v7635_v39  ;;  %v7352_v42 = vpack.c.bf16 %v14693_v46, %v14691_v13  ;;  %v14698_v25 = vld [vmem:[#allocation145_spill] sm:$0xff]  ;;  %v14702_v39 = vld [vmem:[#allocation210_spill] sm:$0xff]  ;;  %v14714_v8 = vand.u32 4294901760, %v14408_v32  ;;  %v7366_v6 = vpack.c.bf16 %v14717_v4, %v14716_v15  ;;  %v14720_v32 = vand.u32 4294901760, %v10874_v11  ;;  %v14730_v13 = vld [vmem:[#allocation108_spill] sm:$0xff] }
 0x2ee   :  { %7345 = vmatprep.subr.bf16.mxu0 %v7344_v59  ;;  %7637 = vmatprep.subr.bf16.mxu1 %v14200_v60  ;;  %v14699_v16 = vand.u32 4294901760, %v14698_v25  ;;  %v14703_v62 = vand.u32 4294901760, %v14702_v39  ;;  %v14707_v59 = vand.u32 4294901760, %v14501_v34  ;;  %v14713_v34 = vand.u32 4294901760, %v14508_v36  ;;  %v14743_v39 = vld [vmem:[#allocation217_spill] sm:$0xff]  ;;  %v14746_v27 = vld [vmem:[#allocation207_spill] sm:$0xff] }
 0x2ef   :  { %v14719_v36 = vand.u32 4294901760, %v10868_v26  ;;  %v14723_v63 = vand.u32 4294901760, %v14722_v49  ;;  %v14727_v57 = vand.u32 4294901760, %v14726_v56  ;;  %v14731_v11 = vand.u32 4294901760, %v14730_v13  ;;  %v14755_v20 = vld [vmem:[#allocation46_spill] sm:$0xff]  ;;  %v14764_v15 = vld [vmem:[#allocation69_spill] sm:$0xff] }
 0x2f0   :  { %v7644_v24 = vpack.c.bf16 %v14699_v16, %v14697_v21  ;;  %v7356_v18 = vpack.c.bf16 %v14703_v62, %v14701_v19  ;;  %v7647_v10 = vpack.c.bf16 %v14707_v59, %v14706_v17  ;;  %v14738_v21 = vld [vmem:[#allocation125_spill] sm:$0xff]  ;;  %v14742_v19 = vld [vmem:[#allocation192_spill] sm:$0xff]  ;;  %v14750_v59 = vld [vmem:[#allocation150_spill] sm:$0xff] }
 0x2f1   :  { %7347 = vmatpush1.bf16.msra.mxu0 %v7346_v47  ;;  %7639 = vmatpush1.bf16.msra.mxu1 %v7638_v35  ;;  %v14709_v47 = vand.u32 4294901760, %v10772_v7  ;;  %v7650_v35 = vpack.c.bf16 %v14713_v34, %v14712_v50  ;;  %v14715_v7 = vand.u32 4294901760, %v14411_v48  ;;  %v14721_v48 = vand.u32 4294901760, %v10876_v45  ;;  %v14740_v16 = vld [vmem:[#allocation129_spill] sm:$0xff]  ;;  %v14749_v17 = vld [vmem:[#allocation144_spill] sm:$0xff]  ;;  %v14756_v43 = vld [vmem:[#allocation50_spill] sm:$0xff] }
 0x2f2   :  { %7349 = vmatprep.subr.bf16.mxu0 %v7348_v12  ;;  %7640 = vmatprep.subr.bf16.mxu1 %v14200_v60  ;;  %v7653_v12 = vpack.c.bf16 %v14719_v36, %v14718_v22  ;;  %v14733_v45 = vand.u32 4294901760, %v14732_v58  ;;  %v14739_v25 = vand.u32 4294901760, %v14738_v21  ;;  %v14744_v62 = vld [vmem:[#allocation193_spill] sm:$0xff]  ;;  %v14758_v50 = vld [vmem:[#allocation228_spill] sm:$0xff]  ;;  %v14759_v34 = vld [vmem:[#allocation55_spill] sm:$0xff] }
 0x2f3   :  { %v7360_v54 = vpack.c.bf16 %v14709_v47, %v14708_v41  ;;  %v7364_v23 = vpack.c.bf16 %v14715_v7, %v14714_v8  ;;  %v7368_v44 = vpack.c.bf16 %v14721_v48, %v14720_v32  ;;  %v14752_v41 = vld [vmem:[#allocation172_spill] sm:$0xff]  ;;  %v14753_v47 = vld [vmem:[#allocation178_spill] sm:$0xff]  ;;  %v14762_v7 = vld [vmem:[#allocation233_spill] sm:$0xff] }
 0x2f4   :  { %v7372_v46 = vpack.c.bf16 %v14733_v45, %v14731_v11  ;;  %v14761_v8 = vld [vmem:[#allocation64_spill] sm:$0xff]  ;;  %v14765_v4 = vld [vmem:[#allocation73_spill] sm:$0xff]  ;;  %v14767_v22 = vld [vmem:[#allocation82_spill] sm:$0xff] }
 0x2f5   :  { %7351 = vmatpush1.bf16.msra.mxu0 %v7350_v51  ;;  %7642 = vmatpush1.bf16.msra.mxu1 %v7641_v30  ;;  %v14724_v51 = vld [vmem:[#allocation92_spill] sm:$0xff]  ;;  %v14728_v30 = vld [vmem:[#allocation101_spill] sm:$0xff]  ;;  %v14768_v36 = vld [vmem:[#allocation86_spill] sm:$0xff] }
 0x2f6   :  { %7353 = vmatprep.subr.bf16.mxu0 %v7352_v42  ;;  %7643 = vmatprep.subr.bf16.mxu1 %v14200_v60  ;;  %v14725_v1 = vand.u32 4294901760, %v14724_v51  ;;  %v14729_v26 = vand.u32 4294901760, %v14728_v30  ;;  %v14734_v42 = vld [vmem:[#allocation117_spill] sm:$0xff]  ;;  %v14770_v32 = vld [vmem:[#allocation96_spill] sm:$0xff]  ;;  %v14776_v51 = vld [vmem:[#allocation123_spill] sm:$0xff] }
 0x2f7   :  { %v14735_v0 = vand.u32 4294901760, %v14734_v42  ;;  %v14771_v48 = vld [vmem:[#allocation100_spill] sm:$0xff]  ;;  %v14773_v49 = vld [vmem:[#allocation109_spill] sm:$0xff]  ;;  %v14781_v30 = vld [vmem:[#allocation186_spill] sm:$0xff] }
 0x2f8   :  { %v7370_v31 = vpack.c.bf16 %v14725_v1, %v14723_v63  ;;  %v7656_v37 = vpack.c.bf16 %v14729_v26, %v14727_v57  ;;  %v14774_v63 = vld [vmem:[#allocation114_spill] sm:$0xff]  ;;  %v14777_v1 = vld [vmem:[#allocation127_spill] sm:$0xff]  ;;  %v14779_v56 = vld [vmem:[#allocation136_spill] sm:$0xff] }
 0x2f9   :  { %7355 = vmatpush1.bf16.msra.mxu0 %v7354_v53  ;;  %7645 = vmatpush1.bf16.msra.mxu1 %v7644_v24  ;;  %v14737_v53 = vand.u32 4294901760, %v14736_v9  ;;  %v14741_v24 = vand.u32 4294901760, %v14740_v16  ;;  %v14780_v57 = vld [vmem:[#allocation139_spill] sm:$0xff]  ;;  %v14784_v13 = vld [vmem:[#allocation44_spill] sm:$0xff]  ;;  %v14786_v58 = vld [vmem:[#allocation65_spill] sm:$0xff] }
 0x2fa   :  { %7357 = vmatprep.subr.bf16.mxu0 %v7356_v18  ;;  %7646 = vmatprep.subr.bf16.mxu1 %v14200_v60  ;;  %v14745_v18 = vld [vmem:[#allocation200_spill] sm:$0xff]  ;;  %v14782_v26 = vld [vmem:[#allocation211_spill] sm:$0xff] }
 0x2fb   :  { %v7374_v29 = vpack.c.bf16 %v14737_v53, %v14735_v0  ;;  %v7659_v2 = vpack.c.bf16 %v14741_v24, %v14739_v25  ;;  %v14785_v11 = vld [vmem:[#allocation56_spill] sm:$0xff] }
 0x2fc   :  { %v14787_v45 = vld [vmem:[#allocation80_spill] sm:$0xff] }
 0x2fd   :  { %7359 = vmatpush1.bf16.msra.mxu0 %v7358_v52  ;;  %7648 = vmatpush1.bf16.msra.mxu1 %v7647_v10  ;;  %v14748_v52 = vld [vmem:[#allocation164_spill] sm:$0xff]  ;;  %v14751_v10 = vld [vmem:[#allocation154_spill] sm:$0xff] }
 0x2fe   :  { %7361 = vmatprep.subr.bf16.mxu0 %v7360_v54  ;;  %7649 = vmatprep.subr.bf16.mxu1 %v14200_v60  ;;  %v14754_v54 = vld [vmem:[#allocation159_spill] sm:$0xff]  ;;  %v14789_v42 = vld [vmem:[#allocation104_spill] sm:$0xff] }
 0x301   :  { %7363 = vmatpush1.bf16.msra.mxu0 %v7362_v40  ;;  %7651 = vmatpush1.bf16.msra.mxu1 %v7650_v35  ;;  %v14757_v40 = vld [vmem:[#allocation226_spill] sm:$0xff]  ;;  %v14760_v35 = vld [vmem:[#allocation60_spill] sm:$0xff] }
 0x302   :  { %7365 = vmatprep.subr.bf16.mxu0 %v7364_v23  ;;  %7652 = vmatprep.subr.bf16.mxu1 %v14200_v60  ;;  %v14763_v23 = vld [vmem:[#allocation236_spill] sm:$0xff] }
 0x305   :  { %7367 = vmatpush1.bf16.msra.mxu0 %v7366_v6  ;;  %7654 = vmatpush1.bf16.msra.mxu1 %v7653_v12  ;;  %v14766_v6 = vld [vmem:[#allocation77_spill] sm:$0xff]  ;;  %v14769_v12 = vld [vmem:[#allocation91_spill] sm:$0xff] }
 0x306   :  { %7369 = vmatprep.subr.bf16.mxu0 %v7368_v44  ;;  %7655 = vmatprep.subr.bf16.mxu1 %v14200_v60  ;;  %v14772_v44 = vld [vmem:[#allocation105_spill] sm:$0xff] }
 0x309   :  { %7371 = vmatpush1.bf16.msra.mxu0 %v7370_v31  ;;  %7657 = vmatpush1.bf16.msra.mxu1 %v7656_v37  ;;  %v14778_v31 = vld [vmem:[#allocation132_spill] sm:$0xff] }
 0x30a   :  { %7373 = vmatprep.subr.bf16.mxu0 %v7372_v46  ;;  %7658 = vmatprep.subr.bf16.mxu1 %v14200_v60  ;;  %v14783_v37 = vld [vmem:[#allocation184_spill] sm:$0xff] }
 0x30b   :  { %v14788_v46 = vld [vmem:[#allocation84_spill] sm:$0xff] }
 0x30d   :  { %7375 = vmatpush1.bf16.msra.mxu0 %v7374_v29  ;;  %7660 = vmatpush1.bf16.msra.mxu1 %v7659_v2  ;;  %v14791_v29 = vld [vmem:[#allocation170_spill] sm:$0xff] }
 0x30e   :  { %7377 = vmatprep.subr.bf16.mxu0 %v14742_v19  ;;  %7661 = vmatprep.subr.bf16.mxu1 %v14200_v60 }
 0x310   :  { %4630 = vmatmul.mubr.f32.vlgmr.msra.gmra.mrb[10].mxu0 %v14743_v39  ;;  %5730 = vmatmul.mubr.f32.vlgmr.msra.gmra.mrb[10].mxu1 %v14743_v39 }
 0x311   :  { %7379 = vmatpush1.bf16.msra.mxu0 %v14744_v62  ;;  %7663 = vmatpush1.bf16.msra.mxu1 %v14745_v18  ;;  %v14792_v18 = vld [vmem:[#allocation185_spill] sm:$0xff] }
 0x312   :  { %7381 = vmatprep.subr.bf16.mxu0 %v14746_v27  ;;  %7664 = vmatprep.subr.bf16.mxu1 %v14200_v60 }
 0x313   :  { %4636 = vmatprep.mubr.f32.mxu0 %v14747_v55  ;;  %5735 = vmatprep.mubr.f32.mxu1 %v14747_v55 }
 0x314   :  { %4638 = vmatmul.mubr.f32.gmra.mrb[12].mxu0 %v14748_v52  ;;  %5737 = vmatmul.mubr.f32.gmra.mrb[12].mxu1 %v14748_v52 }
 0x315   :  { %7383 = vmatpush1.bf16.msra.mxu0 %v14749_v17  ;;  %7666 = vmatpush1.bf16.msra.mxu1 %v14750_v59 }
 0x316   :  { %7385 = vmatprep.subr.bf16.mxu0 %v14751_v10  ;;  %7667 = vmatprep.subr.bf16.mxu1 %v14200_v60 }
 0x317   :  { %4644 = vmatprep.mubr.f32.mxu0 %v14752_v41  ;;  %5742 = vmatprep.mubr.f32.mxu1 %v14752_v41 }
 0x318   :  { %4646 = vmatmul.mubr.f32.gmra.mrb[14].mxu0 %v14753_v47  ;;  %5744 = vmatmul.mubr.f32.gmra.mrb[14].mxu1 %v14753_v47 }
 0x319   :  { %7387 = vmatpush1.bf16.msra.mxu0 %v14754_v54  ;;  %7669 = vmatpush1.bf16.msra.mxu1 %v14755_v20  ;;  %v14793_v54 = vld [vmem:[#allocation201_spill] sm:$0xff] }
 0x31a   :  { %7389 = vmatprep.subr.bf16.mxu0 %v14756_v43  ;;  %7670 = vmatprep.subr.bf16.mxu1 %v14200_v60 }
 0x31b   :  { %4652 = vmatprep.mubr.f32.mxu0 %v14757_v40  ;;  %5749 = vmatprep.mubr.f32.mxu1 %v14757_v40 }
 0x31c   :  { %4654 = vmatmul.mubr.f32.gmra.mrb[16].mxu0 %v14758_v50  ;;  %5751 = vmatmul.mubr.f32.gmra.mrb[16].mxu1 %v14758_v50 }
 0x31d   :  { %7391 = vmatpush1.bf16.msra.mxu0 %v14759_v34  ;;  %7672 = vmatpush1.bf16.msra.mxu1 %v14760_v35 }
 0x31e   :  { %7393 = vmatprep.subr.bf16.mxu0 %v14761_v8  ;;  %7673 = vmatprep.subr.bf16.mxu1 %v14200_v60 }
 0x31f   :  { %4660 = vmatprep.mubr.f32.mxu0 %v14762_v7  ;;  %5756 = vmatprep.mubr.f32.mxu1 %v14762_v7 }
 0x320   :  { %4662 = vmatmul.mubr.f32.gmra.mrb[18].mxu0 %v14763_v23  ;;  %5758 = vmatmul.mubr.f32.gmra.mrb[18].mxu1 %v14763_v23 }
 0x321   :  { %7395 = vmatpush1.bf16.msra.mxu0 %v14764_v15  ;;  %7675 = vmatpush1.bf16.msra.mxu1 %v14765_v4 }
 0x322   :  { %7397 = vmatprep.subr.bf16.mxu0 %v14766_v6  ;;  %7676 = vmatprep.subr.bf16.mxu1 %v14200_v60 }
 0x323   :  { %4793 = vmatprep.mubr.f32.mxu0 %v14668_v3  ;;  %5858 = vmatprep.mubr.f32.mxu1 %v14668_v3  ;;  %v14775_v3 = vld [vmem:[#allocation118_spill] sm:$0xff] }
 0x325   :  { %7399 = vmatpush1.bf16.msra.mxu0 %v14767_v22  ;;  %7678 = vmatpush1.bf16.msra.mxu1 %v14768_v36 }
 0x326   :  { %7401 = vmatprep.subr.bf16.mxu0 %v14769_v12  ;;  %7679 = vmatprep.subr.bf16.mxu1 %v14200_v60 }
 0x329   :  { %7403 = vmatpush1.bf16.msra.mxu0 %v14770_v32  ;;  %7681 = vmatpush1.bf16.msra.mxu1 %v14771_v48 }
 0x32a   :  { %7405 = vmatprep.subr.bf16.mxu0 %v14772_v44  ;;  %7682 = vmatprep.subr.bf16.mxu1 %v14200_v60 }
 0x32d   :  { %7407 = vmatpush1.bf16.msra.mxu0 %v14773_v49  ;;  %7684 = vmatpush1.bf16.msra.mxu1 %v14774_v63  ;;  %v14795_v49 = vld [vmem:[#allocation131_spill] sm:$0xff] }
 0x32e   :  { %7409 = vmatprep.subr.bf16.mxu0 %v14775_v3  ;;  %7685 = vmatprep.subr.bf16.mxu1 %v14200_v60  ;;  %v14796_v3 = vld [vmem:[#allocation137_spill] sm:$0xff] }
 0x331   :  { %7411 = vmatpush1.bf16.msra.mxu0 %v14776_v51  ;;  %7687 = vmatpush1.bf16.msra.mxu1 %v14777_v1  ;;  %v14797_v1 = vld [vmem:[#allocation134_spill] sm:$0xff] }
 0x332   :  { %7413 = vmatprep.subr.bf16.mxu0 %v14778_v31  ;;  %7688 = vmatprep.subr.bf16.mxu1 %v14200_v60 }
 0x335   :  { %7415 = vmatpush1.bf16.msra.mxu0 %v14779_v56  ;;  %7690 = vmatpush1.bf16.msra.mxu1 %v14780_v57  ;;  %v14798_v57 = vld [vmem:[#allocation141_spill] sm:$0xff] }
 0x336   :  { %7417 = vmatprep.subr.bf16.mxu0 %v14781_v30  ;;  %7691 = vmatprep.subr.bf16.mxu1 %v14200_v60 }
 0x339   :  { %7419 = vmatpush1.bf16.msra.mxu0 %v14782_v26  ;;  %7693 = vmatpush1.bf16.msra.mxu1 %v14783_v37 }
 0x33a   :  { %7421 = vmatprep.subr.bf16.mxu0 %v14784_v13  ;;  %7694 = vmatprep.subr.bf16.mxu1 %v14200_v60 }
 0x33d   :  { %7423 = vmatpush1.bf16.msra.mxu0 %v14583_v14  ;;  %7696 = vmatpush1.bf16.msra.mxu1 %v14785_v11 }
 0x33e   :  { %7425 = vmatprep.subr.bf16.mxu0 %v14786_v58  ;;  %7697 = vmatprep.subr.bf16.mxu1 %v14200_v60 }
 0x341   :  { %7427 = vmatpush1.bf16.msra.mxu0 %v14591_v33  ;;  %7699 = vmatpush1.bf16.msra.mxu1 %v14787_v45 }
 0x342   :  { %7429 = vmatprep.subr.bf16.mxu0 %v14788_v46  ;;  %7700 = vmatprep.subr.bf16.mxu1 %v14200_v60 }
 0x345   :  { %7431 = vmatpush1.bf16.msra.mxu0 %v14595_v38  ;;  %7702 = vmatpush1.bf16.msra.mxu1 %v14596_v28 }
 0x346   :  { %7433 = vmatprep.subr.bf16.mxu0 %v14789_v42  ;;  %7703 = vmatprep.subr.bf16.mxu1 %v14200_v60 }
 0x349   :  { %7435 = vmatpush1.bf16.msra.mxu0 %v14600_v61  ;;  %7705 = vmatpush1.bf16.msra.mxu1 %v14601_v5  ;;  %v14790_v5 = vld [vmem:[#allocation155_spill] sm:$0xff] }
 0x34c   :  { %4795 = vmatmul.mubr.f32.vlgmr.msra.gmra.mrb[10].mxu0 %v14743_v39  ;;  %5860 = vmatmul.mubr.f32.vlgmr.msra.gmra.mrb[10].mxu1 %v14743_v39 }
 0x34d   :  { %4801 = vmatprep.mubr.f32.mxu0 %v14747_v55  ;;  %5865 = vmatprep.mubr.f32.mxu1 %v14747_v55 }
 0x350   :  { %4803 = vmatmul.mubr.f32.gmra.mrb[12].mxu0 %v14748_v52  ;;  %5867 = vmatmul.mubr.f32.gmra.mrb[12].mxu1 %v14748_v52 }
 0x351   :  { %4809 = vmatprep.mubr.f32.mxu0 %v14752_v41  ;;  %5872 = vmatprep.mubr.f32.mxu1 %v14752_v41 }
 0x354   :  { %4811 = vmatmul.mubr.f32.gmra.mrb[14].mxu0 %v14753_v47  ;;  %5874 = vmatmul.mubr.f32.gmra.mrb[14].mxu1 %v14753_v47 }
 0x355   :  { %4817 = vmatprep.mubr.f32.mxu0 %v14757_v40  ;;  %5879 = vmatprep.mubr.f32.mxu1 %v14757_v40 }
 0x358   :  { %4819 = vmatmul.mubr.f32.gmra.mrb[16].mxu0 %v14758_v50  ;;  %5881 = vmatmul.mubr.f32.gmra.mrb[16].mxu1 %v14758_v50 }
 0x359   :  { %4825 = vmatprep.mubr.f32.mxu0 %v14762_v7  ;;  %5886 = vmatprep.mubr.f32.mxu1 %v14762_v7 }
 0x35c   :  { %4827 = vmatmul.mubr.f32.gmra.mrb[18].mxu0 %v14763_v23  ;;  %5888 = vmatmul.mubr.f32.gmra.mrb[18].mxu1 %v14763_v23  ;;  %v14794_v23 = vld [vmem:[#allocation203_spill] sm:$0xff] }
 0x41f   :  { %v4796_v14 = vpop.f32.mrb[10].mxu0  ;;  %v5861_v60 = vpop.f32.mrb[10].mxu1 }
 0x420   :  { %v5896_v38 = vadd.f32 %v14790_v5, %v4796_v14  ;;  %v4798_v61 = vpop.f32.mrb[11].mxu0  ;;  %v5863_v33 = vpop.f32.mrb[11].mxu1  ;;  %v5899_v53 = vsel %vm5898_vm1, %v5861_v60, 0.0 }
 0x421   :  { %v14800_v33 = vld [vmem:[#allocation149_spill] sm:$0xff] }
 0x422   :  { %v5897_v28 = vadd.f32 %v5896_v38, %v4798_v61 }
 0x423   :  { %v12102_v0 = vpop.f32.mrb[12].mxu0  ;;  %v12104_v9 = vpop.f32.mrb[12].mxu1 }
 0x424   :  { %v5906_v21 = vadd.f32 %v14791_v29, %v12102_v0  ;;  %v12109_v25 = vpop.f32.mrb[13].mxu0  ;;  %v5870_v16 = vpop.f32.mrb[13].mxu1  ;;  %v5900_v24 = vadd.f32 %v5899_v53, %v5897_v28  ;;  %v5908_v19 = vsel %vm5898_vm1, %v12104_v9, 0.0  ;;  %v14801_v29 = vld [vmem:[#allocation146_spill] sm:$0xff] }
 0x426   :  { %v5907_v2 = vadd.f32 %v5906_v21, %v12109_v25  ;;  %5901 = vadd.xlane.f32.xlu0 %v5900_v24  ;;  %v14802_v24 = vld [vmem:[#allocation153_spill] sm:$0xff] }
 0x427   :  { %v12114_v39 = vpop.f32.mrb[14].mxu0  ;;  %v12116_v62 = vpop.f32.mrb[14].mxu1 }
 0x428   :  { %v5915_v27 = vadd.f32 %v14792_v18, %v12114_v39  ;;  %v12120_v55 = vpop.f32.mrb[15].mxu0  ;;  %v5877_v52 = vpop.f32.mrb[15].mxu1  ;;  %v5909_v17 = vadd.f32 %v5908_v19, %v5907_v2  ;;  %v5917_v47 = vsel %vm5898_vm1, %v12116_v62, 0.0 }
 0x42a   :  { %v5916_v59 = vadd.f32 %v5915_v27, %v12120_v55  ;;  %5910 = vadd.xlane.f32.xlu0 %v5909_v17 }
 0x42b   :  { %v12123_v10 = vpop.f32.mrb[16].mxu0  ;;  %v12125_v41 = vpop.f32.mrb[16].mxu1 }
 0x42c   :  { %v5924_v20 = vadd.f32 %v14793_v54, %v12123_v10  ;;  %v12131_v43 = vpop.f32.mrb[17].mxu0  ;;  %v5884_v40 = vpop.f32.mrb[17].mxu1  ;;  %v5918_v50 = vadd.f32 %v5917_v47, %v5916_v59  ;;  %v5926_v35 = vsel %vm5898_vm1, %v12125_v41, 0.0 }
 0x42e   :  { %v5925_v34 = vadd.f32 %v5924_v20, %v12131_v43  ;;  %5919 = vadd.xlane.f32.xlu1 %v5918_v50  ;;  %v14803_v20 = vld [vmem:[#allocation158_spill] sm:$0xff] }
 0x42f   :  { %v12136_v8 = vpop.f32.mrb[18].mxu0  ;;  %v12138_v7 = vpop.f32.mrb[18].mxu1 }
 0x430   :  { %v5933_v15 = vadd.f32 %v14794_v23, %v12136_v8  ;;  %v12142_v4 = vpop.f32.mrb[19].mxu0  ;;  %v5891_v6 = vpop.f32.mrb[19].mxu1  ;;  %v5927_v22 = vadd.f32 %v5926_v35, %v5925_v34  ;;  %v5935_v12 = vsel %vm5898_vm1, %v12138_v7, 0.0  ;;  %v14804_v35 = vld [vmem:[#allocation165_spill] sm:$0xff] }
 0x432   :  { %v5934_v36 = vadd.f32 %v5933_v15, %v12142_v4  ;;  %5928 = vadd.xlane.f32.xlu1 %v5927_v22 }
 0x434   :  { %v5936_v32 = vadd.f32 %v5935_v12, %v5934_v36  ;;  %v14805_v36 = vld [vmem:[#allocation161_spill] sm:$0xff] }
 0x436   :  { %5937 = vadd.xlane.f32.xlu0 %v5936_v32 }
 0x4b3   :  { %v5902_v48 = vpop.xlane.xlu0 %5901 }
 0x4b4   :  { %v5939_v44 = vmul.f32 0.0012755102, %v5902_v48 }
 0x4b6   :  { %v12148_v63 = vsub.f32 %v14795_v49, %v5939_v44  ;;  %v12151_v51 = vsub.f32 %v14796_v3, %v5939_v44  ;;  %v12154_v31 = vsub.f32 %v14797_v1, %v5939_v44  ;;  %v12157_v30 = vsub.f32 %v14798_v57, %v5939_v44  ;;  %v14806_v3 = vld [vmem:[#allocation167_spill] sm:$0xff] }
 0x4b7   :  { %v5911_v56 = vpop.xlane.xlu0 %5910  ;;  %v12159_v26 = vsub.f32 %v5861_v60, %v5939_v44  ;;  %v12165_v58 = vsub.f32 %v4796_v14, %v5939_v44  ;;  %v12167_v45 = vsub.f32 %v4798_v61, %v5939_v44  ;;  %v14799_v60 = vld [vmem:[#allocation143_spill] sm:$0xff] }
 0x4b8   :  { %v5940_v37 = vmul.f32 0.0012755102, %v5911_v56  ;;  %v5979_v13 = vmul.f32 %v12148_v63, %v12148_v63  ;;  %v5980_v11 = vmul.f32 %v12151_v51, %v12151_v51  ;;  %v5981_v46 = vmul.f32 %v12154_v31, %v12154_v31 }
 0x4b9   :  { %v5985_v42 = vmul.f32 %v12159_v26, %v12159_v26  ;;  %v5982_v14 = vmul.f32 %v12157_v30, %v12157_v30  ;;  %v5983_v18 = vmul.f32 %v12165_v58, %v12165_v58  ;;  %v5984_v59 = vmul.f32 %v12167_v45, %v12167_v45 }
 0x4ba   :  { %v6014_v5 = vadd.f32 %v5980_v11, %v5979_v13  ;;  %v12174_v38 = vsub.f32 %v14799_v60, %v5940_v37  ;;  %v12177_v28 = vsub.f32 %v14800_v33, %v5940_v37  ;;  %v12182_v61 = vsub.f32 %v14801_v29, %v5940_v37  ;;  %v14807_v33 = vld [vmem:[#allocation173_spill] sm:$0xff] }
 0x4bb   :  { %v5920_v53 = vpop.xlane.xlu1 %5919  ;;  %v12185_v2 = vsub.f32 %v14802_v24, %v5940_v37  ;;  %v12192_v27 = vsub.f32 %v12102_v0, %v5940_v37  ;;  %v12195_v52 = vsub.f32 %v12104_v9, %v5940_v37  ;;  %v6019_v54 = vsel %vm5898_vm1, %v5985_v42, 0.0 }
 0x4bc   :  { %v5941_v21 = vmul.f32 0.0012755102, %v5920_v53  ;;  %v6015_v16 = vadd.f32 %v6014_v5, %v5981_v46  ;;  %v5986_v19 = vmul.f32 %v12174_v38, %v12174_v38  ;;  %v5987_v17 = vmul.f32 %v12177_v28, %v12177_v28 }
 0x4bd   :  { %v12206_v34 = vsub.f32 %v12109_v25, %v5940_v37  ;;  %v5988_v0 = vmul.f32 %v12182_v61, %v12182_v61  ;;  %v5989_v22 = vmul.f32 %v12185_v2, %v12185_v2  ;;  %v5990_v32 = vmul.f32 %v12192_v27, %v12192_v27 }
 0x4be   :  { %v6016_v47 = vadd.f32 %v6015_v16, %v5982_v14  ;;  %v12203_v40 = vsub.f32 %v14803_v20, %v5941_v21  ;;  %v6023_v9 = vadd.f32 %v5987_v17, %v5986_v19  ;;  %v12211_v23 = vsub.f32 %v14804_v35, %v5941_v21  ;;  %v14808_v16 = vld [vmem:[#allocation179_spill] sm:$0xff]  ;;  %v14809_v19 = vld [vmem:[#allocation177_spill] sm:$0xff] }
 0x4bf   :  { %v5929_v50 = vpop.xlane.xlu1 %5928  ;;  %v12216_v12 = vsub.f32 %v14805_v36, %v5941_v21  ;;  %v5992_v25 = vmul.f32 %v12195_v52, %v12195_v52  ;;  %v12225_v1 = vsub.f32 %v14806_v3, %v5941_v21  ;;  %v12228_v56 = vsub.f32 %v12114_v39, %v5941_v21 }
 0x4c0   :  { %v5942_v15 = vmul.f32 0.0012755102, %v5929_v50  ;;  %v6017_v6 = vadd.f32 %v6016_v47, %v5983_v18  ;;  %v6024_v48 = vadd.f32 %v6023_v9, %v5988_v0  ;;  %v5993_v44 = vmul.f32 %v12203_v40, %v12203_v40  ;;  %v14810_v47 = vld [vmem:[#allocation182_spill] sm:$0xff] }
 0x4c1   :  { %v5994_v57 = vmul.f32 %v12211_v23, %v12211_v23  ;;  %v5991_v13 = vmul.f32 %v12206_v34, %v12206_v34  ;;  %v12235_v46 = vsub.f32 %v12120_v55, %v5941_v21  ;;  %v12238_v42 = vsub.f32 %v12116_v62, %v5941_v21 }
 0x4c2   :  { %v6018_v49 = vadd.f32 %v6017_v6, %v5984_v59  ;;  %v6025_v11 = vadd.f32 %v6024_v48, %v5989_v22  ;;  %v5995_v60 = vmul.f32 %v12216_v12, %v12216_v12  ;;  %v12243_v53 = vsub.f32 %v14807_v33, %v5942_v15  ;;  %v14814_v33 = vld [vmem:[#allocation197_spill] sm:$0xff] }
 0x4c3   :  { %v5938_v37 = vpop.xlane.xlu0 %5937  ;;  %v6032_v39 = vadd.f32 %v5994_v57, %v5993_v44  ;;  %v6028_v29 = vsel %vm5898_vm1, %v5992_v25, 0.0  ;;  %v12247_v24 = vsub.f32 %v14808_v16, %v5942_v15  ;;  %v12250_v55 = vsub.f32 %v14809_v19, %v5942_v15  ;;  %v14812_v57 = vld [vmem:[#allocation194_spill] sm:$0xff] }
 0x4c4   :  { %v6020_v5 = vadd.f32 %v6019_v54, %v6018_v49  ;;  %v6026_v14 = vadd.f32 %v6025_v11, %v5990_v32  ;;  %v5943_v18 = vmul.f32 0.0012755102, %v5938_v37  ;;  %v5996_v62 = vmul.f32 %v12225_v1, %v12225_v1  ;;  %v14811_v49 = vld [vmem:[#allocation189_spill] sm:$0xff] }
 0x4c5   :  { %v5997_v21 = vmul.f32 %v12228_v56, %v12228_v56  ;;  %v6033_v17 = vadd.f32 %v6032_v39, %v5995_v60  ;;  %v12257_v54 = vsub.f32 %v14810_v47, %v5942_v15  ;;  %v6000_v20 = vmul.f32 %v12243_v53, %v12243_v53 }
 0x4c6   :  { %6021 = vadd.xlane.f32.xlu1 %v6020_v5  ;;  %v6027_v59 = vadd.f32 %v6026_v14, %v5991_v13  ;;  %v6001_v50 = vmul.f32 %v12247_v24, %v12247_v24  ;;  %v5998_v0 = vmul.f32 %v12235_v46, %v12235_v46  ;;  %v5999_v9 = vmul.f32 %v12238_v42, %v12238_v42  ;;  %v14813_v13 = vld [vmem:[#allocation191_spill] sm:$0xff] }
 0x4c7   :  { %v6034_v35 = vadd.f32 %v6033_v17, %v5996_v62  ;;  %v12268_v6 = vsub.f32 %v12123_v10, %v5942_v15  ;;  %v12271_v36 = vsub.f32 %v12131_v43, %v5942_v15  ;;  %v6002_v32 = vmul.f32 %v12250_v55, %v12250_v55 }
 0x4c8   :  { %v6029_v22 = vadd.f32 %v6028_v29, %v6027_v59  ;;  %v6041_v25 = vadd.f32 %v6001_v50, %v6000_v20  ;;  %v12276_v44 = vsub.f32 %v12125_v41, %v5942_v15  ;;  %v12279_v3 = vsub.f32 %v14811_v49, %v5943_v18 }
 0x4c9   :  { %v6035_v48 = vadd.f32 %v6034_v35, %v5997_v21  ;;  %v12282_v37 = vsub.f32 %v14812_v57, %v5943_v18  ;;  %v6003_v10 = vmul.f32 %v12257_v54, %v12257_v54  ;;  %v12287_v11 = vsub.f32 %v14813_v13, %v5943_v18  ;;  %v6352_v13 = vld [vmem:[%s12477_s3 + $0x38] sm:$0xff] }
 0x4ca   :  { %6030 = vadd.xlane.f32.xlu0 %v6029_v22  ;;  %v6042_v43 = vadd.f32 %v6041_v25, %v6002_v32  ;;  %v6037_v60 = vsel %vm5898_vm1, %v5999_v9, 0.0  ;;  %v6007_v41 = vmul.f32 %v12279_v3, %v12279_v3  ;;  %v6004_v15 = vmul.f32 %v12268_v6, %v12268_v6 }
 0x4cb   :  { %v6036_v5 = vadd.f32 %v6035_v48, %v5998_v0  ;;  %v12295_v14 = vsub.f32 %v14814_v33, %v5943_v18  ;;  %v6008_v29 = vmul.f32 %v12282_v37, %v12282_v37  ;;  %v6005_v19 = vmul.f32 %v12271_v36, %v12271_v36 }
 0x4cc   :  { %v6043_v39 = vadd.f32 %v6042_v43, %v6003_v10  ;;  %v6006_v62 = vmul.f32 %v12276_v44, %v12276_v44  ;;  %v12304_v17 = vsub.f32 %v12136_v8, %v5943_v18  ;;  %v6009_v59 = vmul.f32 %v12287_v11, %v12287_v11  ;;  %v6350_v10 = vld [vmem:[%s12477_s3 + $0x28] sm:$0xff]  ;;  %v6351_v43 = vld [vmem:[%s12477_s3 + $0x30] sm:$0xff] }
 0x4cd   :  { %v6038_v16 = vadd.f32 %v6037_v60, %v6036_v5  ;;  %v6050_v47 = vadd.f32 %v6008_v29, %v6007_v41  ;;  %v12309_v20 = vsub.f32 %v12138_v7, %v5943_v18  ;;  %v12312_v0 = vsub.f32 %v12142_v4, %v5943_v18  ;;  %v6353_v5 = vld [vmem:[%s12477_s3 + $0x40] sm:$0xff]  ;;  %v6354_v60 = vld [vmem:[%s12477_s3 + $0x48] sm:$0xff] }
 0x4ce   :  { %v6044_v21 = vadd.f32 %v6043_v39, %v6004_v15  ;;  %v6010_v9 = vmul.f32 %v12295_v14, %v12295_v14  ;;  %v6046_v22 = vsel %vm5898_vm1, %v6006_v62, 0.0  ;;  %v6011_v32 = vmul.f32 %v12304_v17, %v12304_v17 }
 0x4cf   :  { %6039 = vadd.xlane.f32.xlu1 %v6038_v16  ;;  %v6051_v35 = vadd.f32 %v6050_v47, %v6009_v59  ;;  %v6013_v48 = vmul.f32 %v12309_v20, %v12309_v20  ;;  %v6012_v7 = vmul.f32 %v12312_v0, %v12312_v0 }
 0x4d0   :  { %v6045_v50 = vadd.f32 %v6044_v21, %v6005_v19  ;;  %v6064_v21 = vld [vmem:[%s12477_s3] sm:$0xff] }
 0x4d1   :  { %v6052_v25 = vadd.f32 %v6051_v35, %v6010_v9  ;;  %v6055_v49 = vsel %vm5898_vm1, %v6013_v48, 0.0 }
 0x4d2   :  { %v6047_v8 = vadd.f32 %v6046_v22, %v6045_v50  ;;  %v6065_v22 = vld [vmem:[%s12477_s3 + $0x8] sm:$0xff] }
 0x4d3   :  { %v6053_v4 = vadd.f32 %v6052_v25, %v6011_v32 }
 0x4d4   :  { %6048 = vadd.xlane.f32.xlu0 %v6047_v8 }
 0x4d5   :  { %v6054_v18 = vadd.f32 %v6053_v4, %v6012_v7  ;;  %v6066_v4 = vld [vmem:[%s12477_s3 + $0x10] sm:$0xff] }
 0x4d7   :  { %v6056_v57 = vadd.f32 %v6055_v49, %v6054_v18 }
 0x4d9   :  { %6057 = vadd.xlane.f32.xlu1 %v6056_v57 }
 0x553   :  { %v6022_v41 = vpop.xlane.xlu1 %6021 }
 0x554   :  { %v6059_v15 = vmul.f32 0.0012755102, %v6022_v41  ;;  %v6067_v41 = vld [vmem:[%s12477_s3 + $0x18] sm:$0xff] }
 0x556   :  { %v6075_v39 = vadd.f32 1e-05, %v6059_v15 }
 0x557   :  { %v6031_v33 = vpop.xlane.xlu0 %6030 }
 0x558   :  { %7915 = vrsqrt.f32 %v6075_v39  ;;  %v6060_v29 = vmul.f32 0.0012755102, %v6031_v33  ;;  %v6068_v33 = vld [vmem:[%s12477_s3 + $0x20] sm:$0xff] }
 0x55a   :  { %v6076_v16 = vadd.f32 1e-05, %v6060_v29 }
 0x55c   :  { %7917 = vrsqrt.f32 %v6076_v16  ;;  %v6040_v19 = vpop.xlane.xlu1 %6039 }
 0x55d   :  { %v6061_v62 = vmul.f32 0.0012755102, %v6040_v19 }
 0x55f   :  { %v6077_v59 = vadd.f32 1e-05, %v6061_v62 }
 0x561   :  { %7919 = vrsqrt.f32 %v6077_v59  ;;  %v6049_v50 = vpop.xlane.xlu0 %6048 }
 0x562   :  { %v7916_v47 = vpop.eup %7915  ;;  %v6062_v35 = vmul.f32 0.0012755102, %v6049_v50 }
 0x563   :  { %v6085_v9 = vmul.f32 %v7916_v47, %v6064_v21 }
 0x564   :  { %v6078_v8 = vadd.f32 1e-05, %v6062_v35 }
 0x566   :  { %v7918_v32 = vpop.eup %7917  ;;  %7921 = vrsqrt.f32 %v6078_v8  ;;  %v6058_v48 = vpop.xlane.xlu1 %6057 }
 0x567   :  { %v6086_v25 = vmul.f32 %v7918_v32, %v6065_v22  ;;  %v6063_v7 = vmul.f32 0.0012755102, %v6058_v48 }
 0x569   :  { %v6079_v18 = vadd.f32 1e-05, %v6063_v7 }
 0x56b   :  { %v7920_v49 = vpop.eup %7919  ;;  %7923 = vrsqrt.f32 %v6079_v18 }
 0x56c   :  { %v6087_v57 = vmul.f32 %v7920_v49, %v6066_v4 }
 0x570   :  { %v7922_v15 = vpop.eup %7921 }
 0x571   :  { %v6088_v39 = vmul.f32 %v7922_v15, %v6067_v41 }
 0x575   :  { %v7924_v29 = vpop.eup %7923 }
 0x576   :  { %v6089_v16 = vmul.f32 %v7924_v29, %v6068_v33 }
 0x577   :  { %7949 = dma.done.wait [#allocation3], 4480 }
 0x578   :  { %7950 = vsyncadd [#allocation3], 4294962816  ;;  %v7954_v19 = vmov 0   ;;  %v14815_v7 = vld [vmem:[#allocation9_spill] sm:$0xff]  ;;  %v14816_v4 = vld [vmem:[#allocation10_spill] sm:$0xff]  ;;  %s7955_s3 = smov [#allocation4]  }
 0x579   :  { %7926 = vset.pattern.permute.xlu1 %v7954_v19  ;;  %7925 = vset.pattern.permute.xlu0 %v7954_v19  ;;  %v14819_v41 = vld [vmem:[#allocation13_spill] sm:$0xff]  ;;  %v14821_v29 = vld [vmem:[#allocation15_spill] sm:$0xff]  ;;  %s6324_s16 = sshll.u32 %s7955_s3, 4  ;;  %s6325_s16 = int_to_ptr.vmem [resolvable:$true] %s6324_s16 }
 0x57a   :  { %6106 = vperm.xlu1 %7926, %v6087_v57   ;;  %6096 = vperm.xlu0 %7925, %v6085_v9   ;;  %v14818_v57 = vld [vmem:[#allocation12_spill] sm:$0xff]  ;;  %s7927_s17 = scalar_lea.vmem %s6325_s16, 4480  ;;  %p7932_p1 = scmp.lt.s32.totalorder %s6325_s16, %s6325_s16 }
 0x57b   :  { %p7928_p0 = scmp.ne.s32.totalorder %s6325_s16, %s7927_s17  ;;  %p7933_p2 = scmp.lt.s32.totalorder %s7927_s17, %s7927_s17 }
 0x57d   :  { %p7934_p3 = por %p7933_p2, %p7932_p1 }
 0x57e   :  { %6111 = vperm.xlu1 %7926, %v6088_v39   ;;  %6101 = vperm.xlu0 %7925, %v6086_v25   ;;  %v14820_v39 = vld [vmem:[#allocation14_spill] sm:$0xff] }
 0x57f   :  { %p7935_p4 = pnand %p7934_p3, %p7928_p0 }
 0x582   :  { %6156 = vperm.xlu1 %7926, %v6350_v10   ;;  %6116 = vperm.xlu0 %7925, %v6089_v16  }
 0x586   :  { %6166 = vperm.xlu1 %7926, %v6352_v13   ;;  %6161 = vperm.xlu0 %7925, %v6351_v43  }
 0x58a   :  { %6176 = vperm.xlu1 %7926, %v6354_v60   ;;  %6171 = vperm.xlu0 %7925, %v6353_v5  }
 0x5f9   :  { %v6107_v62 = vpop.permute.xlu1 %6106  ;;  %v6097_v21 = vpop.permute.xlu0 %6096 }
 0x5fa   :  { %v6133_v59 = vmul.f32 %v6107_v62, %v12203_v40  ;;  %v6134_v47 = vmul.f32 %v6107_v62, %v12211_v23  ;;  %v6135_v50 = vmul.f32 %v6107_v62, %v12216_v12  ;;  %v6136_v35 = vmul.f32 %v6107_v62, %v12225_v1 }
 0x5fb   :  { %v6137_v9 = vmul.f32 %v6107_v62, %v12228_v56  ;;  %v6138_v22 = vmul.f32 %v6107_v62, %v12235_v46  ;;  %v6139_v10 = vmul.f32 %v6107_v62, %v12238_v42  ;;  %v6119_v43 = vmul.f32 %v6097_v21, %v12148_v63 }
 0x5fc   :  { %v6120_v13 = vmul.f32 %v6097_v21, %v12151_v51  ;;  %v6121_v5 = vmul.f32 %v6097_v21, %v12154_v31  ;;  %v6122_v40 = vmul.f32 %v6097_v21, %v12157_v30  ;;  %v6123_v23 = vmul.f32 %v6097_v21, %v12165_v58 }
 0x5fd   :  { %v6112_v60 = vpop.permute.xlu1 %6111  ;;  %v6102_v12 = vpop.permute.xlu0 %6101  ;;  %v6124_v1 = vmul.f32 %v6097_v21, %v12167_v45  ;;  %v6125_v56 = vmul.f32 %v6097_v21, %v12159_v26 }
 0x5fe   :  { %v6126_v46 = vmul.f32 %v6102_v12, %v12174_v38  ;;  %v6127_v42 = vmul.f32 %v6102_v12, %v12177_v28  ;;  %v6128_v63 = vmul.f32 %v6102_v12, %v12182_v61  ;;  %v6129_v51 = vmul.f32 %v6102_v12, %v12185_v2 }
 0x5ff   :  { %v6130_v31 = vmul.f32 %v6102_v12, %v12192_v27  ;;  %v6131_v30 = vmul.f32 %v6102_v12, %v12206_v34  ;;  %v6132_v58 = vmul.f32 %v6102_v12, %v12195_v52  ;;  %v12376_v8 = vmul.f32 %v6112_v60, %v12243_v53 }
 0x600   :  { %v12379_v45 = vmul.f32 %v6112_v60, %v12247_v24  ;;  %v12382_v26 = vmul.f32 %v6112_v60, %v12250_v55  ;;  %v12387_v61 = vmul.f32 %v6112_v60, %v12257_v54  ;;  %v12390_v2 = vmul.f32 %v6112_v60, %v12268_v6 }
 0x601   :  { %v6157_v38 = vpop.permute.xlu1 %6156  ;;  %v12384_v28 = vpop.permute.xlu0 %6116  ;;  %v12393_v27 = vmul.f32 %v6112_v60, %v12271_v36  ;;  %v12396_v52 = vmul.f32 %v6112_v60, %v12276_v44  ;;  %v14817_v36 = vld [vmem:[#allocation11_spill] sm:$0xff] }
 0x602   :  { %v6179_v34 = vadd.f32 %v6157_v38, %v6119_v43  ;;  %v6180_v53 = vadd.f32 %v6157_v38, %v6120_v13  ;;  %v6181_v24 = vadd.f32 %v6157_v38, %v6121_v5  ;;  %v6182_v55 = vadd.f32 %v6157_v38, %v6122_v40 }
 0x603   :  { %v6183_v32 = vadd.f32 %v6157_v38, %v6123_v23  ;;  %v6184_v25 = vadd.f32 %v6157_v38, %v6124_v1  ;;  %v6185_v48 = vadd.f32 %v6157_v38, %v6125_v56  ;;  %v12400_v54 = vmul.f32 %v12384_v28, %v12279_v3  ;;  %v14822_v1 = vld [vmem:[#allocation23_spill] sm:$0xff]  ;;  %v14823_v38 = vld [vmem:[#allocation24_spill] sm:$0xff] }
 0x604   :  { %v6249_v6 = vadd.f32 %v6179_v34, %v14815_v7  ;;  %v6250_v18 = vadd.f32 %v6180_v53, %v14816_v4  ;;  %v6251_v49 = vadd.f32 %v6181_v24, %v14817_v36  ;;  %v6252_v44 = vadd.f32 %v6182_v55, %v14818_v57  ;;  %v14826_v34 = vld [vmem:[#allocation27_spill] sm:$0xff]  ;;  %v14827_v24 = vld [vmem:[#allocation28_spill] sm:$0xff] }
 0x605   :  { %v6253_v15 = vadd.f32 %v6183_v32, %v14819_v41  ;;  %v6254_v33 = vadd.f32 %v6184_v25, %v14820_v39  ;;  %v6255_v16 = vadd.f32 %v6185_v48, %v14821_v29  ;;  %v6167_v19 = vpop.permute.xlu1 %6166  ;;  %v6162_v62 = vpop.permute.xlu0 %6161  ;;  %v6148_v3 = vmul.f32 %v12384_v28, %v12282_v37  ;;  %v14833_v57 = vld [vmem:[#allocation20_spill] sm:$0xff]  ;;  %v14834_v41 = vld [vmem:[#allocation21_spill] sm:$0xff]  ;;  %v14835_v39 = vld [vmem:[#allocation22_spill] sm:$0xff] }
 0x606   :  { %v6193_v21 = vadd.f32 %v6167_v19, %v6133_v59  ;;  %v6194_v43 = vadd.f32 %v6167_v19, %v6134_v47  ;;  %v6195_v13 = vadd.f32 %v6167_v19, %v6135_v50  ;;  %v6196_v5 = vadd.f32 %v6167_v19, %v6136_v35  ;;  %6284 = vst [vmem:[#allocation4] sm:$0xff] %v6249_v6  ;;  %v14824_v59 = vld [vmem:[#allocation25_spill] sm:$0xff]  ;;  %v14825_v50 = vld [vmem:[#allocation26_spill] sm:$0xff]  ;;  %v14829_v6 = vld [vmem:[#allocation16_spill] sm:$0xff] }
 0x607   :  { %6285 = vst [vmem:[#allocation4 + $0x8] sm:$0xff] %v6250_v18  ;;  %6286 = vst [vmem:[#allocation4 + $0x10] sm:$0xff] %v6251_v49  ;;  %v6197_v40 = vadd.f32 %v6167_v19, %v6137_v9  ;;  %v6198_v23 = vadd.f32 %v6167_v19, %v6138_v22  ;;  %v6199_v60 = vadd.f32 %v6167_v19, %v6139_v10  ;;  %v14828_v9 = vld [vmem:[#allocation29_spill] sm:$0xff] }
 0x608   :  { %6287 = vst [vmem:[#allocation4 + $0x18] sm:$0xff] %v6252_v44  ;;  %v6186_v12 = vadd.f32 %v6162_v62, %v6126_v46  ;;  %6288 = vst [vmem:[#allocation4 + $0x20] sm:$0xff] %v6253_v15  ;;  %v6263_v56 = vadd.f32 %v6193_v21, %v14822_v1  ;;  %v6264_v37 = vadd.f32 %v6194_v43, %v14823_v38  ;;  %v14830_v18 = vld [vmem:[#allocation17_spill] sm:$0xff]  ;;  %v14838_v1 = vld [vmem:[#allocation39_spill] sm:$0xff] }
 0x609   :  { %6289 = vst [vmem:[#allocation4 + $0x28] sm:$0xff] %v6254_v33  ;;  %6290 = vst.msk [vmem:[#allocation4 + $0x30] sm:$0xff] %vm5898_vm1, %v6255_v16  ;;  %v6265_v47 = vadd.f32 %v6195_v13, %v14824_v59  ;;  %v6266_v35 = vadd.f32 %v6196_v5, %v14825_v50  ;;  %v6267_v53 = vadd.f32 %v6197_v40, %v14826_v34  ;;  %v6177_v49 = vpop.permute.xlu1 %6176  ;;  %v6172_v15 = vpop.permute.xlu0 %6171  ;;  %v14839_v38 = vld [vmem:[#allocation40_spill] sm:$0xff] }
 0x60a   :  { %v6268_v55 = vadd.f32 %v6198_v23, %v14827_v24  ;;  %v6269_v22 = vadd.f32 %v6199_v60, %v14828_v9  ;;  %v6187_v10 = vadd.f32 %v6162_v62, %v6127_v42  ;;  %v6188_v46 = vadd.f32 %v6162_v62, %v6128_v63  ;;  %6298 = vst [vmem:[#allocation4 + $0x70] sm:$0xff] %v6263_v56  ;;  %v14831_v63 = vld [vmem:[#allocation18_spill] sm:$0xff]  ;;  %v14844_v9 = vld [vmem:[#allocation31_spill] sm:$0xff] }
 0x60b   :  { %v6189_v32 = vadd.f32 %v6162_v62, %v6129_v51  ;;  %v6190_v25 = vadd.f32 %v6162_v62, %v6130_v31  ;;  %v6191_v48 = vadd.f32 %v6162_v62, %v6131_v30  ;;  %6299 = vst [vmem:[#allocation4 + $0x78] sm:$0xff] %v6264_v37  ;;  %6300 = vst [vmem:[#allocation4 + $0x80] sm:$0xff] %v6265_v47  ;;  %v14832_v31 = vld [vmem:[#allocation19_spill] sm:$0xff]  ;;  %v14837_v60 = vld [vmem:[#allocation38_spill] sm:$0xff] }
 0x60c   :  { %6301 = vst [vmem:[#allocation4 + $0x88] sm:$0xff] %v6266_v35  ;;  %v6192_v7 = vadd.f32 %v6162_v62, %v6132_v58  ;;  %v6256_v4 = vadd.f32 %v6186_v12, %v14829_v6  ;;  %v6257_v36 = vadd.f32 %v6187_v10, %v14830_v18  ;;  %6302 = vst [vmem:[#allocation4 + $0x90] sm:$0xff] %v6267_v53  ;;  %v14842_v47 = vld [vmem:[#allocation43_spill] sm:$0xff]  ;;  %v14843_v24 = vld [vmem:[#allocation30_spill] sm:$0xff] }
 0x60d   :  { %6303 = vst [vmem:[#allocation4 + $0x98] sm:$0xff] %v6268_v55  ;;  %6304 = vst.msk [vmem:[#allocation4 + $0xa0] sm:$0xff] %vm5898_vm1, %v6269_v22  ;;  %v6149_v42 = vmul.f32 %v12384_v28, %v12287_v11  ;;  %v6258_v51 = vadd.f32 %v6188_v46, %v14831_v63  ;;  %v6259_v30 = vadd.f32 %v6189_v32, %v14832_v31 }
 0x60e   :  { %v6260_v44 = vadd.f32 %v6190_v25, %v14833_v57  ;;  %v6261_v58 = vadd.f32 %v6191_v48, %v14834_v41  ;;  %v6262_v33 = vadd.f32 %v6192_v7, %v14835_v39  ;;  %6291 = vst [vmem:[#allocation4 + $0x38] sm:$0xff] %v6256_v4  ;;  %6292 = vst [vmem:[#allocation4 + $0x40] sm:$0xff] %v6257_v36  ;;  %v14848_v25 = vld [vmem:[#allocation35_spill] sm:$0xff]  ;;  %v14849_v7 = vld [vmem:[#allocation36_spill] sm:$0xff] }
 0x60f   :  { %v6150_v29 = vmul.f32 %v12384_v28, %v12295_v14  ;;  %v6151_v16 = vmul.f32 %v12384_v28, %v12304_v17  ;;  %v6152_v11 = vmul.f32 %v12384_v28, %v12312_v0  ;;  %6293 = vst [vmem:[#allocation4 + $0x48] sm:$0xff] %v6258_v51  ;;  %6294 = vst [vmem:[#allocation4 + $0x50] sm:$0xff] %v6259_v30  ;;  %v14836_v0 = vld [vmem:[#allocation37_spill] sm:$0xff] }
 0x610   :  { %6295 = vst [vmem:[#allocation4 + $0x58] sm:$0xff] %v6260_v44  ;;  %6296 = vst [vmem:[#allocation4 + $0x60] sm:$0xff] %v6261_v58  ;;  %v6153_v19 = vmul.f32 %v12384_v28, %v12309_v20  ;;  %v6207_v62 = vadd.f32 %v6177_v49, %v12400_v54  ;;  %v6208_v21 = vadd.f32 %v6177_v49, %v6148_v3  ;;  %v14840_v28 = vld [vmem:[#allocation41_spill] sm:$0xff]  ;;  %v14841_v3 = vld [vmem:[#allocation42_spill] sm:$0xff] }
 0x611   :  { %v6209_v43 = vadd.f32 %v6177_v49, %v6149_v42  ;;  %6297 = vst.msk [vmem:[#allocation4 + $0x68] sm:$0xff] %vm5898_vm1, %v6262_v33  ;;  %v6210_v14 = vadd.f32 %v6177_v49, %v6150_v29  ;;  %v6211_v13 = vadd.f32 %v6177_v49, %v6151_v16  ;;  %v6212_v5 = vadd.f32 %v6177_v49, %v6152_v11 }
 0x612   :  { %v6200_v17 = vadd.f32 %v6172_v15, %v12376_v8  ;;  %v6213_v40 = vadd.f32 %v6177_v49, %v6153_v19  ;;  %v6277_v23 = vadd.f32 %v6207_v62, %v14836_v0  ;;  %v6278_v12 = vadd.f32 %v6208_v21, %v14837_v60 }
 0x613   :  { %v6279_v56 = vadd.f32 %v6209_v43, %v14838_v1  ;;  %v6280_v20 = vadd.f32 %v6210_v14, %v14839_v38  ;;  %v6281_v54 = vadd.f32 %v6211_v13, %v14840_v28  ;;  %v6282_v37 = vadd.f32 %v6212_v5, %v14841_v3 }
 0x614   :  { %v6201_v59 = vadd.f32 %v6172_v15, %v12379_v45  ;;  %v6283_v50 = vadd.f32 %v6213_v40, %v14842_v47  ;;  %6312 = vst [vmem:[#allocation4 + $0xe0] sm:$0xff] %v6277_v23  ;;  %6313 = vst [vmem:[#allocation4 + $0xe8] sm:$0xff] %v6278_v12  ;;  %v6202_v8 = vadd.f32 %v6172_v15, %v12382_v26  ;;  %v14845_v26 = vld [vmem:[#allocation32_spill] sm:$0xff] }
 0x615   :  { %6314 = vst [vmem:[#allocation4 + $0xf0] sm:$0xff] %v6279_v56  ;;  %v6203_v35 = vadd.f32 %v6172_v15, %v12387_v61  ;;  %v6204_v34 = vadd.f32 %v6172_v15, %v12390_v2  ;;  %6315 = vst [vmem:[#allocation4 + $0xf8] sm:$0xff] %v6280_v20  ;;  %v6205_v53 = vadd.f32 %v6172_v15, %v12393_v27  ;;  %v14846_v61 = vld [vmem:[#allocation33_spill] sm:$0xff]  ;;  %v14847_v2 = vld [vmem:[#allocation34_spill] sm:$0xff] }
 0x616   :  { %6316 = vst [vmem:[#allocation4 + $0x100] sm:$0xff] %v6281_v54  ;;  %6317 = vst [vmem:[#allocation4 + $0x108] sm:$0xff] %v6282_v37  ;;  %v6206_v45 = vadd.f32 %v6172_v15, %v12396_v52  ;;  %v6270_v55 = vadd.f32 %v6200_v17, %v14843_v24  ;;  %v6271_v22 = vadd.f32 %v6201_v59, %v14844_v9 }
 0x617   :  { %6318 = vst.msk [vmem:[#allocation4 + $0x110] sm:$0xff] %vm5898_vm1, %v6283_v50  ;;  %v6272_v10 = vadd.f32 %v6202_v8, %v14845_v26  ;;  %v6273_v46 = vadd.f32 %v6203_v35, %v14846_v61  ;;  %v6274_v32 = vadd.f32 %v6204_v34, %v14847_v2  ;;  %v6275_v48 = vadd.f32 %v6205_v53, %v14848_v25 }
 0x618   :  { %v6276_v6 = vadd.f32 %v6206_v45, %v14849_v7  ;;  %6305 = vst [vmem:[#allocation4 + $0xa8] sm:$0xff] %v6270_v55  ;;  %6306 = vst [vmem:[#allocation4 + $0xb0] sm:$0xff] %v6271_v22 }
 0x619   :  { %6307 = vst [vmem:[#allocation4 + $0xb8] sm:$0xff] %v6272_v10  ;;  %6308 = vst [vmem:[#allocation4 + $0xc0] sm:$0xff] %v6273_v46 }
 0x61a   :  { %6309 = vst [vmem:[#allocation4 + $0xc8] sm:$0xff] %v6274_v32  ;;  %6310 = vst [vmem:[#allocation4 + $0xd0] sm:$0xff] %v6275_v48 }
 0x61b   :  { %6311 = vst.msk [vmem:[#allocation4 + $0xd8] sm:$0xff] %vm5898_vm1, %v6276_v6 }
 0x61c   :  { %7938 = shalt.err (!%p7935_p4)
}
 0x61d   :  { %s7939_s20 = scalar_lea.hbm %s12479_s5, 4480 }
 0x61e   :  { %p7940_p5 = scmp.ne.s32.totalorder %s12479_s5, %s7939_s20  ;;  %p7943_p6 = scmp.lt.u32.totalorder %s7939_s20, %s12479_s5 }
 0x620   :  { %p7945_p7 = pnand %p7943_p6, %p7940_p5 }
 0x622   :  { %7948 = shalt.err (!%p7945_p7)
}
 0x623   :  { %s7956_s1 = smov 896   ;;  %s7957_s23 = smov 56  }
 0x624   :  { %6330 = dma.vmem_to_hbm [thread:$0]  %s6325_s16, 4480, %s12479_s5, [#allocation5], %s7956_s1, %s7956_s1, %s7957_s23  }
 0x625   :  { %7951 = dma.done.wait [#allocation5], 4480  }
 0x626   :  { %7952 = vsyncadd [#allocation5], 4294962816 }
 0x627   :  { %6334 = vsyncpa [#allocation5], 1 }
 0x628   :  { %6335 = vsyncmov [#allocation3] }
 0x62b   :  { %s6336_s26 = vpop.sfrf %6335 }
 0x62c   :  { %p6355_p8 = scmp.ne.s32.totalorder %s6336_s26, 0 }
 0x62e   :  { %6340 = shalt.err (%p6355_p8)  }

</bundles_post_ra>
